<compile_context>
chip_gen: v7x
topology: tpu7x:2x2x1
jax: 0.10.0
libtpu: 0.0.40
codegen_flags: <defaults>
</compile_context>

<pallas_src>
import jax
import jax.numpy as jnp
from jax.experimental import pallas as pl
from jax.experimental.pallas import tpu as pltpu

KERNEL_SET = (2, 3, 5, 7)
K_MAX = max(KERNEL_SET)  # 7


def _pad8(n):
    return (n + 7) // 8 * 8


# ---------------------------------------------------------------------------
# Shared encoder math.  `W` / `V` may be jnp arrays (pure-JAX reference) or
# Pallas VMEM Refs (inside the kernel): only static slicing is used, so both
# behave identically.  W: bf16 weight slab, V: f32 bias / folded-BN slab.
# ---------------------------------------------------------------------------
def _encoder_apply(x, W, V, meta, w_base=0, v_base=0):
    """SpatialTemporalEncoder_1D.forward (inference), channels-last.

    x: (B, T, F) f32
    W: (.., H) packed bf16 conv-weight slab (blocks 8-row aligned)
    V: (.., H) packed f32 bias / folded-BN vectors
    returns (B, H)   ( == skip.squeeze(-1) )
    """
    H = meta["hidden_dim"]
    Fd = meta["feature_dim"]
    T = meta["seq_length"]
    n_layers = meta["n_layers"]
    dilations = meta["dilations"]
    t_lens = meta["t_lens"]
    kE = meta["kE"]
    B = x.shape[0]

    w_off = [w_base]

    def take_w(rows):                 # aligned static-offset slice of the slab
        o = w_off[0]
        w_off[0] = o + _pad8(rows)
        return W[o:o + rows, :]

    v_idx = [v_base]

    def take_v():                     # static-offset (1, H) f32 vector
        i = v_idx[0]
        v_idx[0] = i + 1
        return V[i:i + 1, :]

    # start_conv: Conv1d(F -> H, k=1).  Cin = F = 4 -> VPU broadcast-mul-adds
    # (a 4-deep MXU pass would be >95% idle systolic latency).
    w_start = take_w(Fd).astype(jnp.float32)          # (Fd, H)
    b_start = take_v()                                # (1, H)
    h = x[:, :, 0:1] * w_start[0:1, :]
    for f in range(1, Fd):
        h = h + x[:, :, f:f + 1] * w_start[f:f + 1, :]
    h = h + b_start                                   # (B, T, H) f32

    # Full-window conv with Tout == 1: unrolled per-timestep (B,H)@(H,H)
    # MXU accumulate -- no (B,t,H)->(B,t*H) cross-lane flatten.
    def full_window_skip(hb, t):
        acc = None
        for s in range(t):
            w_s = take_w(H)                           # (H, H) bf16, 8-aligned
            c = jnp.dot(hb[:, s, :], w_s, preferred_element_type=jnp.float32)
            acc = c if acc is None else acc + c
        return acc                                    # (B, H) f32

    # skip0: Conv1d(H->H, k=T)
    hb = h.astype(jnp.bfloat16)
    skip = full_window_skip(hb, T) + take_v()

    for i in range(n_layers):
        d = dilations[i]
        residual = h
        t_in = h.shape[1]
        t_out = t_in - (K_MAX - 1) * d
        assert t_out == t_lens[i]

        # TODO(synk): TConv class source was not provided; implemented as the
        # standard MTGNN dilated-inception (per-kernel conv, truncate to
        # shortest, concat) followed by tanh (is_filter=False).  The four
        # branch convs are fused into ONE 7-tap dilated conv at build time.
        hb = h.astype(jnp.bfloat16)
        acc = None
        for j in range(K_MAX):
            w_j = take_w(H)                           # (H, H) tap j, bf16
            xs = hb[:, j * d:j * d + t_out, :]        # (B, t_out, H)
            p = jax.lax.dot_general(xs, w_j, (((2,), (0,)), ((), ())),
                                    preferred_element_type=jnp.float32)
            acc = p if acc is None else acc + p       # seeded by tap 0
        h = jnp.tanh(acc + take_v())
        # F.dropout(p=0.0) -> identity

        # skip_convs[i]: Conv1d(H->H, k=t_out), Tout == 1
        hb2 = h.astype(jnp.bfloat16)
        skip = skip + full_window_skip(hb2, t_out) + take_v()

        # BatchNorm1d (eval, folded) -> relu -> residual  (order per forward())
        scale = take_v()
        shift = take_v()
        h = jnp.maximum(h * scale + shift, 0.0)
        h = h + residual[:, t_in - t_out:, :]

    # skipE: Conv1d(H->H, k=kE), Tout == 1
    hb = h.astype(jnp.bfloat16)
    skip = skip + full_window_skip(hb, kE) + take_v()
    return skip                                       # (B, H) f32


# ---------------------------------------------------------------------------
# Pallas entry points.
# ---------------------------------------------------------------------------
def _encoders_fused(x, win_size, W_all, V_all, meta):
    """Single grid-less program computing BOTH towers (best on v5e/v6e)."""
    B, S, _ = x.shape
    H = meta["hidden_dim"]
    T = meta["seq_length"]
    Rp = W_all.shape[0] // 2
    Nvp = V_all.shape[0] // 2

    def kernel(x_ref, w_ref, v_ref, out_ref):
        ctx = x_ref[:, 0:T, :].astype(jnp.float32)
        sus = x_ref[:, win_size:win_size + T, :].astype(jnp.float32)
        out_ref[0, :, :] = _encoder_apply(ctx, w_ref, v_ref, meta, 0, 0)
        out_ref[1, :, :] = _encoder_apply(sus, w_ref, v_ref, meta, Rp, Nvp)

    return pl.pallas_call(
        kernel,
        out_shape=jax.ShapeDtypeStruct((2, B, H), jnp.float32),
    )(x, W_all, V_all)


def _encoders_core_parallel(x, win_size, W_all, V_all, meta):
    """grid=(2,) over towers, explicitly core-sharded (v7x: 2 TensorCores)."""
    B, S, Fd = x.shape
    H = meta["hidden_dim"]
    T = meta["seq_length"]
    Rp = W_all.shape[0] // 2
    Nvp = V_all.shape[0] // 2
    core_parallel = getattr(pltpu, "CORE_PARALLEL", "parallel")

    def kernel(x_ref, w_ref, v_ref, out_ref):
        start = pl.program_id(0) * win_size
        xw = x_ref[:, pl.ds(start, T), :].astype(jnp.float32)
        out_ref[...] = _encoder_apply(xw, w_ref, v_ref, meta, 0, 0)

    return pl.pallas_call(
        kernel,
        out_shape=jax.ShapeDtypeStruct((2, B, H), jnp.float32),
        grid=(2,),
        in_specs=[
            pl.BlockSpec((B, S, Fd), lambda t: (0, 0, 0)),
            pl.BlockSpec((Rp, H), lambda t: (t, 0)),
            pl.BlockSpec((Nvp, H), lambda t: (t, 0)),
        ],
        out_specs=pl.BlockSpec((None, B, H), lambda t: (t, 0, 0)),
        compiler_params=pltpu.CompilerParams(
            dimension_semantics=(core_parallel,)),
    )(x, W_all, V_all)


def _has_two_tensorcores():
    try:
        dk = jax.devices()[0].device_kind.lower()
    except Exception:
        return False
    return ("v7" in dk) or ("tpu7" in dk) or ("7x" in dk)


def tcn_feature_encoder_separate(x, win_size, W_all, V_all, meta):
    """Two-tower wrapper (context / suspect windows).  x: (B, S, F)."""
    B = x.shape[0]
    H = meta["hidden_dim"]
    out = None
    if _has_two_tensorcores():
        try:
            out = _encoders_core_parallel(x, win_size, W_all, V_all, meta)
        except Exception:
            out = None
    if out is None:
        out = _encoders_fused(x, win_size, W_all, V_all, meta)
    return out[0].reshape(B, 1, H), out[1].reshape(B, 1, H)


# ---------------------------------------------------------------------------
# Deterministic parameter construction (mirrors SpatialTemporalEncoder_1D
# __init__), packed into one bf16 weight slab (Rp, H) + one f32 vector slab
# (Nvp, H) per tower; all blocks 8-row aligned.
# ---------------------------------------------------------------------------
def build_encoder_params(key, feature_dim, seq_length, n_layers, hidden_dim,
                         dilation_exp=2):
    kernel_size = K_MAX
    T = seq_length
    H = hidden_dim
    assert H % 8 == 0 and H % len(KERNEL_SET) == 0

    def rf(nl):
        if dilation_exp > 1:
            return int(1 + (kernel_size - 1) * (dilation_exp ** nl - 1)
                       / (dilation_exp - 1))
        return nl * (kernel_size - 1) + 1

    receptive_field = rf(n_layers)
    while receptive_field > T:
        n_layers -= 1
        receptive_field = rf(n_layers)
    assert receptive_field <= T

    kE = T - receptive_field + 1
    cpk = H // len(KERNEL_SET)

    keys = iter(jax.random.split(key, 1024))

    def rnd(shape, scale=0.1):
        return scale * jax.random.normal(next(keys), shape, jnp.float32)

    w_blocks = []   # each (rows, H); consumed in this order by _encoder_apply
    v_rows = []     # each (H,)

    def add_w(block):                       # pad rows -> 8-aligned slab offsets
        r = block.shape[0]
        p = _pad8(r)
        if p != r:
            block = jnp.concatenate(
                [block, jnp.zeros((p - r, H), jnp.float32)], axis=0)
        w_blocks.append(block)

    # start_conv: Conv1d(F -> H, k=1)
    add_w(rnd((feature_dim, H)))
    v_rows.append(rnd((H,), 0.01))
    # skip0: Conv1d(H -> H, k=T); rows ordered tap-major, Cin-minor
    add_w(rnd((T * H, H)))
    v_rows.append(rnd((H,), 0.01))

    dilations, t_lens = [], []
    dil = 1
    for i in range(1, n_layers + 1):
        t_len_i = T - rf(i) + 1
        # Fused TConv: 4 branch convs (k in KERNEL_SET, Cout = H/4 each)
        # left-zero-padded to 7 taps and concatenated along Cout (exact
        # equivalent of conv-per-branch + truncate-to-last-min_len + concat).
        w_full = jnp.zeros((K_MAX, H, H), jnp.float32)
        b_full = jnp.zeros((H,), jnp.float32)
        for bidx, k in enumerate(KERNEL_SET):
            wb = rnd((k, H, cpk))
            bb = rnd((cpk,), 0.01)
            w_full = w_full.at[K_MAX - k:, :, bidx * cpk:(bidx + 1) * cpk].set(wb)
            b_full = b_full.at[bidx * cpk:(bidx + 1) * cpk].set(bb)
        add_w(w_full.reshape(K_MAX * H, H))
        v_rows.append(b_full)
        # skip_convs[i]: Conv1d(H -> H, k=t_len_i)
        add_w(rnd((t_len_i * H, H)))
        v_rows.append(rnd((H,), 0.01))
        # BatchNorm1d(H) eval mode, folded to scale/shift host-side
        gamma = jnp.ones((H,), jnp.float32)
        beta = jnp.zeros((H,), jnp.float32)
        rmean = rnd((H,), 0.05)
        rvar = jnp.ones((H,), jnp.float32) + jnp.abs(rnd((H,), 0.05))
        scale = gamma * jax.lax.rsqrt(rvar + 1e-5)
        shift = beta - rmean * scale
        v_rows.append(scale)
        v_rows.append(shift)

        dilations.append(dil)
        t_lens.append(t_len_i)
        dil *= dilation_exp

    # skipE: Conv1d(H -> H, k=kE) -- last so the slab is consumed in order
    add_w(rnd((kE * H, H)))
    v_rows.append(rnd((H,), 0.01))

    W = jnp.concatenate(w_blocks, axis=0).astype(jnp.bfloat16)   # (Rp, H)
    V = jnp.stack(v_rows, axis=0).astype(jnp.float32)            # (Nv, H)
    pad = _pad8(V.shape[0]) - V.shape[0]
    if pad:
        V = jnp.concatenate([V, jnp.zeros((pad, H), jnp.float32)], axis=0)

    meta = dict(feature_dim=feature_dim, seq_length=T, hidden_dim=H,
                n_layers=n_layers, dilations=tuple(dilations),
                t_lens=tuple(t_lens), kE=kE)
    return W, V, meta


if __name__ == "__main__":
    # Small config consistent with the module's __init__.
    batch = 2
    seq_len = 28
    win_size = 8            # -> encoder seq_length T = 20
    feature_dim = 4
    n_layers = 2            # receptive_field = 19 <= 20, so both layers survive
    hidden_dim = 32
    T = seq_len - win_size

    key = jax.random.PRNGKey(0)
    kx, kc, ks = jax.random.split(key, 3)
    x = jax.random.normal(kx, (batch, seq_len, feature_dim), jnp.float32)

    W_ctx, V_ctx, meta_c = build_encoder_params(kc, feature_dim, T, n_layers,
                                                hidden_dim)
    W_sus, V_sus, meta_s = build_encoder_params(ks, feature_dim, T, n_layers,
                                                hidden_dim)
    assert meta_c == meta_s
    meta = meta_c

    # Pack both towers' slabs ONCE at build time (hoisted out of the call path).
    W_all = jnp.concatenate([W_ctx, W_sus], axis=0)    # (2*Rp, H) bf16
    V_all = jnp.concatenate([V_ctx, V_sus], axis=0)    # (2*Nvp, H) f32

    context_state, suspect_state = tcn_feature_encoder_separate(
        x, win_size, W_all, V_all, meta)
    jax.block_until_ready((context_state, suspect_state))

    # Plain-JAX reference (identical math, same packed bf16 params).
    ref_c = _encoder_apply(x[:, :T, :].astype(jnp.float32), W_ctx, V_ctx,
                           meta).reshape(batch, 1, hidden_dim)
    ref_s = _encoder_apply(x[:, win_size:, :].astype(jnp.float32), W_sus, V_sus,
                           meta).reshape(batch, 1, hidden_dim)

    assert context_state.shape == (batch, 1, hidden_dim)
    assert suspect_state.shape == (batch, 1, hidden_dim)
    assert jnp.allclose(context_state, ref_c, atol=2e-2, rtol=2e-2)
    assert jnp.allclose(suspect_state, ref_s, atol=2e-2, rtol=2e-2)
    print("KERNEL_OK")
</pallas_src>

<mosaic_0001>
module attributes {stable_mosaic.version = 11 : i64} {
  func.func @kernel(%arg0: memref<2x28x4xf32, #tpu.memory_space<vmem>>, %arg1: memref<3344x32xbf16, #tpu.memory_space<vmem>>, %arg2: memref<32x32xf32, #tpu.memory_space<vmem>>, %arg3: memref<2x2x32xf32, #tpu.memory_space<vmem>>) attributes {dimension_semantics = [], scalar_prefetch = 0 : i64, scratch_operands = 0 : i64, tpu.core_type = #tpu.core_type<tc>} {
    %c0 = arith.constant 0 : index
    %c0_0 = arith.constant 0 : index
    %c0_1 = arith.constant 0 : index
    %0 = vector.load %arg0[%c0, %c0_0, %c0_1] : memref<2x28x4xf32, #tpu.memory_space<vmem>>, vector<2x20x4xf32>
    %c0_2 = arith.constant 0 : index
    %c8 = arith.constant 8 : index
    %c0_3 = arith.constant 0 : index
    %1 = vector.load %arg0[%c0_2, %c8, %c0_3] : memref<2x28x4xf32, #tpu.memory_space<vmem>>, vector<2x20x4xf32>
    %c0_4 = arith.constant 0 : index
    %c0_5 = arith.constant 0 : index
    %2 = vector.load %arg1[%c0_4, %c0_5] : memref<3344x32xbf16, #tpu.memory_space<vmem>>, vector<4x32xbf16>
    %3 = arith.extf %2 : vector<4x32xbf16> to vector<4x32xf32>
    %c0_6 = arith.constant 0 : index
    %c0_7 = arith.constant 0 : index
    %4 = vector.load %arg2[%c0_6, %c0_7] : memref<32x32xf32, #tpu.memory_space<vmem>>, vector<1x32xf32>
    %5 = vector.extract_strided_slice %0 {offsets = [0, 0, 0], sizes = [2, 20, 1], strides = [1, 1, 1]} : vector<2x20x4xf32> to vector<2x20x1xf32>
    %6 = vector.extract_strided_slice %3 {offsets = [0, 0], sizes = [1, 32], strides = [1, 1]} : vector<4x32xf32> to vector<1x32xf32>
    %7 = vector.shape_cast %6 : vector<1x32xf32> to vector<1x1x32xf32>
    %8 = vector.broadcast %5 : vector<2x20x1xf32> to vector<2x20x32xf32>
    %9 = vector.broadcast %7 : vector<1x1x32xf32> to vector<2x20x32xf32>
    %10 = arith.mulf %8, %9 : vector<2x20x32xf32>
    %11 = vector.extract_strided_slice %0 {offsets = [0, 0, 1], sizes = [2, 20, 1], strides = [1, 1, 1]} : vector<2x20x4xf32> to vector<2x20x1xf32>
    %12 = vector.extract_strided_slice %3 {offsets = [1, 0], sizes = [1, 32], strides = [1, 1]} : vector<4x32xf32> to vector<1x32xf32>
    %13 = vector.shape_cast %12 : vector<1x32xf32> to vector<1x1x32xf32>
    %14 = vector.broadcast %11 : vector<2x20x1xf32> to vector<2x20x32xf32>
    %15 = vector.broadcast %13 : vector<1x1x32xf32> to vector<2x20x32xf32>
    %16 = arith.mulf %14, %15 : vector<2x20x32xf32>
    %17 = arith.addf %10, %16 : vector<2x20x32xf32>
    %18 = vector.extract_strided_slice %0 {offsets = [0, 0, 2], sizes = [2, 20, 1], strides = [1, 1, 1]} : vector<2x20x4xf32> to vector<2x20x1xf32>
    %19 = vector.extract_strided_slice %3 {offsets = [2, 0], sizes = [1, 32], strides = [1, 1]} : vector<4x32xf32> to vector<1x32xf32>
    %20 = vector.shape_cast %19 : vector<1x32xf32> to vector<1x1x32xf32>
    %21 = vector.broadcast %18 : vector<2x20x1xf32> to vector<2x20x32xf32>
    %22 = vector.broadcast %20 : vector<1x1x32xf32> to vector<2x20x32xf32>
    %23 = arith.mulf %21, %22 : vector<2x20x32xf32>
    %24 = arith.addf %17, %23 : vector<2x20x32xf32>
    %25 = vector.extract_strided_slice %0 {offsets = [0, 0, 3], sizes = [2, 20, 1], strides = [1, 1, 1]} : vector<2x20x4xf32> to vector<2x20x1xf32>
    %26 = vector.extract_strided_slice %3 {offsets = [3, 0], sizes = [1, 32], strides = [1, 1]} : vector<4x32xf32> to vector<1x32xf32>
    %27 = vector.shape_cast %26 : vector<1x32xf32> to vector<1x1x32xf32>
    %28 = vector.broadcast %25 : vector<2x20x1xf32> to vector<2x20x32xf32>
    %29 = vector.broadcast %27 : vector<1x1x32xf32> to vector<2x20x32xf32>
    %30 = arith.mulf %28, %29 : vector<2x20x32xf32>
    %31 = arith.addf %24, %30 : vector<2x20x32xf32>
    %32 = vector.shape_cast %4 : vector<1x32xf32> to vector<1x1x32xf32>
    %33 = vector.broadcast %32 : vector<1x1x32xf32> to vector<2x20x32xf32>
    %34 = arith.addf %31, %33 : vector<2x20x32xf32>
    %35 = arith.truncf %34 : vector<2x20x32xf32> to vector<2x20x32xbf16>
    %c8_8 = arith.constant 8 : index
    %c0_9 = arith.constant 0 : index
    %36 = vector.load %arg1[%c8_8, %c0_9] : memref<3344x32xbf16, #tpu.memory_space<vmem>>, vector<32x32xbf16>
    %37 = vector.extract_strided_slice %35 {offsets = [0, 0, 0], sizes = [2, 1, 32], strides = [1, 1, 1]} : vector<2x20x32xbf16> to vector<2x1x32xbf16>
    %38 = vector.shape_cast %37 : vector<2x1x32xbf16> to vector<2x32xbf16>
    %cst = arith.constant dense<0.000000e+00> : vector<2x32xf32>
    %39 = tpu.matmul %38, %36, %cst {dimension_numbers = #tpu.dot_dimension_numbers<[1], [0], [0], [1], [0, 0, 1, 1], [], []>} : vector<2x32xbf16>, vector<32x32xbf16>, vector<2x32xf32> -> vector<2x32xf32>
    %c40 = arith.constant 40 : index
    %c0_10 = arith.constant 0 : index
    %40 = vector.load %arg1[%c40, %c0_10] : memref<3344x32xbf16, #tpu.memory_space<vmem>>, vector<32x32xbf16>
    %41 = vector.extract_strided_slice %35 {offsets = [0, 1, 0], sizes = [2, 1, 32], strides = [1, 1, 1]} : vector<2x20x32xbf16> to vector<2x1x32xbf16>
    %42 = vector.shape_cast %41 : vector<2x1x32xbf16> to vector<2x32xbf16>
    %cst_11 = arith.constant dense<0.000000e+00> : vector<2x32xf32>
    %43 = tpu.matmul %42, %40, %cst_11 {dimension_numbers = #tpu.dot_dimension_numbers<[1], [0], [0], [1], [0, 0, 1, 1], [], []>} : vector<2x32xbf16>, vector<32x32xbf16>, vector<2x32xf32> -> vector<2x32xf32>
    %44 = arith.addf %39, %43 : vector<2x32xf32>
    %c72 = arith.constant 72 : index
    %c0_12 = arith.constant 0 : index
    %45 = vector.load %arg1[%c72, %c0_12] : memref<3344x32xbf16, #tpu.memory_space<vmem>>, vector<32x32xbf16>
    %46 = vector.extract_strided_slice %35 {offsets = [0, 2, 0], sizes = [2, 1, 32], strides = [1, 1, 1]} : vector<2x20x32xbf16> to vector<2x1x32xbf16>
    %47 = vector.shape_cast %46 : vector<2x1x32xbf16> to vector<2x32xbf16>
    %cst_13 = arith.constant dense<0.000000e+00> : vector<2x32xf32>
    %48 = tpu.matmul %47, %45, %cst_13 {dimension_numbers = #tpu.dot_dimension_numbers<[1], [0], [0], [1], [0, 0, 1, 1], [], []>} : vector<2x32xbf16>, vector<32x32xbf16>, vector<2x32xf32> -> vector<2x32xf32>
    %49 = arith.addf %44, %48 : vector<2x32xf32>
    %c104 = arith.constant 104 : index
    %c0_14 = arith.constant 0 : index
    %50 = vector.load %arg1[%c104, %c0_14] : memref<3344x32xbf16, #tpu.memory_space<vmem>>, vector<32x32xbf16>
    %51 = vector.extract_strided_slice %35 {offsets = [0, 3, 0], sizes = [2, 1, 32], strides = [1, 1, 1]} : vector<2x20x32xbf16> to vector<2x1x32xbf16>
    %52 = vector.shape_cast %51 : vector<2x1x32xbf16> to vector<2x32xbf16>
    %cst_15 = arith.constant dense<0.000000e+00> : vector<2x32xf32>
    %53 = tpu.matmul %52, %50, %cst_15 {dimension_numbers = #tpu.dot_dimension_numbers<[1], [0], [0], [1], [0, 0, 1, 1], [], []>} : vector<2x32xbf16>, vector<32x32xbf16>, vector<2x32xf32> -> vector<2x32xf32>
    %54 = arith.addf %49, %53 : vector<2x32xf32>
    %c136 = arith.constant 136 : index
    %c0_16 = arith.constant 0 : index
    %55 = vector.load %arg1[%c136, %c0_16] : memref<3344x32xbf16, #tpu.memory_space<vmem>>, vector<32x32xbf16>
    %56 = vector.extract_strided_slice %35 {offsets = [0, 4, 0], sizes = [2, 1, 32], strides = [1, 1, 1]} : vector<2x20x32xbf16> to vector<2x1x32xbf16>
    %57 = vector.shape_cast %56 : vector<2x1x32xbf16> to vector<2x32xbf16>
    %cst_17 = arith.constant dense<0.000000e+00> : vector<2x32xf32>
    %58 = tpu.matmul %57, %55, %cst_17 {dimension_numbers = #tpu.dot_dimension_numbers<[1], [0], [0], [1], [0, 0, 1, 1], [], []>} : vector<2x32xbf16>, vector<32x32xbf16>, vector<2x32xf32> -> vector<2x32xf32>
    %59 = arith.addf %54, %58 : vector<2x32xf32>
    %c168 = arith.constant 168 : index
    %c0_18 = arith.constant 0 : index
    %60 = vector.load %arg1[%c168, %c0_18] : memref<3344x32xbf16, #tpu.memory_space<vmem>>, vector<32x32xbf16>
    %61 = vector.extract_strided_slice %35 {offsets = [0, 5, 0], sizes = [2, 1, 32], strides = [1, 1, 1]} : vector<2x20x32xbf16> to vector<2x1x32xbf16>
    %62 = vector.shape_cast %61 : vector<2x1x32xbf16> to vector<2x32xbf16>
    %cst_19 = arith.constant dense<0.000000e+00> : vector<2x32xf32>
    %63 = tpu.matmul %62, %60, %cst_19 {dimension_numbers = #tpu.dot_dimension_numbers<[1], [0], [0], [1], [0, 0, 1, 1], [], []>} : vector<2x32xbf16>, vector<32x32xbf16>, vector<2x32xf32> -> vector<2x32xf32>
    %64 = arith.addf %59, %63 : vector<2x32xf32>
    %c200 = arith.constant 200 : index
    %c0_20 = arith.constant 0 : index
    %65 = vector.load %arg1[%c200, %c0_20] : memref<3344x32xbf16, #tpu.memory_space<vmem>>, vector<32x32xbf16>
    %66 = vector.extract_strided_slice %35 {offsets = [0, 6, 0], sizes = [2, 1, 32], strides = [1, 1, 1]} : vector<2x20x32xbf16> to vector<2x1x32xbf16>
    %67 = vector.shape_cast %66 : vector<2x1x32xbf16> to vector<2x32xbf16>
    %cst_21 = arith.constant dense<0.000000e+00> : vector<2x32xf32>
    %68 = tpu.matmul %67, %65, %cst_21 {dimension_numbers = #tpu.dot_dimension_numbers<[1], [0], [0], [1], [0, 0, 1, 1], [], []>} : vector<2x32xbf16>, vector<32x32xbf16>, vector<2x32xf32> -> vector<2x32xf32>
    %69 = arith.addf %64, %68 : vector<2x32xf32>
    %c232 = arith.constant 232 : index
    %c0_22 = arith.constant 0 : index
    %70 = vector.load %arg1[%c232, %c0_22] : memref<3344x32xbf16, #tpu.memory_space<vmem>>, vector<32x32xbf16>
    %71 = vector.extract_strided_slice %35 {offsets = [0, 7, 0], sizes = [2, 1, 32], strides = [1, 1, 1]} : vector<2x20x32xbf16> to vector<2x1x32xbf16>
    %72 = vector.shape_cast %71 : vector<2x1x32xbf16> to vector<2x32xbf16>
    %cst_23 = arith.constant dense<0.000000e+00> : vector<2x32xf32>
    %73 = tpu.matmul %72, %70, %cst_23 {dimension_numbers = #tpu.dot_dimension_numbers<[1], [0], [0], [1], [0, 0, 1, 1], [], []>} : vector<2x32xbf16>, vector<32x32xbf16>, vector<2x32xf32> -> vector<2x32xf32>
    %74 = arith.addf %69, %73 : vector<2x32xf32>
    %c264 = arith.constant 264 : index
    %c0_24 = arith.constant 0 : index
    %75 = vector.load %arg1[%c264, %c0_24] : memref<3344x32xbf16, #tpu.memory_space<vmem>>, vector<32x32xbf16>
    %76 = vector.extract_strided_slice %35 {offsets = [0, 8, 0], sizes = [2, 1, 32], strides = [1, 1, 1]} : vector<2x20x32xbf16> to vector<2x1x32xbf16>
    %77 = vector.shape_cast %76 : vector<2x1x32xbf16> to vector<2x32xbf16>
    %cst_25 = arith.constant dense<0.000000e+00> : vector<2x32xf32>
    %78 = tpu.matmul %77, %75, %cst_25 {dimension_numbers = #tpu.dot_dimension_numbers<[1], [0], [0], [1], [0, 0, 1, 1], [], []>} : vector<2x32xbf16>, vector<32x32xbf16>, vector<2x32xf32> -> vector<2x32xf32>
    %79 = arith.addf %74, %78 : vector<2x32xf32>
    %c296 = arith.constant 296 : index
    %c0_26 = arith.constant 0 : index
    %80 = vector.load %arg1[%c296, %c0_26] : memref<3344x32xbf16, #tpu.memory_space<vmem>>, vector<32x32xbf16>
    %81 = vector.extract_strided_slice %35 {offsets = [0, 9, 0], sizes = [2, 1, 32], strides = [1, 1, 1]} : vector<2x20x32xbf16> to vector<2x1x32xbf16>
    %82 = vector.shape_cast %81 : vector<2x1x32xbf16> to vector<2x32xbf16>
    %cst_27 = arith.constant dense<0.000000e+00> : vector<2x32xf32>
    %83 = tpu.matmul %82, %80, %cst_27 {dimension_numbers = #tpu.dot_dimension_numbers<[1], [0], [0], [1], [0, 0, 1, 1], [], []>} : vector<2x32xbf16>, vector<32x32xbf16>, vector<2x32xf32> -> vector<2x32xf32>
    %84 = arith.addf %79, %83 : vector<2x32xf32>
    %c328 = arith.constant 328 : index
    %c0_28 = arith.constant 0 : index
    %85 = vector.load %arg1[%c328, %c0_28] : memref<3344x32xbf16, #tpu.memory_space<vmem>>, vector<32x32xbf16>
    %86 = vector.extract_strided_slice %35 {offsets = [0, 10, 0], sizes = [2, 1, 32], strides = [1, 1, 1]} : vector<2x20x32xbf16> to vector<2x1x32xbf16>
    %87 = vector.shape_cast %86 : vector<2x1x32xbf16> to vector<2x32xbf16>
    %cst_29 = arith.constant dense<0.000000e+00> : vector<2x32xf32>
    %88 = tpu.matmul %87, %85, %cst_29 {dimension_numbers = #tpu.dot_dimension_numbers<[1], [0], [0], [1], [0, 0, 1, 1], [], []>} : vector<2x32xbf16>, vector<32x32xbf16>, vector<2x32xf32> -> vector<2x32xf32>
    %89 = arith.addf %84, %88 : vector<2x32xf32>
    %c360 = arith.constant 360 : index
    %c0_30 = arith.constant 0 : index
    %90 = vector.load %arg1[%c360, %c0_30] : memref<3344x32xbf16, #tpu.memory_space<vmem>>, vector<32x32xbf16>
    %91 = vector.extract_strided_slice %35 {offsets = [0, 11, 0], sizes = [2, 1, 32], strides = [1, 1, 1]} : vector<2x20x32xbf16> to vector<2x1x32xbf16>
    %92 = vector.shape_cast %91 : vector<2x1x32xbf16> to vector<2x32xbf16>
    %cst_31 = arith.constant dense<0.000000e+00> : vector<2x32xf32>
    %93 = tpu.matmul %92, %90, %cst_31 {dimension_numbers = #tpu.dot_dimension_numbers<[1], [0], [0], [1], [0, 0, 1, 1], [], []>} : vector<2x32xbf16>, vector<32x32xbf16>, vector<2x32xf32> -> vector<2x32xf32>
    %94 = arith.addf %89, %93 : vector<2x32xf32>
    %c392 = arith.constant 392 : index
    %c0_32 = arith.constant 0 : index
    %95 = vector.load %arg1[%c392, %c0_32] : memref<3344x32xbf16, #tpu.memory_space<vmem>>, vector<32x32xbf16>
    %96 = vector.extract_strided_slice %35 {offsets = [0, 12, 0], sizes = [2, 1, 32], strides = [1, 1, 1]} : vector<2x20x32xbf16> to vector<2x1x32xbf16>
    %97 = vector.shape_cast %96 : vector<2x1x32xbf16> to vector<2x32xbf16>
    %cst_33 = arith.constant dense<0.000000e+00> : vector<2x32xf32>
    %98 = tpu.matmul %97, %95, %cst_33 {dimension_numbers = #tpu.dot_dimension_numbers<[1], [0], [0], [1], [0, 0, 1, 1], [], []>} : vector<2x32xbf16>, vector<32x32xbf16>, vector<2x32xf32> -> vector<2x32xf32>
    %99 = arith.addf %94, %98 : vector<2x32xf32>
    %c424 = arith.constant 424 : index
    %c0_34 = arith.constant 0 : index
    %100 = vector.load %arg1[%c424, %c0_34] : memref<3344x32xbf16, #tpu.memory_space<vmem>>, vector<32x32xbf16>
    %101 = vector.extract_strided_slice %35 {offsets = [0, 13, 0], sizes = [2, 1, 32], strides = [1, 1, 1]} : vector<2x20x32xbf16> to vector<2x1x32xbf16>
    %102 = vector.shape_cast %101 : vector<2x1x32xbf16> to vector<2x32xbf16>
    %cst_35 = arith.constant dense<0.000000e+00> : vector<2x32xf32>
    %103 = tpu.matmul %102, %100, %cst_35 {dimension_numbers = #tpu.dot_dimension_numbers<[1], [0], [0], [1], [0, 0, 1, 1], [], []>} : vector<2x32xbf16>, vector<32x32xbf16>, vector<2x32xf32> -> vector<2x32xf32>
    %104 = arith.addf %99, %103 : vector<2x32xf32>
    %c456 = arith.constant 456 : index
    %c0_36 = arith.constant 0 : index
    %105 = vector.load %arg1[%c456, %c0_36] : memref<3344x32xbf16, #tpu.memory_space<vmem>>, vector<32x32xbf16>
    %106 = vector.extract_strided_slice %35 {offsets = [0, 14, 0], sizes = [2, 1, 32], strides = [1, 1, 1]} : vector<2x20x32xbf16> to vector<2x1x32xbf16>
    %107 = vector.shape_cast %106 : vector<2x1x32xbf16> to vector<2x32xbf16>
    %cst_37 = arith.constant dense<0.000000e+00> : vector<2x32xf32>
    %108 = tpu.matmul %107, %105, %cst_37 {dimension_numbers = #tpu.dot_dimension_numbers<[1], [0], [0], [1], [0, 0, 1, 1], [], []>} : vector<2x32xbf16>, vector<32x32xbf16>, vector<2x32xf32> -> vector<2x32xf32>
    %109 = arith.addf %104, %108 : vector<2x32xf32>
    %c488 = arith.constant 488 : index
    %c0_38 = arith.constant 0 : index
    %110 = vector.load %arg1[%c488, %c0_38] : memref<3344x32xbf16, #tpu.memory_space<vmem>>, vector<32x32xbf16>
    %111 = vector.extract_strided_slice %35 {offsets = [0, 15, 0], sizes = [2, 1, 32], strides = [1, 1, 1]} : vector<2x20x32xbf16> to vector<2x1x32xbf16>
    %112 = vector.shape_cast %111 : vector<2x1x32xbf16> to vector<2x32xbf16>
    %cst_39 = arith.constant dense<0.000000e+00> : vector<2x32xf32>
    %113 = tpu.matmul %112, %110, %cst_39 {dimension_numbers = #tpu.dot_dimension_numbers<[1], [0], [0], [1], [0, 0, 1, 1], [], []>} : vector<2x32xbf16>, vector<32x32xbf16>, vector<2x32xf32> -> vector<2x32xf32>
    %114 = arith.addf %109, %113 : vector<2x32xf32>
    %c520 = arith.constant 520 : index
    %c0_40 = arith.constant 0 : index
    %115 = vector.load %arg1[%c520, %c0_40] : memref<3344x32xbf16, #tpu.memory_space<vmem>>, vector<32x32xbf16>
    %116 = vector.extract_strided_slice %35 {offsets = [0, 16, 0], sizes = [2, 1, 32], strides = [1, 1, 1]} : vector<2x20x32xbf16> to vector<2x1x32xbf16>
    %117 = vector.shape_cast %116 : vector<2x1x32xbf16> to vector<2x32xbf16>
    %cst_41 = arith.constant dense<0.000000e+00> : vector<2x32xf32>
    %118 = tpu.matmul %117, %115, %cst_41 {dimension_numbers = #tpu.dot_dimension_numbers<[1], [0], [0], [1], [0, 0, 1, 1], [], []>} : vector<2x32xbf16>, vector<32x32xbf16>, vector<2x32xf32> -> vector<2x32xf32>
    %119 = arith.addf %114, %118 : vector<2x32xf32>
    %c552 = arith.constant 552 : index
    %c0_42 = arith.constant 0 : index
    %120 = vector.load %arg1[%c552, %c0_42] : memref<3344x32xbf16, #tpu.memory_space<vmem>>, vector<32x32xbf16>
    %121 = vector.extract_strided_slice %35 {offsets = [0, 17, 0], sizes = [2, 1, 32], strides = [1, 1, 1]} : vector<2x20x32xbf16> to vector<2x1x32xbf16>
    %122 = vector.shape_cast %121 : vector<2x1x32xbf16> to vector<2x32xbf16>
    %cst_43 = arith.constant dense<0.000000e+00> : vector<2x32xf32>
    %123 = tpu.matmul %122, %120, %cst_43 {dimension_numbers = #tpu.dot_dimension_numbers<[1], [0], [0], [1], [0, 0, 1, 1], [], []>} : vector<2x32xbf16>, vector<32x32xbf16>, vector<2x32xf32> -> vector<2x32xf32>
    %124 = arith.addf %119, %123 : vector<2x32xf32>
    %c584 = arith.constant 584 : index
    %c0_44 = arith.constant 0 : index
    %125 = vector.load %arg1[%c584, %c0_44] : memref<3344x32xbf16, #tpu.memory_space<vmem>>, vector<32x32xbf16>
    %126 = vector.extract_strided_slice %35 {offsets = [0, 18, 0], sizes = [2, 1, 32], strides = [1, 1, 1]} : vector<2x20x32xbf16> to vector<2x1x32xbf16>
    %127 = vector.shape_cast %126 : vector<2x1x32xbf16> to vector<2x32xbf16>
    %cst_45 = arith.constant dense<0.000000e+00> : vector<2x32xf32>
    %128 = tpu.matmul %127, %125, %cst_45 {dimension_numbers = #tpu.dot_dimension_numbers<[1], [0], [0], [1], [0, 0, 1, 1], [], []>} : vector<2x32xbf16>, vector<32x32xbf16>, vector<2x32xf32> -> vector<2x32xf32>
    %129 = arith.addf %124, %128 : vector<2x32xf32>
    %c616 = arith.constant 616 : index
    %c0_46 = arith.constant 0 : index
    %130 = vector.load %arg1[%c616, %c0_46] : memref<3344x32xbf16, #tpu.memory_space<vmem>>, vector<32x32xbf16>
    %131 = vector.extract_strided_slice %35 {offsets = [0, 19, 0], sizes = [2, 1, 32], strides = [1, 1, 1]} : vector<2x20x32xbf16> to vector<2x1x32xbf16>
    %132 = vector.shape_cast %131 : vector<2x1x32xbf16> to vector<2x32xbf16>
    %cst_47 = arith.constant dense<0.000000e+00> : vector<2x32xf32>
    %133 = tpu.matmul %132, %130, %cst_47 {dimension_numbers = #tpu.dot_dimension_numbers<[1], [0], [0], [1], [0, 0, 1, 1], [], []>} : vector<2x32xbf16>, vector<32x32xbf16>, vector<2x32xf32> -> vector<2x32xf32>
    %134 = arith.addf %129, %133 : vector<2x32xf32>
    %c1 = arith.constant 1 : index
    %c0_48 = arith.constant 0 : index
    %135 = vector.load %arg2[%c1, %c0_48] : memref<32x32xf32, #tpu.memory_space<vmem>>, vector<1x32xf32>
    %136 = vector.broadcast %135 : vector<1x32xf32> to vector<2x32xf32>
    %137 = arith.addf %134, %136 : vector<2x32xf32>
    %138 = arith.truncf %34 : vector<2x20x32xf32> to vector<2x20x32xbf16>
    %c648 = arith.constant 648 : index
    %c0_49 = arith.constant 0 : index
    %139 = vector.load %arg1[%c648, %c0_49] : memref<3344x32xbf16, #tpu.memory_space<vmem>>, vector<32x32xbf16>
    %140 = vector.extract_strided_slice %138 {offsets = [0, 0, 0], sizes = [2, 14, 32], strides = [1, 1, 1]} : vector<2x20x32xbf16> to vector<2x14x32xbf16>
    %cst_50 = arith.constant dense<0.000000e+00> : vector<2x14x32xf32>
    %141 = tpu.matmul %140, %139, %cst_50 {dimension_numbers = #tpu.dot_dimension_numbers<[2], [0], [0, 1], [1], [0, 0, 0, 1, 1, 1], [], []>} : vector<2x14x32xbf16>, vector<32x32xbf16>, vector<2x14x32xf32> -> vector<2x14x32xf32>
    %c680 = arith.constant 680 : index
    %c0_51 = arith.constant 0 : index
    %142 = vector.load %arg1[%c680, %c0_51] : memref<3344x32xbf16, #tpu.memory_space<vmem>>, vector<32x32xbf16>
    %143 = vector.extract_strided_slice %138 {offsets = [0, 1, 0], sizes = [2, 14, 32], strides = [1, 1, 1]} : vector<2x20x32xbf16> to vector<2x14x32xbf16>
    %cst_52 = arith.constant dense<0.000000e+00> : vector<2x14x32xf32>
    %144 = tpu.matmul %143, %142, %cst_52 {dimension_numbers = #tpu.dot_dimension_numbers<[2], [0], [0, 1], [1], [0, 0, 0, 1, 1, 1], [], []>} : vector<2x14x32xbf16>, vector<32x32xbf16>, vector<2x14x32xf32> -> vector<2x14x32xf32>
    %145 = arith.addf %141, %144 : vector<2x14x32xf32>
    %c712 = arith.constant 712 : index
    %c0_53 = arith.constant 0 : index
    %146 = vector.load %arg1[%c712, %c0_53] : memref<3344x32xbf16, #tpu.memory_space<vmem>>, vector<32x32xbf16>
    %147 = vector.extract_strided_slice %138 {offsets = [0, 2, 0], sizes = [2, 14, 32], strides = [1, 1, 1]} : vector<2x20x32xbf16> to vector<2x14x32xbf16>
    %cst_54 = arith.constant dense<0.000000e+00> : vector<2x14x32xf32>
    %148 = tpu.matmul %147, %146, %cst_54 {dimension_numbers = #tpu.dot_dimension_numbers<[2], [0], [0, 1], [1], [0, 0, 0, 1, 1, 1], [], []>} : vector<2x14x32xbf16>, vector<32x32xbf16>, vector<2x14x32xf32> -> vector<2x14x32xf32>
    %149 = arith.addf %145, %148 : vector<2x14x32xf32>
    %c744 = arith.constant 744 : index
    %c0_55 = arith.constant 0 : index
    %150 = vector.load %arg1[%c744, %c0_55] : memref<3344x32xbf16, #tpu.memory_space<vmem>>, vector<32x32xbf16>
    %151 = vector.extract_strided_slice %138 {offsets = [0, 3, 0], sizes = [2, 14, 32], strides = [1, 1, 1]} : vector<2x20x32xbf16> to vector<2x14x32xbf16>
    %cst_56 = arith.constant dense<0.000000e+00> : vector<2x14x32xf32>
    %152 = tpu.matmul %151, %150, %cst_56 {dimension_numbers = #tpu.dot_dimension_numbers<[2], [0], [0, 1], [1], [0, 0, 0, 1, 1, 1], [], []>} : vector<2x14x32xbf16>, vector<32x32xbf16>, vector<2x14x32xf32> -> vector<2x14x32xf32>
    %153 = arith.addf %149, %152 : vector<2x14x32xf32>
    %c776 = arith.constant 776 : index
    %c0_57 = arith.constant 0 : index
    %154 = vector.load %arg1[%c776, %c0_57] : memref<3344x32xbf16, #tpu.memory_space<vmem>>, vector<32x32xbf16>
    %155 = vector.extract_strided_slice %138 {offsets = [0, 4, 0], sizes = [2, 14, 32], strides = [1, 1, 1]} : vector<2x20x32xbf16> to vector<2x14x32xbf16>
    %cst_58 = arith.constant dense<0.000000e+00> : vector<2x14x32xf32>
    %156 = tpu.matmul %155, %154, %cst_58 {dimension_numbers = #tpu.dot_dimension_numbers<[2], [0], [0, 1], [1], [0, 0, 0, 1, 1, 1], [], []>} : vector<2x14x32xbf16>, vector<32x32xbf16>, vector<2x14x32xf32> -> vector<2x14x32xf32>
    %157 = arith.addf %153, %156 : vector<2x14x32xf32>
    %c808 = arith.constant 808 : index
    %c0_59 = arith.constant 0 : index
    %158 = vector.load %arg1[%c808, %c0_59] : memref<3344x32xbf16, #tpu.memory_space<vmem>>, vector<32x32xbf16>
    %159 = vector.extract_strided_slice %138 {offsets = [0, 5, 0], sizes = [2, 14, 32], strides = [1, 1, 1]} : vector<2x20x32xbf16> to vector<2x14x32xbf16>
    %cst_60 = arith.constant dense<0.000000e+00> : vector<2x14x32xf32>
    %160 = tpu.matmul %159, %158, %cst_60 {dimension_numbers = #tpu.dot_dimension_numbers<[2], [0], [0, 1], [1], [0, 0, 0, 1, 1, 1], [], []>} : vector<2x14x32xbf16>, vector<32x32xbf16>, vector<2x14x32xf32> -> vector<2x14x32xf32>
    %161 = arith.addf %157, %160 : vector<2x14x32xf32>
    %c840 = arith.constant 840 : index
    %c0_61 = arith.constant 0 : index
    %162 = vector.load %arg1[%c840, %c0_61] : memref<3344x32xbf16, #tpu.memory_space<vmem>>, vector<32x32xbf16>
    %163 = vector.extract_strided_slice %138 {offsets = [0, 6, 0], sizes = [2, 14, 32], strides = [1, 1, 1]} : vector<2x20x32xbf16> to vector<2x14x32xbf16>
    %cst_62 = arith.constant dense<0.000000e+00> : vector<2x14x32xf32>
    %164 = tpu.matmul %163, %162, %cst_62 {dimension_numbers = #tpu.dot_dimension_numbers<[2], [0], [0, 1], [1], [0, 0, 0, 1, 1, 1], [], []>} : vector<2x14x32xbf16>, vector<32x32xbf16>, vector<2x14x32xf32> -> vector<2x14x32xf32>
    %165 = arith.addf %161, %164 : vector<2x14x32xf32>
    %c2 = arith.constant 2 : index
    %c0_63 = arith.constant 0 : index
    %166 = vector.load %arg2[%c2, %c0_63] : memref<32x32xf32, #tpu.memory_space<vmem>>, vector<1x32xf32>
    %167 = vector.shape_cast %166 : vector<1x32xf32> to vector<1x1x32xf32>
    %168 = vector.broadcast %167 : vector<1x1x32xf32> to vector<2x14x32xf32>
    %169 = arith.addf %165, %168 : vector<2x14x32xf32>
    %170 = math.tanh %169 : vector<2x14x32xf32>
    %171 = arith.truncf %170 : vector<2x14x32xf32> to vector<2x14x32xbf16>
    %c872 = arith.constant 872 : index
    %c0_64 = arith.constant 0 : index
    %172 = vector.load %arg1[%c872, %c0_64] : memref<3344x32xbf16, #tpu.memory_space<vmem>>, vector<32x32xbf16>
    %173 = vector.extract_strided_slice %171 {offsets = [0, 0, 0], sizes = [2, 1, 32], strides = [1, 1, 1]} : vector<2x14x32xbf16> to vector<2x1x32xbf16>
    %174 = vector.shape_cast %173 : vector<2x1x32xbf16> to vector<2x32xbf16>
    %cst_65 = arith.constant dense<0.000000e+00> : vector<2x32xf32>
    %175 = tpu.matmul %174, %172, %cst_65 {dimension_numbers = #tpu.dot_dimension_numbers<[1], [0], [0], [1], [0, 0, 1, 1], [], []>} : vector<2x32xbf16>, vector<32x32xbf16>, vector<2x32xf32> -> vector<2x32xf32>
    %c904 = arith.constant 904 : index
    %c0_66 = arith.constant 0 : index
    %176 = vector.load %arg1[%c904, %c0_66] : memref<3344x32xbf16, #tpu.memory_space<vmem>>, vector<32x32xbf16>
    %177 = vector.extract_strided_slice %171 {offsets = [0, 1, 0], sizes = [2, 1, 32], strides = [1, 1, 1]} : vector<2x14x32xbf16> to vector<2x1x32xbf16>
    %178 = vector.shape_cast %177 : vector<2x1x32xbf16> to vector<2x32xbf16>
    %cst_67 = arith.constant dense<0.000000e+00> : vector<2x32xf32>
    %179 = tpu.matmul %178, %176, %cst_67 {dimension_numbers = #tpu.dot_dimension_numbers<[1], [0], [0], [1], [0, 0, 1, 1], [], []>} : vector<2x32xbf16>, vector<32x32xbf16>, vector<2x32xf32> -> vector<2x32xf32>
    %180 = arith.addf %175, %179 : vector<2x32xf32>
    %c936 = arith.constant 936 : index
    %c0_68 = arith.constant 0 : index
    %181 = vector.load %arg1[%c936, %c0_68] : memref<3344x32xbf16, #tpu.memory_space<vmem>>, vector<32x32xbf16>
    %182 = vector.extract_strided_slice %171 {offsets = [0, 2, 0], sizes = [2, 1, 32], strides = [1, 1, 1]} : vector<2x14x32xbf16> to vector<2x1x32xbf16>
    %183 = vector.shape_cast %182 : vector<2x1x32xbf16> to vector<2x32xbf16>
    %cst_69 = arith.constant dense<0.000000e+00> : vector<2x32xf32>
    %184 = tpu.matmul %183, %181, %cst_69 {dimension_numbers = #tpu.dot_dimension_numbers<[1], [0], [0], [1], [0, 0, 1, 1], [], []>} : vector<2x32xbf16>, vector<32x32xbf16>, vector<2x32xf32> -> vector<2x32xf32>
    %185 = arith.addf %180, %184 : vector<2x32xf32>
    %c968 = arith.constant 968 : index
    %c0_70 = arith.constant 0 : index
    %186 = vector.load %arg1[%c968, %c0_70] : memref<3344x32xbf16, #tpu.memory_space<vmem>>, vector<32x32xbf16>
    %187 = vector.extract_strided_slice %171 {offsets = [0, 3, 0], sizes = [2, 1, 32], strides = [1, 1, 1]} : vector<2x14x32xbf16> to vector<2x1x32xbf16>
    %188 = vector.shape_cast %187 : vector<2x1x32xbf16> to vector<2x32xbf16>
    %cst_71 = arith.constant dense<0.000000e+00> : vector<2x32xf32>
    %189 = tpu.matmul %188, %186, %cst_71 {dimension_numbers = #tpu.dot_dimension_numbers<[1], [0], [0], [1], [0, 0, 1, 1], [], []>} : vector<2x32xbf16>, vector<32x32xbf16>, vector<2x32xf32> -> vector<2x32xf32>
    %190 = arith.addf %185, %189 : vector<2x32xf32>
    %c1000 = arith.constant 1000 : index
    %c0_72 = arith.constant 0 : index
    %191 = vector.load %arg1[%c1000, %c0_72] : memref<3344x32xbf16, #tpu.memory_space<vmem>>, vector<32x32xbf16>
    %192 = vector.extract_strided_slice %171 {offsets = [0, 4, 0], sizes = [2, 1, 32], strides = [1, 1, 1]} : vector<2x14x32xbf16> to vector<2x1x32xbf16>
    %193 = vector.shape_cast %192 : vector<2x1x32xbf16> to vector<2x32xbf16>
    %cst_73 = arith.constant dense<0.000000e+00> : vector<2x32xf32>
    %194 = tpu.matmul %193, %191, %cst_73 {dimension_numbers = #tpu.dot_dimension_numbers<[1], [0], [0], [1], [0, 0, 1, 1], [], []>} : vector<2x32xbf16>, vector<32x32xbf16>, vector<2x32xf32> -> vector<2x32xf32>
    %195 = arith.addf %190, %194 : vector<2x32xf32>
    %c1032 = arith.constant 1032 : index
    %c0_74 = arith.constant 0 : index
    %196 = vector.load %arg1[%c1032, %c0_74] : memref<3344x32xbf16, #tpu.memory_space<vmem>>, vector<32x32xbf16>
    %197 = vector.extract_strided_slice %171 {offsets = [0, 5, 0], sizes = [2, 1, 32], strides = [1, 1, 1]} : vector<2x14x32xbf16> to vector<2x1x32xbf16>
    %198 = vector.shape_cast %197 : vector<2x1x32xbf16> to vector<2x32xbf16>
    %cst_75 = arith.constant dense<0.000000e+00> : vector<2x32xf32>
    %199 = tpu.matmul %198, %196, %cst_75 {dimension_numbers = #tpu.dot_dimension_numbers<[1], [0], [0], [1], [0, 0, 1, 1], [], []>} : vector<2x32xbf16>, vector<32x32xbf16>, vector<2x32xf32> -> vector<2x32xf32>
    %200 = arith.addf %195, %199 : vector<2x32xf32>
    %c1064 = arith.constant 1064 : index
    %c0_76 = arith.constant 0 : index
    %201 = vector.load %arg1[%c1064, %c0_76] : memref<3344x32xbf16, #tpu.memory_space<vmem>>, vector<32x32xbf16>
    %202 = vector.extract_strided_slice %171 {offsets = [0, 6, 0], sizes = [2, 1, 32], strides = [1, 1, 1]} : vector<2x14x32xbf16> to vector<2x1x32xbf16>
    %203 = vector.shape_cast %202 : vector<2x1x32xbf16> to vector<2x32xbf16>
    %cst_77 = arith.constant dense<0.000000e+00> : vector<2x32xf32>
    %204 = tpu.matmul %203, %201, %cst_77 {dimension_numbers = #tpu.dot_dimension_numbers<[1], [0], [0], [1], [0, 0, 1, 1], [], []>} : vector<2x32xbf16>, vector<32x32xbf16>, vector<2x32xf32> -> vector<2x32xf32>
    %205 = arith.addf %200, %204 : vector<2x32xf32>
    %c1096 = arith.constant 1096 : index
    %c0_78 = arith.constant 0 : index
    %206 = vector.load %arg1[%c1096, %c0_78] : memref<3344x32xbf16, #tpu.memory_space<vmem>>, vector<32x32xbf16>
    %207 = vector.extract_strided_slice %171 {offsets = [0, 7, 0], sizes = [2, 1, 32], strides = [1, 1, 1]} : vector<2x14x32xbf16> to vector<2x1x32xbf16>
    %208 = vector.shape_cast %207 : vector<2x1x32xbf16> to vector<2x32xbf16>
    %cst_79 = arith.constant dense<0.000000e+00> : vector<2x32xf32>
    %209 = tpu.matmul %208, %206, %cst_79 {dimension_numbers = #tpu.dot_dimension_numbers<[1], [0], [0], [1], [0, 0, 1, 1], [], []>} : vector<2x32xbf16>, vector<32x32xbf16>, vector<2x32xf32> -> vector<2x32xf32>
    %210 = arith.addf %205, %209 : vector<2x32xf32>
    %c1128 = arith.constant 1128 : index
    %c0_80 = arith.constant 0 : index
    %211 = vector.load %arg1[%c1128, %c0_80] : memref<3344x32xbf16, #tpu.memory_space<vmem>>, vector<32x32xbf16>
    %212 = vector.extract_strided_slice %171 {offsets = [0, 8, 0], sizes = [2, 1, 32], strides = [1, 1, 1]} : vector<2x14x32xbf16> to vector<2x1x32xbf16>
    %213 = vector.shape_cast %212 : vector<2x1x32xbf16> to vector<2x32xbf16>
    %cst_81 = arith.constant dense<0.000000e+00> : vector<2x32xf32>
    %214 = tpu.matmul %213, %211, %cst_81 {dimension_numbers = #tpu.dot_dimension_numbers<[1], [0], [0], [1], [0, 0, 1, 1], [], []>} : vector<2x32xbf16>, vector<32x32xbf16>, vector<2x32xf32> -> vector<2x32xf32>
    %215 = arith.addf %210, %214 : vector<2x32xf32>
    %c1160 = arith.constant 1160 : index
    %c0_82 = arith.constant 0 : index
    %216 = vector.load %arg1[%c1160, %c0_82] : memref<3344x32xbf16, #tpu.memory_space<vmem>>, vector<32x32xbf16>
    %217 = vector.extract_strided_slice %171 {offsets = [0, 9, 0], sizes = [2, 1, 32], strides = [1, 1, 1]} : vector<2x14x32xbf16> to vector<2x1x32xbf16>
    %218 = vector.shape_cast %217 : vector<2x1x32xbf16> to vector<2x32xbf16>
    %cst_83 = arith.constant dense<0.000000e+00> : vector<2x32xf32>
    %219 = tpu.matmul %218, %216, %cst_83 {dimension_numbers = #tpu.dot_dimension_numbers<[1], [0], [0], [1], [0, 0, 1, 1], [], []>} : vector<2x32xbf16>, vector<32x32xbf16>, vector<2x32xf32> -> vector<2x32xf32>
    %220 = arith.addf %215, %219 : vector<2x32xf32>
    %c1192 = arith.constant 1192 : index
    %c0_84 = arith.constant 0 : index
    %221 = vector.load %arg1[%c1192, %c0_84] : memref<3344x32xbf16, #tpu.memory_space<vmem>>, vector<32x32xbf16>
    %222 = vector.extract_strided_slice %171 {offsets = [0, 10, 0], sizes = [2, 1, 32], strides = [1, 1, 1]} : vector<2x14x32xbf16> to vector<2x1x32xbf16>
    %223 = vector.shape_cast %222 : vector<2x1x32xbf16> to vector<2x32xbf16>
    %cst_85 = arith.constant dense<0.000000e+00> : vector<2x32xf32>
    %224 = tpu.matmul %223, %221, %cst_85 {dimension_numbers = #tpu.dot_dimension_numbers<[1], [0], [0], [1], [0, 0, 1, 1], [], []>} : vector<2x32xbf16>, vector<32x32xbf16>, vector<2x32xf32> -> vector<2x32xf32>
    %225 = arith.addf %220, %224 : vector<2x32xf32>
    %c1224 = arith.constant 1224 : index
    %c0_86 = arith.constant 0 : index
    %226 = vector.load %arg1[%c1224, %c0_86] : memref<3344x32xbf16, #tpu.memory_space<vmem>>, vector<32x32xbf16>
    %227 = vector.extract_strided_slice %171 {offsets = [0, 11, 0], sizes = [2, 1, 32], strides = [1, 1, 1]} : vector<2x14x32xbf16> to vector<2x1x32xbf16>
    %228 = vector.shape_cast %227 : vector<2x1x32xbf16> to vector<2x32xbf16>
    %cst_87 = arith.constant dense<0.000000e+00> : vector<2x32xf32>
    %229 = tpu.matmul %228, %226, %cst_87 {dimension_numbers = #tpu.dot_dimension_numbers<[1], [0], [0], [1], [0, 0, 1, 1], [], []>} : vector<2x32xbf16>, vector<32x32xbf16>, vector<2x32xf32> -> vector<2x32xf32>
    %230 = arith.addf %225, %229 : vector<2x32xf32>
    %c1256 = arith.constant 1256 : index
    %c0_88 = arith.constant 0 : index
    %231 = vector.load %arg1[%c1256, %c0_88] : memref<3344x32xbf16, #tpu.memory_space<vmem>>, vector<32x32xbf16>
    %232 = vector.extract_strided_slice %171 {offsets = [0, 12, 0], sizes = [2, 1, 32], strides = [1, 1, 1]} : vector<2x14x32xbf16> to vector<2x1x32xbf16>
    %233 = vector.shape_cast %232 : vector<2x1x32xbf16> to vector<2x32xbf16>
    %cst_89 = arith.constant dense<0.000000e+00> : vector<2x32xf32>
    %234 = tpu.matmul %233, %231, %cst_89 {dimension_numbers = #tpu.dot_dimension_numbers<[1], [0], [0], [1], [0, 0, 1, 1], [], []>} : vector<2x32xbf16>, vector<32x32xbf16>, vector<2x32xf32> -> vector<2x32xf32>
    %235 = arith.addf %230, %234 : vector<2x32xf32>
    %c1288 = arith.constant 1288 : index
    %c0_90 = arith.constant 0 : index
    %236 = vector.load %arg1[%c1288, %c0_90] : memref<3344x32xbf16, #tpu.memory_space<vmem>>, vector<32x32xbf16>
    %237 = vector.extract_strided_slice %171 {offsets = [0, 13, 0], sizes = [2, 1, 32], strides = [1, 1, 1]} : vector<2x14x32xbf16> to vector<2x1x32xbf16>
    %238 = vector.shape_cast %237 : vector<2x1x32xbf16> to vector<2x32xbf16>
    %cst_91 = arith.constant dense<0.000000e+00> : vector<2x32xf32>
    %239 = tpu.matmul %238, %236, %cst_91 {dimension_numbers = #tpu.dot_dimension_numbers<[1], [0], [0], [1], [0, 0, 1, 1], [], []>} : vector<2x32xbf16>, vector<32x32xbf16>, vector<2x32xf32> -> vector<2x32xf32>
    %240 = arith.addf %235, %239 : vector<2x32xf32>
    %241 = arith.addf %137, %240 : vector<2x32xf32>
    %c3 = arith.constant 3 : index
    %c0_92 = arith.constant 0 : index
    %242 = vector.load %arg2[%c3, %c0_92] : memref<32x32xf32, #tpu.memory_space<vmem>>, vector<1x32xf32>
    %243 = vector.broadcast %242 : vector<1x32xf32> to vector<2x32xf32>
    %244 = arith.addf %241, %243 : vector<2x32xf32>
    %c4 = arith.constant 4 : index
    %c0_93 = arith.constant 0 : index
    %245 = vector.load %arg2[%c4, %c0_93] : memref<32x32xf32, #tpu.memory_space<vmem>>, vector<1x32xf32>
    %c5 = arith.constant 5 : index
    %c0_94 = arith.constant 0 : index
    %246 = vector.load %arg2[%c5, %c0_94] : memref<32x32xf32, #tpu.memory_space<vmem>>, vector<1x32xf32>
    %247 = vector.shape_cast %245 : vector<1x32xf32> to vector<1x1x32xf32>
    %248 = vector.broadcast %247 : vector<1x1x32xf32> to vector<2x14x32xf32>
    %249 = arith.mulf %170, %248 : vector<2x14x32xf32>
    %250 = vector.shape_cast %246 : vector<1x32xf32> to vector<1x1x32xf32>
    %251 = vector.broadcast %250 : vector<1x1x32xf32> to vector<2x14x32xf32>
    %252 = arith.addf %249, %251 : vector<2x14x32xf32>
    %cst_95 = arith.constant 0.000000e+00 : f32
    %253 = vector.broadcast %cst_95 : f32 to vector<2x14x32xf32>
    %254 = arith.maximumf %252, %253 : vector<2x14x32xf32>
    %255 = vector.extract_strided_slice %34 {offsets = [0, 6, 0], sizes = [2, 14, 32], strides = [1, 1, 1]} : vector<2x20x32xf32> to vector<2x14x32xf32>
    %256 = arith.addf %254, %255 : vector<2x14x32xf32>
    %257 = arith.truncf %256 : vector<2x14x32xf32> to vector<2x14x32xbf16>
    %c1320 = arith.constant 1320 : index
    %c0_96 = arith.constant 0 : index
    %258 = vector.load %arg1[%c1320, %c0_96] : memref<3344x32xbf16, #tpu.memory_space<vmem>>, vector<32x32xbf16>
    %259 = vector.extract_strided_slice %257 {offsets = [0, 0, 0], sizes = [2, 2, 32], strides = [1, 1, 1]} : vector<2x14x32xbf16> to vector<2x2x32xbf16>
    %cst_97 = arith.constant dense<0.000000e+00> : vector<2x2x32xf32>
    %260 = tpu.matmul %259, %258, %cst_97 {dimension_numbers = #tpu.dot_dimension_numbers<[2], [0], [0, 1], [1], [0, 0, 0, 1, 1, 1], [], []>} : vector<2x2x32xbf16>, vector<32x32xbf16>, vector<2x2x32xf32> -> vector<2x2x32xf32>
    %c1352 = arith.constant 1352 : index
    %c0_98 = arith.constant 0 : index
    %261 = vector.load %arg1[%c1352, %c0_98] : memref<3344x32xbf16, #tpu.memory_space<vmem>>, vector<32x32xbf16>
    %262 = vector.extract_strided_slice %257 {offsets = [0, 2, 0], sizes = [2, 2, 32], strides = [1, 1, 1]} : vector<2x14x32xbf16> to vector<2x2x32xbf16>
    %cst_99 = arith.constant dense<0.000000e+00> : vector<2x2x32xf32>
    %263 = tpu.matmul %262, %261, %cst_99 {dimension_numbers = #tpu.dot_dimension_numbers<[2], [0], [0, 1], [1], [0, 0, 0, 1, 1, 1], [], []>} : vector<2x2x32xbf16>, vector<32x32xbf16>, vector<2x2x32xf32> -> vector<2x2x32xf32>
    %264 = arith.addf %260, %263 : vector<2x2x32xf32>
    %c1384 = arith.constant 1384 : index
    %c0_100 = arith.constant 0 : index
    %265 = vector.load %arg1[%c1384, %c0_100] : memref<3344x32xbf16, #tpu.memory_space<vmem>>, vector<32x32xbf16>
    %266 = vector.extract_strided_slice %257 {offsets = [0, 4, 0], sizes = [2, 2, 32], strides = [1, 1, 1]} : vector<2x14x32xbf16> to vector<2x2x32xbf16>
    %cst_101 = arith.constant dense<0.000000e+00> : vector<2x2x32xf32>
    %267 = tpu.matmul %266, %265, %cst_101 {dimension_numbers = #tpu.dot_dimension_numbers<[2], [0], [0, 1], [1], [0, 0, 0, 1, 1, 1], [], []>} : vector<2x2x32xbf16>, vector<32x32xbf16>, vector<2x2x32xf32> -> vector<2x2x32xf32>
    %268 = arith.addf %264, %267 : vector<2x2x32xf32>
    %c1416 = arith.constant 1416 : index
    %c0_102 = arith.constant 0 : index
    %269 = vector.load %arg1[%c1416, %c0_102] : memref<3344x32xbf16, #tpu.memory_space<vmem>>, vector<32x32xbf16>
    %270 = vector.extract_strided_slice %257 {offsets = [0, 6, 0], sizes = [2, 2, 32], strides = [1, 1, 1]} : vector<2x14x32xbf16> to vector<2x2x32xbf16>
    %cst_103 = arith.constant dense<0.000000e+00> : vector<2x2x32xf32>
    %271 = tpu.matmul %270, %269, %cst_103 {dimension_numbers = #tpu.dot_dimension_numbers<[2], [0], [0, 1], [1], [0, 0, 0, 1, 1, 1], [], []>} : vector<2x2x32xbf16>, vector<32x32xbf16>, vector<2x2x32xf32> -> vector<2x2x32xf32>
    %272 = arith.addf %268, %271 : vector<2x2x32xf32>
    %c1448 = arith.constant 1448 : index
    %c0_104 = arith.constant 0 : index
    %273 = vector.load %arg1[%c1448, %c0_104] : memref<3344x32xbf16, #tpu.memory_space<vmem>>, vector<32x32xbf16>
    %274 = vector.extract_strided_slice %257 {offsets = [0, 8, 0], sizes = [2, 2, 32], strides = [1, 1, 1]} : vector<2x14x32xbf16> to vector<2x2x32xbf16>
    %cst_105 = arith.constant dense<0.000000e+00> : vector<2x2x32xf32>
    %275 = tpu.matmul %274, %273, %cst_105 {dimension_numbers = #tpu.dot_dimension_numbers<[2], [0], [0, 1], [1], [0, 0, 0, 1, 1, 1], [], []>} : vector<2x2x32xbf16>, vector<32x32xbf16>, vector<2x2x32xf32> -> vector<2x2x32xf32>
    %276 = arith.addf %272, %275 : vector<2x2x32xf32>
    %c1480 = arith.constant 1480 : index
    %c0_106 = arith.constant 0 : index
    %277 = vector.load %arg1[%c1480, %c0_106] : memref<3344x32xbf16, #tpu.memory_space<vmem>>, vector<32x32xbf16>
    %278 = vector.extract_strided_slice %257 {offsets = [0, 10, 0], sizes = [2, 2, 32], strides = [1, 1, 1]} : vector<2x14x32xbf16> to vector<2x2x32xbf16>
    %cst_107 = arith.constant dense<0.000000e+00> : vector<2x2x32xf32>
    %279 = tpu.matmul %278, %277, %cst_107 {dimension_numbers = #tpu.dot_dimension_numbers<[2], [0], [0, 1], [1], [0, 0, 0, 1, 1, 1], [], []>} : vector<2x2x32xbf16>, vector<32x32xbf16>, vector<2x2x32xf32> -> vector<2x2x32xf32>
    %280 = arith.addf %276, %279 : vector<2x2x32xf32>
    %c1512 = arith.constant 1512 : index
    %c0_108 = arith.constant 0 : index
    %281 = vector.load %arg1[%c1512, %c0_108] : memref<3344x32xbf16, #tpu.memory_space<vmem>>, vector<32x32xbf16>
    %282 = vector.extract_strided_slice %257 {offsets = [0, 12, 0], sizes = [2, 2, 32], strides = [1, 1, 1]} : vector<2x14x32xbf16> to vector<2x2x32xbf16>
    %cst_109 = arith.constant dense<0.000000e+00> : vector<2x2x32xf32>
    %283 = tpu.matmul %282, %281, %cst_109 {dimension_numbers = #tpu.dot_dimension_numbers<[2], [0], [0, 1], [1], [0, 0, 0, 1, 1, 1], [], []>} : vector<2x2x32xbf16>, vector<32x32xbf16>, vector<2x2x32xf32> -> vector<2x2x32xf32>
    %284 = arith.addf %280, %283 : vector<2x2x32xf32>
    %c6 = arith.constant 6 : index
    %c0_110 = arith.constant 0 : index
    %285 = vector.load %arg2[%c6, %c0_110] : memref<32x32xf32, #tpu.memory_space<vmem>>, vector<1x32xf32>
    %286 = vector.shape_cast %285 : vector<1x32xf32> to vector<1x1x32xf32>
    %287 = vector.broadcast %286 : vector<1x1x32xf32> to vector<2x2x32xf32>
    %288 = arith.addf %284, %287 : vector<2x2x32xf32>
    %289 = math.tanh %288 : vector<2x2x32xf32>
    %290 = arith.truncf %289 : vector<2x2x32xf32> to vector<2x2x32xbf16>
    %c1544 = arith.constant 1544 : index
    %c0_111 = arith.constant 0 : index
    %291 = vector.load %arg1[%c1544, %c0_111] : memref<3344x32xbf16, #tpu.memory_space<vmem>>, vector<32x32xbf16>
    %292 = vector.extract_strided_slice %290 {offsets = [0, 0, 0], sizes = [2, 1, 32], strides = [1, 1, 1]} : vector<2x2x32xbf16> to vector<2x1x32xbf16>
    %293 = vector.shape_cast %292 : vector<2x1x32xbf16> to vector<2x32xbf16>
    %cst_112 = arith.constant dense<0.000000e+00> : vector<2x32xf32>
    %294 = tpu.matmul %293, %291, %cst_112 {dimension_numbers = #tpu.dot_dimension_numbers<[1], [0], [0], [1], [0, 0, 1, 1], [], []>} : vector<2x32xbf16>, vector<32x32xbf16>, vector<2x32xf32> -> vector<2x32xf32>
    %c1576 = arith.constant 1576 : index
    %c0_113 = arith.constant 0 : index
    %295 = vector.load %arg1[%c1576, %c0_113] : memref<3344x32xbf16, #tpu.memory_space<vmem>>, vector<32x32xbf16>
    %296 = vector.extract_strided_slice %290 {offsets = [0, 1, 0], sizes = [2, 1, 32], strides = [1, 1, 1]} : vector<2x2x32xbf16> to vector<2x1x32xbf16>
    %297 = vector.shape_cast %296 : vector<2x1x32xbf16> to vector<2x32xbf16>
    %cst_114 = arith.constant dense<0.000000e+00> : vector<2x32xf32>
    %298 = tpu.matmul %297, %295, %cst_114 {dimension_numbers = #tpu.dot_dimension_numbers<[1], [0], [0], [1], [0, 0, 1, 1], [], []>} : vector<2x32xbf16>, vector<32x32xbf16>, vector<2x32xf32> -> vector<2x32xf32>
    %299 = arith.addf %294, %298 : vector<2x32xf32>
    %300 = arith.addf %244, %299 : vector<2x32xf32>
    %c7 = arith.constant 7 : index
    %c0_115 = arith.constant 0 : index
    %301 = vector.load %arg2[%c7, %c0_115] : memref<32x32xf32, #tpu.memory_space<vmem>>, vector<1x32xf32>
    %302 = vector.broadcast %301 : vector<1x32xf32> to vector<2x32xf32>
    %303 = arith.addf %300, %302 : vector<2x32xf32>
    %c8_116 = arith.constant 8 : index
    %c0_117 = arith.constant 0 : index
    %304 = vector.load %arg2[%c8_116, %c0_117] : memref<32x32xf32, #tpu.memory_space<vmem>>, vector<1x32xf32>
    %c9 = arith.constant 9 : index
    %c0_118 = arith.constant 0 : index
    %305 = vector.load %arg2[%c9, %c0_118] : memref<32x32xf32, #tpu.memory_space<vmem>>, vector<1x32xf32>
    %306 = vector.shape_cast %304 : vector<1x32xf32> to vector<1x1x32xf32>
    %307 = vector.broadcast %306 : vector<1x1x32xf32> to vector<2x2x32xf32>
    %308 = arith.mulf %289, %307 : vector<2x2x32xf32>
    %309 = vector.shape_cast %305 : vector<1x32xf32> to vector<1x1x32xf32>
    %310 = vector.broadcast %309 : vector<1x1x32xf32> to vector<2x2x32xf32>
    %311 = arith.addf %308, %310 : vector<2x2x32xf32>
    %cst_119 = arith.constant 0.000000e+00 : f32
    %312 = vector.broadcast %cst_119 : f32 to vector<2x2x32xf32>
    %313 = arith.maximumf %311, %312 : vector<2x2x32xf32>
    %314 = vector.extract_strided_slice %256 {offsets = [0, 12, 0], sizes = [2, 2, 32], strides = [1, 1, 1]} : vector<2x14x32xf32> to vector<2x2x32xf32>
    %315 = arith.addf %313, %314 : vector<2x2x32xf32>
    %316 = arith.truncf %315 : vector<2x2x32xf32> to vector<2x2x32xbf16>
    %c1608 = arith.constant 1608 : index
    %c0_120 = arith.constant 0 : index
    %317 = vector.load %arg1[%c1608, %c0_120] : memref<3344x32xbf16, #tpu.memory_space<vmem>>, vector<32x32xbf16>
    %318 = vector.extract_strided_slice %316 {offsets = [0, 0, 0], sizes = [2, 1, 32], strides = [1, 1, 1]} : vector<2x2x32xbf16> to vector<2x1x32xbf16>
    %319 = vector.shape_cast %318 : vector<2x1x32xbf16> to vector<2x32xbf16>
    %cst_121 = arith.constant dense<0.000000e+00> : vector<2x32xf32>
    %320 = tpu.matmul %319, %317, %cst_121 {dimension_numbers = #tpu.dot_dimension_numbers<[1], [0], [0], [1], [0, 0, 1, 1], [], []>} : vector<2x32xbf16>, vector<32x32xbf16>, vector<2x32xf32> -> vector<2x32xf32>
    %c1640 = arith.constant 1640 : index
    %c0_122 = arith.constant 0 : index
    %321 = vector.load %arg1[%c1640, %c0_122] : memref<3344x32xbf16, #tpu.memory_space<vmem>>, vector<32x32xbf16>
    %322 = vector.extract_strided_slice %316 {offsets = [0, 1, 0], sizes = [2, 1, 32], strides = [1, 1, 1]} : vector<2x2x32xbf16> to vector<2x1x32xbf16>
    %323 = vector.shape_cast %322 : vector<2x1x32xbf16> to vector<2x32xbf16>
    %cst_123 = arith.constant dense<0.000000e+00> : vector<2x32xf32>
    %324 = tpu.matmul %323, %321, %cst_123 {dimension_numbers = #tpu.dot_dimension_numbers<[1], [0], [0], [1], [0, 0, 1, 1], [], []>} : vector<2x32xbf16>, vector<32x32xbf16>, vector<2x32xf32> -> vector<2x32xf32>
    %325 = arith.addf %320, %324 : vector<2x32xf32>
    %326 = arith.addf %303, %325 : vector<2x32xf32>
    %c10 = arith.constant 10 : index
    %c0_124 = arith.constant 0 : index
    %327 = vector.load %arg2[%c10, %c0_124] : memref<32x32xf32, #tpu.memory_space<vmem>>, vector<1x32xf32>
    %328 = vector.broadcast %327 : vector<1x32xf32> to vector<2x32xf32>
    %329 = arith.addf %326, %328 : vector<2x32xf32>
    %c0_125 = arith.constant 0 : index
    %c0_126 = arith.constant 0 : index
    %c0_127 = arith.constant 0 : index
    %330 = vector.load %arg3[%c0_125, %c0_126, %c0_127] : memref<2x2x32xf32, #tpu.memory_space<vmem>>, vector<1x2x32xf32>
    %331 = vector.shape_cast %330 : vector<1x2x32xf32> to vector<2x32xf32>
    %332 = vector.shape_cast %329 : vector<2x32xf32> to vector<1x2x32xf32>
    tpu.vector_store %arg3[%c0_125, %c0_126, %c0_127], %332 {strides = array<i32>} : memref<2x2x32xf32, #tpu.memory_space<vmem>>, vector<1x2x32xf32>,
    %c1672 = arith.constant 1672 : index
    %c0_128 = arith.constant 0 : index
    %333 = vector.load %arg1[%c1672, %c0_128] : memref<3344x32xbf16, #tpu.memory_space<vmem>>, vector<4x32xbf16>
    %334 = arith.extf %333 : vector<4x32xbf16> to vector<4x32xf32>
    %c16 = arith.constant 16 : index
    %c0_129 = arith.constant 0 : index
    %335 = vector.load %arg2[%c16, %c0_129] : memref<32x32xf32, #tpu.memory_space<vmem>>, vector<1x32xf32>
    %336 = vector.extract_strided_slice %1 {offsets = [0, 0, 0], sizes = [2, 20, 1], strides = [1, 1, 1]} : vector<2x20x4xf32> to vector<2x20x1xf32>
    %337 = vector.extract_strided_slice %334 {offsets = [0, 0], sizes = [1, 32], strides = [1, 1]} : vector<4x32xf32> to vector<1x32xf32>
    %338 = vector.shape_cast %337 : vector<1x32xf32> to vector<1x1x32xf32>
    %339 = vector.broadcast %336 : vector<2x20x1xf32> to vector<2x20x32xf32>
    %340 = vector.broadcast %338 : vector<1x1x32xf32> to vector<2x20x32xf32>
    %341 = arith.mulf %339, %340 : vector<2x20x32xf32>
    %342 = vector.extract_strided_slice %1 {offsets = [0, 0, 1], sizes = [2, 20, 1], strides = [1, 1, 1]} : vector<2x20x4xf32> to vector<2x20x1xf32>
    %343 = vector.extract_strided_slice %334 {offsets = [1, 0], sizes = [1, 32], strides = [1, 1]} : vector<4x32xf32> to vector<1x32xf32>
    %344 = vector.shape_cast %343 : vector<1x32xf32> to vector<1x1x32xf32>
    %345 = vector.broadcast %342 : vector<2x20x1xf32> to vector<2x20x32xf32>
    %346 = vector.broadcast %344 : vector<1x1x32xf32> to vector<2x20x32xf32>
    %347 = arith.mulf %345, %346 : vector<2x20x32xf32>
    %348 = arith.addf %341, %347 : vector<2x20x32xf32>
    %349 = vector.extract_strided_slice %1 {offsets = [0, 0, 2], sizes = [2, 20, 1], strides = [1, 1, 1]} : vector<2x20x4xf32> to vector<2x20x1xf32>
    %350 = vector.extract_strided_slice %334 {offsets = [2, 0], sizes = [1, 32], strides = [1, 1]} : vector<4x32xf32> to vector<1x32xf32>
    %351 = vector.shape_cast %350 : vector<1x32xf32> to vector<1x1x32xf32>
    %352 = vector.broadcast %349 : vector<2x20x1xf32> to vector<2x20x32xf32>
    %353 = vector.broadcast %351 : vector<1x1x32xf32> to vector<2x20x32xf32>
    %354 = arith.mulf %352, %353 : vector<2x20x32xf32>
    %355 = arith.addf %348, %354 : vector<2x20x32xf32>
    %356 = vector.extract_strided_slice %1 {offsets = [0, 0, 3], sizes = [2, 20, 1], strides = [1, 1, 1]} : vector<2x20x4xf32> to vector<2x20x1xf32>
    %357 = vector.extract_strided_slice %334 {offsets = [3, 0], sizes = [1, 32], strides = [1, 1]} : vector<4x32xf32> to vector<1x32xf32>
    %358 = vector.shape_cast %357 : vector<1x32xf32> to vector<1x1x32xf32>
    %359 = vector.broadcast %356 : vector<2x20x1xf32> to vector<2x20x32xf32>
    %360 = vector.broadcast %358 : vector<1x1x32xf32> to vector<2x20x32xf32>
    %361 = arith.mulf %359, %360 : vector<2x20x32xf32>
    %362 = arith.addf %355, %361 : vector<2x20x32xf32>
    %363 = vector.shape_cast %335 : vector<1x32xf32> to vector<1x1x32xf32>
    %364 = vector.broadcast %363 : vector<1x1x32xf32> to vector<2x20x32xf32>
    %365 = arith.addf %362, %364 : vector<2x20x32xf32>
    %366 = arith.truncf %365 : vector<2x20x32xf32> to vector<2x20x32xbf16>
    %c1680 = arith.constant 1680 : index
    %c0_130 = arith.constant 0 : index
    %367 = vector.load %arg1[%c1680, %c0_130] : memref<3344x32xbf16, #tpu.memory_space<vmem>>, vector<32x32xbf16>
    %368 = vector.extract_strided_slice %366 {offsets = [0, 0, 0], sizes = [2, 1, 32], strides = [1, 1, 1]} : vector<2x20x32xbf16> to vector<2x1x32xbf16>
    %369 = vector.shape_cast %368 : vector<2x1x32xbf16> to vector<2x32xbf16>
    %cst_131 = arith.constant dense<0.000000e+00> : vector<2x32xf32>
    %370 = tpu.matmul %369, %367, %cst_131 {dimension_numbers = #tpu.dot_dimension_numbers<[1], [0], [0], [1], [0, 0, 1, 1], [], []>} : vector<2x32xbf16>, vector<32x32xbf16>, vector<2x32xf32> -> vector<2x32xf32>
    %c1712 = arith.constant 1712 : index
    %c0_132 = arith.constant 0 : index
    %371 = vector.load %arg1[%c1712, %c0_132] : memref<3344x32xbf16, #tpu.memory_space<vmem>>, vector<32x32xbf16>
    %372 = vector.extract_strided_slice %366 {offsets = [0, 1, 0], sizes = [2, 1, 32], strides = [1, 1, 1]} : vector<2x20x32xbf16> to vector<2x1x32xbf16>
    %373 = vector.shape_cast %372 : vector<2x1x32xbf16> to vector<2x32xbf16>
    %cst_133 = arith.constant dense<0.000000e+00> : vector<2x32xf32>
    %374 = tpu.matmul %373, %371, %cst_133 {dimension_numbers = #tpu.dot_dimension_numbers<[1], [0], [0], [1], [0, 0, 1, 1], [], []>} : vector<2x32xbf16>, vector<32x32xbf16>, vector<2x32xf32> -> vector<2x32xf32>
    %375 = arith.addf %370, %374 : vector<2x32xf32>
    %c1744 = arith.constant 1744 : index
    %c0_134 = arith.constant 0 : index
    %376 = vector.load %arg1[%c1744, %c0_134] : memref<3344x32xbf16, #tpu.memory_space<vmem>>, vector<32x32xbf16>
    %377 = vector.extract_strided_slice %366 {offsets = [0, 2, 0], sizes = [2, 1, 32], strides = [1, 1, 1]} : vector<2x20x32xbf16> to vector<2x1x32xbf16>
    %378 = vector.shape_cast %377 : vector<2x1x32xbf16> to vector<2x32xbf16>
    %cst_135 = arith.constant dense<0.000000e+00> : vector<2x32xf32>
    %379 = tpu.matmul %378, %376, %cst_135 {dimension_numbers = #tpu.dot_dimension_numbers<[1], [0], [0], [1], [0, 0, 1, 1], [], []>} : vector<2x32xbf16>, vector<32x32xbf16>, vector<2x32xf32> -> vector<2x32xf32>
    %380 = arith.addf %375, %379 : vector<2x32xf32>
    %c1776 = arith.constant 1776 : index
    %c0_136 = arith.constant 0 : index
    %381 = vector.load %arg1[%c1776, %c0_136] : memref<3344x32xbf16, #tpu.memory_space<vmem>>, vector<32x32xbf16>
    %382 = vector.extract_strided_slice %366 {offsets = [0, 3, 0], sizes = [2, 1, 32], strides = [1, 1, 1]} : vector<2x20x32xbf16> to vector<2x1x32xbf16>
    %383 = vector.shape_cast %382 : vector<2x1x32xbf16> to vector<2x32xbf16>
    %cst_137 = arith.constant dense<0.000000e+00> : vector<2x32xf32>
    %384 = tpu.matmul %383, %381, %cst_137 {dimension_numbers = #tpu.dot_dimension_numbers<[1], [0], [0], [1], [0, 0, 1, 1], [], []>} : vector<2x32xbf16>, vector<32x32xbf16>, vector<2x32xf32> -> vector<2x32xf32>
    %385 = arith.addf %380, %384 : vector<2x32xf32>
    %c1808 = arith.constant 1808 : index
    %c0_138 = arith.constant 0 : index
    %386 = vector.load %arg1[%c1808, %c0_138] : memref<3344x32xbf16, #tpu.memory_space<vmem>>, vector<32x32xbf16>
    %387 = vector.extract_strided_slice %366 {offsets = [0, 4, 0], sizes = [2, 1, 32], strides = [1, 1, 1]} : vector<2x20x32xbf16> to vector<2x1x32xbf16>
    %388 = vector.shape_cast %387 : vector<2x1x32xbf16> to vector<2x32xbf16>
    %cst_139 = arith.constant dense<0.000000e+00> : vector<2x32xf32>
    %389 = tpu.matmul %388, %386, %cst_139 {dimension_numbers = #tpu.dot_dimension_numbers<[1], [0], [0], [1], [0, 0, 1, 1], [], []>} : vector<2x32xbf16>, vector<32x32xbf16>, vector<2x32xf32> -> vector<2x32xf32>
    %390 = arith.addf %385, %389 : vector<2x32xf32>
    %c1840 = arith.constant 1840 : index
    %c0_140 = arith.constant 0 : index
    %391 = vector.load %arg1[%c1840, %c0_140] : memref<3344x32xbf16, #tpu.memory_space<vmem>>, vector<32x32xbf16>
    %392 = vector.extract_strided_slice %366 {offsets = [0, 5, 0], sizes = [2, 1, 32], strides = [1, 1, 1]} : vector<2x20x32xbf16> to vector<2x1x32xbf16>
    %393 = vector.shape_cast %392 : vector<2x1x32xbf16> to vector<2x32xbf16>
    %cst_141 = arith.constant dense<0.000000e+00> : vector<2x32xf32>
    %394 = tpu.matmul %393, %391, %cst_141 {dimension_numbers = #tpu.dot_dimension_numbers<[1], [0], [0], [1], [0, 0, 1, 1], [], []>} : vector<2x32xbf16>, vector<32x32xbf16>, vector<2x32xf32> -> vector<2x32xf32>
    %395 = arith.addf %390, %394 : vector<2x32xf32>
    %c1872 = arith.constant 1872 : index
    %c0_142 = arith.constant 0 : index
    %396 = vector.load %arg1[%c1872, %c0_142] : memref<3344x32xbf16, #tpu.memory_space<vmem>>, vector<32x32xbf16>
    %397 = vector.extract_strided_slice %366 {offsets = [0, 6, 0], sizes = [2, 1, 32], strides = [1, 1, 1]} : vector<2x20x32xbf16> to vector<2x1x32xbf16>
    %398 = vector.shape_cast %397 : vector<2x1x32xbf16> to vector<2x32xbf16>
    %cst_143 = arith.constant dense<0.000000e+00> : vector<2x32xf32>
    %399 = tpu.matmul %398, %396, %cst_143 {dimension_numbers = #tpu.dot_dimension_numbers<[1], [0], [0], [1], [0, 0, 1, 1], [], []>} : vector<2x32xbf16>, vector<32x32xbf16>, vector<2x32xf32> -> vector<2x32xf32>
    %400 = arith.addf %395, %399 : vector<2x32xf32>
    %c1904 = arith.constant 1904 : index
    %c0_144 = arith.constant 0 : index
    %401 = vector.load %arg1[%c1904, %c0_144] : memref<3344x32xbf16, #tpu.memory_space<vmem>>, vector<32x32xbf16>
    %402 = vector.extract_strided_slice %366 {offsets = [0, 7, 0], sizes = [2, 1, 32], strides = [1, 1, 1]} : vector<2x20x32xbf16> to vector<2x1x32xbf16>
    %403 = vector.shape_cast %402 : vector<2x1x32xbf16> to vector<2x32xbf16>
    %cst_145 = arith.constant dense<0.000000e+00> : vector<2x32xf32>
    %404 = tpu.matmul %403, %401, %cst_145 {dimension_numbers = #tpu.dot_dimension_numbers<[1], [0], [0], [1], [0, 0, 1, 1], [], []>} : vector<2x32xbf16>, vector<32x32xbf16>, vector<2x32xf32> -> vector<2x32xf32>
    %405 = arith.addf %400, %404 : vector<2x32xf32>
    %c1936 = arith.constant 1936 : index
    %c0_146 = arith.constant 0 : index
    %406 = vector.load %arg1[%c1936, %c0_146] : memref<3344x32xbf16, #tpu.memory_space<vmem>>, vector<32x32xbf16>
    %407 = vector.extract_strided_slice %366 {offsets = [0, 8, 0], sizes = [2, 1, 32], strides = [1, 1, 1]} : vector<2x20x32xbf16> to vector<2x1x32xbf16>
    %408 = vector.shape_cast %407 : vector<2x1x32xbf16> to vector<2x32xbf16>
    %cst_147 = arith.constant dense<0.000000e+00> : vector<2x32xf32>
    %409 = tpu.matmul %408, %406, %cst_147 {dimension_numbers = #tpu.dot_dimension_numbers<[1], [0], [0], [1], [0, 0, 1, 1], [], []>} : vector<2x32xbf16>, vector<32x32xbf16>, vector<2x32xf32> -> vector<2x32xf32>
    %410 = arith.addf %405, %409 : vector<2x32xf32>
    %c1968 = arith.constant 1968 : index
    %c0_148 = arith.constant 0 : index
    %411 = vector.load %arg1[%c1968, %c0_148] : memref<3344x32xbf16, #tpu.memory_space<vmem>>, vector<32x32xbf16>
    %412 = vector.extract_strided_slice %366 {offsets = [0, 9, 0], sizes = [2, 1, 32], strides = [1, 1, 1]} : vector<2x20x32xbf16> to vector<2x1x32xbf16>
    %413 = vector.shape_cast %412 : vector<2x1x32xbf16> to vector<2x32xbf16>
    %cst_149 = arith.constant dense<0.000000e+00> : vector<2x32xf32>
    %414 = tpu.matmul %413, %411, %cst_149 {dimension_numbers = #tpu.dot_dimension_numbers<[1], [0], [0], [1], [0, 0, 1, 1], [], []>} : vector<2x32xbf16>, vector<32x32xbf16>, vector<2x32xf32> -> vector<2x32xf32>
    %415 = arith.addf %410, %414 : vector<2x32xf32>
    %c2000 = arith.constant 2000 : index
    %c0_150 = arith.constant 0 : index
    %416 = vector.load %arg1[%c2000, %c0_150] : memref<3344x32xbf16, #tpu.memory_space<vmem>>, vector<32x32xbf16>
    %417 = vector.extract_strided_slice %366 {offsets = [0, 10, 0], sizes = [2, 1, 32], strides = [1, 1, 1]} : vector<2x20x32xbf16> to vector<2x1x32xbf16>
    %418 = vector.shape_cast %417 : vector<2x1x32xbf16> to vector<2x32xbf16>
    %cst_151 = arith.constant dense<0.000000e+00> : vector<2x32xf32>
    %419 = tpu.matmul %418, %416, %cst_151 {dimension_numbers = #tpu.dot_dimension_numbers<[1], [0], [0], [1], [0, 0, 1, 1], [], []>} : vector<2x32xbf16>, vector<32x32xbf16>, vector<2x32xf32> -> vector<2x32xf32>
    %420 = arith.addf %415, %419 : vector<2x32xf32>
    %c2032 = arith.constant 2032 : index
    %c0_152 = arith.constant 0 : index
    %421 = vector.load %arg1[%c2032, %c0_152] : memref<3344x32xbf16, #tpu.memory_space<vmem>>, vector<32x32xbf16>
    %422 = vector.extract_strided_slice %366 {offsets = [0, 11, 0], sizes = [2, 1, 32], strides = [1, 1, 1]} : vector<2x20x32xbf16> to vector<2x1x32xbf16>
    %423 = vector.shape_cast %422 : vector<2x1x32xbf16> to vector<2x32xbf16>
    %cst_153 = arith.constant dense<0.000000e+00> : vector<2x32xf32>
    %424 = tpu.matmul %423, %421, %cst_153 {dimension_numbers = #tpu.dot_dimension_numbers<[1], [0], [0], [1], [0, 0, 1, 1], [], []>} : vector<2x32xbf16>, vector<32x32xbf16>, vector<2x32xf32> -> vector<2x32xf32>
    %425 = arith.addf %420, %424 : vector<2x32xf32>
    %c2064 = arith.constant 2064 : index
    %c0_154 = arith.constant 0 : index
    %426 = vector.load %arg1[%c2064, %c0_154] : memref<3344x32xbf16, #tpu.memory_space<vmem>>, vector<32x32xbf16>
    %427 = vector.extract_strided_slice %366 {offsets = [0, 12, 0], sizes = [2, 1, 32], strides = [1, 1, 1]} : vector<2x20x32xbf16> to vector<2x1x32xbf16>
    %428 = vector.shape_cast %427 : vector<2x1x32xbf16> to vector<2x32xbf16>
    %cst_155 = arith.constant dense<0.000000e+00> : vector<2x32xf32>
    %429 = tpu.matmul %428, %426, %cst_155 {dimension_numbers = #tpu.dot_dimension_numbers<[1], [0], [0], [1], [0, 0, 1, 1], [], []>} : vector<2x32xbf16>, vector<32x32xbf16>, vector<2x32xf32> -> vector<2x32xf32>
    %430 = arith.addf %425, %429 : vector<2x32xf32>
    %c2096 = arith.constant 2096 : index
    %c0_156 = arith.constant 0 : index
    %431 = vector.load %arg1[%c2096, %c0_156] : memref<3344x32xbf16, #tpu.memory_space<vmem>>, vector<32x32xbf16>
    %432 = vector.extract_strided_slice %366 {offsets = [0, 13, 0], sizes = [2, 1, 32], strides = [1, 1, 1]} : vector<2x20x32xbf16> to vector<2x1x32xbf16>
    %433 = vector.shape_cast %432 : vector<2x1x32xbf16> to vector<2x32xbf16>
    %cst_157 = arith.constant dense<0.000000e+00> : vector<2x32xf32>
    %434 = tpu.matmul %433, %431, %cst_157 {dimension_numbers = #tpu.dot_dimension_numbers<[1], [0], [0], [1], [0, 0, 1, 1], [], []>} : vector<2x32xbf16>, vector<32x32xbf16>, vector<2x32xf32> -> vector<2x32xf32>
    %435 = arith.addf %430, %434 : vector<2x32xf32>
    %c2128 = arith.constant 2128 : index
    %c0_158 = arith.constant 0 : index
    %436 = vector.load %arg1[%c2128, %c0_158] : memref<3344x32xbf16, #tpu.memory_space<vmem>>, vector<32x32xbf16>
    %437 = vector.extract_strided_slice %366 {offsets = [0, 14, 0], sizes = [2, 1, 32], strides = [1, 1, 1]} : vector<2x20x32xbf16> to vector<2x1x32xbf16>
    %438 = vector.shape_cast %437 : vector<2x1x32xbf16> to vector<2x32xbf16>
    %cst_159 = arith.constant dense<0.000000e+00> : vector<2x32xf32>
    %439 = tpu.matmul %438, %436, %cst_159 {dimension_numbers = #tpu.dot_dimension_numbers<[1], [0], [0], [1], [0, 0, 1, 1], [], []>} : vector<2x32xbf16>, vector<32x32xbf16>, vector<2x32xf32> -> vector<2x32xf32>
    %440 = arith.addf %435, %439 : vector<2x32xf32>
    %c2160 = arith.constant 2160 : index
    %c0_160 = arith.constant 0 : index
    %441 = vector.load %arg1[%c2160, %c0_160] : memref<3344x32xbf16, #tpu.memory_space<vmem>>, vector<32x32xbf16>
    %442 = vector.extract_strided_slice %366 {offsets = [0, 15, 0], sizes = [2, 1, 32], strides = [1, 1, 1]} : vector<2x20x32xbf16> to vector<2x1x32xbf16>
    %443 = vector.shape_cast %442 : vector<2x1x32xbf16> to vector<2x32xbf16>
    %cst_161 = arith.constant dense<0.000000e+00> : vector<2x32xf32>
    %444 = tpu.matmul %443, %441, %cst_161 {dimension_numbers = #tpu.dot_dimension_numbers<[1], [0], [0], [1], [0, 0, 1, 1], [], []>} : vector<2x32xbf16>, vector<32x32xbf16>, vector<2x32xf32> -> vector<2x32xf32>
    %445 = arith.addf %440, %444 : vector<2x32xf32>
    %c2192 = arith.constant 2192 : index
    %c0_162 = arith.constant 0 : index
    %446 = vector.load %arg1[%c2192, %c0_162] : memref<3344x32xbf16, #tpu.memory_space<vmem>>, vector<32x32xbf16>
    %447 = vector.extract_strided_slice %366 {offsets = [0, 16, 0], sizes = [2, 1, 32], strides = [1, 1, 1]} : vector<2x20x32xbf16> to vector<2x1x32xbf16>
    %448 = vector.shape_cast %447 : vector<2x1x32xbf16> to vector<2x32xbf16>
    %cst_163 = arith.constant dense<0.000000e+00> : vector<2x32xf32>
    %449 = tpu.matmul %448, %446, %cst_163 {dimension_numbers = #tpu.dot_dimension_numbers<[1], [0], [0], [1], [0, 0, 1, 1], [], []>} : vector<2x32xbf16>, vector<32x32xbf16>, vector<2x32xf32> -> vector<2x32xf32>
    %450 = arith.addf %445, %449 : vector<2x32xf32>
    %c2224 = arith.constant 2224 : index
    %c0_164 = arith.constant 0 : index
    %451 = vector.load %arg1[%c2224, %c0_164] : memref<3344x32xbf16, #tpu.memory_space<vmem>>, vector<32x32xbf16>
    %452 = vector.extract_strided_slice %366 {offsets = [0, 17, 0], sizes = [2, 1, 32], strides = [1, 1, 1]} : vector<2x20x32xbf16> to vector<2x1x32xbf16>
    %453 = vector.shape_cast %452 : vector<2x1x32xbf16> to vector<2x32xbf16>
    %cst_165 = arith.constant dense<0.000000e+00> : vector<2x32xf32>
    %454 = tpu.matmul %453, %451, %cst_165 {dimension_numbers = #tpu.dot_dimension_numbers<[1], [0], [0], [1], [0, 0, 1, 1], [], []>} : vector<2x32xbf16>, vector<32x32xbf16>, vector<2x32xf32> -> vector<2x32xf32>
    %455 = arith.addf %450, %454 : vector<2x32xf32>
    %c2256 = arith.constant 2256 : index
    %c0_166 = arith.constant 0 : index
    %456 = vector.load %arg1[%c2256, %c0_166] : memref<3344x32xbf16, #tpu.memory_space<vmem>>, vector<32x32xbf16>
    %457 = vector.extract_strided_slice %366 {offsets = [0, 18, 0], sizes = [2, 1, 32], strides = [1, 1, 1]} : vector<2x20x32xbf16> to vector<2x1x32xbf16>
    %458 = vector.shape_cast %457 : vector<2x1x32xbf16> to vector<2x32xbf16>
    %cst_167 = arith.constant dense<0.000000e+00> : vector<2x32xf32>
    %459 = tpu.matmul %458, %456, %cst_167 {dimension_numbers = #tpu.dot_dimension_numbers<[1], [0], [0], [1], [0, 0, 1, 1], [], []>} : vector<2x32xbf16>, vector<32x32xbf16>, vector<2x32xf32> -> vector<2x32xf32>
    %460 = arith.addf %455, %459 : vector<2x32xf32>
    %c2288 = arith.constant 2288 : index
    %c0_168 = arith.constant 0 : index
    %461 = vector.load %arg1[%c2288, %c0_168] : memref<3344x32xbf16, #tpu.memory_space<vmem>>, vector<32x32xbf16>
    %462 = vector.extract_strided_slice %366 {offsets = [0, 19, 0], sizes = [2, 1, 32], strides = [1, 1, 1]} : vector<2x20x32xbf16> to vector<2x1x32xbf16>
    %463 = vector.shape_cast %462 : vector<2x1x32xbf16> to vector<2x32xbf16>
    %cst_169 = arith.constant dense<0.000000e+00> : vector<2x32xf32>
    %464 = tpu.matmul %463, %461, %cst_169 {dimension_numbers = #tpu.dot_dimension_numbers<[1], [0], [0], [1], [0, 0, 1, 1], [], []>} : vector<2x32xbf16>, vector<32x32xbf16>, vector<2x32xf32> -> vector<2x32xf32>
    %465 = arith.addf %460, %464 : vector<2x32xf32>
    %c17 = arith.constant 17 : index
    %c0_170 = arith.constant 0 : index
    %466 = vector.load %arg2[%c17, %c0_170] : memref<32x32xf32, #tpu.memory_space<vmem>>, vector<1x32xf32>
    %467 = vector.broadcast %466 : vector<1x32xf32> to vector<2x32xf32>
    %468 = arith.addf %465, %467 : vector<2x32xf32>
    %469 = arith.truncf %365 : vector<2x20x32xf32> to vector<2x20x32xbf16>
    %c2320 = arith.constant 2320 : index
    %c0_171 = arith.constant 0 : index
    %470 = vector.load %arg1[%c2320, %c0_171] : memref<3344x32xbf16, #tpu.memory_space<vmem>>, vector<32x32xbf16>
    %471 = vector.extract_strided_slice %469 {offsets = [0, 0, 0], sizes = [2, 14, 32], strides = [1, 1, 1]} : vector<2x20x32xbf16> to vector<2x14x32xbf16>
    %cst_172 = arith.constant dense<0.000000e+00> : vector<2x14x32xf32>
    %472 = tpu.matmul %471, %470, %cst_172 {dimension_numbers = #tpu.dot_dimension_numbers<[2], [0], [0, 1], [1], [0, 0, 0, 1, 1, 1], [], []>} : vector<2x14x32xbf16>, vector<32x32xbf16>, vector<2x14x32xf32> -> vector<2x14x32xf32>
    %c2352 = arith.constant 2352 : index
    %c0_173 = arith.constant 0 : index
    %473 = vector.load %arg1[%c2352, %c0_173] : memref<3344x32xbf16, #tpu.memory_space<vmem>>, vector<32x32xbf16>
    %474 = vector.extract_strided_slice %469 {offsets = [0, 1, 0], sizes = [2, 14, 32], strides = [1, 1, 1]} : vector<2x20x32xbf16> to vector<2x14x32xbf16>
    %cst_174 = arith.constant dense<0.000000e+00> : vector<2x14x32xf32>
    %475 = tpu.matmul %474, %473, %cst_174 {dimension_numbers = #tpu.dot_dimension_numbers<[2], [0], [0, 1], [1], [0, 0, 0, 1, 1, 1], [], []>} : vector<2x14x32xbf16>, vector<32x32xbf16>, vector<2x14x32xf32> -> vector<2x14x32xf32>
    %476 = arith.addf %472, %475 : vector<2x14x32xf32>
    %c2384 = arith.constant 2384 : index
    %c0_175 = arith.constant 0 : index
    %477 = vector.load %arg1[%c2384, %c0_175] : memref<3344x32xbf16, #tpu.memory_space<vmem>>, vector<32x32xbf16>
    %478 = vector.extract_strided_slice %469 {offsets = [0, 2, 0], sizes = [2, 14, 32], strides = [1, 1, 1]} : vector<2x20x32xbf16> to vector<2x14x32xbf16>
    %cst_176 = arith.constant dense<0.000000e+00> : vector<2x14x32xf32>
    %479 = tpu.matmul %478, %477, %cst_176 {dimension_numbers = #tpu.dot_dimension_numbers<[2], [0], [0, 1], [1], [0, 0, 0, 1, 1, 1], [], []>} : vector<2x14x32xbf16>, vector<32x32xbf16>, vector<2x14x32xf32> -> vector<2x14x32xf32>
    %480 = arith.addf %476, %479 : vector<2x14x32xf32>
    %c2416 = arith.constant 2416 : index
    %c0_177 = arith.constant 0 : index
    %481 = vector.load %arg1[%c2416, %c0_177] : memref<3344x32xbf16, #tpu.memory_space<vmem>>, vector<32x32xbf16>
    %482 = vector.extract_strided_slice %469 {offsets = [0, 3, 0], sizes = [2, 14, 32], strides = [1, 1, 1]} : vector<2x20x32xbf16> to vector<2x14x32xbf16>
    %cst_178 = arith.constant dense<0.000000e+00> : vector<2x14x32xf32>
    %483 = tpu.matmul %482, %481, %cst_178 {dimension_numbers = #tpu.dot_dimension_numbers<[2], [0], [0, 1], [1], [0, 0, 0, 1, 1, 1], [], []>} : vector<2x14x32xbf16>, vector<32x32xbf16>, vector<2x14x32xf32> -> vector<2x14x32xf32>
    %484 = arith.addf %480, %483 : vector<2x14x32xf32>
    %c2448 = arith.constant 2448 : index
    %c0_179 = arith.constant 0 : index
    %485 = vector.load %arg1[%c2448, %c0_179] : memref<3344x32xbf16, #tpu.memory_space<vmem>>, vector<32x32xbf16>
    %486 = vector.extract_strided_slice %469 {offsets = [0, 4, 0], sizes = [2, 14, 32], strides = [1, 1, 1]} : vector<2x20x32xbf16> to vector<2x14x32xbf16>
    %cst_180 = arith.constant dense<0.000000e+00> : vector<2x14x32xf32>
    %487 = tpu.matmul %486, %485, %cst_180 {dimension_numbers = #tpu.dot_dimension_numbers<[2], [0], [0, 1], [1], [0, 0, 0, 1, 1, 1], [], []>} : vector<2x14x32xbf16>, vector<32x32xbf16>, vector<2x14x32xf32> -> vector<2x14x32xf32>
    %488 = arith.addf %484, %487 : vector<2x14x32xf32>
    %c2480 = arith.constant 2480 : index
    %c0_181 = arith.constant 0 : index
    %489 = vector.load %arg1[%c2480, %c0_181] : memref<3344x32xbf16, #tpu.memory_space<vmem>>, vector<32x32xbf16>
    %490 = vector.extract_strided_slice %469 {offsets = [0, 5, 0], sizes = [2, 14, 32], strides = [1, 1, 1]} : vector<2x20x32xbf16> to vector<2x14x32xbf16>
    %cst_182 = arith.constant dense<0.000000e+00> : vector<2x14x32xf32>
    %491 = tpu.matmul %490, %489, %cst_182 {dimension_numbers = #tpu.dot_dimension_numbers<[2], [0], [0, 1], [1], [0, 0, 0, 1, 1, 1], [], []>} : vector<2x14x32xbf16>, vector<32x32xbf16>, vector<2x14x32xf32> -> vector<2x14x32xf32>
    %492 = arith.addf %488, %491 : vector<2x14x32xf32>
    %c2512 = arith.constant 2512 : index
    %c0_183 = arith.constant 0 : index
    %493 = vector.load %arg1[%c2512, %c0_183] : memref<3344x32xbf16, #tpu.memory_space<vmem>>, vector<32x32xbf16>
    %494 = vector.extract_strided_slice %469 {offsets = [0, 6, 0], sizes = [2, 14, 32], strides = [1, 1, 1]} : vector<2x20x32xbf16> to vector<2x14x32xbf16>
    %cst_184 = arith.constant dense<0.000000e+00> : vector<2x14x32xf32>
    %495 = tpu.matmul %494, %493, %cst_184 {dimension_numbers = #tpu.dot_dimension_numbers<[2], [0], [0, 1], [1], [0, 0, 0, 1, 1, 1], [], []>} : vector<2x14x32xbf16>, vector<32x32xbf16>, vector<2x14x32xf32> -> vector<2x14x32xf32>
    %496 = arith.addf %492, %495 : vector<2x14x32xf32>
    %c18 = arith.constant 18 : index
    %c0_185 = arith.constant 0 : index
    %497 = vector.load %arg2[%c18, %c0_185] : memref<32x32xf32, #tpu.memory_space<vmem>>, vector<1x32xf32>
    %498 = vector.shape_cast %497 : vector<1x32xf32> to vector<1x1x32xf32>
    %499 = vector.broadcast %498 : vector<1x1x32xf32> to vector<2x14x32xf32>
    %500 = arith.addf %496, %499 : vector<2x14x32xf32>
    %501 = math.tanh %500 : vector<2x14x32xf32>
    %502 = arith.truncf %501 : vector<2x14x32xf32> to vector<2x14x32xbf16>
    %c2544 = arith.constant 2544 : index
    %c0_186 = arith.constant 0 : index
    %503 = vector.load %arg1[%c2544, %c0_186] : memref<3344x32xbf16, #tpu.memory_space<vmem>>, vector<32x32xbf16>
    %504 = vector.extract_strided_slice %502 {offsets = [0, 0, 0], sizes = [2, 1, 32], strides = [1, 1, 1]} : vector<2x14x32xbf16> to vector<2x1x32xbf16>
    %505 = vector.shape_cast %504 : vector<2x1x32xbf16> to vector<2x32xbf16>
    %cst_187 = arith.constant dense<0.000000e+00> : vector<2x32xf32>
    %506 = tpu.matmul %505, %503, %cst_187 {dimension_numbers = #tpu.dot_dimension_numbers<[1], [0], [0], [1], [0, 0, 1, 1], [], []>} : vector<2x32xbf16>, vector<32x32xbf16>, vector<2x32xf32> -> vector<2x32xf32>
    %c2576 = arith.constant 2576 : index
    %c0_188 = arith.constant 0 : index
    %507 = vector.load %arg1[%c2576, %c0_188] : memref<3344x32xbf16, #tpu.memory_space<vmem>>, vector<32x32xbf16>
    %508 = vector.extract_strided_slice %502 {offsets = [0, 1, 0], sizes = [2, 1, 32], strides = [1, 1, 1]} : vector<2x14x32xbf16> to vector<2x1x32xbf16>
    %509 = vector.shape_cast %508 : vector<2x1x32xbf16> to vector<2x32xbf16>
    %cst_189 = arith.constant dense<0.000000e+00> : vector<2x32xf32>
    %510 = tpu.matmul %509, %507, %cst_189 {dimension_numbers = #tpu.dot_dimension_numbers<[1], [0], [0], [1], [0, 0, 1, 1], [], []>} : vector<2x32xbf16>, vector<32x32xbf16>, vector<2x32xf32> -> vector<2x32xf32>
    %511 = arith.addf %506, %510 : vector<2x32xf32>
    %c2608 = arith.constant 2608 : index
    %c0_190 = arith.constant 0 : index
    %512 = vector.load %arg1[%c2608, %c0_190] : memref<3344x32xbf16, #tpu.memory_space<vmem>>, vector<32x32xbf16>
    %513 = vector.extract_strided_slice %502 {offsets = [0, 2, 0], sizes = [2, 1, 32], strides = [1, 1, 1]} : vector<2x14x32xbf16> to vector<2x1x32xbf16>
    %514 = vector.shape_cast %513 : vector<2x1x32xbf16> to vector<2x32xbf16>
    %cst_191 = arith.constant dense<0.000000e+00> : vector<2x32xf32>
    %515 = tpu.matmul %514, %512, %cst_191 {dimension_numbers = #tpu.dot_dimension_numbers<[1], [0], [0], [1], [0, 0, 1, 1], [], []>} : vector<2x32xbf16>, vector<32x32xbf16>, vector<2x32xf32> -> vector<2x32xf32>
    %516 = arith.addf %511, %515 : vector<2x32xf32>
    %c2640 = arith.constant 2640 : index
    %c0_192 = arith.constant 0 : index
    %517 = vector.load %arg1[%c2640, %c0_192] : memref<3344x32xbf16, #tpu.memory_space<vmem>>, vector<32x32xbf16>
    %518 = vector.extract_strided_slice %502 {offsets = [0, 3, 0], sizes = [2, 1, 32], strides = [1, 1, 1]} : vector<2x14x32xbf16> to vector<2x1x32xbf16>
    %519 = vector.shape_cast %518 : vector<2x1x32xbf16> to vector<2x32xbf16>
    %cst_193 = arith.constant dense<0.000000e+00> : vector<2x32xf32>
    %520 = tpu.matmul %519, %517, %cst_193 {dimension_numbers = #tpu.dot_dimension_numbers<[1], [0], [0], [1], [0, 0, 1, 1], [], []>} : vector<2x32xbf16>, vector<32x32xbf16>, vector<2x32xf32> -> vector<2x32xf32>
    %521 = arith.addf %516, %520 : vector<2x32xf32>
    %c2672 = arith.constant 2672 : index
    %c0_194 = arith.constant 0 : index
    %522 = vector.load %arg1[%c2672, %c0_194] : memref<3344x32xbf16, #tpu.memory_space<vmem>>, vector<32x32xbf16>
    %523 = vector.extract_strided_slice %502 {offsets = [0, 4, 0], sizes = [2, 1, 32], strides = [1, 1, 1]} : vector<2x14x32xbf16> to vector<2x1x32xbf16>
    %524 = vector.shape_cast %523 : vector<2x1x32xbf16> to vector<2x32xbf16>
    %cst_195 = arith.constant dense<0.000000e+00> : vector<2x32xf32>
    %525 = tpu.matmul %524, %522, %cst_195 {dimension_numbers = #tpu.dot_dimension_numbers<[1], [0], [0], [1], [0, 0, 1, 1], [], []>} : vector<2x32xbf16>, vector<32x32xbf16>, vector<2x32xf32> -> vector<2x32xf32>
    %526 = arith.addf %521, %525 : vector<2x32xf32>
    %c2704 = arith.constant 2704 : index
    %c0_196 = arith.constant 0 : index
    %527 = vector.load %arg1[%c2704, %c0_196] : memref<3344x32xbf16, #tpu.memory_space<vmem>>, vector<32x32xbf16>
    %528 = vector.extract_strided_slice %502 {offsets = [0, 5, 0], sizes = [2, 1, 32], strides = [1, 1, 1]} : vector<2x14x32xbf16> to vector<2x1x32xbf16>
    %529 = vector.shape_cast %528 : vector<2x1x32xbf16> to vector<2x32xbf16>
    %cst_197 = arith.constant dense<0.000000e+00> : vector<2x32xf32>
    %530 = tpu.matmul %529, %527, %cst_197 {dimension_numbers = #tpu.dot_dimension_numbers<[1], [0], [0], [1], [0, 0, 1, 1], [], []>} : vector<2x32xbf16>, vector<32x32xbf16>, vector<2x32xf32> -> vector<2x32xf32>
    %531 = arith.addf %526, %530 : vector<2x32xf32>
    %c2736 = arith.constant 2736 : index
    %c0_198 = arith.constant 0 : index
    %532 = vector.load %arg1[%c2736, %c0_198] : memref<3344x32xbf16, #tpu.memory_space<vmem>>, vector<32x32xbf16>
    %533 = vector.extract_strided_slice %502 {offsets = [0, 6, 0], sizes = [2, 1, 32], strides = [1, 1, 1]} : vector<2x14x32xbf16> to vector<2x1x32xbf16>
    %534 = vector.shape_cast %533 : vector<2x1x32xbf16> to vector<2x32xbf16>
    %cst_199 = arith.constant dense<0.000000e+00> : vector<2x32xf32>
    %535 = tpu.matmul %534, %532, %cst_199 {dimension_numbers = #tpu.dot_dimension_numbers<[1], [0], [0], [1], [0, 0, 1, 1], [], []>} : vector<2x32xbf16>, vector<32x32xbf16>, vector<2x32xf32> -> vector<2x32xf32>
    %536 = arith.addf %531, %535 : vector<2x32xf32>
    %c2768 = arith.constant 2768 : index
    %c0_200 = arith.constant 0 : index
    %537 = vector.load %arg1[%c2768, %c0_200] : memref<3344x32xbf16, #tpu.memory_space<vmem>>, vector<32x32xbf16>
    %538 = vector.extract_strided_slice %502 {offsets = [0, 7, 0], sizes = [2, 1, 32], strides = [1, 1, 1]} : vector<2x14x32xbf16> to vector<2x1x32xbf16>
    %539 = vector.shape_cast %538 : vector<2x1x32xbf16> to vector<2x32xbf16>
    %cst_201 = arith.constant dense<0.000000e+00> : vector<2x32xf32>
    %540 = tpu.matmul %539, %537, %cst_201 {dimension_numbers = #tpu.dot_dimension_numbers<[1], [0], [0], [1], [0, 0, 1, 1], [], []>} : vector<2x32xbf16>, vector<32x32xbf16>, vector<2x32xf32> -> vector<2x32xf32>
    %541 = arith.addf %536, %540 : vector<2x32xf32>
    %c2800 = arith.constant 2800 : index
    %c0_202 = arith.constant 0 : index
    %542 = vector.load %arg1[%c2800, %c0_202] : memref<3344x32xbf16, #tpu.memory_space<vmem>>, vector<32x32xbf16>
    %543 = vector.extract_strided_slice %502 {offsets = [0, 8, 0], sizes = [2, 1, 32], strides = [1, 1, 1]} : vector<2x14x32xbf16> to vector<2x1x32xbf16>
    %544 = vector.shape_cast %543 : vector<2x1x32xbf16> to vector<2x32xbf16>
    %cst_203 = arith.constant dense<0.000000e+00> : vector<2x32xf32>
    %545 = tpu.matmul %544, %542, %cst_203 {dimension_numbers = #tpu.dot_dimension_numbers<[1], [0], [0], [1], [0, 0, 1, 1], [], []>} : vector<2x32xbf16>, vector<32x32xbf16>, vector<2x32xf32> -> vector<2x32xf32>
    %546 = arith.addf %541, %545 : vector<2x32xf32>
    %c2832 = arith.constant 2832 : index
    %c0_204 = arith.constant 0 : index
    %547 = vector.load %arg1[%c2832, %c0_204] : memref<3344x32xbf16, #tpu.memory_space<vmem>>, vector<32x32xbf16>
    %548 = vector.extract_strided_slice %502 {offsets = [0, 9, 0], sizes = [2, 1, 32], strides = [1, 1, 1]} : vector<2x14x32xbf16> to vector<2x1x32xbf16>
    %549 = vector.shape_cast %548 : vector<2x1x32xbf16> to vector<2x32xbf16>
    %cst_205 = arith.constant dense<0.000000e+00> : vector<2x32xf32>
    %550 = tpu.matmul %549, %547, %cst_205 {dimension_numbers = #tpu.dot_dimension_numbers<[1], [0], [0], [1], [0, 0, 1, 1], [], []>} : vector<2x32xbf16>, vector<32x32xbf16>, vector<2x32xf32> -> vector<2x32xf32>
    %551 = arith.addf %546, %550 : vector<2x32xf32>
    %c2864 = arith.constant 2864 : index
    %c0_206 = arith.constant 0 : index
    %552 = vector.load %arg1[%c2864, %c0_206] : memref<3344x32xbf16, #tpu.memory_space<vmem>>, vector<32x32xbf16>
    %553 = vector.extract_strided_slice %502 {offsets = [0, 10, 0], sizes = [2, 1, 32], strides = [1, 1, 1]} : vector<2x14x32xbf16> to vector<2x1x32xbf16>
    %554 = vector.shape_cast %553 : vector<2x1x32xbf16> to vector<2x32xbf16>
    %cst_207 = arith.constant dense<0.000000e+00> : vector<2x32xf32>
    %555 = tpu.matmul %554, %552, %cst_207 {dimension_numbers = #tpu.dot_dimension_numbers<[1], [0], [0], [1], [0, 0, 1, 1], [], []>} : vector<2x32xbf16>, vector<32x32xbf16>, vector<2x32xf32> -> vector<2x32xf32>
    %556 = arith.addf %551, %555 : vector<2x32xf32>
    %c2896 = arith.constant 2896 : index
    %c0_208 = arith.constant 0 : index
    %557 = vector.load %arg1[%c2896, %c0_208] : memref<3344x32xbf16, #tpu.memory_space<vmem>>, vector<32x32xbf16>
    %558 = vector.extract_strided_slice %502 {offsets = [0, 11, 0], sizes = [2, 1, 32], strides = [1, 1, 1]} : vector<2x14x32xbf16> to vector<2x1x32xbf16>
    %559 = vector.shape_cast %558 : vector<2x1x32xbf16> to vector<2x32xbf16>
    %cst_209 = arith.constant dense<0.000000e+00> : vector<2x32xf32>
    %560 = tpu.matmul %559, %557, %cst_209 {dimension_numbers = #tpu.dot_dimension_numbers<[1], [0], [0], [1], [0, 0, 1, 1], [], []>} : vector<2x32xbf16>, vector<32x32xbf16>, vector<2x32xf32> -> vector<2x32xf32>
    %561 = arith.addf %556, %560 : vector<2x32xf32>
    %c2928 = arith.constant 2928 : index
    %c0_210 = arith.constant 0 : index
    %562 = vector.load %arg1[%c2928, %c0_210] : memref<3344x32xbf16, #tpu.memory_space<vmem>>, vector<32x32xbf16>
    %563 = vector.extract_strided_slice %502 {offsets = [0, 12, 0], sizes = [2, 1, 32], strides = [1, 1, 1]} : vector<2x14x32xbf16> to vector<2x1x32xbf16>
    %564 = vector.shape_cast %563 : vector<2x1x32xbf16> to vector<2x32xbf16>
    %cst_211 = arith.constant dense<0.000000e+00> : vector<2x32xf32>
    %565 = tpu.matmul %564, %562, %cst_211 {dimension_numbers = #tpu.dot_dimension_numbers<[1], [0], [0], [1], [0, 0, 1, 1], [], []>} : vector<2x32xbf16>, vector<32x32xbf16>, vector<2x32xf32> -> vector<2x32xf32>
    %566 = arith.addf %561, %565 : vector<2x32xf32>
    %c2960 = arith.constant 2960 : index
    %c0_212 = arith.constant 0 : index
    %567 = vector.load %arg1[%c2960, %c0_212] : memref<3344x32xbf16, #tpu.memory_space<vmem>>, vector<32x32xbf16>
    %568 = vector.extract_strided_slice %502 {offsets = [0, 13, 0], sizes = [2, 1, 32], strides = [1, 1, 1]} : vector<2x14x32xbf16> to vector<2x1x32xbf16>
    %569 = vector.shape_cast %568 : vector<2x1x32xbf16> to vector<2x32xbf16>
    %cst_213 = arith.constant dense<0.000000e+00> : vector<2x32xf32>
    %570 = tpu.matmul %569, %567, %cst_213 {dimension_numbers = #tpu.dot_dimension_numbers<[1], [0], [0], [1], [0, 0, 1, 1], [], []>} : vector<2x32xbf16>, vector<32x32xbf16>, vector<2x32xf32> -> vector<2x32xf32>
    %571 = arith.addf %566, %570 : vector<2x32xf32>
    %572 = arith.addf %468, %571 : vector<2x32xf32>
    %c19 = arith.constant 19 : index
    %c0_214 = arith.constant 0 : index
    %573 = vector.load %arg2[%c19, %c0_214] : memref<32x32xf32, #tpu.memory_space<vmem>>, vector<1x32xf32>
    %574 = vector.broadcast %573 : vector<1x32xf32> to vector<2x32xf32>
    %575 = arith.addf %572, %574 : vector<2x32xf32>
    %c20 = arith.constant 20 : index
    %c0_215 = arith.constant 0 : index
    %576 = vector.load %arg2[%c20, %c0_215] : memref<32x32xf32, #tpu.memory_space<vmem>>, vector<1x32xf32>
    %c21 = arith.constant 21 : index
    %c0_216 = arith.constant 0 : index
    %577 = vector.load %arg2[%c21, %c0_216] : memref<32x32xf32, #tpu.memory_space<vmem>>, vector<1x32xf32>
    %578 = vector.shape_cast %576 : vector<1x32xf32> to vector<1x1x32xf32>
    %579 = vector.broadcast %578 : vector<1x1x32xf32> to vector<2x14x32xf32>
    %580 = arith.mulf %501, %579 : vector<2x14x32xf32>
    %581 = vector.shape_cast %577 : vector<1x32xf32> to vector<1x1x32xf32>
    %582 = vector.broadcast %581 : vector<1x1x32xf32> to vector<2x14x32xf32>
    %583 = arith.addf %580, %582 : vector<2x14x32xf32>
    %cst_217 = arith.constant 0.000000e+00 : f32
    %584 = vector.broadcast %cst_217 : f32 to vector<2x14x32xf32>
    %585 = arith.maximumf %583, %584 : vector<2x14x32xf32>
    %586 = vector.extract_strided_slice %365 {offsets = [0, 6, 0], sizes = [2, 14, 32], strides = [1, 1, 1]} : vector<2x20x32xf32> to vector<2x14x32xf32>
    %587 = arith.addf %585, %586 : vector<2x14x32xf32>
    %588 = arith.truncf %587 : vector<2x14x32xf32> to vector<2x14x32xbf16>
    %c2992 = arith.constant 2992 : index
    %c0_218 = arith.constant 0 : index
    %589 = vector.load %arg1[%c2992, %c0_218] : memref<3344x32xbf16, #tpu.memory_space<vmem>>, vector<32x32xbf16>
    %590 = vector.extract_strided_slice %588 {offsets = [0, 0, 0], sizes = [2, 2, 32], strides = [1, 1, 1]} : vector<2x14x32xbf16> to vector<2x2x32xbf16>
    %cst_219 = arith.constant dense<0.000000e+00> : vector<2x2x32xf32>
    %591 = tpu.matmul %590, %589, %cst_219 {dimension_numbers = #tpu.dot_dimension_numbers<[2], [0], [0, 1], [1], [0, 0, 0, 1, 1, 1], [], []>} : vector<2x2x32xbf16>, vector<32x32xbf16>, vector<2x2x32xf32> -> vector<2x2x32xf32>
    %c3024 = arith.constant 3024 : index
    %c0_220 = arith.constant 0 : index
    %592 = vector.load %arg1[%c3024, %c0_220] : memref<3344x32xbf16, #tpu.memory_space<vmem>>, vector<32x32xbf16>
    %593 = vector.extract_strided_slice %588 {offsets = [0, 2, 0], sizes = [2, 2, 32], strides = [1, 1, 1]} : vector<2x14x32xbf16> to vector<2x2x32xbf16>
    %cst_221 = arith.constant dense<0.000000e+00> : vector<2x2x32xf32>
    %594 = tpu.matmul %593, %592, %cst_221 {dimension_numbers = #tpu.dot_dimension_numbers<[2], [0], [0, 1], [1], [0, 0, 0, 1, 1, 1], [], []>} : vector<2x2x32xbf16>, vector<32x32xbf16>, vector<2x2x32xf32> -> vector<2x2x32xf32>
    %595 = arith.addf %591, %594 : vector<2x2x32xf32>
    %c3056 = arith.constant 3056 : index
    %c0_222 = arith.constant 0 : index
    %596 = vector.load %arg1[%c3056, %c0_222] : memref<3344x32xbf16, #tpu.memory_space<vmem>>, vector<32x32xbf16>
    %597 = vector.extract_strided_slice %588 {offsets = [0, 4, 0], sizes = [2, 2, 32], strides = [1, 1, 1]} : vector<2x14x32xbf16> to vector<2x2x32xbf16>
    %cst_223 = arith.constant dense<0.000000e+00> : vector<2x2x32xf32>
    %598 = tpu.matmul %597, %596, %cst_223 {dimension_numbers = #tpu.dot_dimension_numbers<[2], [0], [0, 1], [1], [0, 0, 0, 1, 1, 1], [], []>} : vector<2x2x32xbf16>, vector<32x32xbf16>, vector<2x2x32xf32> -> vector<2x2x32xf32>
    %599 = arith.addf %595, %598 : vector<2x2x32xf32>
    %c3088 = arith.constant 3088 : index
    %c0_224 = arith.constant 0 : index
    %600 = vector.load %arg1[%c3088, %c0_224] : memref<3344x32xbf16, #tpu.memory_space<vmem>>, vector<32x32xbf16>
    %601 = vector.extract_strided_slice %588 {offsets = [0, 6, 0], sizes = [2, 2, 32], strides = [1, 1, 1]} : vector<2x14x32xbf16> to vector<2x2x32xbf16>
    %cst_225 = arith.constant dense<0.000000e+00> : vector<2x2x32xf32>
    %602 = tpu.matmul %601, %600, %cst_225 {dimension_numbers = #tpu.dot_dimension_numbers<[2], [0], [0, 1], [1], [0, 0, 0, 1, 1, 1], [], []>} : vector<2x2x32xbf16>, vector<32x32xbf16>, vector<2x2x32xf32> -> vector<2x2x32xf32>
    %603 = arith.addf %599, %602 : vector<2x2x32xf32>
    %c3120 = arith.constant 3120 : index
    %c0_226 = arith.constant 0 : index
    %604 = vector.load %arg1[%c3120, %c0_226] : memref<3344x32xbf16, #tpu.memory_space<vmem>>, vector<32x32xbf16>
    %605 = vector.extract_strided_slice %588 {offsets = [0, 8, 0], sizes = [2, 2, 32], strides = [1, 1, 1]} : vector<2x14x32xbf16> to vector<2x2x32xbf16>
    %cst_227 = arith.constant dense<0.000000e+00> : vector<2x2x32xf32>
    %606 = tpu.matmul %605, %604, %cst_227 {dimension_numbers = #tpu.dot_dimension_numbers<[2], [0], [0, 1], [1], [0, 0, 0, 1, 1, 1], [], []>} : vector<2x2x32xbf16>, vector<32x32xbf16>, vector<2x2x32xf32> -> vector<2x2x32xf32>
    %607 = arith.addf %603, %606 : vector<2x2x32xf32>
    %c3152 = arith.constant 3152 : index
    %c0_228 = arith.constant 0 : index
    %608 = vector.load %arg1[%c3152, %c0_228] : memref<3344x32xbf16, #tpu.memory_space<vmem>>, vector<32x32xbf16>
    %609 = vector.extract_strided_slice %588 {offsets = [0, 10, 0], sizes = [2, 2, 32], strides = [1, 1, 1]} : vector<2x14x32xbf16> to vector<2x2x32xbf16>
    %cst_229 = arith.constant dense<0.000000e+00> : vector<2x2x32xf32>
    %610 = tpu.matmul %609, %608, %cst_229 {dimension_numbers = #tpu.dot_dimension_numbers<[2], [0], [0, 1], [1], [0, 0, 0, 1, 1, 1], [], []>} : vector<2x2x32xbf16>, vector<32x32xbf16>, vector<2x2x32xf32> -> vector<2x2x32xf32>
    %611 = arith.addf %607, %610 : vector<2x2x32xf32>
    %c3184 = arith.constant 3184 : index
    %c0_230 = arith.constant 0 : index
    %612 = vector.load %arg1[%c3184, %c0_230] : memref<3344x32xbf16, #tpu.memory_space<vmem>>, vector<32x32xbf16>
    %613 = vector.extract_strided_slice %588 {offsets = [0, 12, 0], sizes = [2, 2, 32], strides = [1, 1, 1]} : vector<2x14x32xbf16> to vector<2x2x32xbf16>
    %cst_231 = arith.constant dense<0.000000e+00> : vector<2x2x32xf32>
    %614 = tpu.matmul %613, %612, %cst_231 {dimension_numbers = #tpu.dot_dimension_numbers<[2], [0], [0, 1], [1], [0, 0, 0, 1, 1, 1], [], []>} : vector<2x2x32xbf16>, vector<32x32xbf16>, vector<2x2x32xf32> -> vector<2x2x32xf32>
    %615 = arith.addf %611, %614 : vector<2x2x32xf32>
    %c22 = arith.constant 22 : index
    %c0_232 = arith.constant 0 : index
    %616 = vector.load %arg2[%c22, %c0_232] : memref<32x32xf32, #tpu.memory_space<vmem>>, vector<1x32xf32>
    %617 = vector.shape_cast %616 : vector<1x32xf32> to vector<1x1x32xf32>
    %618 = vector.broadcast %617 : vector<1x1x32xf32> to vector<2x2x32xf32>
    %619 = arith.addf %615, %618 : vector<2x2x32xf32>
    %620 = math.tanh %619 : vector<2x2x32xf32>
    %621 = arith.truncf %620 : vector<2x2x32xf32> to vector<2x2x32xbf16>
    %c3216 = arith.constant 3216 : index
    %c0_233 = arith.constant 0 : index
    %622 = vector.load %arg1[%c3216, %c0_233] : memref<3344x32xbf16, #tpu.memory_space<vmem>>, vector<32x32xbf16>
    %623 = vector.extract_strided_slice %621 {offsets = [0, 0, 0], sizes = [2, 1, 32], strides = [1, 1, 1]} : vector<2x2x32xbf16> to vector<2x1x32xbf16>
    %624 = vector.shape_cast %623 : vector<2x1x32xbf16> to vector<2x32xbf16>
    %cst_234 = arith.constant dense<0.000000e+00> : vector<2x32xf32>
    %625 = tpu.matmul %624, %622, %cst_234 {dimension_numbers = #tpu.dot_dimension_numbers<[1], [0], [0], [1], [0, 0, 1, 1], [], []>} : vector<2x32xbf16>, vector<32x32xbf16>, vector<2x32xf32> -> vector<2x32xf32>
    %c3248 = arith.constant 3248 : index
    %c0_235 = arith.constant 0 : index
    %626 = vector.load %arg1[%c3248, %c0_235] : memref<3344x32xbf16, #tpu.memory_space<vmem>>, vector<32x32xbf16>
    %627 = vector.extract_strided_slice %621 {offsets = [0, 1, 0], sizes = [2, 1, 32], strides = [1, 1, 1]} : vector<2x2x32xbf16> to vector<2x1x32xbf16>
    %628 = vector.shape_cast %627 : vector<2x1x32xbf16> to vector<2x32xbf16>
    %cst_236 = arith.constant dense<0.000000e+00> : vector<2x32xf32>
    %629 = tpu.matmul %628, %626, %cst_236 {dimension_numbers = #tpu.dot_dimension_numbers<[1], [0], [0], [1], [0, 0, 1, 1], [], []>} : vector<2x32xbf16>, vector<32x32xbf16>, vector<2x32xf32> -> vector<2x32xf32>
    %630 = arith.addf %625, %629 : vector<2x32xf32>
    %631 = arith.addf %575, %630 : vector<2x32xf32>
    %c23 = arith.constant 23 : index
    %c0_237 = arith.constant 0 : index
    %632 = vector.load %arg2[%c23, %c0_237] : memref<32x32xf32, #tpu.memory_space<vmem>>, vector<1x32xf32>
    %633 = vector.broadcast %632 : vector<1x32xf32> to vector<2x32xf32>
    %634 = arith.addf %631, %633 : vector<2x32xf32>
    %c24 = arith.constant 24 : index
    %c0_238 = arith.constant 0 : index
    %635 = vector.load %arg2[%c24, %c0_238] : memref<32x32xf32, #tpu.memory_space<vmem>>, vector<1x32xf32>
    %c25 = arith.constant 25 : index
    %c0_239 = arith.constant 0 : index
    %636 = vector.load %arg2[%c25, %c0_239] : memref<32x32xf32, #tpu.memory_space<vmem>>, vector<1x32xf32>
    %637 = vector.shape_cast %635 : vector<1x32xf32> to vector<1x1x32xf32>
    %638 = vector.broadcast %637 : vector<1x1x32xf32> to vector<2x2x32xf32>
    %639 = arith.mulf %620, %638 : vector<2x2x32xf32>
    %640 = vector.shape_cast %636 : vector<1x32xf32> to vector<1x1x32xf32>
    %641 = vector.broadcast %640 : vector<1x1x32xf32> to vector<2x2x32xf32>
    %642 = arith.addf %639, %641 : vector<2x2x32xf32>
    %cst_240 = arith.constant 0.000000e+00 : f32
    %643 = vector.broadcast %cst_240 : f32 to vector<2x2x32xf32>
    %644 = arith.maximumf %642, %643 : vector<2x2x32xf32>
    %645 = vector.extract_strided_slice %587 {offsets = [0, 12, 0], sizes = [2, 2, 32], strides = [1, 1, 1]} : vector<2x14x32xf32> to vector<2x2x32xf32>
    %646 = arith.addf %644, %645 : vector<2x2x32xf32>
    %647 = arith.truncf %646 : vector<2x2x32xf32> to vector<2x2x32xbf16>
    %c3280 = arith.constant 3280 : index
    %c0_241 = arith.constant 0 : index
    %648 = vector.load %arg1[%c3280, %c0_241] : memref<3344x32xbf16, #tpu.memory_space<vmem>>, vector<32x32xbf16>
    %649 = vector.extract_strided_slice %647 {offsets = [0, 0, 0], sizes = [2, 1, 32], strides = [1, 1, 1]} : vector<2x2x32xbf16> to vector<2x1x32xbf16>
    %650 = vector.shape_cast %649 : vector<2x1x32xbf16> to vector<2x32xbf16>
    %cst_242 = arith.constant dense<0.000000e+00> : vector<2x32xf32>
    %651 = tpu.matmul %650, %648, %cst_242 {dimension_numbers = #tpu.dot_dimension_numbers<[1], [0], [0], [1], [0, 0, 1, 1], [], []>} : vector<2x32xbf16>, vector<32x32xbf16>, vector<2x32xf32> -> vector<2x32xf32>
    %c3312 = arith.constant 3312 : index
    %c0_243 = arith.constant 0 : index
    %652 = vector.load %arg1[%c3312, %c0_243] : memref<3344x32xbf16, #tpu.memory_space<vmem>>, vector<32x32xbf16>
    %653 = vector.extract_strided_slice %647 {offsets = [0, 1, 0], sizes = [2, 1, 32], strides = [1, 1, 1]} : vector<2x2x32xbf16> to vector<2x1x32xbf16>
    %654 = vector.shape_cast %653 : vector<2x1x32xbf16> to vector<2x32xbf16>
    %cst_244 = arith.constant dense<0.000000e+00> : vector<2x32xf32>
    %655 = tpu.matmul %654, %652, %cst_244 {dimension_numbers = #tpu.dot_dimension_numbers<[1], [0], [0], [1], [0, 0, 1, 1], [], []>} : vector<2x32xbf16>, vector<32x32xbf16>, vector<2x32xf32> -> vector<2x32xf32>
    %656 = arith.addf %651, %655 : vector<2x32xf32>
    %657 = arith.addf %634, %656 : vector<2x32xf32>
    %c26 = arith.constant 26 : index
    %c0_245 = arith.constant 0 : index
    %658 = vector.load %arg2[%c26, %c0_245] : memref<32x32xf32, #tpu.memory_space<vmem>>, vector<1x32xf32>
    %659 = vector.broadcast %658 : vector<1x32xf32> to vector<2x32xf32>
    %660 = arith.addf %657, %659 : vector<2x32xf32>
    %c1_246 = arith.constant 1 : index
    %c0_247 = arith.constant 0 : index
    %c0_248 = arith.constant 0 : index
    %661 = vector.load %arg3[%c1_246, %c0_247, %c0_248] : memref<2x2x32xf32, #tpu.memory_space<vmem>>, vector<1x2x32xf32>
    %662 = vector.shape_cast %661 : vector<1x2x32xf32> to vector<2x32xf32>
    %663 = vector.shape_cast %660 : vector<2x32xf32> to vector<1x2x32xf32>
    tpu.vector_store %arg3[%c1_246, %c0_247, %c0_248], %663 {strides = array<i32>} : memref<2x2x32xf32, #tpu.memory_space<vmem>>, vector<1x2x32xf32>,
    return
  }
}

</mosaic_0001>

<bundles_post_ra>
// kernel: tpu_custom_call.1
= control target key start
LH: loop header
LB: loop body
LE: loop exit
PB: predicated region body
PF: predicated region fallthrough
CT: control target
= control target key end

     0   :  { %v16909_v1 = vmov 1   ;;  %v16905_v2 = vmov 0   ;;  %v16907_v6 = vmov 2   ;;  %v16903_v7 = vmov 3   ;;  %s16895_s0 = inlined_call_operand.vmem [shape: f32[2,28,4], index: 0, kind: input, shape index: {}]   ;;  %s16896_s1 = inlined_call_operand.vmem [shape: bf16[3344,32], index: 1, kind: input, shape index: {}]   ;;  %s16897_s2 = inlined_call_operand.vmem [shape: f32[32,32], index: 2, kind: input, shape index: {}]   ;;  %s16898_s3 = inlined_call_operand.hbm [shape: f32[2,2,32], index: 3, kind: output, shape index: {}]  }
   0x1   :  { %v16_v0 = vld [vmem:[%s16895_s0] sm:$0xff]  ;;  %12915 = vset.pattern.permute.xlu1 %v16909_v1  ;;  %12914 = vset.pattern.permute.xlu0 %v16905_v2  ;;  %v13284_v3 = vld [vmem:[%s16895_s0 + $0x8] sm:$0xff]  ;;  %v21_v8 = vld [vmem:[%s16895_s0 + $0x30] sm:$0xf]  ;;  %v16911_v11 = vmov 0.0   ;;  %vm13250_vm0 = vmmov 0   ;;  %v59_v17 = vlaneseq }
   0x2   :  { %70 = vperm.xlu1 %12915, %v16_v0   ;;  %31 = vperm.xlu0 %12914, %v16_v0   ;;  %v19_v4 = vld [vmem:[%s16895_s0 + $0x20] sm:$0xff]  ;;  %v20_v5 = vld [vmem:[%s16895_s0 + $0x28] sm:$0xff]  ;;  %v18_v9 = vld [vmem:[%s16895_s0 + $0x10] sm:$0xf] }
   0x3   :  { %v12947_v10 = vld [vmem:[%s16896_s1 + $0x14] sm:$0xff]   ;;  %12055 = vmatprep.subr.bf16.mxu0 %v16911_v11  ;;  %12063 = vmatprep.subr.bf16.mxu1 %v16911_v11  ;;  %v12948_v12 = vld [vmem:[%s16896_s1 + $0x4] sm:$0xff]   ;;  %v12949_v13 = vld [vmem:[%s16896_s1 + $0x1c] sm:$0xff]   ;;  %v13343_v20 = vshrl.u32 %v59_v17, 7 }
   0x4   :  { %12056 = vmatpush3.bf16.msra.mxu0 %v12947_v10  ;;  %12064 = vmatpush3.bf16.msra.mxu1 %v12948_v12  ;;  %v12950_v14 = vld [vmem:[%s16896_s1 + $0xc] sm:$0xff]   ;;  %v26_v23 = vld [vmem:[%s16896_s1] sm:$0x3] }
   0x5   :  { %12057 = vmatprep.subr.bf16.mxu0 %v16911_v11  ;;  %12065 = vmatprep.subr.bf16.mxu1 %v16911_v11  ;;  %16927 = vst [vmem:[#allocation5_spill] sm:$0xff] %v13343_v20  ;;  %v27_v26 = vunpack.c.l.bf16 %v26_v23  ;;  %v16901_v27 = vsub.s32 1, %v13343_v20  ;;  %v16902_v28 = vsub.s32 0, %v13343_v20  ;;  %v16900_v29 = vsub.s32 2, %v13343_v20  ;;  %v13377_v56 = vld [vmem:[%s16897_s2] ss:$0 sm:$0xff] }
   0x6   :  { %74 = vperm.xlu1 %12915, %v13284_v3   ;;  %36 = vperm.xlu0 %12914, %v13284_v3   ;;  %v16899_v30 = vsub.s32 3, %v13343_v20 }
   0x7   :  { %12059 = vmatprep.mubr.msk.bf16.mxu0 %vm13250_vm0, %v16911_v11  ;;  %12067 = vmatprep.mubr.msk.bf16.mxu1 %vm13250_vm0, %v16911_v11  ;;  %v13354_v33 = vrot.slane %v27_v26, %v16901_v27  ;;  %v62_v34 = vrot.slane %v27_v26, %v16902_v28  ;;  %v13360_v35 = vrot.slane %v27_v26, %v16900_v29 }
   0x8   :  { %12058 = vmatpush3.bf16.msra.mxu0 %v12949_v13  ;;  %12066 = vmatpush3.bf16.msra.mxu1 %v12950_v14  ;;  %v13365_v39 = vrot.slane %v27_v26, %v16899_v30 }
   0x9   :  { %12071 = vmatprep.subr.bf16.mxu0 %v16911_v11  ;;  %12079 = vmatprep.subr.bf16.mxu1 %v16911_v11 }
   0xa   :  { %12916 = vset.pattern.permute.xlu1 %v16905_v2  ;;  %46 = vperm.xlu0 %12914, %v19_v4  }
   0xb   :  { %51 = vperm.xlu1 %12916, %v20_v5  }
   0xe   :  { %12917 = vset.pattern.permute.xlu0 %v16909_v1 }
   0xf   :  { %12918 = vset.pattern.permute.xlu1 %v16909_v1  ;;  %82 = vperm.xlu0 %12917, %v19_v4  }
  0x10   :  { %86 = vperm.xlu1 %12918, %v20_v5  }
  0x13   :  { %12920 = vset.pattern.permute.xlu0 %v16907_v6 }
  0x14   :  { %12919 = vset.pattern.permute.xlu1 %v16907_v6  ;;  %114 = vperm.xlu0 %12920, %v13284_v3  }
  0x15   :  { %110 = vperm.xlu1 %12919, %v16_v0  }
  0x18   :  { %12921 = vset.pattern.permute.xlu0 %v16903_v7 }
  0x19   :  { %122 = vperm.xlu1 %12919, %v19_v4   ;;  %150 = vperm.xlu0 %12921, %v16_v0  }
  0x1d   :  { %126 = vperm.xlu1 %12919, %v20_v5   ;;  %166 = vperm.xlu0 %12921, %v20_v5  }
  0x21   :  { %12922 = vset.pattern.permute.xlu1 %v16903_v7  ;;  %12924 = vset.pattern.permute.xlu0 %v16909_v1 }
  0x22   :  { %154 = vperm.xlu1 %12922, %v13284_v3   ;;  %90 = vperm.xlu0 %12924, %v21_v8  }
  0x26   :  { %162 = vperm.xlu1 %12922, %v19_v4   ;;  %12926 = vset.pattern.permute.xlu0 %v16907_v6 }
  0x27   :  { %130 = vperm.xlu0 %12926, %v21_v8  }
  0x2a   :  { %12923 = vset.pattern.permute.xlu1 %v16905_v2 }
  0x2b   :  { %56 = vperm.xlu1 %12923, %v21_v8   ;;  %12929 = vset.pattern.permute.xlu0 %v16903_v7 }
  0x2c   :  { %158 = vperm.xlu0 %12929, %v18_v9  }
  0x2f   :  { %41 = vperm.xlu1 %12923, %v18_v9  }
  0x30   :  { %12931 = vset.pattern.permute.xlu0 %v16909_v1 }
  0x31   :  { %5717 = vperm.xlu0 %12931, %v13284_v3  }
  0x33   :  { %12925 = vset.pattern.permute.xlu1 %v16909_v1 }
  0x34   :  { %78 = vperm.xlu1 %12925, %v18_v9  }
  0x35   :  { %12934 = vset.pattern.permute.xlu0 %v16905_v2 }
  0x38   :  { %12927 = vset.pattern.permute.xlu1 %v16907_v6 }
  0x39   :  { %118 = vperm.xlu1 %12927, %v18_v9  }
  0x3d   :  { %12928 = vset.pattern.permute.xlu1 %v16903_v7 }
  0x3e   :  { %170 = vperm.xlu1 %12928, %v21_v8  }
  0x42   :  { %12930 = vset.pattern.permute.xlu1 %v16905_v2 }
  0x43   :  { %5679 = vperm.xlu1 %12930, %v13284_v3  }
  0x81   :  { %v71_v15 = vpop.permute.xlu1 %70  ;;  %v32_v16 = vpop.permute.xlu0 %31 }
  0x82   :  { %v97_v37 = vmul.f32 %v13354_v33, %v71_v15  ;;  %v63_v38 = vmul.f32 %v62_v34, %v32_v16 }
  0x84   :  { %v103_v46 = vadd.f32 %v97_v37, %v63_v38 }
  0x85   :  { %v75_v18 = vpop.permute.xlu1 %74  ;;  %v37_v19 = vpop.permute.xlu0 %36 }
  0x86   :  { %v98_v41 = vmul.f32 %v13354_v33, %v75_v18  ;;  %v64_v42 = vmul.f32 %v62_v34, %v37_v19 }
  0x88   :  { %v104_v51 = vadd.f32 %v98_v41, %v64_v42 }
  0x89   :  { %v47_v21 = vpop.permute.xlu0 %46 }
  0x8a   :  { %v52_v22 = vpop.permute.xlu1 %51  ;;  %v66_v61 = vmul.f32 %v62_v34, %v47_v21 }
  0x8b   :  { %v67_v49 = vmul.f32 %v62_v34, %v52_v22 }
  0x8e   :  { %v83_v24 = vpop.permute.xlu0 %82 }
  0x8f   :  { %v87_v25 = vpop.permute.xlu1 %86  ;;  %v100_v54 = vmul.f32 %v13354_v33, %v83_v24 }
  0x90   :  { %v101_v45 = vmul.f32 %v13354_v33, %v87_v25 }
  0x91   :  { %v106_v4 = vadd.f32 %v100_v54, %v66_v61 }
  0x92   :  { %v107_v55 = vadd.f32 %v101_v45, %v67_v49 }
  0x93   :  { %v115_v32 = vpop.permute.xlu0 %114 }
  0x94   :  { %v111_v31 = vpop.permute.xlu1 %110  ;;  %v138_v47 = vmul.f32 %v13360_v35, %v115_v32 }
  0x95   :  { %v137_v43 = vmul.f32 %v13360_v35, %v111_v31 }
  0x96   :  { %v144_v58 = vadd.f32 %v138_v47, %v104_v51 }
  0x97   :  { %v143_v52 = vadd.f32 %v137_v43, %v103_v46 }
  0x98   :  { %v123_v36 = vpop.permute.xlu1 %122  ;;  %v151_v40 = vpop.permute.xlu0 %150 }
  0x99   :  { %v177_v48 = vmul.f32 %v13365_v39, %v151_v40  ;;  %v140_v62 = vmul.f32 %v13360_v35, %v123_v36 }
  0x9b   :  { %v183_v59 = vadd.f32 %v177_v48, %v143_v52 }
  0x9c   :  { %v127_v44 = vpop.permute.xlu1 %126  ;;  %v167_v53 = vpop.permute.xlu0 %166 }
  0x9d   :  { %v141_v50 = vmul.f32 %v13360_v35, %v127_v44  ;;  %v181_v0 = vmul.f32 %v13365_v39, %v167_v53 }
  0x9f   :  { %v147_v63 = vadd.f32 %v141_v50, %v107_v55 }
  0xa1   :  { %v155_v57 = vpop.permute.xlu1 %154 }
  0xa2   :  { %v178_v60 = vmul.f32 %v13365_v39, %v155_v57 }
  0xa4   :  { %v184_v3 = vadd.f32 %v178_v60, %v144_v58 }
  0xa5   :  { %v163_v5 = vpop.permute.xlu1 %162 }
  0xa6   :  { %8 = vsyncpa [#allocation3], 0  ;;  %v13383_v8 = vadd.f32 %v13377_v56, %v183_v59  ;;  %v13386_v9 = vadd.f32 %v13377_v56, %v184_v3  ;;  %v180_v10 = vmul.f32 %v13365_v39, %v163_v5  ;;  %v146_v12 = vadd.f32 %v140_v62, %v106_v4  ;;  %v91_v14 = vpop.permute.xlu0 %90  ;;  %v12951_v42 = vld [vmem:[%s16896_s1 + $0x24] sm:$0xff]   ;;  %v12952_v52 = vld [vmem:[%s16896_s1 + $0x34] sm:$0xff]   ;;  %s13253_s27 = smov [#allocation2]  }
  0xa7   :  { %v187_v13 = vadd.f32 %v181_v0, %v147_v63  ;;  %v102_v22 = vmul.f32 %v13354_v33, %v91_v14  ;;  %vm216_vm1 = vcmask 1041409   ;;  %v13251_v37 = vmov 1966171168   ;;  %v12953_v53 = vld [vmem:[%s16896_s1 + $0x2c] sm:$0xff]   ;;  %v12954_v62 = vld [vmem:[%s16896_s1 + $0x3c] sm:$0xff]   ;;  %v12955_v4 = vld [vmem:[%s16896_s1 + $0x44] sm:$0xff]  }
  0xa8   :  { %16928 = vst [vmem:[#allocation6_spill] sm:$0xff] %v13386_v9  ;;  %v13391_v15 = vpack.c.bf16 %v13386_v9, %v13383_v8  ;;  %v186_v16 = vadd.f32 %v180_v10, %v146_v12  ;;  %v1503_v38 = vunpack.c.l.s4 %v13251_v37  ;;  %vm231_vm2 = vcmask 261120   ;;  %v12970_v7 = vld [vmem:[%s16896_s1 + $0xbc] sm:$0xff]   ;;  %s11310_s28 = sshll.u32 %s13253_s27, 4  ;;  %s11311_s28 = int_to_ptr.vmem [resolvable:$true] %s11310_s28 }
  0xa9   :  { %v13394_v18 = vadd.f32 %v13377_v56, %v187_v13  ;;  %v11383_v12 = vpack.c.bf16 %v13386_v9, %v13386_v9  ;;  %vm1599_vm3 = vsmask.f32 256  ;;  %vm1600_vm4 = vsmask.f32 1284  ;;  %s13221_s29 = scalar_lea.vmem %s11311_s28, 64  ;;  %p13226_p1 = scmp.lt.s32.totalorder %s11311_s28, %s11311_s28 }
  0xaa   :  { %v57_v17 = vpop.permute.xlu1 %56  ;;  %v13397_v19 = vunpack.c.l.b16 %v13391_v15  ;;  %v13400_v21 = vadd.f32 %v13377_v56, %v186_v16  ;;  %v131_v25 = vpop.permute.xlu0 %130  ;;  %v1504_v49 = vunpack.c.0.s8 %v1503_v38  ;;  %v12956_v16 = vld [vmem:[%s16896_s1 + $0x54] sm:$0xff]   ;;  %vm1602_vm5 = vsmask.f32 2312  ;;  %vm13529_vm8 = vmor %vm1599_vm3, %vm1600_vm4  ;;  %p13222_p0 = scmp.ne.s32.totalorder %s11311_s28, %s13221_s29  ;;  %p13227_p2 = scmp.lt.s32.totalorder %s13221_s29, %s13221_s29 }
  0xab   :  { %v68_v24 = vmul.f32 %v62_v34, %v57_v17  ;;  %v142_v31 = vmul.f32 %v13360_v35, %v131_v25  ;;  %v11384_v60 = vpack.c.bf16 %v13394_v18, %v13394_v18  ;;  %vm1604_vm6 = vsmask.f32 3340  ;;  %vm13569_vm10 = vmor %vm13529_vm8, %vm1602_vm5 }
  0xac   :  { %16929 = vst [vmem:[#allocation7_spill] sm:$0xff] %v13400_v21  ;;  %v13405_v23 = vpack.c.bf16 %v13394_v18, %v13400_v21  ;;  %v215_v36 = vrot.slane %v13397_v19, 1  ;;  %v337_v54 = vrot.slane %v13397_v19, 2  ;;  %v13437_v59 = vsub.s32 %v1504_v49, %v13343_v20  ;;  %vm13603_vm12 = vmor %vm13569_vm10, %vm1604_vm6  ;;  %p13228_p3 = por %p13227_p2, %p13226_p1 }
  0xad   :  { %v108_v40 = vadd.f32 %v102_v22, %v68_v24  ;;  %v401_v63 = vrot.slane %v13397_v19, 3  ;;  %vm1606_vm7 = vsmask.f32 4368  ;;  %vm1608_vm9 = vsmask.f32 5396 }
  0xae   :  { %v42_v26 = vpop.permute.xlu1 %41  ;;  %v13409_v32 = vunpack.c.l.b16 %v13405_v23  ;;  %v1508_v17 = vrot.slane %v13391_v15, %v13437_v59  ;;  %v1515_v38 = vrot.slane %v11383_v12, %v13437_v59  ;;  %vm1610_vm11 = vsmask.f32 6424  ;;  %vm13645_vm13 = vmor %vm13603_vm12, %vm1606_vm7  ;;  %p13229_p4 = pnand %p13228_p3, %p13222_p0 }
  0xaf   :  { %v65_v43 = vmul.f32 %v62_v34, %v42_v26  ;;  %v148_v46 = vadd.f32 %v142_v31, %v108_v40  ;;  %v12957_v26 = vld [vmem:[%s16896_s1 + $0x4c] sm:$0xff]   ;;  %v465_v31 = vrot.slane %v13397_v19, 4  ;;  %v1557_v40 = vrot.slane %v13405_v23, %v13437_v59  ;;  %vm1609_vm15 = vmor %vm13645_vm13, %vm1608_vm9 }
  0xb0   :  { %v217_v41 = vsel %vm216_vm1, %v13409_v32, %v215_v36  ;;  %v275_v45 = vrot.slane %v13409_v32, 7  ;;  %v338_v48 = vrot.slane %v13409_v32, 1  ;;  %v402_v57 = vrot.slane %v13409_v32, 2  ;;  %vm13706_vm3 = vmor %vm1609_vm15, %vm1610_vm11 }
  0xb1   :  { %v218_v44 = vpack.c.b16 %v217_v41, %v217_v41  ;;  %v466_v14 = vrot.slane %v13409_v32, 3  ;;  %v530_v37 = vrot.slane %v13409_v32, 4  ;;  %v658_v12 = vrot.slane %v13409_v32, 6 }
  0xb2   :  { %v276_v51 = vsel %vm216_vm1, %v275_v45, %v13397_v19  ;;  %v339_v58 = vsel %vm216_vm1, %v338_v48, %v337_v54  ;;  %v403_v10 = vsel %vm216_vm1, %v402_v57, %v401_v63  ;;  %v529_v45 = vrot.slane %v13397_v19, 5 }
  0xb3   :  { %v79_v47 = vpop.permute.xlu1 %78  ;;  %12060 = vmatmul.mubr.msk.bf16.vlgmr.msra.gmra.mrb[0].mxu0 %vm231_vm2, %v218_v44  ;;  %v277_v34 = vpack.c.b16 %v276_v51, %v276_v51  ;;  %v340_v5 = vpack.c.b16 %v339_v58, %v339_v58  ;;  %v404_v25 = vpack.c.b16 %v403_v10, %v403_v10  ;;  %v12958_v44 = vld [vmem:[%s16896_s1 + $0x5c] sm:$0xff]   ;;  %v1516_v48 = vcombine.high %v1508_v17, %v1508_v17 }
  0xb4   :  { %v99_v50 = vmul.f32 %v13354_v33, %v79_v47  ;;  %12072 = vmatpush3.bf16.msra.mxu0 %v12951_v42  ;;  %12075 = vmatprep.mubr.msk.bf16.mxu0 %vm13250_vm0, %v16911_v11  ;;  %v159_v33 = vpop.permute.xlu0 %158  ;;  %v13507_v54 = vunpack.c.h.b16 %v13405_v23  ;;  %v12960_v23 = vld [vmem:[%s16896_s1 + $0x74] sm:$0xff]   ;;  %v13537_v63 = vrot.slane %v1515_v38, %v13437_v59  ;;  %vm1612_vm14 = vsmask.f32 7452 }
  0xb5   :  { %12073 = vmatprep.subr.bf16.mxu0 %v16911_v11  ;;  %12068 = vmatmul.mubr.msk.bf16.vlgmr.msra.gmra.mrb[0].mxu1 %vm231_vm2, %v277_v34  ;;  %v179_v3 = vmul.f32 %v13365_v39, %v159_v33  ;;  %v594_v34 = vrot.slane %v13409_v32, 5  ;;  %vm13744_vm4 = vmor %vm13706_vm3, %vm1612_vm14  ;;  %vm5673_vm5 = vcmask 254976  }
  0xb6   :  { %v105_v55 = vadd.f32 %v99_v50, %v65_v43  ;;  %12080 = vmatpush3.bf16.msra.mxu1 %v12952_v52  ;;  %12083 = vmatprep.mubr.msk.bf16.mxu1 %vm13250_vm0, %v16911_v11  ;;  %v531_v52 = vsel %vm216_vm1, %v530_v37, %v529_v45  ;;  %v1647_v28 = vshrl.u32 %v13537_v63, 16 }
  0xb7   :  { %12081 = vmatprep.subr.bf16.mxu1 %v16911_v11 }
  0xb8   :  { %v119_v61 = vpop.permute.xlu1 %118  ;;  %12074 = vmatpush3.bf16.msra.mxu0 %v12953_v53  ;;  %v1517_v53 = vcombine.high %v1515_v38, %v1515_v38  ;;  %v850_v38 = vrot.slane %v13507_v54, 1 }
  0xb9   :  { %v139_v0 = vmul.f32 %v13360_v35, %v119_v61  ;;  %12087 = vmatprep.subr.bf16.mxu0 %v16911_v11  ;;  %v1564_v35 = vrot.slane %v11384_v60, %v13437_v59  ;;  %v593_v60 = vrot.slane %v13397_v19, 6  ;;  %v12965_v61 = vld [vmem:[%s16896_s1 + $0x8c] sm:$0xff]  }
  0xba   :  { %12082 = vmatpush3.bf16.msra.mxu1 %v12954_v62  ;;  %v13534_v62 = vunpack.c.h.b16 %v13391_v15 }
  0xbb   :  { %v145_v13 = vadd.f32 %v139_v0, %v105_v55  ;;  %12076 = vmatmul.mubr.msk.bf16.vlgmr.msra.gmra.mrb[4].mxu0 %vm231_vm2, %v340_v5  ;;  %12095 = vmatprep.subr.bf16.mxu1 %v16911_v11  ;;  %v1566_v42 = vcombine.high %v1564_v35, %v1564_v35  ;;  %v13490_v47 = vrot.slane %v1564_v35, %v13437_v59 }
  0xbc   :  { %12088 = vmatpush3.bf16.msra.mxu0 %v12955_v4  ;;  %12091 = vmatprep.mubr.msk.bf16.mxu0 %vm13250_vm0, %v16911_v11  ;;  %v1565_v55 = vcombine.high %v1557_v40, %v1557_v40  ;;  %v13540_v0 = vrot.slane %v1516_v48, %v13437_v59  ;;  %v12961_v4 = vld [vmem:[%s16896_s1 + $0x6c] sm:$0xff]   ;;  %v595_v10 = vsel %vm216_vm1, %v594_v34, %v593_v60  ;;  %v786_v37 = vrot.slane %v13534_v62, 1 }
  0xbd   :  { %v185_v22 = vadd.f32 %v179_v3, %v145_v13  ;;  %v171_v24 = vpop.permute.xlu1 %170  ;;  %12089 = vmatprep.subr.bf16.mxu0 %v16911_v11  ;;  %12084 = vmatmul.mubr.msk.bf16.vlgmr.msra.gmra.mrb[4].mxu1 %vm231_vm2, %v404_v25  ;;  %v13513_v57 = vrot.slane %v1566_v42, %v13437_v59  ;;  %v532_v3 = vpack.c.b16 %v531_v52, %v531_v52  ;;  %v12962_v25 = vld [vmem:[%s16896_s1 + $0x7c] sm:$0xff]   ;;  %v1704_v21 = vshrl.u32 %v13490_v47, 16 }
  0xbe   :  { %v182_v36 = vmul.f32 %v13365_v39, %v171_v24  ;;  %v467_v39 = vsel %vm216_vm1, %v466_v14, %v465_v31  ;;  %12096 = vmatpush3.bf16.msra.mxu1 %v12956_v16  ;;  %12099 = vmatprep.mubr.msk.bf16.mxu1 %vm13250_vm0, %v16911_v11  ;;  %v13556_v13 = vrot.slane %v1517_v53, %v13437_v59  ;;  %v723_v16 = vrot.slane %v13507_v54, 7  ;;  %v12964_v53 = vld [vmem:[%s16896_s1 + $0x94] sm:$0xff]  }
  0xbf   :  { %v13479_v41 = vadd.f32 %v13377_v56, %v185_v22  ;;  %12097 = vmatprep.subr.bf16.mxu1 %v16911_v11  ;;  %v468_v51 = vpack.c.b16 %v467_v39, %v467_v39  ;;  %v13559_v14 = vrot.slane %v1557_v40, %v13437_v59  ;;  %v13562_v35 = vrot.slane %v1565_v55, %v13437_v59 }
  0xc0   :  { %v188_v43 = vadd.f32 %v182_v36, %v148_v46  ;;  %12090 = vmatpush3.bf16.msra.mxu0 %v12957_v26  ;;  %v12959_v46 = vld [vmem:[%s16896_s1 + $0x64] sm:$0xff]   ;;  %v657_v26 = vrot.slane %v13397_v19, 7  ;;  %v596_v31 = vpack.c.b16 %v595_v10, %v595_v10  ;;  %v914_v40 = vrot.slane %v13507_v54, 2 }
  0xc1   :  { %16930 = vst [vmem:[#allocation8_spill] sm:$0xff] %v13479_v41  ;;  %v13494_v49 = vpack.c.bf16 %v13479_v41, %v13479_v41  ;;  %12103 = vmatprep.subr.bf16.mxu0 %v16911_v11  ;;  %v12963_v36 = vld [vmem:[%s16896_s1 + $0x84] sm:$0xff]   ;;  %v978_v19 = vrot.slane %v13507_v54, 3  ;;  %v724_v45 = vsel %vm216_vm1, %v723_v16, %v13534_v62  ;;  %v13611_v48 = vsel %vm216_vm1, %v13507_v54, %v786_v37 }
  0xc2   :  { %v13501_v50 = vadd.f32 %v13377_v56, %v188_v43  ;;  %v13516_v56 = vrot.slane %v1508_v17, %v13437_v59  ;;  %12098 = vmatpush3.bf16.msra.mxu1 %v12958_v44  ;;  %v659_v39 = vsel %vm216_vm1, %v658_v12, %v657_v26  ;;  %v13617_v52 = vcombine.high %v13559_v14, %v13559_v14  ;;  %v12966_v26 = vld [vmem:[%s16896_s1 + $0x9c] sm:$0xff]  }
  0xc3   :  { %v13510_v33 = vunpack.c.l.b16 %v13494_v49  ;;  %12092 = vmatmul.mubr.msk.bf16.vlgmr.msra.gmra.mrb[8].mxu0 %vm231_vm2, %v468_v51  ;;  %12111 = vmatprep.subr.bf16.mxu1 %v16911_v11  ;;  %v913_v51 = vrot.slane %v13534_v62, 3  ;;  %v13621_v34 = vcombine.high %v13562_v35, %v13562_v35  ;;  %v977_v55 = vrot.slane %v13534_v62, 4 }
  0xc4   :  { %16931 = vst [vmem:[#allocation9_spill] sm:$0xff] %v13501_v50  ;;  %v13520_v58 = vpack.c.bf16 %v13501_v50, %v13501_v50  ;;  %12104 = vmatpush3.bf16.msra.mxu0 %v12959_v46  ;;  %12107 = vmatprep.mubr.msk.bf16.mxu0 %vm13250_vm0, %v16911_v11  ;;  %v849_v46 = vrot.slane %v13534_v62, 2  ;;  %v660_v60 = vpack.c.b16 %v659_v39, %v659_v39  ;;  %v1677_v30 = vshll.u32 %v13562_v35, 16 }
  0xc5   :  { %v1300_v5 = vrot.slane %v13510_v33, 1  ;;  %12105 = vmatprep.subr.bf16.mxu0 %v16911_v11  ;;  %12100 = vmatmul.mubr.msk.bf16.vlgmr.msra.gmra.mrb[8].mxu1 %vm231_vm2, %v532_v3  ;;  %v1363_v32 = vrot.slane %v13510_v33, 2  ;;  %v725_v12 = vpack.c.b16 %v724_v45, %v724_v45  ;;  %v788_v16 = vpack.c.b16 %v13611_v48, %v13611_v48 }
  0xc6   :  { %v13548_v15 = vunpack.c.l.b16 %v13520_v58  ;;  %12112 = vmatpush3.bf16.msra.mxu1 %v12960_v23  ;;  %12115 = vmatprep.mubr.msk.bf16.mxu1 %vm13250_vm0, %v16911_v11  ;;  %v13636_v3 = vsel %vm216_vm1, %v850_v38, %v849_v46  ;;  %v13655_v17 = vsel %vm216_vm1, %v978_v19, %v977_v55  ;;  %v13684_v37 = vrot.slane %v13494_v49, %v13437_v59  ;;  %v12967_v38 = vld [vmem:[%s16896_s1 + $0xa4] sm:$0xff]  }
  0xc7   :  { %12113 = vmatprep.subr.bf16.mxu1 %v16911_v11  ;;  %v1105_v19 = vrot.slane %v13534_v62, 6  ;;  %v2392_v44 = vrot.slane %v13520_v58, %v13437_v59  ;;  %v1169_v49 = vrot.slane %v13534_v62, 7  ;;  %v1170_v45 = vrot.slane %v13507_v54, 6 }
  0xc8   :  { %v1237_v22 = vrot.slane %v13548_v15, 7  ;;  %v1364_v24 = vrot.slane %v13548_v15, 1  ;;  %12106 = vmatpush3.bf16.msra.mxu0 %v12961_v4  ;;  %v13598_v43 = vsel %vm216_vm1, %v13548_v15, %v1300_v5  ;;  %v13639_v4 = vsel %vm216_vm1, %v914_v40, %v913_v51 }
  0xc9   :  { %12119 = vmatprep.subr.bf16.mxu0 %v16911_v11  ;;  %v1042_v5 = vrot.slane %v13507_v54, 4  ;;  %v980_v40 = vpack.c.b16 %v13655_v17, %v13655_v17  ;;  %v13703_v48 = vcombine.high %v13537_v63, %v13537_v63  ;;  %v1620_v51 = vshll.u32 %v13540_v0, 16  ;;  %v12977_v17 = vld [vmem:[%s16896_s1 + $0xec] sm:$0xff]  }
  0xca   :  { %v13594_v42 = vsel %vm216_vm1, %v1237_v22, %v13510_v33  ;;  %12114 = vmatpush3.bf16.msra.mxu1 %v12962_v25  ;;  %v13629_v23 = vsel %vm216_vm1, %v1364_v24, %v1363_v32  ;;  %v1427_v32 = vrot.slane %v13510_v33, 3  ;;  %v1428_v22 = vrot.slane %v13548_v15, 2 }
  0xcb   :  { %12108 = vmatmul.mubr.msk.bf16.vlgmr.msra.gmra.mrb[12].mxu0 %vm231_vm2, %v596_v31  ;;  %12127 = vmatprep.subr.bf16.mxu1 %v16911_v11  ;;  %v1041_v24 = vrot.slane %v13534_v62, 5  ;;  %v13663_v25 = vcombine.high %v13516_v56, %v13516_v56  ;;  %v852_v33 = vpack.c.b16 %v13636_v3, %v13636_v3  ;;  %v916_v15 = vpack.c.b16 %v13639_v4, %v13639_v4 }
  0xcc   :  { %12120 = vmatpush3.bf16.msra.mxu0 %v12963_v36  ;;  %12123 = vmatprep.mubr.msk.bf16.mxu0 %vm13250_vm0, %v16911_v11  ;;  %v1106_v31 = vrot.slane %v13507_v54, 5  ;;  %v13677_v36 = vcombine.high %v13540_v0, %v13540_v0  ;;  %v13714_v55 = vsel %vm216_vm1, %v1428_v22, %v1427_v32  ;;  %v12968_v54 = vld [vmem:[%s16896_s1 + $0xb4] sm:$0xff]   ;;  %v2886_v10 = vcombine.high %v13684_v37, %v13684_v37 }
  0xcd   :  { %12121 = vmatprep.subr.bf16.mxu0 %v16911_v11  ;;  %12116 = vmatmul.mubr.msk.bf16.vlgmr.msra.gmra.mrb[12].mxu1 %vm231_vm2, %v660_v60  ;;  %v13693_v39 = vsel %vm216_vm1, %v1042_v5, %v1041_v24  ;;  %v1628_v58 = vshll.u32 %v13663_v25, 16  ;;  %v13725_v60 = vcombine.high %v13556_v13, %v13556_v13  ;;  %v1615_v32 = vshrl.u32 %v13516_v56, 16 }
  0xce   :  { %12128 = vmatpush3.bf16.msra.mxu1 %v12964_v53  ;;  %12131 = vmatprep.mubr.msk.bf16.mxu1 %vm13250_vm0, %v16911_v11  ;;  %v1623_v53 = vshrl.u32 %v13540_v0, 16  ;;  %v13721_v62 = vsel %vm216_vm1, %v1106_v31, %v1105_v19  ;;  %v1639_v5 = vshrl.u32 %v13677_v36, 16  ;;  %v1631_v22 = vshrl.u32 %v13663_v25, 16 }
  0xcf   :  { %12129 = vmatprep.subr.bf16.mxu1 %v16911_v11  ;;  %v1644_v24 = vshll.u32 %v13537_v63, 16  ;;  %v1652_v31 = vshll.u32 %v13556_v13, 16  ;;  %v1660_v19 = vshll.u32 %v13703_v48, 16  ;;  %v2894_v29 = vcombine.high %v2392_v44, %v2392_v44 }
  0xd0   :  { %12122 = vmatpush3.bf16.msra.mxu0 %v12965_v61  ;;  %v1636_v61 = vshll.u32 %v13677_v36, 16  ;;  %v1622_v27 = vsel %vm13744_vm4, %v1615_v32, %v1620_v51  ;;  %v13757_v46 = vsel %vm13744_vm4, %v1623_v53, %v1628_v58  ;;  %v1668_v53 = vshll.u32 %v13725_v60, 16 }
  0xd1   :  { %12135 = vmatprep.subr.bf16.mxu0 %v16911_v11  ;;  %v13771_v51 = vsel %vm13744_vm4, %v1639_v5, %v1644_v24  ;;  %v1672_v58 = vshrl.u32 %v13559_v14, 16  ;;  %v13784_v5 = vsel %vm216_vm1, %v1170_v45, %v1169_v49  ;;  %v1663_v24 = vshrl.u32 %v13703_v48, 16 }
  0xd2   :  { %12130 = vmatpush3.bf16.msra.mxu1 %v12966_v26  ;;  %v16942_v26 = vmov 0  ;;  %v13800_v6 = vrot.slane %v13684_v37, %v13437_v59  ;;  %v13803_v49 = vrot.slane %v2894_v29, %v13437_v59  ;;  %v1728_v45 = vcombine.low %v1622_v27, %v13757_v46  ;;  %v12972_v29 = vld [vmem:[%s16896_s1 + $0xd4] sm:$0xff]  }
  0xd3   :  { %12124 = vmatmul.mubr.msk.bf16.vlgmr.msra.gmra.mrb[16].mxu0 %vm231_vm2, %v725_v12  ;;  %12143 = vmatprep.subr.bf16.mxu1 %v16911_v11  ;;  %v12969_v12 = vld [vmem:[%s16896_s1 + $0xac] sm:$0xff]   ;;  %v16943_v26 = vsel %vm13744_vm4, 4294967295, %v16942_v26  ;;  %v1679_v2 = vsel %vm13744_vm4, %v1672_v58, %v1677_v30  ;;  %v13823_v27 = vsel %vm13744_vm4, %v1663_v24, %v1668_v53  ;;  %v2121_v4 = vcombine.low %v13540_v0, %v13663_v25 }
  0xd4   :  { %12136 = vmatpush3.bf16.msra.mxu0 %v12967_v38  ;;  %12139 = vmatprep.mubr.msk.bf16.mxu0 %vm13250_vm0, %v16911_v11  ;;  %16944 = vst [vmem:[#allocation10_spill] sm:$0xff] %v16943_v26  ;;  %v1655_v38 = vshrl.u32 %v13556_v13, 16  ;;  %v1738_v53 = vrot.slane %v1728_v45, %v13437_v59  ;;  %v1693_v24 = vshll.u32 %v13621_v34, 16  ;;  %v12975_v45 = vld [vmem:[%s16896_s1 + $0xe4] sm:$0xff]   ;;  %v1696_v1 = vshrl.u32 %v13621_v34, 16 }
  0xd5   :  { %12137 = vmatprep.subr.bf16.mxu0 %v16911_v11  ;;  %12132 = vmatmul.mubr.msk.bf16.vlgmr.msra.gmra.mrb[16].mxu1 %vm231_vm2, %v788_v16  ;;  %v13767_v16 = vsel %vm13744_vm4, %v1631_v22, %v1636_v61  ;;  %v1701_v37 = vshll.u32 %v13490_v47, 16  ;;  %v1709_v30 = vshll.u32 %v13513_v57, 16  ;;  %v2131_v61 = vrot.slane %v2121_v4, %v13437_v59 }
  0xd6   :  { %12144 = vmatpush3.bf16.msra.mxu1 %v12968_v54  ;;  %12147 = vmatprep.mubr.msk.bf16.mxu1 %vm13250_vm0, %v16911_v11  ;;  %v12971_v54 = vld [vmem:[%s16896_s1 + $0xc4] sm:$0xff]   ;;  %v13793_v22 = vsel %vm13744_vm4, %v1655_v38, %v1660_v19  ;;  %v13812_v38 = vrot.slane %v2392_v44, %v13437_v59  ;;  %v2123_v44 = vcombine.low %v13556_v13, %v13703_v48  ;;  %v1712_v32 = vshrl.u32 %v13513_v57, 16 }
  0xd7   :  { %12145 = vmatprep.subr.bf16.mxu1 %v16911_v11  ;;  %v1703_v4 = vsel %vm13744_vm4, %v1696_v1, %v1701_v37  ;;  %v16946_v1 = vpack.c.b16 %v13693_v39, %v13693_v39  ;;  %v1711_v50 = vsel %vm13744_vm4, %v1704_v21, %v1709_v30  ;;  %v11403_v37 = vcombine.high %v13516_v56, %v13540_v0 }
  0xd8   :  { %12138 = vmatpush3.bf16.msra.mxu0 %v12969_v12  ;;  %v13789_v12 = vsel %vm13744_vm4, %v1647_v28, %v1652_v31  ;;  %v1729_v28 = vcombine.low %v13767_v16, %v13771_v51  ;;  %v13809_v31 = vrot.slane %v2886_v10, %v13437_v59  ;;  %v2122_v10 = vcombine.low %v13677_v36, %v13537_v63  ;;  %v12974_v36 = vld [vmem:[%s16896_s1 + $0xdc] sm:$0xff]  }
  0xd9   :  { %12151 = vmatprep.subr.bf16.mxu0 %v16911_v11  ;;  %v1730_v3 = vcombine.low %v13789_v12, %v13793_v22  ;;  %v13944_v39 = vrot.slane %v2123_v44, %v13437_v59  ;;  %v1778_v21 = vcombine.low %v1703_v4, %v1711_v50 }
  0xda   :  { %12146 = vmatpush3.bf16.msra.mxu1 %v12970_v7  ;;  %v12973_v7 = vld [vmem:[%s16896_s1 + $0xcc] sm:$0xff]   ;;  %v13853_v58 = vrot.slane %v1729_v28, %v13437_v59  ;;  %v13885_v19 = vrot.slane %v2122_v10, %v13437_v59  ;;  %v12976_v10 = vld [vmem:[%s16896_s1 + $0xf4] sm:$0xff]  }
  0xdb   :  { %12140 = vmatmul.mubr.msk.bf16.vlgmr.msra.gmra.mrb[20].mxu0 %vm231_vm2, %v852_v33  ;;  %12159 = vmatprep.subr.bf16.mxu1 %v16911_v11  ;;  %v1731_v33 = vcombine.low %v13823_v27, %v1679_v2  ;;  %v13873_v28 = vrot.slane %v1730_v3, %v13437_v59  ;;  %v1685_v2 = vshll.u32 %v13617_v52, 16  ;;  %v1688_v3 = vshrl.u32 %v13617_v52, 16 }
  0xdc   :  { %12152 = vmatpush3.bf16.msra.mxu0 %v12971_v54  ;;  %12155 = vmatprep.mubr.msk.bf16.mxu0 %vm13250_vm0, %v16911_v11  ;;  %v1680_v54 = vshrl.u32 %v13562_v35, 16  ;;  %v2153_v41 = vcombine.low %v2131_v61, %v13885_v19 }
  0xdd   :  { %12153 = vmatprep.subr.bf16.mxu0 %v16911_v11  ;;  %12148 = vmatmul.mubr.msk.bf16.vlgmr.msra.gmra.mrb[20].mxu1 %vm231_vm2, %v916_v15  ;;  %v13864_v15 = vcombine.high %v13490_v47, %v13490_v47  ;;  %v1759_v25 = vrot.slane %v1731_v33, %v13437_v59  ;;  %v1760_v33 = vcombine.low %v1738_v53, %v13853_v58 }
  0xde   :  { %12160 = vmatpush3.bf16.msra.mxu1 %v12972_v29  ;;  %12163 = vmatprep.mubr.msk.bf16.mxu1 %vm13250_vm0, %v16911_v11  ;;  %v13878_v29 = vcombine.high %v13513_v57, %v13513_v57  ;;  %v13904_v53 = vsel %vm13744_vm4, %v1688_v3, %v1693_v24  ;;  %v2413_v3 = vshll.u32 %v13812_v38, 16 }
  0xdf   :  { %12161 = vmatprep.subr.bf16.mxu1 %v16911_v11  ;;  %v1720_v9 = vshrl.u32 %v13864_v15, 16 }
  0xe0   :  { %12154 = vmatpush3.bf16.msra.mxu0 %v12973_v7  ;;  %v2124_v7 = vcombine.low %v13725_v60, %v13562_v35  ;;  %v1725_v24 = vshll.u32 %v13878_v29, 16  ;;  %v2408_v30 = vshrl.u32 %v13878_v29, 16 }
  0xe1   :  { %12167 = vmatprep.subr.bf16.mxu0 %v16911_v11  ;;  %v1717_v11 = vshll.u32 %v13864_v15, 16 }
  0xe2   :  { %12162 = vmatpush3.bf16.msra.mxu1 %v12974_v36  ;;  %v16945_v36 = vmov 0.0   ;;  %v1727_v44 = vsel %vm13744_vm4, %v1720_v9, %v1725_v24  ;;  %v2465_v9 = vcombine.low %v13904_v53, %v1703_v4 }
  0xe3   :  { %12156 = vmatmul.mubr.msk.bf16.vlgmr.msra.gmra.mrb[24].mxu0 %vm231_vm2, %v980_v40  ;;  %12175 = vmatprep.subr.bf16.mxu1 %v16945_v36  ;;  %v1761_v40 = vcombine.low %v13873_v28, %v1759_v25  ;;  %v13925_v25 = vsel %vm13744_vm4, %v1680_v54, %v1685_v2  ;;  %v12978_v2 = vld [vmem:[%s16896_s1 + $0xfc] sm:$0xff]   ;;  %v1719_v54 = vsel %vm13744_vm4, %v1712_v32, %v1717_v11 }
  0xe4   :  { %12168 = vmatpush3.bf16.msra.mxu0 %v12975_v45  ;;  %12171 = vmatprep.mubr.msk.bf16.mxu0 %vm13250_vm0, %v16945_v36  ;;  %v2152_v45 = vrot.slane %v2124_v7, %v13437_v59  ;;  %v1777_v61 = vcombine.low %v13925_v25, %v13904_v53  ;;  %v12979_v7 = vld [vmem:[%s16896_s1 + $0x104] sm:$0xff]   ;;  %v13964_v32 = vrot.slane %v2153_v41, %v13437_v59 }
  0xe5   :  { %12169 = vmatprep.subr.bf16.mxu0 %v16945_v36  ;;  %12164 = vmatmul.mubr.msk.bf16.vlgmr.msra.gmra.mrb[24].mxu1 %vm231_vm2, %v16946_v1  ;;  %v13957_v1 = vrot.slane %v1761_v40, %v13437_v59  ;;  %v2466_v24 = vcombine.low %v1711_v50, %v1719_v54  ;;  %v16947_v41 = vpack.c.b16 %v13721_v62, %v13721_v62  ;;  %v12981_v50 = vld [vmem:[%s16896_s1 + $0x10c] sm:$0xff]  }
  0xe6   :  { %12176 = vmatpush3.bf16.msra.mxu1 %v12976_v10  ;;  %12179 = vmatprep.mubr.msk.bf16.mxu1 %vm13250_vm0, %v16945_v36  ;;  %v13954_v10 = vrot.slane %v1760_v33, %v13437_v59  ;;  %v2154_v11 = vcombine.low %v13944_v39, %v2152_v45  ;;  %v13970_v33 = vsel %vm13744_vm4, %v2408_v30, %v2413_v3  ;;  %v2405_v45 = vshll.u32 %v13800_v6, 16  ;;  %v12980_v3 = vld [vmem:[%s16896_s1 + $0x114] sm:$0xff]  }
  0xe7   :  { %12177 = vmatprep.subr.bf16.mxu1 %v16945_v36  ;;  %v1786_v40 = vrot.slane %v1777_v61, %v13437_v59  ;;  %v1779_v30 = vcombine.low %v1719_v54, %v1727_v44  ;;  %v13985_v61 = vrot.slane %v1778_v21, %v13437_v59  ;;  %v2474_v62 = vrot.slane %v2465_v9, %v13437_v59 }
  0xe8   :  { %12170 = vmatpush3.bf16.msra.mxu0 %v12977_v17  ;;  %v1884_v17 = vcombine.low %v13516_v56, %v13540_v0  ;;  %v2467_v56 = vcombine.low %v1727_v44, %v13970_v33  ;;  %v1887_v0 = vcombine.low %v13703_v48, %v13559_v14  ;;  %v2481_v4 = vrot.slane %v2466_v24, %v13437_v59 }
  0xe9   :  { %12183 = vmatprep.subr.bf16.mxu0 %v16945_v36  ;;  %v1886_v54 = vcombine.low %v13537_v63, %v13556_v13  ;;  %v2400_v21 = vshrl.u32 %v13725_v60, 16  ;;  %v16948_v48 = vpack.c.b16 %v13784_v5, %v13784_v5  ;;  %v14012_v9 = vrot.slane %v11403_v37, %v13437_v59 }
  0xea   :  { %12178 = vmatpush3.bf16.msra.mxu1 %v12978_v2  ;;  %v14000_v2 = vrot.slane %v2154_v11, %v13437_v59  ;;  %v1894_v44 = vrot.slane %v1884_v17, %v13437_v59  ;;  %v11408_v11 = vcombine.high %v13559_v14, %v13562_v35  ;;  %v2489_v24 = vcombine.low %v2474_v62, %v2481_v4 }
  0xeb   :  { %12172 = vmatmul.mubr.msk.bf16.vlgmr.msra.gmra.mrb[28].mxu0 %vm231_vm2, %v16947_v41  ;;  %12191 = vmatprep.subr.bf16.mxu1 %v16945_v36  ;;  %v2910_v41 = vshrl.u32 %v13812_v38, 16  ;;  %v14023_v5 = vrot.slane %v1779_v30, %v13437_v59  ;;  %v14027_v37 = vsel %vm13744_vm4, %v2400_v21, %v2405_v45  ;;  %v2915_v17 = vshll.u32 %v13803_v49, 16 }
  0xec   :  { %12184 = vmatpush3.bf16.msra.mxu0 %v12979_v7  ;;  %12187 = vmatprep.mubr.msk.bf16.mxu0 %vm13250_vm0, %v16945_v36  ;;  %v2488_v7 = vrot.slane %v2467_v56, %v13437_v59  ;;  %v12982_v56 = vld [vmem:[%s16896_s1 + $0x11c] sm:$0xff]   ;;  %v1801_v62 = vcombine.low %v1786_v40, %v13985_v61  ;;  %v14037_v30 = vrot.slane %v1887_v0, %v13437_v59 }
  0xed   :  { %12185 = vmatprep.subr.bf16.mxu0 %v16945_v36  ;;  %12180 = vmatmul.mubr.msk.bf16.vlgmr.msra.gmra.mrb[28].mxu1 %vm231_vm2, %v16948_v48  ;;  %v2496_v4 = vrot.slane %v2489_v24, %v13437_v59  ;;  %v1776_v45 = vcombine.low %v13954_v10, %v13957_v1  ;;  %v2171_v21 = vcombine.low %v13490_v47, %v13513_v57  ;;  %v12984_v1 = vld [vmem:[%s16896_s1 + $0x134] sm:$0xff]  }
  0xee   :  { %12192 = vmatpush3.bf16.msra.mxu1 %v12980_v3  ;;  %12195 = vmatprep.mubr.msk.bf16.mxu1 %vm13250_vm0, %v16945_v36  ;;  %v2503_v14 = vrot.slane %v2488_v7, %v13437_v59  ;;  %v12983_v3 = vld [vmem:[%s16896_s1 + $0x124] sm:$0xff]   ;;  %v1934_v7 = vcombine.low %v13621_v34, %v13490_v47  ;;  %v14050_v40 = vrot.slane %v1886_v54, %v13437_v59 }
  0xef   :  { %12193 = vmatprep.subr.bf16.mxu1 %v16945_v36  ;;  %v1916_v0 = vcombine.low %v1894_v44, %v14012_v9  ;;  %v2419_v48 = vcombine.low %v14027_v37, %v13925_v25  ;;  %v16949_v10 = vpack.c.b16 %v13594_v42, %v13594_v42  ;;  %v11409_v54 = vcombine.high %v13490_v47, %v13513_v57  ;;  %v12985_v42 = vld [vmem:[%s16896_s1 + $0x12c] sm:$0xff]  }
  0xf0   :  { %12186 = vmatpush3.bf16.msra.mxu0 %v12981_v50  ;;  %v14055_v24 = vcombine.low %v2496_v4, %v2503_v14  ;;  %v14067_v44 = vrot.slane %v11408_v11, %v13437_v59  ;;  %v1935_v25 = vcombine.low %v13513_v57, %v13864_v15  ;;  %v14077_v14 = vrot.slane %v1801_v62, %v13437_v59  ;;  %v12987_v15 = vld [vmem:[%s16896_s1 + $0x154] sm:$0xff]  }
  0xf1   :  { %12199 = vmatprep.subr.bf16.mxu0 %v16945_v36  ;;  %v1917_v11 = vcombine.low %v14050_v40, %v14037_v30  ;;  %v2907_v57 = vshll.u32 %v13809_v31, 16  ;;  %v2418_v62 = vcombine.low %v13793_v22, %v13823_v27  ;;  %v14094_v4 = vrot.slane %v1934_v7, %v13437_v59  ;;  %v12986_v22 = vld [vmem:[%s16896_s1 + $0x13c] sm:$0xff]  }
  0xf2   :  { %12194 = vmatpush3.bf16.msra.mxu1 %v12982_v56  ;;  %v2902_v56 = vshrl.u32 %v13800_v6, 16  ;;  %v16950_v30 = vpack.c.b16 %v13598_v43, %v13598_v43  ;;  %v2417_v47 = vcombine.low %v13771_v51, %v13789_v12  ;;  %v2447_v50 = vrot.slane %v2419_v48, %v13437_v59 }
  0xf3   :  { %12188 = vmatmul.mubr.msk.bf16.vlgmr.msra.gmra.mrb[32].mxu0 %vm231_vm2, %v16949_v10  ;;  %12207 = vmatprep.subr.bf16.mxu1 %v16945_v36  ;;  %v2416_v10 = vcombine.low %v13757_v46, %v13767_v16  ;;  %v14113_v43 = vrot.slane %v1935_v25, %v13437_v59  ;;  %v2959_v16 = vcombine.low %v13985_v61, %v14023_v5 }
  0xf4   :  { %12200 = vmatpush3.bf16.msra.mxu0 %v12983_v3  ;;  %12203 = vmatprep.mubr.msk.bf16.mxu0 %vm13250_vm0, %v16945_v36  ;;  %v2186_v3 = vrot.slane %v2171_v21, %v13437_v59  ;;  %v2917_v21 = vsel %vm13744_vm4, %v2910_v41, %v2915_v17  ;;  %v1924_v51 = vrot.slane %v1916_v0, %v13437_v59  ;;  %v12988_v17 = vld [vmem:[%s16896_s1 + $0x164] sm:$0xff]  }
  0xf5   :  { %12201 = vmatprep.subr.bf16.mxu0 %v16945_v36  ;;  %12196 = vmatmul.mubr.msk.bf16.vlgmr.msra.gmra.mrb[32].mxu1 %vm231_vm2, %v16950_v30  ;;  %v2951_v46 = vcombine.low %v13970_v33, %v2917_v21  ;;  %v2193_v12 = vrot.slane %v11409_v54, %v13437_v59  ;;  %v2700_v41 = vcombine.low %v13878_v29, %v13812_v38  ;;  %v12989_v33 = vld [vmem:[%s16896_s1 + $0x15c] sm:$0xff]  }
  0xf6   :  { %12208 = vmatpush3.bf16.msra.mxu1 %v12984_v1  ;;  %12211 = vmatprep.mubr.msk.bf16.mxu1 %vm13250_vm0, %v16945_v36  ;;  %v2194_v61 = vcombine.low %v14067_v44, %v2186_v3  ;;  %v2440_v7 = vrot.slane %v2418_v62, %v13437_v59  ;;  %v2708_v48 = vcombine.low %v14094_v4, %v14113_v43 }
  0xf7   :  { %12209 = vmatprep.subr.bf16.mxu1 %v16945_v36  ;;  %v2958_v0 = vrot.slane %v2951_v46, %v13437_v59  ;;  %v2426_v29 = vrot.slane %v2416_v10, %v13437_v59  ;;  %v2433_v1 = vrot.slane %v2417_v47, %v13437_v59  ;;  %v2909_v54 = vsel %vm13744_vm4, %v2902_v56, %v2907_v57  ;;  %v12990_v56 = vld [vmem:[%s16896_s1 + $0x16c] sm:$0xff]  }
  0xf8   :  { %12202 = vmatpush3.bf16.msra.mxu0 %v12985_v42  ;;  %v2707_v25 = vrot.slane %v2700_v41, %v13437_v59  ;;  %v16951_v44 = vpack.c.b16 %v13629_v23, %v13629_v23  ;;  %v2449_v42 = vcombine.low %v2440_v7, %v2447_v50  ;;  %v2966_v62 = vrot.slane %v2959_v16, %v13437_v59 }
  0xf9   :  { %12215 = vmatprep.subr.bf16.mxu0 %v12987_v15  ;;  %v2973_v30 = vrot.slane %v2958_v0, %v13437_v59  ;;  %v2715_v47 = vrot.slane %v2708_v48, %v13437_v59  ;;  %v16952_v23 = vcombine.low %v13812_v38, %v13803_v49  ;;  %v3178_v21 = vcombine.low %v2186_v3, %v2193_v12 }
  0xfa   :  { %12210 = vmatpush3.bf16.msra.mxu1 %v12986_v22  ;;  %v2722_v57 = vrot.slane %v2707_v25, %v13437_v59  ;;  %v16953_v22 = vpack.c.b16 %v13714_v55, %v13714_v55  ;;  %v1931_v46 = vrot.slane %v1917_v11, %v13437_v59  ;;  %v2448_v49 = vcombine.low %v2426_v29, %v2433_v1 }
  0xfb   :  { %12204 = vmatmul.mubr.msk.bf16.vlgmr.msra.gmra.mrb[36].mxu0 %vm231_vm2, %v16951_v44  ;;  %v3177_v50 = vrot.slane %v16952_v23, %v13437_v59  ;;  %12231 = vmatprep.subr.bf16.mxu1 %v12988_v17  ;;  %v14159_v10 = vcombine.low %v2966_v62, %v2973_v30  ;;  %v16954_v41 = vcombine.low %v13964_v32, %v14000_v2  ;;  %v12995_v30 = vld [vmem:[%s16896_s1 + $0x194] sm:$0xff]  }
  0xfc   :  { %12216 = vmatpush3.bf16.msra.mxu0 %v12987_v15  ;;  %12219 = vmatprep.mubr.msk.bf16.mxu0 %vm231_vm2, %v1776_v45  ;;  %v12991_v15 = vld [vmem:[%s16896_s1 + $0x144] sm:$0xff]   ;;  %v2919_v45 = vcombine.low %v2909_v54, %v13904_v53  ;;  %v14166_v38 = vcombine.low %v2715_v47, %v2722_v57  ;;  %v2918_v53 = vcombine.low %v13823_v27, %v14027_v37  ;;  %v12992_v27 = vld [vmem:[%s16896_s1 + $0x174] sm:$0xff]   ;;  %v12993_v37 = vld [vmem:[%s16896_s1 + $0x14c] sm:$0xff]  }
  0xfd   :  { %12217 = vmatprep.subr.bf16.mxu0 %v12989_v33  ;;  %12212 = vmatmul.mubr.msk.bf16.vlgmr.msra.gmra.mrb[36].mxu1 %vm231_vm2, %v16953_v22  ;;  %v3192_v16 = vrot.slane %v3177_v50, %v13437_v59  ;;  %v2668_v55 = vcombine.low %v13800_v6, %v13617_v52  ;;  %v3185_v3 = vrot.slane %v3178_v21, %v13437_v59  ;;  %v12998_v50 = vld [vmem:[%s16896_s1 + $0x18c] sm:$0xff]  }
  0xfe   :  { %12232 = vmatpush3.bf16.msra.mxu1 %v12988_v17  ;;  %12235 = vmatprep.mubr.msk.bf16.mxu1 %vm231_vm2, %v16954_v41  ;;  %v16955_v11 = vrot.slane %v14023_v5, %v13437_v59  ;;  %v2201_v7 = vrot.slane %v2194_v61, %v13437_v59  ;;  %v1933_v32 = vcombine.low %v13562_v35, %v13617_v52 }
  0xff   :  { %12233 = vmatprep.subr.bf16.mxu1 %v12990_v56  ;;  %v2463_v2 = vrot.slane %v2449_v42, %v13437_v59  ;;  %v2933_v5 = vrot.slane %v2919_v45, %v13437_v59  ;;  %v1932_v61 = vcombine.low %v1924_v51, %v1931_v46  ;;  %v2208_v35 = vrot.slane %v2193_v12, %v13437_v59  ;;  %v12996_v12 = vld [vmem:[%s16896_s1 + $0x184] sm:$0xff]  }
 0x100   :  { %12218 = vmatpush3.bf16.msra.mxu0 %v12989_v33  ;;  %v1816_v17 = vcombine.low %v14077_v14, %v16955_v11  ;;  %v11420_v14 = vcombine.high %v13537_v63, %v13556_v13  ;;  %v14195_v33 = vcombine.low %v3185_v3, %v3192_v16  ;;  %v2456_v52 = vrot.slane %v2448_v49, %v13437_v59  ;;  %v12994_v63 = vld [vmem:[%s16896_s1 + $0x17c] sm:$0xff]  }
 0x101   :  { %12223 = vmatprep.subr.bf16.mxu0 %v12991_v15  ;;  %v2926_v0 = vrot.slane %v2918_v53, %v13437_v59  ;;  %v2682_v48 = vrot.slane %v2668_v55, %v13437_v59  ;;  %v2209_v29 = vcombine.low %v2201_v7, %v2208_v35  ;;  %v1942_v13 = vrot.slane %v1933_v32, %v13437_v59 }
 0x102   :  { %12234 = vmatpush3.bf16.msra.mxu1 %v12990_v56  ;;  %v2464_v51 = vcombine.low %v2456_v52, %v2463_v2  ;;  %v2675_v54 = vrot.slane %v11420_v14, %v13437_v59  ;;  %v3138_v44 = vcombine.low %v13809_v31, %v13621_v34  ;;  %v2934_v42 = vcombine.low %v13853_v58, %v13873_v28 }
 0x103   :  { %12220 = vmatmul.mubr.msk.bf16.vlgmr.msra.gmra.mrb[40].mxu0 %vm231_vm2, %v1816_v17  ;;  %12239 = vmatprep.subr.bf16.mxu1 %v12992_v27  ;;  %v2935_v1 = vcombine.low %v2926_v0, %v2933_v5  ;;  %v1957_v25 = vcombine.low %v1942_v13, %v14094_v4  ;;  %v2683_v4 = vcombine.low %v14012_v9, %v14050_v40  ;;  %v12997_v9 = vld [vmem:[%s16896_s1 + $0x19c] sm:$0xff]  }
 0x104   :  { %12224 = vmatpush3.bf16.msra.mxu0 %v12991_v15  ;;  %12227 = vmatprep.mubr.msk.bf16.mxu0 %vm231_vm2, %v1932_v61  ;;  %v2684_v62 = vcombine.low %v2675_v54, %v2682_v48  ;;  %v3137_v34 = vcombine.low %v13725_v60, %v13800_v6  ;;  %v2942_v58 = vrot.slane %v2934_v42, %v13437_v59 }
 0x105   :  { %12225 = vmatprep.subr.bf16.mxu0 %v12993_v37  ;;  %12236 = vmatmul.mubr.msk.bf16.vlgmr.msra.gmra.mrb[40].mxu1 %vm231_vm2, %v2209_v29  ;;  %v2949_v56 = vrot.slane %v2935_v1, %v13437_v59  ;;  %v1964_v31 = vrot.slane %v1957_v25, %v13437_v59  ;;  %v3152_v47 = vrot.slane %v3138_v44, %v13437_v59 }
 0x106   :  { %12240 = vmatpush3.bf16.msra.mxu1 %v12992_v27  ;;  %12243 = vmatprep.mubr.msk.bf16.mxu1 %vm231_vm2, %v2464_v51  ;;  %v2698_v28 = vrot.slane %v2684_v62, %v13437_v59  ;;  %v1971_v57 = vrot.slane %v14113_v43, %v13437_v59  ;;  %v2691_v6 = vrot.slane %v2683_v4, %v13437_v59 }
 0x107   :  { %12241 = vmatprep.subr.bf16.mxu1 %v12994_v63  ;;  %v2950_v40 = vcombine.low %v2942_v58, %v2949_v56  ;;  %v3145_v60 = vrot.slane %v3137_v34, %v13437_v59  ;;  %v3153_v45 = vcombine.low %v13885_v19, %v13944_v39  ;;  %v13000_v19 = vld [vmem:[%s16896_s1 + $0x1ac] sm:$0xff]  }
 0x108   :  { %12226 = vmatpush3.bf16.msra.mxu0 %v12993_v37  ;;  %v1972_v23 = vcombine.low %v1964_v31, %v1971_v57  ;;  %v2699_v43 = vcombine.low %v2691_v6, %v2698_v28 }
 0x109   :  { %12247 = vmatprep.subr.bf16.mxu0 %v12996_v12  ;;  %v3154_v15 = vcombine.low %v3145_v60, %v3152_v47  ;;  %v3161_v22 = vrot.slane %v3153_v45, %v13437_v59 }
 0x10a   :  { %12242 = vmatpush3.bf16.msra.mxu1 %v12994_v63 }
 0x10b   :  { %12255 = vmatprep.subr.bf16.mxu1 %v12995_v30  ;;  %v3168_v21 = vrot.slane %v3154_v15, %v13437_v59 }
 0x10d   :  { %12244 = vmatmul.mubr.msk.bf16.vlgmr.msra.gmra.mrb[44].mxu1 %vm231_vm2, %v14055_v24  ;;  %v12999_v24 = vld [vmem:[%s16896_s1 + $0x1a4] sm:$0xff]   ;;  %v3169_v39 = vcombine.low %v3161_v22, %v3168_v21 }
 0x10e   :  { %12256 = vmatpush3.bf16.msra.mxu1 %v12995_v30  ;;  %12259 = vmatprep.mubr.msk.bf16.mxu1 %vm231_vm2, %v2950_v40 }
 0x10f   :  { %12228 = vmatmul.mubr.msk.bf16.vlgmr.msra.gmra.mrb[40].mxu0 %vm231_vm2, %v1972_v23  ;;  %12257 = vmatprep.subr.bf16.mxu1 %v12997_v9 }
 0x110   :  { %12248 = vmatpush3.bf16.msra.mxu0 %v12996_v12  ;;  %12251 = vmatprep.mubr.msk.bf16.mxu0 %vm231_vm2, %v2699_v43 }
 0x111   :  { %12249 = vmatprep.subr.bf16.mxu0 %v12998_v50 }
 0x112   :  { %12258 = vmatpush3.bf16.msra.mxu1 %v12997_v9 }
 0x113   :  { %12271 = vmatprep.subr.bf16.mxu1 %v16945_v36 }
 0x114   :  { %12250 = vmatpush3.bf16.msra.mxu0 %v12998_v50 }
 0x115   :  { %12260 = vmatmul.mubr.msk.bf16.vlgmr.msra.gmra.mrb[48].mxu1 %vm231_vm2, %v14159_v10  ;;  %12263 = vmatprep.subr.bf16.mxu0 %v12999_v24 }
 0x116   :  { %12275 = vmatprep.mubr.msk.bf16.mxu1 %vm13250_vm0, %v16945_v36 }
 0x117   :  { %12252 = vmatmul.mubr.msk.bf16.vlgmr.msra.gmra.mrb[44].mxu0 %vm231_vm2, %v14166_v38 }
 0x118   :  { %12264 = vmatpush3.bf16.msra.mxu0 %v12999_v24  ;;  %12267 = vmatprep.mubr.msk.bf16.mxu0 %vm231_vm2, %v3169_v39  ;;  %v13001_v39 = vld [vmem:[%s16896_s1 + $0x1c4] sm:$0xff]  }
 0x119   :  { %12265 = vmatprep.subr.bf16.mxu0 %v13000_v19  ;;  %12272 = vmatpush3.bf16.msra.mxu1 %v13001_v39 }
 0x11a   :  { %12273 = vmatprep.subr.bf16.mxu1 %v16945_v36 }
 0x11c   :  { %12266 = vmatpush3.bf16.msra.mxu0 %v13000_v19 }
 0x11d   :  { %12279 = vmatprep.subr.bf16.mxu0 %v16945_v36 }
 0x11f   :  { %12268 = vmatmul.mubr.msk.bf16.vlgmr.msra.gmra.mrb[48].mxu0 %vm231_vm2, %v14195_v33 }
 0x120   :  { %12283 = vmatprep.mubr.msk.bf16.mxu0 %vm13250_vm0, %v16945_v36 }
 0x186   :  { %v269_v10 = vpop.f32.mrb[0].mxu0 }
 0x187   :  { %v12061_v46 = vpop.f32.mrb[1].mxu0 }
 0x188   :  { %v272_v49 = vpop.f32.mrb[2].mxu0  ;;  %v327_v16 = vpop.f32.mrb[0].mxu1 }
 0x189   :  { %v12062_v41 = vpop.f32.mrb[3].mxu0  ;;  %v328_v53 = vadd.f32 %v327_v16, %v269_v10  ;;  %v12069_v38 = vpop.f32.mrb[1].mxu1  ;;  %v13002_v10 = vld [vmem:[%s16896_s1 + $0x1b4] sm:$0xff]   ;;  %v13003_v16 = vld [vmem:[%s16896_s1 + $0x1cc] sm:$0xff]  }
 0x18a   :  { %v330_v55 = vpop.f32.mrb[2].mxu1  ;;  %12280 = vmatpush3.bf16.msra.mxu0 %v13002_v10  ;;  %v13004_v41 = vld [vmem:[%s16896_s1 + $0x1bc] sm:$0xff]   ;;  %12274 = vmatpush3.bf16.msra.mxu1 %v13003_v16 }
 0x18b   :  { %v12070_v3 = vpop.f32.mrb[3].mxu1  ;;  %12281 = vmatprep.subr.bf16.mxu0 %v16945_v36  ;;  %12287 = vmatprep.subr.bf16.mxu1 %v16945_v36 }
 0x18e   :  { %v390_v11 = vpop.f32.mrb[4].mxu0  ;;  %12282 = vmatpush3.bf16.msra.mxu0 %v13004_v41 }
 0x18f   :  { %v396_v17 = vadd.f32 %v390_v11, %v328_v53  ;;  %v12077_v7 = vpop.f32.mrb[5].mxu0  ;;  %12295 = vmatprep.subr.bf16.mxu0 %v16945_v36 }
 0x190   :  { %v393_v32 = vpop.f32.mrb[6].mxu0  ;;  %v454_v27 = vpop.f32.mrb[4].mxu1 }
 0x191   :  { %v12078_v2 = vpop.f32.mrb[7].mxu0  ;;  %v460_v37 = vadd.f32 %v454_v27, %v396_v17  ;;  %v12085_v5 = vpop.f32.mrb[5].mxu1 }
 0x192   :  { %v457_v14 = vpop.f32.mrb[6].mxu1 }
 0x193   :  { %v12086_v33 = vpop.f32.mrb[7].mxu1 }
 0x196   :  { %v518_v61 = vpop.f32.mrb[8].mxu0 }
 0x197   :  { %v524_v35 = vadd.f32 %v518_v61, %v460_v37  ;;  %v12093_v52 = vpop.f32.mrb[9].mxu0 }
 0x198   :  { %v521_v0 = vpop.f32.mrb[10].mxu0  ;;  %v582_v48 = vpop.f32.mrb[8].mxu1 }
 0x199   :  { %v12094_v29 = vpop.f32.mrb[11].mxu0  ;;  %v588_v63 = vadd.f32 %v582_v48, %v524_v35  ;;  %v12101_v13 = vpop.f32.mrb[9].mxu1 }
 0x19a   :  { %v585_v51 = vpop.f32.mrb[10].mxu1 }
 0x19b   :  { %v12102_v12 = vpop.f32.mrb[11].mxu1 }
 0x19e   :  { %v646_v1 = vpop.f32.mrb[12].mxu0 }
 0x19f   :  { %v652_v54 = vadd.f32 %v646_v1, %v588_v63  ;;  %v12109_v25 = vpop.f32.mrb[13].mxu0 }
 0x1a0   :  { %v649_v44 = vpop.f32.mrb[14].mxu0  ;;  %v710_v42 = vpop.f32.mrb[12].mxu1 }
 0x1a1   :  { %v12110_v62 = vpop.f32.mrb[15].mxu0  ;;  %v716_v30 = vadd.f32 %v710_v42, %v652_v54  ;;  %v12117_v56 = vpop.f32.mrb[13].mxu1 }
 0x1a2   :  { %v713_v4 = vpop.f32.mrb[14].mxu1  ;;  %v13252_v62 = vmov 1983009808  }
 0x1a3   :  { %v12118_v34 = vpop.f32.mrb[15].mxu1 }
 0x1a6   :  { %v775_v31 = vpop.f32.mrb[16].mxu0 }
 0x1a7   :  { %v781_v58 = vadd.f32 %v775_v31, %v716_v30  ;;  %v12125_v28 = vpop.f32.mrb[17].mxu0  ;;  %v2046_v30 = vunpack.c.l.s4 %v13252_v62 }
 0x1a8   :  { %v778_v47 = vpop.f32.mrb[18].mxu0  ;;  %v838_v57 = vpop.f32.mrb[16].mxu1 }
 0x1a9   :  { %v12126_v9 = vpop.f32.mrb[19].mxu0  ;;  %v844_v40 = vadd.f32 %v838_v57, %v781_v58  ;;  %v12133_v6 = vpop.f32.mrb[17].mxu1  ;;  %v2047_v58 = vunpack.c.0.s8 %v2046_v30 }
 0x1aa   :  { %v841_v60 = vpop.f32.mrb[18].mxu1 }
 0x1ab   :  { %v12134_v23 = vpop.f32.mrb[19].mxu1  ;;  %v14287_v60 = vsub.s32 %v2047_v58, %v13343_v20 }
 0x1ac   :  { %v4498_v23 = vcombine.high %v13383_v8, %v13383_v8 }
 0x1ad   :  { %v14304_v8 = vrot.slane %v13394_v18, %v14287_v60 }
 0x1ae   :  { %v902_v50 = vpop.f32.mrb[20].mxu0 }
 0x1af   :  { %v908_v43 = vadd.f32 %v902_v50, %v844_v40  ;;  %v12141_v15 = vpop.f32.mrb[21].mxu0 }
 0x1b0   :  { %v905_v45 = vpop.f32.mrb[22].mxu0  ;;  %v966_v24 = vpop.f32.mrb[20].mxu1  ;;  %v14295_v15 = vrot.slane %v4498_v23, %v14287_v60 }
 0x1b1   :  { %v12142_v21 = vpop.f32.mrb[23].mxu0  ;;  %v972_v22 = vadd.f32 %v966_v24, %v908_v43  ;;  %v12149_v19 = vpop.f32.mrb[21].mxu1  ;;  %v11435_v43 = vld [vmem:[%s16897_s2 + $0x2] ss:$0 sm:$0xff] }
 0x1b2   :  { %v969_v46 = vpop.f32.mrb[22].mxu1  ;;  %v3358_v45 = vcombine.high %v11435_v43, %v11435_v43  ;;  %v11479_v21 = vld [vmem:[%s16897_s2 + $0x4] ss:$0 sm:$0xff] }
 0x1b3   :  { %v12150_v49 = vpop.f32.mrb[23].mxu1 }
 0x1b4   :  { %v14307_v49 = vrot.slane %v11435_v43, %v14287_v60 }
 0x1b6   :  { %v1030_v53 = vpop.f32.mrb[24].mxu0 }
 0x1b7   :  { %v1036_v38 = vadd.f32 %v1030_v53, %v972_v22  ;;  %v12157_v55 = vpop.f32.mrb[25].mxu0  ;;  %v4541_v22 = vcombine.high %v13394_v18, %v13394_v18  ;;  %v14312_v53 = vrot.slane %v3358_v45, %v14287_v60 }
 0x1b8   :  { %v1033_v3 = vpop.f32.mrb[26].mxu0  ;;  %v1094_v11 = vpop.f32.mrb[24].mxu1  ;;  %v14315_v55 = vrot.slane %v11479_v21, %v14287_v60 }
 0x1b9   :  { %v12158_v17 = vpop.f32.mrb[27].mxu0  ;;  %v1100_v7 = vadd.f32 %v1094_v11, %v1036_v38  ;;  %v12165_v32 = vpop.f32.mrb[25].mxu1  ;;  %v4403_v38 = vcombine.high %v11479_v21, %v11479_v21 }
 0x1ba   :  { %v1097_v27 = vpop.f32.mrb[26].mxu1  ;;  %v14328_v32 = vrot.slane %v4541_v22, %v14287_v60 }
 0x1bb   :  { %v12166_v2 = vpop.f32.mrb[27].mxu1 }
 0x1be   :  { %v1158_v37 = vpop.f32.mrb[28].mxu0 }
 0x1bf   :  { %v1164_v5 = vadd.f32 %v1158_v37, %v1100_v7  ;;  %v12173_v14 = vpop.f32.mrb[29].mxu0  ;;  %v14325_v7 = vld [vmem:[%s16897_s2 + $0x5] ss:$0 sm:$0xff] }
 0x1c0   :  { %v1161_v33 = vpop.f32.mrb[30].mxu0  ;;  %v1222_v61 = vpop.f32.mrb[28].mxu1 }
 0x1c1   :  { %v12174_v35 = vpop.f32.mrb[31].mxu0  ;;  %v1228_v52 = vadd.f32 %v1222_v61, %v1164_v5  ;;  %v12181_v0 = vpop.f32.mrb[29].mxu1  ;;  %v16957_v5 = vld [vmem:[#allocation6_spill] sm:$0xff] }
 0x1c2   :  { %v1225_v48 = vpop.f32.mrb[30].mxu1  ;;  %v14346_v35 = vcombine.high %v14307_v49, %v14307_v49  ;;  %v14353_v0 = vrot.slane %v4403_v38, %v14287_v60 }
 0x1c3   :  { %v12182_v29 = vpop.f32.mrb[31].mxu1 }
 0x1c4   :  { %v14359_v29 = vrot.slane %v14325_v7, %v14287_v60 }
 0x1c6   :  { %v1289_v63 = vpop.f32.mrb[32].mxu0 }
 0x1c7   :  { %v1295_v13 = vadd.f32 %v1289_v63, %v1228_v52  ;;  %v12189_v51 = vpop.f32.mrb[33].mxu0  ;;  %v14350_v52 = vcombine.high %v14312_v53, %v14312_v53 }
 0x1c8   :  { %v1292_v12 = vpop.f32.mrb[34].mxu0  ;;  %v1352_v1 = vpop.f32.mrb[32].mxu1 }
 0x1c9   :  { %v12190_v54 = vpop.f32.mrb[35].mxu0  ;;  %v1358_v25 = vadd.f32 %v1352_v1, %v1295_v13  ;;  %v12197_v44 = vpop.f32.mrb[33].mxu1  ;;  %v14365_v1 = vcombine.high %v14315_v55, %v14315_v55 }
 0x1ca   :  { %v1355_v42 = vpop.f32.mrb[34].mxu1 }
 0x1cb   :  { %v12198_v56 = vpop.f32.mrb[35].mxu1 }
 0x1ce   :  { %v1416_v4 = vpop.f32.mrb[36].mxu0 }
 0x1cf   :  { %v1422_v34 = vadd.f32 %v1416_v4, %v1358_v25  ;;  %v12205_v31 = vpop.f32.mrb[37].mxu0 }
 0x1d0   :  { %v1419_v28 = vpop.f32.mrb[38].mxu0  ;;  %v1480_v47 = vpop.f32.mrb[36].mxu1 }
 0x1d1   :  { %v12206_v57 = vpop.f32.mrb[39].mxu0  ;;  %v14284_v9 = vadd.f32 %v1480_v47, %v1422_v34  ;;  %v12213_v40 = vpop.f32.mrb[37].mxu1 }
 0x1d2   :  { %v1483_v6 = vpop.f32.mrb[38].mxu1 }
 0x1d3   :  { %16956 = vst [vmem:[#allocation11_spill] sm:$0xff] %v14284_v9  ;;  %v12214_v50 = vpop.f32.mrb[39].mxu1 }
 0x1d8   :  { %v12237_v24 = vpop.f32.mrb[40].mxu1 }
 0x1d9   :  { %v2315_v19 = vcombine.high %v12237_v24, %v12237_v24  ;;  %v2262_v39 = vpop.f32.mrb[41].mxu1  ;;  %v2322_v18 = vrot.slane %v12237_v24, %v14287_v60 }
 0x1da   :  { %v2281_v10 = vcombine.high %v2262_v39, %v2262_v39  ;;  %v12238_v46 = vpop.f32.mrb[42].mxu1  ;;  %v14320_v11 = vrot.slane %v2262_v39, %v14287_v60 }
 0x1db   :  { %v2265_v41 = vpop.f32.mrb[43].mxu1  ;;  %v2329_v3 = vrot.slane %v2315_v19, %v14287_v60  ;;  %v14334_v37 = vrot.slane %v12238_v46, %v14287_v60  ;;  %v2330_v63 = vcombine.high %v2322_v18, %v2322_v18 }
 0x1dc   :  { %v2298_v17 = vcombine.high %v2265_v41, %v2265_v41  ;;  %v2295_v2 = vrot.slane %v2281_v10, %v14287_v60  ;;  %v14339_v33 = vrot.slane %v2265_v41, %v14287_v60  ;;  %v2296_v51 = vcombine.high %v14320_v11, %v14320_v11 }
 0x1dd   :  { %v2331_v13 = vcombine.high %v2329_v3, %v2329_v3  ;;  %v2339_v25 = vcombine.high %v14334_v37, %v14334_v37 }
 0x1de   :  { %v14342_v61 = vrot.slane %v2298_v17, %v14287_v60  ;;  %v2297_v54 = vcombine.high %v2295_v2, %v2295_v2  ;;  %v2313_v30 = vcombine.high %v14339_v33, %v14339_v33 }
 0x1e0   :  { %v12245_v12 = vpop.f32.mrb[44].mxu1  ;;  %v2314_v56 = vcombine.high %v14342_v61, %v14342_v61 }
 0x1e1   :  { %v2610_v44 = vcombine.high %v12245_v12, %v12245_v12  ;;  %v14370_v42 = vrot.slane %v12245_v12, %v14287_v60  ;;  %v2557_v62 = vpop.f32.mrb[45].mxu1 }
 0x1e2   :  { %v2576_v4 = vcombine.high %v2557_v62, %v2557_v62  ;;  %v14377_v34 = vrot.slane %v2557_v62, %v14287_v60  ;;  %v12229_v31 = vpop.f32.mrb[40].mxu0  ;;  %v12246_v58 = vpop.f32.mrb[46].mxu1 }
 0x1e3   :  { %v14380_v28 = vrot.slane %v2610_v44, %v14287_v60  ;;  %v2625_v47 = vcombine.high %v14370_v42, %v14370_v42  ;;  %v2078_v57 = vcombine.high %v12229_v31, %v12229_v31  ;;  %v2085_v40 = vrot.slane %v12229_v31, %v14287_v60  ;;  %v2025_v6 = vpop.f32.mrb[41].mxu0  ;;  %v2560_v23 = vpop.f32.mrb[47].mxu1 }
 0x1e4   :  { %v14386_v50 = vrot.slane %v2576_v4, %v14287_v60  ;;  %v14391_v45 = vrot.slane %v12246_v58, %v14287_v60  ;;  %v2044_v24 = vcombine.high %v2025_v6, %v2025_v6  ;;  %v12230_v21 = vpop.f32.mrb[42].mxu0  ;;  %v2051_v17 = vrot.slane %v2025_v6, %v14287_v60 }
 0x1e5   :  { %v2626_v22 = vcombine.high %v14380_v28, %v14380_v28  ;;  %v2092_v19 = vrot.slane %v2078_v57, %v14287_v60  ;;  %v2093_v39 = vcombine.high %v2085_v40, %v2085_v40  ;;  %v2362_v10 = vadd.f32 %v2322_v18, %v2085_v40  ;;  %v2028_v46 = vpop.f32.mrb[43].mxu0 }
 0x1e6   :  { %v2058_v12 = vrot.slane %v2044_v24, %v14287_v60  ;;  %v2593_v31 = vcombine.high %v2560_v23, %v2560_v23  ;;  %v2059_v58 = vcombine.high %v2051_v17, %v2051_v17  ;;  %v2354_v57 = vadd.f32 %v14320_v11, %v2051_v17 }
 0x1e7   :  { %v2094_v44 = vcombine.high %v2092_v19, %v2092_v19  ;;  %v2363_v62 = vadd.f32 %v2330_v63, %v2093_v39  ;;  %v2364_v4 = vadd.f32 %v2329_v3, %v2092_v19  ;;  %v14404_v14 = vrot.slane %v2560_v23, %v14287_v60 }
 0x1e8   :  { %v2060_v16 = vcombine.high %v2058_v12, %v2058_v12  ;;  %v2356_v18 = vadd.f32 %v2295_v2, %v2058_v12  ;;  %v12261_v40 = vpop.f32.mrb[48].mxu1  ;;  %v14407_v48 = vrot.slane %v2593_v31, %v14287_v60  ;;  %v2101_v6 = vrot.slane %v12230_v21, %v14287_v60 }
 0x1e9   :  { %v2365_v27 = vadd.f32 %v2331_v13, %v2094_v44  ;;  %v3027_v24 = vpop.f32.mrb[49].mxu1  ;;  %v2355_v38 = vadd.f32 %v2296_v51, %v2059_v58  ;;  %v2061_v3 = vcombine.high %v2028_v46, %v2028_v46  ;;  %v2068_v19 = vrot.slane %v2028_v46, %v14287_v60 }
 0x1ea   :  { %v2357_v63 = vadd.f32 %v2297_v54, %v2060_v16  ;;  %v12253_v39 = vpop.f32.mrb[44].mxu0  ;;  %v12262_v41 = vpop.f32.mrb[50].mxu1  ;;  %v2102_v13 = vcombine.high %v2101_v6, %v2101_v6  ;;  %v2366_v23 = vadd.f32 %v14334_v37, %v2101_v6  ;;  %v3080_v54 = vcombine.high %v12261_v40, %v12261_v40 }
 0x1eb   :  { %v2776_v17 = vpop.f32.mrb[45].mxu0  ;;  %v3030_v12 = vpop.f32.mrb[51].mxu1  ;;  %v2075_v21 = vrot.slane %v2061_v3, %v14287_v60  ;;  %v2076_v51 = vcombine.high %v2068_v19, %v2068_v19  ;;  %v2358_v16 = vadd.f32 %v14339_v33, %v2068_v19  ;;  %v14419_v31 = vrot.slane %v12261_v40, %v14287_v60 }
 0x1ec   :  { %v12254_v46 = vpop.f32.mrb[46].mxu0  ;;  %v2367_v44 = vadd.f32 %v2339_v25, %v2102_v13  ;;  %v3046_v58 = vcombine.high %v3027_v24, %v3027_v24  ;;  %v14422_v11 = vrot.slane %v3027_v24, %v14287_v60  ;;  %v14429_v3 = vrot.slane %v3080_v54, %v14287_v60 }
 0x1ed   :  { %v2779_v2 = vpop.f32.mrb[47].mxu0  ;;  %v2077_v43 = vcombine.high %v2075_v21, %v2075_v21  ;;  %v2359_v37 = vadd.f32 %v2313_v30, %v2076_v51  ;;  %v2360_v6 = vadd.f32 %v14342_v61, %v2075_v21  ;;  %v3095_v25 = vcombine.high %v14419_v31, %v14419_v31 }
 0x1ee   :  { %v14434_v40 = vrot.slane %v3046_v58, %v14287_v60  ;;  %v2657_v19 = vadd.f32 %v14370_v42, %v2362_v10  ;;  %v3096_v30 = vcombine.high %v14429_v3, %v14429_v3  ;;  %v2658_v13 = vadd.f32 %v2625_v47, %v2363_v62 }
 0x1ef   :  { %v2361_v33 = vadd.f32 %v2314_v56, %v2077_v43  ;;  %v2659_v21 = vadd.f32 %v14380_v28, %v2364_v4  ;;  %v2660_v54 = vadd.f32 %v2626_v22, %v2365_v27  ;;  %v2829_v58 = vcombine.high %v12253_v39, %v12253_v39 }
 0x1f0   :  { %v2836_v10 = vrot.slane %v12253_v39, %v14287_v60  ;;  %v14452_v24 = vrot.slane %v12262_v41, %v14287_v60  ;;  %v2649_v61 = vadd.f32 %v14377_v34, %v2354_v57  ;;  %v16958_v56 = vcombine.high %v14377_v34, %v14377_v34 }
 0x1f1   :  { %v2651_v42 = vadd.f32 %v14386_v50, %v2356_v18  ;;  %v2843_v28 = vrot.slane %v2829_v58, %v14287_v60  ;;  %v16959_v27 = vcombine.high %v14386_v50, %v14386_v50  ;;  %v2795_v57 = vcombine.high %v2776_v17, %v2776_v17 }
 0x1f2   :  { %v2650_v43 = vadd.f32 %v16958_v56, %v2355_v38  ;;  %v12269_v47 = vpop.f32.mrb[48].mxu0  ;;  %v2844_v62 = vcombine.high %v2836_v10, %v2836_v10  ;;  %v2876_v4 = vadd.f32 %v2836_v10, %v2657_v19  ;;  %v3104_v41 = vcombine.high %v14452_v24, %v14452_v24 }
 0x1f3   :  { %v2652_v22 = vadd.f32 %v16959_v27, %v2357_v63  ;;  %v3246_v39 = vpop.f32.mrb[49].mxu0  ;;  %v2802_v51 = vrot.slane %v2776_v17, %v14287_v60  ;;  %v3063_v34 = vcombine.high %v3030_v12, %v3030_v12  ;;  %v2845_v18 = vcombine.high %v2843_v28, %v2843_v28 }
 0x1f4   :  { %v14466_v38 = vpop.f32.mrb[50].mxu0  ;;  %v2877_v56 = vadd.f32 %v2844_v62, %v2658_v13  ;;  %v2878_v9 = vadd.f32 %v2843_v28, %v2659_v21  ;;  %v14469_v58 = vrot.slane %v3030_v12, %v14287_v60  ;;  %v2809_v50 = vrot.slane %v2795_v57, %v14287_v60 }
 0x1f5   :  { %v14471_v19 = vpop.f32.mrb[51].mxu0  ;;  %v2810_v63 = vcombine.high %v2802_v51, %v2802_v51  ;;  %v2868_v10 = vadd.f32 %v2802_v51, %v2649_v61  ;;  %v14475_v27 = vrot.slane %v3063_v34, %v14287_v60  ;;  %v2879_v26 = vadd.f32 %v2845_v18, %v2660_v54 }
 0x1f6   :  { %v3078_v17 = vcombine.high %v14469_v58, %v14469_v58  ;;  %v2661_v20 = vadd.f32 %v14391_v45, %v2366_v23  ;;  %v16960_v13 = vcombine.high %v14391_v45, %v14391_v45  ;;  %v2811_v21 = vcombine.high %v2809_v50, %v2809_v50 }
 0x1f7   :  { %v2869_v28 = vadd.f32 %v2810_v63, %v2650_v43  ;;  %v2870_v62 = vadd.f32 %v2809_v50, %v2651_v42  ;;  %v2852_v51 = vrot.slane %v12254_v46, %v14287_v60  ;;  %v2653_v61 = vadd.f32 %v14404_v14, %v2358_v16 }
 0x1f8   :  { %v2662_v12 = vadd.f32 %v16960_v13, %v2367_v44  ;;  %v16961_v54 = vcombine.high %v14404_v14, %v14404_v14  ;;  %v2655_v23 = vadd.f32 %v14407_v48, %v2360_v6  ;;  %v2871_v18 = vadd.f32 %v2811_v21, %v2652_v22 }
 0x1f9   :  { %v16962_v45 = vcombine.high %v14407_v48, %v14407_v48  ;;  %v2812_v43 = vcombine.high %v2779_v2, %v2779_v2  ;;  %v2819_v42 = vrot.slane %v2779_v2, %v14287_v60  ;;  %v2853_v50 = vcombine.high %v2852_v51, %v2852_v51 }
 0x1fa   :  { %v2654_v34 = vadd.f32 %v16961_v54, %v2359_v37  ;;  %v2880_v63 = vadd.f32 %v2852_v51, %v2661_v20  ;;  %v3127_v46 = vadd.f32 %v14419_v31, %v2876_v4  ;;  %v3128_v13 = vadd.f32 %v3095_v25, %v2877_v56 }
 0x1fb   :  { %v2656_v44 = vadd.f32 %v16962_v45, %v2361_v33  ;;  %v2826_v16 = vrot.slane %v2812_v43, %v14287_v60  ;;  %v2827_v57 = vcombine.high %v2819_v42, %v2819_v42  ;;  %v2872_v14 = vadd.f32 %v2819_v42, %v2653_v61 }
 0x1fc   :  { %v3129_v37 = vadd.f32 %v14429_v3, %v2878_v9  ;;  %v2881_v6 = vadd.f32 %v2853_v50, %v2662_v12  ;;  %v3130_v22 = vadd.f32 %v3096_v30, %v2879_v26  ;;  %v3299_v21 = vcombine.high %v12269_v47, %v12269_v47 }
 0x1fd   :  { %v3306_v48 = vrot.slane %v12269_v47, %v14287_v60  ;;  %v2828_v33 = vcombine.high %v2826_v16, %v2826_v16  ;;  %v2873_v54 = vadd.f32 %v2827_v57, %v2654_v34  ;;  %v2874_v45 = vadd.f32 %v2826_v16, %v2655_v23 }
 0x1fe   :  { %v3119_v2 = vadd.f32 %v14422_v11, %v2868_v10  ;;  %v3313_v20 = vrot.slane %v3299_v21, %v14287_v60  ;;  %v16963_v4 = vcombine.high %v14422_v11, %v14422_v11  ;;  %v3121_v9 = vadd.f32 %v14434_v40, %v2870_v62 }
 0x1ff   :  { %v3314_v31 = vcombine.high %v3306_v48, %v3306_v48  ;;  %v3346_v25 = vadd.f32 %v3306_v48, %v3127_v46  ;;  %v2875_v51 = vadd.f32 %v2828_v33, %v2656_v44  ;;  %v16964_v26 = vcombine.high %v14434_v40, %v14434_v40 }
 0x200   :  { %v3120_v56 = vadd.f32 %v16963_v4, %v2869_v28  ;;  %v3265_v30 = vcombine.high %v3246_v39, %v3246_v39  ;;  %v3315_v47 = vcombine.high %v3313_v20, %v3313_v20  ;;  %v3348_v57 = vadd.f32 %v3313_v20, %v3129_v37 }
 0x201   :  { %v3122_v3 = vadd.f32 %v16964_v26, %v2871_v18  ;;  %v3347_v12 = vadd.f32 %v3314_v31, %v3128_v13  ;;  %v3387_v10 = vadd.f32 %v14346_v35, %v3346_v25  ;;  %v3272_v61 = vrot.slane %v3246_v39, %v14287_v60 }
 0x202   :  { %v3279_v34 = vrot.slane %v3265_v30, %v14287_v60  ;;  %v3131_v11 = vadd.f32 %v14452_v24, %v2880_v63  ;;  %v3132_v28 = vadd.f32 %v3104_v41, %v2881_v6  ;;  %v3349_v23 = vadd.f32 %v3315_v47, %v3130_v22 }
 0x203   :  { %v3388_v62 = vadd.f32 %v14312_v53, %v3347_v12  ;;  %v3389_v44 = vadd.f32 %v14350_v52, %v3348_v57  ;;  %13155 = vtanh.f32 %v3387_v10  ;;  %v3280_v40 = vcombine.high %v3272_v61, %v3272_v61 }
 0x204   :  { %v3281_v18 = vcombine.high %v3279_v34, %v3279_v34  ;;  %v3338_v43 = vadd.f32 %v3272_v61, %v3119_v2  ;;  %v3340_v42 = vadd.f32 %v3279_v34, %v3121_v9  ;;  %v3390_v50 = vadd.f32 %v14307_v49, %v3349_v23 }
 0x205   :  { %13157 = vtanh.f32 %v3388_v62  ;;  %v3322_v39 = vrot.slane %v14466_v38, %v14287_v60  ;;  %v3123_v46 = vadd.f32 %v14469_v58, %v2872_v14  ;;  %v3339_v24 = vadd.f32 %v3280_v40, %v3120_v56  ;;  %v14537_v58 = vld [vmem:[%s16895_s0 + $0x10] sm:$0xff] }
 0x206   :  { %13159 = vtanh.f32 %v3389_v44  ;;  %v3341_v41 = vadd.f32 %v3281_v18, %v3122_v3  ;;  %v3379_v63 = vadd.f32 %v14307_v49, %v3338_v43  ;;  %v3381_v13 = vadd.f32 %v14312_v53, %v3340_v42  ;;  %5684 = vperm.xlu1 %12930, %v14537_v58  }
 0x207   :  { %13161 = vtanh.f32 %v3390_v50  ;;  %v3323_v16 = vcombine.high %v3322_v39, %v3322_v39  ;;  %v3350_v37 = vadd.f32 %v3322_v39, %v3131_v11  ;;  %v3380_v6 = vadd.f32 %v14346_v35, %v3339_v24  ;;  %v14598_v39 = vld [vmem:[%s16895_s0 + $0x8] sm:$0xff] }
 0x208   :  { %v3382_v22 = vadd.f32 %v14350_v52, %v3341_v41  ;;  %13163 = vtanh.f32 %v3379_v63  ;;  %v3124_v38 = vadd.f32 %v3078_v17, %v2873_v54  ;;  %v3125_v48 = vadd.f32 %v14475_v27, %v2874_v45  ;;  %v14542_v17 = vld [vmem:[%s16895_s0 + $0x30] sm:$0xff] }
 0x209   :  { %13165 = vtanh.f32 %v3381_v13  ;;  %v3351_v14 = vadd.f32 %v3323_v16, %v3132_v28  ;;  %v3391_v21 = vadd.f32 %v14346_v35, %v3350_v37  ;;  %v16965_v33 = vcombine.high %v14475_v27, %v14475_v27  ;;  %5698 = vperm.xlu0 %12934, %v14542_v17  }
 0x20a   :  { %13167 = vtanh.f32 %v3380_v6  ;;  %v3282_v20 = vcombine.high %v14471_v19, %v14471_v19  ;;  %v3289_v52 = vrot.slane %v14471_v19, %v14287_v60  ;;  %v16966_v27 = vcombine.high %v14325_v7, %v14325_v7 }
 0x20b   :  { %v3126_v2 = vadd.f32 %v16965_v33, %v2875_v51  ;;  %v14552_v45 = vcombine.high %v14359_v29, %v14359_v29  ;;  %13169 = vtanh.f32 %v3382_v22  ;;  %v3392_v19 = vadd.f32 %v14312_v53, %v3351_v14 }
 0x20c   :  { %v14548_v54 = vrot.slane %v16966_v27, %v14287_v60  ;;  %13171 = vtanh.f32 %v3391_v21  ;;  %v3296_v31 = vrot.slane %v3282_v20, %v14287_v60  ;;  %v3297_v25 = vcombine.high %v3289_v52, %v3289_v52 }
 0x20d   :  { %v3342_v4 = vadd.f32 %v3289_v52, %v3123_v46  ;;  %v14558_v56 = vpop.eup %13155  ;;  %v4557_v7 = vcombine.high %v14328_v32, %v14328_v32  ;;  %v14564_v51 = vrot.slane %v16957_v5, %v14287_v60  ;;  %v4419_v9 = vcombine.high %v14353_v0, %v14353_v0 }
 0x20e   :  { %13173 = vtanh.f32 %v3392_v19  ;;  %v4432_v26 = vmul.f32 %v14558_v56, %v14365_v1  ;;  %v3298_v3 = vcombine.high %v3296_v31, %v3296_v31  ;;  %v3343_v30 = vadd.f32 %v3297_v25, %v3124_v38 }
 0x20f   :  { %v3344_v47 = vadd.f32 %v3296_v31, %v3125_v48  ;;  %v14570_v12 = vpop.eup %13157  ;;  %v16967_v57 = vcombine.high %v16957_v5, %v16957_v5  ;;  %v4459_v61 = vcombine.high %v14548_v54, %v14548_v54  ;;  %v3383_v34 = vadd.f32 %v14307_v49, %v3342_v4 }
 0x210   :  { %v16968_v11 = vmov 1   ;;  %v16969_v28 = vmov 2   ;;  %v14583_v23 = vpop.eup %13159  ;;  %v4433_v62 = vmul.f32 %v14570_v12, %v14353_v0  ;;  %v4472_v44 = vadd.f32 %v14552_v45, %v4432_v26 }
 0x211   :  { %v14576_v10 = vrot.slane %v16967_v57, %v14287_v60  ;;  %12932 = vset.pattern.permute.xlu1 %v16968_v11  ;;  %12936 = vset.pattern.permute.xlu0 %v16969_v28  ;;  %v3345_v40 = vadd.f32 %v3298_v3, %v3126_v2  ;;  %v3384_v5 = vadd.f32 %v14346_v35, %v3343_v30  ;;  %v13162_v18 = vpop.eup %13161  ;;  %13175 = vtanh.f32 %v3383_v34 }
 0x212   :  { %5721 = vperm.xlu1 %12932, %v14537_v58   ;;  %v4522_v43 = vcombine.high %v14564_v51, %v14564_v51  ;;  %v3455_v42 = vcombine.low %v14570_v12, %v14583_v23  ;;  %v4434_v50 = vmul.f32 %v14583_v23, %v4419_v9  ;;  %5757 = vperm.xlu0 %12936, %v14598_v39   ;;  %v13164_v35 = vpop.eup %13163  ;;  %v4486_v41 = vmax.f32 %v4472_v44, 0.0 }
 0x213   :  { %v4435_v46 = vmul.f32 %v13162_v18, %v14315_v55  ;;  %v4473_v24 = vadd.f32 %v14548_v54, %v4433_v62  ;;  %v3385_v63 = vadd.f32 %v14312_v53, %v3344_v47  ;;  %v13166_v13 = vpop.eup %13165  ;;  %v4424_v37 = vmul.f32 %v13164_v35, %v14315_v55 }
 0x214   :  { %v4474_v16 = vadd.f32 %v4459_v61, %v4434_v50  ;;  %v3386_v6 = vadd.f32 %v14307_v49, %v3345_v40  ;;  %13177 = vtanh.f32 %v3384_v5  ;;  %v13168_v22 = vpop.eup %13167  ;;  %v14608_v21 = vadd.f32 %v14304_v8, %v4486_v41  ;;  %v14617_v49 = vld [vmem:[%s16895_s0 + $0x28] sm:$0xff] }
 0x215   :  { %v4475_v38 = vadd.f32 %v14359_v29, %v4435_v46  ;;  %v4487_v14 = vmax.f32 %v4473_v24, 0.0  ;;  %v4426_v48 = vmul.f32 %v13166_v13, %v14353_v0  ;;  %v16970_v33 = vmov 0   ;;  %v13170_v2 = vpop.eup %13169 }
 0x216   :  { %12933 = vset.pattern.permute.xlu1 %v16970_v33  ;;  %v4488_v53 = vmax.f32 %v4474_v16, 0.0  ;;  %v3421_v20 = vcombine.low %v13164_v35, %v13168_v22  ;;  %v4425_v52 = vmul.f32 %v13168_v22, %v14365_v1  ;;  %v4464_v27 = vadd.f32 %v14359_v29, %v4424_v37  ;;  %5773 = vperm.xlu0 %12936, %v14542_v17   ;;  %v13172_v19 = vpop.eup %13171  ;;  %v16974_v22 = vld [vmem:[#allocation9_spill] sm:$0xff] }
 0x217   :  { %5693 = vperm.xlu1 %12933, %v14617_v49   ;;  %v4489_v31 = vmax.f32 %v4475_v38, 0.0  ;;  %v16971_v25 = vcombine.high %v14304_v8, %v14304_v8  ;;  %v3422_v26 = vcombine.low %v13166_v13, %v13170_v2  ;;  %v4427_v3 = vmul.f32 %v13170_v2, %v4419_v9 }
 0x218   :  { %v13174_v30 = vpop.eup %13173  ;;  %v14627_v47 = vadd.f32 %v14328_v32, %v4488_v53  ;;  %v14630_v57 = vrot.slane %v3421_v20, %v14287_v60  ;;  %v4465_v34 = vadd.f32 %v14552_v45, %v4425_v52  ;;  %v4466_v62 = vadd.f32 %v14548_v54, %v4426_v48 }
 0x219   :  { %v14624_v4 = vadd.f32 %v16971_v25, %v4487_v14  ;;  %v14635_v44 = vrot.slane %v3422_v26, %v14287_v60  ;;  %v4467_v40 = vadd.f32 %v4459_v61, %v4427_v3  ;;  %v4478_v8 = vmax.f32 %v4464_v27, 0.0 }
 0x21a   :  { %v3471_v5 = vcombine.low %v13162_v18, %v13172_v19  ;;  %v4479_v50 = vmax.f32 %v4465_v34, 0.0  ;;  %v4480_v35 = vmax.f32 %v4466_v62, 0.0  ;;  %v3485_v46 = vrot.slane %v13174_v30, %v14287_v60 }
 0x21b   :  { %v4642_v9 = vcombine.low %v14624_v4, %v14627_v47  ;;  %12935 = vset.pattern.permute.xlu1 %v16968_v11  ;;  %v16972_v24 = vmov 3   ;;  %v3437_v41 = vcombine.low %v14630_v57, %v14635_v44  ;;  %v4481_v13 = vmax.f32 %v4467_v40, 0.0  ;;  %v13176_v37 = vpop.eup %13175 }
 0x21c   :  { %12939 = vset.pattern.permute.xlu0 %v16972_v24  ;;  %v16973_v61 = vcombine.high %v14295_v15, %v14295_v15  ;;  %v3478_v18 = vrot.slane %v3471_v5, %v14287_v60  ;;  %5729 = vperm.xlu1 %12935, %v14617_v49   ;;  %v4564_v38 = vrot.slane %v16974_v22, %v14287_v60  ;;  %13179 = vtanh.f32 %v3385_v63 }
 0x21d   :  { %5801 = vperm.xlu0 %12939, %v14537_v58   ;;  %v4581_v14 = vadd.f32 %v14564_v51, %v4479_v50  ;;  %v4582_v48 = vadd.f32 %v4522_v43, %v4480_v35  ;;  %v4436_v2 = vmul.f32 %v13172_v19, %v14365_v1  ;;  %v4583_v53 = vadd.f32 %v14576_v10, %v4481_v13 }
 0x21e   :  { %v4580_v16 = vadd.f32 %v16973_v61, %v4478_v8  ;;  %v14655_v20 = vcombine.low %v3478_v18, %v3485_v46  ;;  %v4437_v15 = vmul.f32 %v13174_v30, %v14353_v0  ;;  %v4591_v52 = vadd.f32 %v4557_v7, %v4489_v31  ;;  %v13178_v27 = vpop.eup %13177  ;;  %v14668_v30 = vld [vmem:[%s16895_s0 + $0x38] sm:$0xf]  ;;  %v16975_v46 = vld [vmem:[#allocation8_spill] sm:$0xff] }
 0x21f   :  { %v4476_v26 = vadd.f32 %v14552_v45, %v4436_v2  ;;  %v4428_v51 = vmul.f32 %v13176_v37, %v14315_v55  ;;  %v4609_v43 = vcombine.low %v4582_v48, %v4583_v53  ;;  %13181 = vtanh.f32 %v3386_v6 }
 0x220   :  { %v4608_v25 = vcombine.low %v4580_v16, %v4581_v14  ;;  %v4477_v19 = vadd.f32 %v14548_v54, %v4437_v15  ;;  %v3438_v3 = vcombine.low %v13176_v37, %v13178_v27  ;;  %5733 = vperm.xlu1 %12935, %v14542_v17   ;;  %v4429_v7 = vmul.f32 %v13178_v27, %v14365_v1 }
 0x221   :  { %12940 = vset.pattern.permute.xlu0 %v16970_v33  ;;  %v4490_v32 = vmax.f32 %v4476_v26, 0.0  ;;  %v4468_v63 = vadd.f32 %v14359_v29, %v4428_v51  ;;  %v4565_v31 = vcombine.high %v4564_v38, %v4564_v38  ;;  %v4623_v34 = vrot.slane %v4609_v43, %v14287_v60 }
 0x222   :  { %5703 = vperm.xlu0 %12940, %v14668_v30   ;;  %v4616_v6 = vrot.slane %v4608_v25, %v14287_v60  ;;  %v4491_v62 = vmax.f32 %v4477_v19, 0.0  ;;  %v4523_v40 = vcombine.high %v14576_v10, %v14576_v10  ;;  %v4469_v5 = vadd.f32 %v14552_v45, %v4429_v7  ;;  %v14692_v45 = vld [vmem:[%s16895_s0 + $0x18] sm:$0xf] }
 0x223   :  { %v4592_v8 = vadd.f32 %v4564_v38, %v4490_v32  ;;  %v4482_v50 = vmax.f32 %v4468_v63, 0.0  ;;  %v4530_v13 = vrot.slane %v16975_v46, %v14287_v60  ;;  %v16976_v10 = vld [vmem:[#allocation7_spill] sm:$0xff]  ;;  %v3445_v38 = vrot.slane %v3438_v3, %v14287_v60 }
 0x224   :  { %v14679_v35 = vadd.f32 %v4565_v31, %v4491_v62  ;;  %v14681_v1 = vcombine.low %v4616_v6, %v4623_v34  ;;  %12937 = vset.pattern.permute.xlu1 %v16969_v28  ;;  %v4483_v16 = vmax.f32 %v4469_v5, 0.0  ;;  %v4532_v37 = vcombine.high %v16976_v10, %v16976_v10  ;;  %v13005_v46 = vld [vmem:[%s16896_s1 + $0x1d4] sm:$0xff]  }
 0x225   :  { %v4658_v61 = vcombine.low %v4591_v52, %v4592_v8  ;;  %v14686_v18 = vadd.f32 %v4523_v40, %v4482_v50  ;;  %5761 = vperm.xlu1 %12937, %v14537_v58   ;;  %v3469_v51 = vrot.slane %v3455_v42, %v14287_v60  ;;  %v4531_v19 = vcombine.high %v4530_v13, %v4530_v13 }
 0x226   :  { %12943 = vset.pattern.permute.xlu0 %v16968_v11  ;;  %v14698_v22 = vadd.f32 %v4530_v13, %v4483_v16  ;;  %v13180_v14 = vpop.eup %13179  ;;  %v4539_v15 = vrot.slane %v4532_v37, %v14287_v60  ;;  %v4672_v23 = vrot.slane %v14679_v35, %v14287_v60 }
 0x227   :  { %5725 = vperm.xlu0 %12943, %v14692_v45   ;;  %v3452_v2 = vrot.slane %v13180_v14, %v14287_v60  ;;  %v4430_v53 = vmul.f32 %v13180_v14, %v14353_v0 }
 0x228   :  { %v4625_v58 = vcombine.low %v14686_v18, %v14698_v22 }
 0x229   :  { %5769 = vperm.xlu1 %12937, %v14617_v49   ;;  %v13182_v48 = vpop.eup %13181  ;;  %v3453_v25 = vcombine.low %v3445_v38, %v3452_v2  ;;  %v4470_v26 = vadd.f32 %v14548_v54, %v4430_v53  ;;  %v4540_v54 = vcombine.high %v4539_v15, %v4539_v15 }
 0x22a   :  { %v3454_v52 = vcombine.low %v13182_v48, %v14558_v56  ;;  %v4431_v27 = vmul.f32 %v13182_v48, %v14315_v55  ;;  %v4665_v56 = vrot.slane %v4658_v61, %v14287_v60  ;;  %v13006_v48 = vld [vmem:[%s16896_s1 + $0x1e4] sm:$0xff]  }
 0x22b   :  { %12945 = vset.pattern.permute.xlu0 %v16972_v24  ;;  %v3491_v55 = vpack.c.bf16 %v3453_v25, %v3437_v41  ;;  %v4484_v3 = vmax.f32 %v4470_v26, 0.0  ;;  %v13007_v26 = vld [vmem:[%s16896_s1 + $0x1dc] sm:$0xff]  }
 0x22c   :  { %5817 = vperm.xlu0 %12945, %v14668_v30   ;;  %v3462_v0 = vrot.slane %v3454_v52, %v14287_v60  ;;  %v4471_v43 = vadd.f32 %v14359_v29, %v4431_v27  ;;  %v14733_v41 = vcombine.low %v4665_v56, %v4672_v23 }
 0x22d   :  { %12938 = vset.pattern.permute.xlu1 %v16972_v24  ;;  %v3503_v42 = vunpack.c.l.b16 %v3491_v55  ;;  %v14726_v29 = vunpack.c.h.b16 %v3491_v55  ;;  %v14728_v7 = vadd.f32 %v4531_v19, %v4484_v3  ;;  %v4632_v19 = vrot.slane %v4625_v58, %v14287_v60  ;;  %v13008_v55 = vld [vmem:[%s16896_s1 + $0x1ec] sm:$0xff]  }
 0x22e   :  { %5797 = vperm.xlu1 %12938, %v14598_v39   ;;  %v3470_v32 = vcombine.low %v3462_v0, %v3469_v51  ;;  %v4485_v12 = vmax.f32 %v4471_v43, 0.0 }
 0x22f   :  { %v3505_v57 = vrot.slane %v3503_v42, 1  ;;  %v3625_v44 = vrot.slane %v3503_v42, 2  ;;  %v3689_v62 = vrot.slane %v3503_v42, 3  ;;  %v3753_v40 = vrot.slane %v3503_v42, 4 }
 0x230   :  { %v3492_v63 = vpack.c.bf16 %v14655_v20, %v3470_v32  ;;  %v14731_v31 = vadd.f32 %v4540_v54, %v4485_v12  ;;  %v3817_v8 = vrot.slane %v3503_v42, 5  ;;  %v3881_v5 = vrot.slane %v3503_v42, 6 }
 0x231   :  { %v4074_v20 = vrot.slane %v14726_v29, 1  ;;  %v3945_v25 = vrot.slane %v3503_v42, 7  ;;  %v4137_v22 = vrot.slane %v14726_v29, 2  ;;  %v4639_v54 = vrot.slane %v14728_v7, %v14287_v60 }
 0x232   :  { %5809 = vperm.xlu1 %12938, %v14617_v49   ;;  %v3504_v39 = vunpack.c.l.b16 %v3492_v63  ;;  %v14736_v6 = vunpack.c.h.b16 %v3492_v63  ;;  %v4641_v34 = vcombine.low %v14731_v31, %v14608_v21  ;;  %v4201_v32 = vrot.slane %v14726_v29, 3  ;;  %v13009_v63 = vld [vmem:[%s16896_s1 + $0x1f4] sm:$0xff]  }
 0x234   :  { %v3506_v50 = vsel %vm216_vm1, %v3504_v39, %v3505_v57  ;;  %v3563_v13 = vrot.slane %v3504_v39, 7  ;;  %v3626_v49 = vrot.slane %v3504_v39, 1  ;;  %v3690_v61 = vrot.slane %v3504_v39, 2 }
 0x235   :  { %v3507_v16 = vpack.c.b16 %v3506_v50, %v3506_v50  ;;  %v3754_v10 = vrot.slane %v3504_v39, 3  ;;  %v3818_v37 = vrot.slane %v3504_v39, 4  ;;  %v3882_v38 = vrot.slane %v3504_v39, 5 }
 0x236   :  { %5813 = vperm.xlu1 %12938, %v14542_v17   ;;  %v3564_v14 = vsel %vm216_vm1, %v3563_v13, %v3503_v42  ;;  %v3627_v2 = vsel %vm216_vm1, %v3626_v49, %v3625_v44  ;;  %v3691_v53 = vsel %vm216_vm1, %v3690_v61, %v3689_v62  ;;  %v3946_v15 = vrot.slane %v3504_v39, 6  ;;  %v13012_v13 = vld [vmem:[%s16896_s1 + $0x20c] sm:$0xff]  }
 0x237   :  { %12276 = vmatmul.mubr.msk.bf16.vlgmr.msra.gmra.mrb[52].mxu1 %vm231_vm2, %v3507_v16  ;;  %v3565_v52 = vpack.c.b16 %v3564_v14, %v3564_v14  ;;  %v14754_v27 = vsel %vm216_vm1, %v3754_v10, %v3753_v40  ;;  %v11497_v17 = vpack.c.bf16 %v14733_v41, %v14733_v41  ;;  %v14764_v51 = vsel %vm216_vm1, %v3818_v37, %v3817_v8 }
 0x238   :  { %12288 = vmatpush3.bf16.msra.mxu1 %v13005_v46  ;;  %12291 = vmatprep.mubr.msk.bf16.mxu1 %vm13250_vm0, %v16945_v36  ;;  %v14767_v0 = vsel %vm216_vm1, %v3882_v38, %v3881_v5  ;;  %v4011_v43 = vrot.slane %v14736_v6, 7  ;;  %v14777_v56 = vsel %vm216_vm1, %v3946_v15, %v3945_v25  ;;  %v14790_v18 = vsel %vm216_vm1, %v14736_v6, %v4074_v20  ;;  %v13010_v20 = vld [vmem:[%s16896_s1 + $0x204] sm:$0xff]   ;;  %v13013_v38 = vld [vmem:[%s16896_s1 + $0x214] sm:$0xff]  }
 0x239   :  { %12284 = vmatmul.mubr.msk.bf16.vlgmr.msra.gmra.mrb[52].mxu0 %vm231_vm2, %v3565_v52  ;;  %12289 = vmatprep.subr.bf16.mxu1 %v16945_v36  ;;  %v4138_v58 = vrot.slane %v14736_v6, 1  ;;  %v4202_v12 = vrot.slane %v14736_v6, 2  ;;  %v5089_v23 = vrot.slane %v11497_v17, %v13437_v59  ;;  %v3628_v42 = vpack.c.b16 %v3627_v2, %v3627_v2  ;;  %v13014_v15 = vld [vmem:[%s16896_s1 + $0x224] sm:$0xff]  }
 0x23a   :  { %12296 = vmatpush3.bf16.msra.mxu0 %v13006_v48  ;;  %12299 = vmatprep.mubr.msk.bf16.mxu0 %vm13250_vm0, %v16945_v36  ;;  %v14786_v3 = vsel %vm216_vm1, %v4011_v43, %v14726_v29  ;;  %v4265_v44 = vrot.slane %v14726_v29, 4  ;;  %v4266_v39 = vrot.slane %v14736_v6, 3  ;;  %v4330_v40 = vrot.slane %v14736_v6, 4 }
 0x23b   :  { %12297 = vmatprep.subr.bf16.mxu0 %v16945_v36  ;;  %12941 = vset.pattern.permute.xlu1 %v16968_v11  ;;  %v14805_v57 = vsel %vm216_vm1, %v4138_v58, %v4137_v22  ;;  %v14812_v62 = vsel %vm216_vm1, %v4202_v12, %v4201_v32  ;;  %v4329_v11 = vrot.slane %v14726_v29, 5  ;;  %v4640_v8 = vcombine.low %v4632_v19, %v4639_v54  ;;  %v13015_v19 = vld [vmem:[%s16896_s1 + $0x21c] sm:$0xff]   ;;  %v13016_v54 = vld [vmem:[%s16896_s1 + $0x22c] sm:$0xff]  }
 0x23c   :  { %12290 = vmatpush3.bf16.msra.mxu1 %v13007_v26  ;;  %5737 = vperm.xlu1 %12941, %v14668_v30   ;;  %v4656_v5 = vrot.slane %v4642_v9, %v14287_v60  ;;  %v14824_v50 = vsel %vm216_vm1, %v4266_v39, %v4265_v44  ;;  %v4649_v29 = vrot.slane %v4641_v34, %v14287_v60  ;;  %v13011_v9 = vld [vmem:[%s16896_s1 + $0x1fc] sm:$0xff]   ;;  %v13022_v39 = vld [vmem:[%s16896_s1 + $0x264] sm:$0xff]  }
 0x23d   :  { %12303 = vmatprep.subr.bf16.mxu1 %v16945_v36  ;;  %v3692_v6 = vpack.c.b16 %v3691_v53, %v3691_v53  ;;  %v14833_v4 = vsel %vm216_vm1, %v4330_v40, %v4329_v11  ;;  %v4678_v47 = vpack.c.bf16 %v4640_v8, %v14681_v1  ;;  %v11496_v31 = vpack.c.bf16 %v4640_v8, %v4640_v8  ;;  %v13023_v40 = vld [vmem:[%s16896_s1 + $0x25c] sm:$0xff]  }
 0x23e   :  { %12298 = vmatpush3.bf16.msra.mxu0 %v13008_v55  ;;  %v14841_v21 = vcombine.low %v4649_v29, %v4656_v5  ;;  %v5192_v34 = vcombine.high %v5089_v23, %v5089_v23  ;;  %v14858_v37 = vrot.slane %v5089_v23, %v13437_v59  ;;  %v3756_v53 = vpack.c.b16 %v14754_v27, %v14754_v27  ;;  %v13017_v23 = vld [vmem:[%s16896_s1 + $0x234] sm:$0xff]   ;;  %v13026_v5 = vld [vmem:[%s16896_s1 + $0x284] sm:$0xff]  }
 0x23f   :  { %12292 = vmatmul.mubr.msk.bf16.vlgmr.msra.gmra.mrb[56].mxu1 %vm231_vm2, %v3628_v42  ;;  %12311 = vmatprep.subr.bf16.mxu0 %v16945_v36  ;;  %v4696_v46 = vrot.slane %v4678_v47, %v13437_v59  ;;  %v5074_v16 = vrot.slane %v11496_v31, %v13437_v59  ;;  %v3884_v42 = vpack.c.b16 %v14767_v0, %v14767_v0  ;;  %v13020_v0 = vld [vmem:[%s16896_s1 + $0x24c] sm:$0xff]   ;;  %v13030_v29 = vld [vmem:[%s16896_s1 + $0x2b4] sm:$0xff]  }
 0x240   :  { %12304 = vmatpush3.bf16.msra.mxu1 %v13009_v63  ;;  %12307 = vmatprep.mubr.msk.bf16.mxu1 %vm13250_vm0, %v16945_v36  ;;  %v4679_v49 = vpack.c.bf16 %v14733_v41, %v14841_v21  ;;  %v11484_v61 = vpack.c.bf16 %v14841_v21, %v14681_v1  ;;  %v14866_v48 = vrot.slane %v5192_v34, %v13437_v59  ;;  %v13018_v63 = vld [vmem:[%s16896_s1 + $0x244] sm:$0xff]   ;;  %v13031_v47 = vld [vmem:[%s16896_s1 + $0x2ac] sm:$0xff]   ;;  %v13033_v31 = vld [vmem:[%s16896_s1 + $0x294] sm:$0xff]  }
 0x241   :  { %12300 = vmatmul.mubr.msk.bf16.vlgmr.msra.gmra.mrb[56].mxu0 %vm231_vm2, %v3692_v6  ;;  %12305 = vmatprep.subr.bf16.mxu1 %v16945_v36  ;;  %v4697_v10 = vcombine.high %v4696_v46, %v4696_v46  ;;  %v5184_v14 = vcombine.high %v5074_v16, %v5074_v16  ;;  %v14869_v2 = vrot.slane %v5074_v16, %v13437_v59  ;;  %v13036_v16 = vld [vmem:[%s16896_s1 + $0x2cc] sm:$0xff]  }
 0x242   :  { %12312 = vmatpush3.bf16.msra.mxu0 %v13010_v20  ;;  %12315 = vmatprep.mubr.msk.bf16.mxu0 %vm13250_vm0, %v16945_v36  ;;  %v4718_v41 = vrot.slane %v4679_v49, %v13437_v59  ;;  %v4704_v25 = vrot.slane %v4696_v46, %v13437_v59  ;;  %v4013_v44 = vpack.c.b16 %v14786_v3, %v14786_v3  ;;  %v13024_v3 = vld [vmem:[%s16896_s1 + $0x26c] sm:$0xff]   ;;  %v13034_v46 = vld [vmem:[%s16896_s1 + $0x2c4] sm:$0xff]   ;;  %v13035_v49 = vld [vmem:[%s16896_s1 + $0x29c] sm:$0xff]  }
 0x243   :  { %12313 = vmatprep.subr.bf16.mxu0 %v16945_v36  ;;  %12942 = vset.pattern.permute.xlu1 %v16970_v33  ;;  %v3820_v33 = vpack.c.b16 %v14764_v51, %v14764_v51  ;;  %v14883_v26 = vrot.slane %v5184_v14, %v13437_v59  ;;  %v14888_v27 = vrot.slane %v4697_v10, %v13437_v59  ;;  %v13039_v1 = vld [vmem:[%s16896_s1 + $0x2ec] sm:$0xff]  }
 0x244   :  { %12306 = vmatpush3.bf16.msra.mxu1 %v13011_v9  ;;  %5689 = vperm.xlu1 %12942, %v14692_v45   ;;  %v4719_v52 = vcombine.high %v4718_v41, %v4718_v41  ;;  %v4726_v17 = vrot.slane %v4718_v41, %v13437_v59  ;;  %v5097_v51 = vcombine.low %v14869_v2, %v14858_v37  ;;  %v13037_v41 = vld [vmem:[%s16896_s1 + $0x2e4] sm:$0xff]  }
 0x245   :  { %12319 = vmatprep.subr.bf16.mxu1 %v16945_v36  ;;  %v11504_v43 = vcombine.high %v14869_v2, %v14858_v37  ;;  %v5200_v58 = vcombine.low %v14883_v26, %v14866_v48  ;;  %v4076_v11 = vpack.c.b16 %v14790_v18, %v14790_v18  ;;  %v13025_v18 = vld [vmem:[%s16896_s1 + $0x274] sm:$0xff]   ;;  %v4140_v8 = vpack.c.b16 %v14805_v57, %v14805_v57  ;;  %v13028_v57 = vld [vmem:[%s16896_s1 + $0x28c] sm:$0xff]  }
 0x246   :  { %12314 = vmatpush3.bf16.msra.mxu0 %v13012_v13  ;;  %v14900_v55 = vrot.slane %v4719_v52, %v13437_v59  ;;  %v14902_v22 = vcombine.high %v4704_v25, %v4726_v17  ;;  %v4268_v20 = vpack.c.b16 %v14824_v50, %v14824_v50  ;;  %v4332_v6 = vpack.c.b16 %v14833_v4, %v14833_v4  ;;  %v13032_v4 = vld [vmem:[%s16896_s1 + $0x2bc] sm:$0xff]   ;;  %v13041_v48 = vld [vmem:[%s16896_s1 + $0x2f4] sm:$0xff]  }
 0x247   :  { %12308 = vmatmul.mubr.msk.bf16.vlgmr.msra.gmra.mrb[60].mxu1 %vm231_vm2, %v3756_v53  ;;  %12327 = vmatprep.subr.bf16.mxu0 %v16945_v36  ;;  %v13038_v53 = vld [vmem:[%s16896_s1 + $0x2d4] sm:$0xff]   ;;  %v5207_v21 = vrot.slane %v5200_v58, %v13437_v59  ;;  %v13042_v17 = vld [vmem:[%s16896_s1 + $0x2fc] sm:$0xff]   ;;  %v5296_v26 = vrot.slane %v11504_v43, %v13437_v59 }
 0x248   :  { %12320 = vmatpush3.bf16.msra.mxu1 %v13013_v38  ;;  %12323 = vmatprep.mubr.msk.bf16.mxu1 %vm13250_vm0, %v16945_v36  ;;  %v4734_v32 = vcombine.low %v14888_v27, %v14900_v55  ;;  %v11492_v12 = vcombine.high %v14888_v27, %v14900_v55  ;;  %v4898_v9 = vrot.slane %v14902_v22, %v13437_v59 }
 0x249   :  { %12316 = vmatmul.mubr.msk.bf16.vlgmr.msra.gmra.mrb[60].mxu0 %vm231_vm2, %v3820_v33  ;;  %12321 = vmatprep.subr.bf16.mxu1 %v16945_v36  ;;  %v4811_v38 = vrot.slane %v11484_v61, %v13437_v59  ;;  %v13040_v61 = vld [vmem:[%s16896_s1 + $0x2dc] sm:$0xff]   ;;  %v5214_v52 = vrot.slane %v5207_v21, %v13437_v59  ;;  %v5303_v27 = vrot.slane %v5296_v26, %v13437_v59  ;;  %v13044_v21 = vld [vmem:[%s16896_s1 + $0x304] sm:$0xff]  }
 0x24a   :  { %12328 = vmatpush3.bf16.msra.mxu0 %v13014_v15  ;;  %12331 = vmatprep.mubr.msk.bf16.mxu0 %vm13250_vm0, %v16945_v36  ;;  %v4741_v50 = vrot.slane %v4734_v32, %v13437_v59  ;;  %v4905_v13 = vrot.slane %v4898_v9, %v13437_v59  ;;  %v4987_v10 = vrot.slane %v11492_v12, %v13437_v59  ;;  %v15135_v32 = vpop.permute.xlu0 %5717 }
 0x24b   :  { %12329 = vmatprep.subr.bf16.mxu0 %v16945_v36  ;;  %12944 = vset.pattern.permute.xlu1 %v16969_v28  ;;  %v3948_v28 = vpack.c.b16 %v14777_v56, %v14777_v56  ;;  %v13021_v56 = vld [vmem:[%s16896_s1 + $0x254] sm:$0xff]   ;;  %v4818_v33 = vrot.slane %v4811_v38, %v13437_v59  ;;  %v5104_v15 = vrot.slane %v5097_v51, %v13437_v59  ;;  %v15123_v51 = vpop.permute.xlu1 %5679  ;;  %v15173_v38 = vld [vmem:[%s16897_s2 + $0x10] ss:$0 sm:$0xff] }
 0x24c   :  { %12322 = vmatpush3.bf16.msra.mxu1 %v13015_v19  ;;  %5777 = vperm.xlu1 %12944, %v14668_v30   ;;  %v13019_v30 = vld [vmem:[%s16896_s1 + $0x23c] sm:$0xff]   ;;  %v4748_v34 = vrot.slane %v4741_v50, %v13437_v59  ;;  %v4994_v14 = vrot.slane %v4987_v10, %v13437_v59 }
 0x24d   :  { %12335 = vmatprep.subr.bf16.mxu1 %v16945_v36  ;;  %v5111_v25 = vrot.slane %v5104_v15, %v13437_v59  ;;  %v13045_v15 = vld [vmem:[%s16896_s1 + $0x31c] sm:$0xff]  }
 0x24e   :  { %12330 = vmatpush3.bf16.msra.mxu0 %v13016_v54 }
 0x24f   :  { %12324 = vmatmul.mubr.msk.bf16.vlgmr.msra.gmra.mrb[64].mxu1 %vm231_vm2, %v3884_v42  ;;  %12343 = vmatprep.subr.bf16.mxu0 %v16945_v36 }
 0x250   :  { %12336 = vmatpush3.bf16.msra.mxu1 %v13017_v23  ;;  %12339 = vmatprep.mubr.msk.bf16.mxu1 %vm13250_vm0, %v16945_v36 }
 0x251   :  { %12332 = vmatmul.mubr.msk.bf16.vlgmr.msra.gmra.mrb[64].mxu0 %vm231_vm2, %v3948_v28  ;;  %12337 = vmatprep.subr.bf16.mxu1 %v16945_v36 }
 0x252   :  { %12344 = vmatpush3.bf16.msra.mxu0 %v13018_v63  ;;  %12347 = vmatprep.mubr.msk.bf16.mxu0 %vm13250_vm0, %v16945_v36 }
 0x253   :  { %12345 = vmatprep.subr.bf16.mxu0 %v16945_v36  ;;  %5765 = vperm.xlu1 %12944, %v14692_v45  }
 0x254   :  { %12338 = vmatpush3.bf16.msra.mxu1 %v13019_v30 }
 0x255   :  { %12351 = vmatprep.subr.bf16.mxu1 %v16945_v36 }
 0x256   :  { %12346 = vmatpush3.bf16.msra.mxu0 %v13020_v0  ;;  %v5675_v0 = vld [vmem:[%s16896_s1 + $0x344] sm:$0x3] }
 0x257   :  { %12340 = vmatmul.mubr.msk.bf16.vlgmr.msra.gmra.mrb[68].mxu1 %vm231_vm2, %v4013_v44  ;;  %12359 = vmatprep.subr.bf16.mxu0 %v16945_v36 }
 0x258   :  { %12352 = vmatpush3.bf16.msra.mxu1 %v13021_v56  ;;  %12355 = vmatprep.mubr.msk.bf16.mxu1 %vm13250_vm0, %v16945_v36 }
 0x259   :  { %12348 = vmatmul.mubr.msk.bf16.vlgmr.msra.gmra.mrb[68].mxu0 %vm231_vm2, %v4076_v11  ;;  %12353 = vmatprep.subr.bf16.mxu1 %v16945_v36 }
 0x25a   :  { %12360 = vmatpush3.bf16.msra.mxu0 %v13022_v39  ;;  %12363 = vmatprep.mubr.msk.bf16.mxu0 %vm13250_vm0, %v16945_v36  ;;  %v5676_v39 = vunpack.c.l.bf16 %v5675_v0 }
 0x25b   :  { %12361 = vmatprep.subr.bf16.mxu0 %v16945_v36  ;;  %12946 = vset.pattern.permute.xlu1 %v16972_v24  ;;  %v4204_v24 = vpack.c.b16 %v14812_v62, %v14812_v62  ;;  %v13029_v62 = vld [vmem:[%s16896_s1 + $0x2a4] sm:$0xff]  }
 0x25c   :  { %12354 = vmatpush3.bf16.msra.mxu1 %v13023_v40  ;;  %5805 = vperm.xlu1 %12946, %v14692_v45   ;;  %v13027_v45 = vld [vmem:[%s16896_s1 + $0x27c] sm:$0xff]   ;;  %v16977_v40 = vld [vmem:[#allocation5_spill] sm:$0xff] }
 0x25d   :  { %12367 = vmatprep.subr.bf16.mxu1 %v16945_v36 }
 0x25e   :  { %12362 = vmatpush3.bf16.msra.mxu0 %v13024_v3  ;;  %v16978_v3 = vsub.s32 0, %v16977_v40 }
 0x25f   :  { %12356 = vmatmul.mubr.msk.bf16.vlgmr.msra.gmra.mrb[72].mxu1 %vm231_vm2, %v4140_v8  ;;  %12375 = vmatprep.subr.bf16.mxu0 %v16945_v36  ;;  %v16979_v8 = vsub.s32 1, %v16977_v40 }
 0x260   :  { %12368 = vmatpush3.bf16.msra.mxu1 %v13025_v18  ;;  %12371 = vmatprep.mubr.msk.bf16.mxu1 %vm13250_vm0, %v16945_v36  ;;  %v15150_v18 = vrot.slane %v5676_v39, %v16978_v3 }
 0x261   :  { %12364 = vmatmul.mubr.msk.bf16.vlgmr.msra.gmra.mrb[72].mxu0 %vm231_vm2, %v4204_v24  ;;  %12369 = vmatprep.subr.bf16.mxu1 %v16945_v36 }
 0x262   :  { %12376 = vmatpush3.bf16.msra.mxu0 %v13026_v5  ;;  %12379 = vmatprep.mubr.msk.bf16.mxu0 %vm13250_vm0, %v16945_v36  ;;  %v15154_v5 = vrot.slane %v5676_v39, %v16979_v8 }
 0x263   :  { %12377 = vmatprep.subr.bf16.mxu0 %v16945_v36 }
 0x264   :  { %12370 = vmatpush3.bf16.msra.mxu1 %v13027_v45 }
 0x265   :  { %12383 = vmatprep.subr.bf16.mxu1 %v16945_v36 }
 0x266   :  { %12378 = vmatpush3.bf16.msra.mxu0 %v13028_v57 }
 0x267   :  { %12372 = vmatmul.mubr.msk.bf16.vlgmr.msra.gmra.mrb[76].mxu1 %vm231_vm2, %v4268_v20  ;;  %12399 = vmatprep.subr.bf16.mxu0 %v16945_v36  ;;  %v16980_v20 = vsub.s32 2, %v16977_v40 }
 0x268   :  { %12384 = vmatpush3.bf16.msra.mxu1 %v13029_v62  ;;  %12387 = vmatprep.mubr.msk.bf16.mxu1 %vm13250_vm0, %v16945_v36 }
 0x269   :  { %12380 = vmatmul.mubr.msk.bf16.vlgmr.msra.gmra.mrb[76].mxu0 %vm231_vm2, %v4332_v6  ;;  %12385 = vmatprep.subr.bf16.mxu1 %v16945_v36 }
 0x26a   :  { %12400 = vmatpush3.bf16.msra.mxu0 %v13030_v29  ;;  %12403 = vmatprep.mubr.msk.bf16.mxu0 %vm13250_vm0, %v16945_v36  ;;  %v15160_v29 = vrot.slane %v5676_v39, %v16980_v20 }
 0x26b   :  { %12401 = vmatprep.subr.bf16.mxu0 %v16945_v36 }
 0x26c   :  { %12386 = vmatpush3.bf16.msra.mxu1 %v13031_v47 }
 0x26d   :  { %12391 = vmatprep.subr.bf16.mxu1 %v16945_v36 }
 0x26e   :  { %12402 = vmatpush3.bf16.msra.mxu0 %v13032_v4 }
 0x26f   :  { %12388 = vmatmul.mubr.msk.bf16.vlgmr.msra.gmra.mrb[80].mxu1 %vm231_vm2, %v4748_v34  ;;  %12407 = vmatprep.subr.bf16.mxu0 %v16945_v36 }
 0x270   :  { %12392 = vmatpush3.bf16.msra.mxu1 %v13033_v31  ;;  %12395 = vmatprep.mubr.msk.bf16.mxu1 %vm13250_vm0, %v16945_v36 }
 0x271   :  { %12404 = vmatmul.mubr.msk.bf16.vlgmr.msra.gmra.mrb[80].mxu0 %vm231_vm2, %v4905_v13  ;;  %12393 = vmatprep.subr.bf16.mxu1 %v16945_v36 }
 0x272   :  { %12408 = vmatpush3.bf16.msra.mxu0 %v13034_v46  ;;  %12411 = vmatprep.mubr.msk.bf16.mxu0 %vm13250_vm0, %v16945_v36  ;;  %v16981_v46 = vsub.s32 3, %v16977_v40 }
 0x273   :  { %12409 = vmatprep.subr.bf16.mxu0 %v16945_v36 }
 0x274   :  { %12394 = vmatpush3.bf16.msra.mxu1 %v13035_v49  ;;  %v15167_v13 = vrot.slane %v5676_v39, %v16981_v46 }
 0x275   :  { %12415 = vmatprep.subr.bf16.mxu1 %v16945_v36 }
 0x276   :  { %12410 = vmatpush3.bf16.msra.mxu0 %v13036_v16 }
 0x277   :  { %12423 = vmatprep.subr.bf16.mxu0 %v16945_v36 }
 0x279   :  { %12412 = vmatmul.mubr.msk.bf16.vlgmr.msra.gmra.mrb[84].mxu0 %vm231_vm2, %v4994_v14 }
 0x27a   :  { %12424 = vmatpush3.bf16.msra.mxu0 %v13037_v41  ;;  %12427 = vmatprep.mubr.msk.bf16.mxu0 %vm13250_vm0, %v16945_v36 }
 0x27b   :  { %12396 = vmatmul.mubr.msk.bf16.vlgmr.msra.gmra.mrb[80].mxu1 %vm231_vm2, %v4818_v33  ;;  %12425 = vmatprep.subr.bf16.mxu0 %v16945_v36 }
 0x27c   :  { %12416 = vmatpush3.bf16.msra.mxu1 %v13038_v53  ;;  %12419 = vmatprep.mubr.msk.bf16.mxu1 %vm13250_vm0, %v16945_v36 }
 0x27d   :  { %12417 = vmatprep.subr.bf16.mxu1 %v16945_v36 }
 0x27e   :  { %12426 = vmatpush3.bf16.msra.mxu0 %v13039_v1  ;;  %v13043_v1 = vld [vmem:[%s16896_s1 + $0x314] sm:$0xff]  }
 0x27f   :  { %12439 = vmatprep.subr.bf16.mxu0 %v16945_v36 }
 0x280   :  { %12418 = vmatpush3.bf16.msra.mxu1 %v13040_v61 }
 0x281   :  { %12428 = vmatmul.mubr.msk.bf16.vlgmr.msra.gmra.mrb[88].mxu0 %vm231_vm2, %v5214_v52  ;;  %12431 = vmatprep.subr.bf16.mxu1 %v16945_v36  ;;  %v13046_v52 = vld [vmem:[%s16896_s1 + $0x30c] sm:$0xff]  }
 0x282   :  { %12443 = vmatprep.mubr.msk.bf16.mxu0 %vm13250_vm0, %v16945_v36  ;;  %12440 = vmatpush3.bf16.msra.mxu0 %v13043_v1 }
 0x283   :  { %12420 = vmatmul.mubr.msk.bf16.vlgmr.msra.gmra.mrb[84].mxu1 %vm231_vm2, %v5111_v25  ;;  %12441 = vmatprep.subr.bf16.mxu0 %v16945_v36 }
 0x284   :  { %12432 = vmatpush3.bf16.msra.mxu1 %v13041_v48  ;;  %12435 = vmatprep.mubr.msk.bf16.mxu1 %vm13250_vm0, %v16945_v36 }
 0x285   :  { %12433 = vmatprep.subr.bf16.mxu1 %v16945_v36  ;;  %v15125_v19 = vpop.permute.xlu1 %5684 }
 0x286   :  { %12442 = vmatpush3.bf16.msra.mxu0 %v13045_v15 }
 0x287   :  { %12455 = vmatprep.subr.bf16.mxu0 %v16945_v36 }
 0x288   :  { %12434 = vmatpush3.bf16.msra.mxu1 %v13042_v17  ;;  %v5699_v23 = vpop.permute.xlu0 %5698 }
 0x289   :  { %12447 = vmatprep.subr.bf16.mxu1 %v16945_v36  ;;  %v5714_v0 = vmul.f32 %v15150_v18, %v5699_v23 }
 0x28b   :  { %12436 = vmatmul.mubr.msk.bf16.vlgmr.msra.gmra.mrb[88].mxu1 %vm231_vm2, %v5303_v27 }
 0x28c   :  { %12451 = vmatprep.mubr.msk.bf16.mxu1 %vm13250_vm0, %v16945_v36  ;;  %12448 = vmatpush3.bf16.msra.mxu1 %v13044_v21 }
 0x28d   :  { %12449 = vmatprep.subr.bf16.mxu1 %v16945_v36 }
 0x290   :  { %12450 = vmatpush3.bf16.msra.mxu1 %v13046_v52 }
 0x291   :  { %v15127_v55 = vpop.permute.xlu1 %5721  ;;  %v15141_v63 = vpop.permute.xlu0 %5757  ;;  %12463 = vmatprep.subr.bf16.mxu1 %v16945_v36 }
 0x295   :  { %v5774_v30 = vpop.permute.xlu0 %5773 }
 0x296   :  { %v5694_v22 = vpop.permute.xlu1 %5693 }
 0x297   :  { %v5713_v26 = vmul.f32 %v15150_v18, %v5694_v22  ;;  %v5788_v22 = vmul.f32 %v15160_v29, %v5774_v30 }
 0x29b   :  { %v5730_v58 = vpop.permute.xlu1 %5729 }
 0x29c   :  { %v15146_v56 = vpop.permute.xlu0 %5801  ;;  %v5747_v27 = vmul.f32 %v15154_v5, %v5730_v58 }
 0x29f   :  { %v5734_v37 = vpop.permute.xlu1 %5733 }
 0x2a1   :  { %v5704_v11 = vpop.permute.xlu0 %5703 }
 0x2a2   :  { %v5715_v57 = vmul.f32 %v15150_v18, %v5704_v11 }
 0x2a4   :  { %v15129_v2 = vpop.permute.xlu1 %5761 }
 0x2a6   :  { %v5726_v62 = vpop.permute.xlu0 %5725 }
 0x2a7   :  { %v5746_v9 = vmul.f32 %v15154_v5, %v5726_v62 }
 0x2a8   :  { %v15131_v43 = vpop.permute.xlu1 %5769 }
 0x2ab   :  { %v5818_v33 = vpop.permute.xlu0 %5817 }
 0x2ac   :  { %v5829_v61 = vmul.f32 %v15167_v13, %v5818_v33 }
 0x2ad   :  { %v15133_v54 = vpop.permute.xlu1 %5797 }
 0x2b1   :  { %v15137_v12 = vpop.permute.xlu1 %5809 }
 0x2b5   :  { %v15139_v42 = vpop.permute.xlu1 %5813 }
 0x2b6   :  { %v5828_v23 = vmul.f32 %v15167_v13, %v15139_v42 }
 0x2bb   :  { %v5738_v28 = vpop.permute.xlu1 %5737 }
 0x2bc   :  { %v5749_v45 = vmul.f32 %v15154_v5, %v5738_v28  ;;  %v5748_v28 = vmul.f32 %v15154_v5, %v5734_v37  ;;  %v5827_v37 = vmul.f32 %v15167_v13, %v15137_v12 }
 0x2be   :  { %v5755_v47 = vadd.f32 %v5749_v45, %v5715_v57  ;;  %v5753_v45 = vadd.f32 %v5747_v27, %v5713_v26  ;;  %v5787_v57 = vmul.f32 %v15160_v29, %v15131_v43  ;;  %v5754_v62 = vadd.f32 %v5748_v28, %v5714_v0 }
 0x2c3   :  { %v5690_v44 = vpop.permute.xlu1 %5689 }
 0x2c4   :  { %v5712_v6 = vmul.f32 %v15150_v18, %v5690_v44 }
 0x2c6   :  { %v5752_v31 = vadd.f32 %v5746_v9, %v5712_v6  ;;  %v5793_v6 = vadd.f32 %v5787_v57, %v5753_v45 }
 0x2cb   :  { %v5778_v24 = vpop.permute.xlu1 %5777 }
 0x2cc   :  { %v5789_v14 = vmul.f32 %v15160_v29, %v5778_v24 }
 0x2ce   :  { %v5795_v53 = vadd.f32 %v5789_v14, %v5755_v47  ;;  %v5794_v47 = vadd.f32 %v5788_v22, %v5754_v62 }
 0x2d0   :  { %v5835_v48 = vadd.f32 %v5829_v61, %v5795_v53  ;;  %v5834_v30 = vadd.f32 %v5828_v23, %v5794_v47 }
 0x2d2   :  { %v5766_v50 = vpop.permute.xlu1 %5765  ;;  %v15195_v25 = vadd.f32 %v15173_v38, %v5835_v48  ;;  %v15214_v12 = vadd.f32 %v15173_v38, %v5834_v30 }
 0x2d3   :  { %v5786_v4 = vmul.f32 %v15160_v29, %v5766_v50 }
 0x2d4   :  { %16983 = vst [vmem:[#allocation9_spill] sm:$0xff] %v15195_v25  ;;  %16985 = vst [vmem:[#allocation7_spill] sm:$0xff] %v15214_v12  ;;  %v11588_v27 = vpack.c.bf16 %v15214_v12, %v15214_v12 }
 0x2d5   :  { %v5792_v34 = vadd.f32 %v5786_v4, %v5752_v31 }
 0x2d6   :  { %v7209_v45 = vrot.slane %v11588_v27, %v13437_v59 }
 0x2db   :  { %v5806_v49 = vpop.permute.xlu1 %5805 }
 0x2dc   :  { %v5826_v16 = vmul.f32 %v15167_v13, %v5806_v49 }
 0x2de   :  { %v5832_v10 = vadd.f32 %v5826_v16, %v5792_v34  ;;  %v5833_v16 = vadd.f32 %v5827_v37, %v5793_v6  ;;  %v15230_v6 = vrot.slane %v7209_v45, %v13437_v59 }
 0x2e0   :  { %v15176_v41 = vadd.f32 %v15173_v38, %v5832_v10  ;;  %v15211_v53 = vadd.f32 %v15173_v38, %v5833_v16  ;;  %v15245_v30 = vcombine.high %v15230_v6, %v15230_v6 }
 0x2e2   :  { %16982 = vst [vmem:[#allocation6_spill] sm:$0xff] %v15176_v41  ;;  %16984 = vst [vmem:[#allocation8_spill] sm:$0xff] %v15211_v53  ;;  %v7347_v27 = vshll.u32 %v15245_v30, 16 }
 0x30a   :  { %v3557_v17 = vpop.f32.mrb[52].mxu1 }
 0x30b   :  { %v12277_v44 = vpop.f32.mrb[53].mxu1 }
 0x30c   :  { %v3560_v39 = vpop.f32.mrb[54].mxu1  ;;  %v3615_v11 = vpop.f32.mrb[52].mxu0 }
 0x30d   :  { %v3616_v40 = vadd.f32 %v3615_v11, %v3557_v17  ;;  %v12278_v3 = vpop.f32.mrb[55].mxu1  ;;  %v12285_v8 = vpop.f32.mrb[53].mxu0  ;;  %v15218_v17 = vpack.c.bf16 %v15214_v12, %v15211_v53 }
 0x30e   :  { %v3618_v24 = vpop.f32.mrb[54].mxu0 }
 0x30f   :  { %v12286_v20 = vpop.f32.mrb[55].mxu0  ;;  %v7202_v0 = vrot.slane %v15218_v17, %v13437_v59 }
 0x310   :  { %v15227_v20 = vpack.c.bf16 %v15195_v25, %v15195_v25 }
 0x311   :  { %v7210_v62 = vcombine.high %v7202_v0, %v7202_v0  ;;  %v15233_v23 = vrot.slane %v7202_v0, %v13437_v59 }
 0x312   :  { %v3678_v58 = vpop.f32.mrb[56].mxu1 }
 0x313   :  { %v3684_v50 = vadd.f32 %v3678_v58, %v3616_v40  ;;  %v12293_v4 = vpop.f32.mrb[57].mxu1  ;;  %v7211_v58 = vcombine.high %v7209_v45, %v7209_v45  ;;  %v15236_v47 = vrot.slane %v7210_v62, %v13437_v59 }
 0x314   :  { %v3681_v9 = vpop.f32.mrb[58].mxu1  ;;  %v3742_v31 = vpop.f32.mrb[56].mxu0 }
 0x315   :  { %v3748_v34 = vadd.f32 %v3742_v31, %v3684_v50  ;;  %v12294_v46 = vpop.f32.mrb[59].mxu1  ;;  %v12301_v43 = vpop.f32.mrb[57].mxu0  ;;  %v15241_v16 = vrot.slane %v7211_v58, %v13437_v59 }
 0x316   :  { %v3745_v49 = vpop.f32.mrb[58].mxu0 }
 0x317   :  { %v12302_v10 = vpop.f32.mrb[59].mxu0 }
 0x31a   :  { %v3806_v14 = vpop.f32.mrb[60].mxu1 }
 0x31b   :  { %v3812_v42 = vadd.f32 %v3806_v14, %v3748_v34  ;;  %v12309_v33 = vpop.f32.mrb[61].mxu1  ;;  %v8022_v34 = vrot.slane %v15227_v20, %v13437_v59  ;;  %v15249_v14 = vcombine.high %v15233_v23, %v15233_v23 }
 0x31c   :  { %v3809_v1 = vpop.f32.mrb[62].mxu1  ;;  %v3870_v21 = vpop.f32.mrb[60].mxu0 }
 0x31d   :  { %v3876_v61 = vadd.f32 %v3870_v21, %v3812_v42  ;;  %v12310_v15 = vpop.f32.mrb[63].mxu1  ;;  %v12317_v52 = vpop.f32.mrb[61].mxu0  ;;  %v15253_v42 = vcombine.high %v15236_v47, %v15236_v47  ;;  %v15257_v1 = vcombine.high %v15241_v16, %v15241_v16  ;;  %v15260_v21 = vrot.slane %v8022_v34, %v13437_v59 }
 0x31e   :  { %v3873_v48 = vpop.f32.mrb[62].mxu0  ;;  %v7331_v15 = vshll.u32 %v15230_v6, 16  ;;  %v7334_v52 = vshrl.u32 %v15230_v6, 16  ;;  %v7318_v0 = vshrl.u32 %v15249_v14, 16  ;;  %v8524_v45 = vcombine.high %v8022_v34, %v8022_v34 }
 0x31f   :  { %v12318_v26 = vpop.f32.mrb[63].mxu0  ;;  %v7339_v48 = vshll.u32 %v15241_v16, 16 }
 0x320   :  { %v7342_v26 = vshrl.u32 %v15241_v16, 16 }
 0x322   :  { %v3934_v28 = vpop.f32.mrb[64].mxu1 }
 0x323   :  { %v3940_v44 = vadd.f32 %v3934_v28, %v3876_v61  ;;  %v12325_v39 = vpop.f32.mrb[65].mxu1  ;;  %v7326_v61 = vshrl.u32 %v15253_v42, 16 }
 0x324   :  { %v3937_v11 = vpop.f32.mrb[66].mxu1  ;;  %v3998_v40 = vpop.f32.mrb[64].mxu0 }
 0x325   :  { %v4004_v3 = vadd.f32 %v3998_v40, %v3940_v44  ;;  %v12326_v8 = vpop.f32.mrb[67].mxu1  ;;  %v12333_v24 = vpop.f32.mrb[65].mxu0  ;;  %v7323_v44 = vshll.u32 %v15253_v42, 16  ;;  %v7350_v40 = vshrl.u32 %v15245_v30, 16  ;;  %v7333_v62 = vsel %vm13744_vm4, %v7326_v61, %v7331_v15  ;;  %v11382_v61 = vld [vmem:[%s16897_s2 + $0x1] ss:$0 sm:$0xff] }
 0x326   :  { %v4001_v57 = vpop.f32.mrb[66].mxu0  ;;  %v8531_v15 = vrot.slane %v8524_v45, %v13437_v59 }
 0x327   :  { %v12334_v22 = vpop.f32.mrb[67].mxu0  ;;  %v13094_v57 = vld [vmem:[%s16896_s1 + $0x4b0] sm:$0xff]  }
 0x32a   :  { %v4063_v37 = vpop.f32.mrb[68].mxu1 }
 0x32b   :  { %v4069_v50 = vadd.f32 %v4063_v37, %v4004_v3  ;;  %v12341_v4 = vpop.f32.mrb[69].mxu1  ;;  %v7355_v3 = vshll.u32 %v15257_v1, 16 }
 0x32c   :  { %v4066_v9 = vpop.f32.mrb[70].mxu1  ;;  %v4126_v31 = vpop.f32.mrb[68].mxu0  ;;  %v7341_v4 = vsel %vm13744_vm4, %v7334_v52, %v7339_v48 }
 0x32d   :  { %v4132_v46 = vadd.f32 %v4126_v31, %v4069_v50  ;;  %v12342_v43 = vpop.f32.mrb[71].mxu1  ;;  %v12349_v49 = vpop.f32.mrb[69].mxu0  ;;  %v8043_v50 = vshll.u32 %v15260_v21, 16  ;;  %v7349_v9 = vsel %vm13744_vm4, %v7342_v26, %v7347_v27 }
 0x32e   :  { %v4129_v10 = vpop.f32.mrb[70].mxu0  ;;  %v7357_v43 = vsel %vm13744_vm4, %v7350_v40, %v7355_v3  ;;  %v8038_v49 = vshrl.u32 %v15257_v1, 16 }
 0x32f   :  { %v12350_v33 = vpop.f32.mrb[71].mxu0 }
 0x330   :  { %v8096_v33 = vcombine.low %v7341_v4, %v7349_v9  ;;  %v8045_v52 = vsel %vm13744_vm4, %v8038_v49, %v8043_v50  ;;  %v8540_v50 = vshrl.u32 %v15260_v21, 16  ;;  %v7408_v49 = vcombine.low %v7333_v62, %v7341_v4 }
 0x331   :  { %v8097_v27 = vcombine.low %v7357_v43, %v8045_v52  ;;  %v6881_v4 = vunpack.c.l.b16 %v15227_v20 }
 0x332   :  { %v4190_v28 = vpop.f32.mrb[72].mxu1 }
 0x333   :  { %v4196_v39 = vadd.f32 %v4190_v28, %v4132_v46  ;;  %v12357_v11 = vpop.f32.mrb[73].mxu1  ;;  %v15281_v46 = vsel %vm13744_vm4, %v7318_v0, %v7323_v44  ;;  %v8111_v28 = vrot.slane %v8096_v33, %v13437_v59 }
 0x334   :  { %v4193_v8 = vpop.f32.mrb[74].mxu1  ;;  %v4254_v24 = vpop.f32.mrb[72].mxu0  ;;  %v8095_v10 = vcombine.low %v15281_v46, %v7333_v62  ;;  %v16987_v11 = vld [vmem:[#allocation11_spill] sm:$0xff]  ;;  %v15311_v62 = vpack.c.bf16 %v15176_v41, %v15176_v41 }
 0x335   :  { %v4260_v22 = vadd.f32 %v4254_v24, %v4196_v39  ;;  %v12358_v58 = vpop.f32.mrb[75].mxu1  ;;  %v12365_v37 = vpop.f32.mrb[73].mxu0  ;;  %v7409_v39 = vcombine.low %v7349_v9, %v7357_v43  ;;  %v1492_v40 = vadd.f32 %v11382_v61, %v16987_v11  ;;  %v8118_v24 = vrot.slane %v8097_v27, %v13437_v59 }
 0x336   :  { %v4257_v31 = vpop.f32.mrb[74].mxu0  ;;  %v8104_v48 = vrot.slane %v8095_v10, %v13437_v59  ;;  %v7801_v11 = vcombine.low %v15230_v6, %v15241_v16 }
 0x337   :  { %v12366_v34 = vpop.f32.mrb[75].mxu0  ;;  %v15303_v61 = vrot.slane %v7409_v39, %v13437_v59  ;;  %v6880_v39 = vunpack.c.l.b16 %v15311_v62 }
 0x338   :  { %v8119_v58 = vcombine.low %v8104_v48, %v8111_v28  ;;  %v8545_v34 = vshll.u32 %v8531_v15, 16  ;;  %v7564_v48 = vcombine.low %v15253_v42, %v15230_v6  ;;  %v15317_v28 = vrot.slane %v7408_v49, %v13437_v59 }
 0x339   :  { %v6945_v49 = vrot.slane %v6880_v39, 1 }
 0x33a   :  { %v4318_v26 = vpop.f32.mrb[76].mxu1  ;;  %v8126_v33 = vrot.slane %v8119_v58, %v13437_v59  ;;  %v8589_v20 = vcombine.low %v15317_v28, %v15303_v61 }
 0x33b   :  { %v4324_v0 = vadd.f32 %v4318_v26, %v4260_v22  ;;  %v12373_v44 = vpop.f32.mrb[77].mxu1  ;;  %v8133_v22 = vrot.slane %v8118_v24, %v13437_v59  ;;  %v7565_v26 = vcombine.low %v15241_v16, %v15245_v30  ;;  %v11613_v24 = vcombine.high %v15230_v6, %v15241_v16 }
 0x33c   :  { %v4321_v3 = vpop.f32.mrb[78].mxu1  ;;  %v4382_v8 = vpop.f32.mrb[76].mxu0  ;;  %v8547_v44 = vsel %vm13744_vm4, %v8540_v50, %v8545_v34  ;;  %v15344_v16 = vrot.slane %v7801_v11, %v13437_v59 }
 0x33d   :  { %v4388_v45 = vadd.f32 %v4382_v8, %v4324_v0  ;;  %v12374_v37 = vpop.f32.mrb[79].mxu1  ;;  %v12381_v31 = vpop.f32.mrb[77].mxu0  ;;  %v15314_v27 = vcombine.low %v8126_v33, %v8133_v22  ;;  %v15320_v0 = vrot.slane %v7565_v26, %v13437_v59  ;;  %v8581_v30 = vcombine.low %v8045_v52, %v8547_v44 }
 0x33e   :  { %v4385_v10 = vpop.f32.mrb[78].mxu0  ;;  %v6882_v8 = vrot.slane %v6881_v4, 7  ;;  %v8800_v37 = vcombine.low %v15260_v21, %v8531_v15  ;;  %v8596_v31 = vrot.slane %v8589_v20, %v13437_v59  ;;  %v15358_v26 = vsel %vm216_vm1, %v6881_v4, %v6945_v49 }
 0x33f   :  { %v15300_v9 = vadd.f32 %v4388_v45, %v1492_v40  ;;  %v12382_v43 = vpop.f32.mrb[79].mxu0  ;;  %v15328_v40 = vrot.slane %v7564_v48, %v13437_v59  ;;  %v8588_v58 = vrot.slane %v8581_v30, %v13437_v59  ;;  %v8330_v45 = vcombine.low %v15257_v1, %v15260_v21 }
 0x340   :  { %v15348_v22 = vsel %vm216_vm1, %v6882_v8, %v6880_v39  ;;  %v15351_v21 = vrot.slane %v11613_v24, %v13437_v59  ;;  %v8807_v48 = vrot.slane %v8800_v37, %v13437_v59  ;;  %v7008_v8 = vrot.slane %v6880_v39, 2 }
 0x341   :  { %v8338_v50 = vcombine.low %v15328_v40, %v15320_v0  ;;  %v8603_v10 = vrot.slane %v8588_v58, %v13437_v59  ;;  %v8337_v33 = vrot.slane %v8330_v45, %v13437_v59  ;;  %v7009_v24 = vrot.slane %v6881_v4, 1 }
 0x342   :  { %v8808_v30 = vcombine.low %v15344_v16, %v15351_v21  ;;  %v8822_v11 = vrot.slane %v8807_v48, %v13437_v59 }
 0x343   :  { %v8345_v1 = vrot.slane %v8338_v50, %v13437_v59  ;;  %v15353_v15 = vcombine.low %v8596_v31, %v8603_v10  ;;  %v8352_v43 = vrot.slane %v8337_v33, %v13437_v59  ;;  %v7072_v50 = vrot.slane %v6880_v39, 3 }
 0x344   :  { %v4955_v3 = vpop.f32.mrb[80].mxu0  ;;  %v8815_v58 = vrot.slane %v8808_v30, %v13437_v59  ;;  %v15372_v48 = vsel %vm216_vm1, %v7009_v24, %v7008_v8 }
 0x345   :  { %v12405_v52 = vpop.f32.mrb[81].mxu0  ;;  %v15360_v44 = vcombine.low %v8345_v1, %v8352_v43  ;;  %v4968_v45 = vrot.slane %v4955_v3, %v14287_v60 }
 0x346   :  { %v4958_v34 = vpop.f32.mrb[82].mxu0  ;;  %v15367_v49 = vcombine.low %v8815_v58, %v8822_v11 }
 0x347   :  { %v12406_v6 = vpop.f32.mrb[83].mxu0  ;;  %v7073_v34 = vrot.slane %v6881_v4, 2  ;;  %v4969_v30 = vcombine.high %v4968_v45, %v4968_v45 }
 0x34c   :  { %v5044_v20 = vpop.f32.mrb[84].mxu0 }
 0x34d   :  { %v12413_v52 = vpop.f32.mrb[85].mxu0  ;;  %v5057_v10 = vrot.slane %v5044_v20, %v14287_v60 }
 0x34e   :  { %v4868_v31 = vpop.f32.mrb[80].mxu1  ;;  %v5047_v37 = vpop.f32.mrb[86].mxu0 }
 0x34f   :  { %v4881_v33 = vrot.slane %v4868_v31, %v14287_v60  ;;  %v12397_v6 = vpop.f32.mrb[81].mxu1  ;;  %v12414_v1 = vpop.f32.mrb[87].mxu0  ;;  %v15375_v37 = vsel %vm216_vm1, %v7073_v34, %v7072_v50  ;;  %v5058_v4 = vcombine.high %v5057_v10, %v5057_v10 }
 0x350   :  { %v4871_v43 = vpop.f32.mrb[82].mxu1 }
 0x351   :  { %v4882_v53 = vcombine.high %v4881_v33, %v4881_v33  ;;  %v4972_v3 = vadd.f32 %v4968_v45, %v4881_v33  ;;  %v12398_v52 = vpop.f32.mrb[83].mxu1 }
 0x353   :  { %v4973_v39 = vadd.f32 %v4969_v30, %v4882_v53  ;;  %v5061_v11 = vadd.f32 %v5057_v10, %v4972_v3 }
 0x354   :  { %v5264_v58 = vpop.f32.mrb[88].mxu0 }
 0x355   :  { %v12429_v20 = vpop.f32.mrb[89].mxu0  ;;  %v5062_v41 = vadd.f32 %v5058_v4, %v4973_v39  ;;  %v5277_v1 = vrot.slane %v5264_v58, %v14287_v60  ;;  %v11508_v4 = vld [vmem:[%s16897_s2 + $0x6] ss:$0 sm:$0xff] }
 0x356   :  { %v5161_v31 = vpop.f32.mrb[84].mxu1  ;;  %v5267_v6 = vpop.f32.mrb[90].mxu0 }
 0x357   :  { %v5174_v8 = vrot.slane %v5161_v31, %v14287_v60  ;;  %v12421_v24 = vpop.f32.mrb[85].mxu1  ;;  %v12430_v43 = vpop.f32.mrb[91].mxu0  ;;  %v5278_v50 = vcombine.high %v5277_v1, %v5277_v1 }
 0x358   :  { %v5164_v25 = vpop.f32.mrb[86].mxu1 }
 0x359   :  { %v5175_v45 = vcombine.high %v5174_v8, %v5174_v8  ;;  %v5178_v33 = vadd.f32 %v5174_v8, %v5061_v11  ;;  %v12422_v52 = vpop.f32.mrb[87].mxu1  ;;  %v5710_v11 = vmul.f32 %v15150_v18, %v15123_v51  ;;  %v5744_v8 = vmul.f32 %v15154_v5, %v15135_v32  ;;  %v11516_v32 = vld [vmem:[%s16897_s2 + $0x8] ss:$0 sm:$0xff] }
 0x35a   :  { %v5784_v51 = vmul.f32 %v15160_v29, %v15141_v63 }
 0x35b   :  { %v5179_v34 = vadd.f32 %v5175_v45, %v5062_v41  ;;  %v5281_v12 = vadd.f32 %v5277_v1, %v5178_v33  ;;  %v5711_v41 = vmul.f32 %v15150_v18, %v15125_v19  ;;  %v5745_v1 = vmul.f32 %v15154_v5, %v15127_v55 }
 0x35c   :  { %v5750_v45 = vadd.f32 %v5744_v8, %v5710_v11  ;;  %v5824_v19 = vmul.f32 %v15167_v13, %v15133_v54  ;;  %v5825_v55 = vmul.f32 %v15167_v13, %v15146_v56  ;;  %v13048_v8 = vld [vmem:[%s16896_s1 + $0x324] sm:$0xff]  }
 0x35d   :  { %v5282_v53 = vadd.f32 %v5278_v50, %v5179_v34  ;;  %v5751_v43 = vadd.f32 %v5745_v1, %v5711_v41 }
 0x35e   :  { %v5353_v10 = vpop.f32.mrb[88].mxu1  ;;  %v5790_v18 = vadd.f32 %v5784_v51, %v5750_v45 }
 0x35f   :  { %v5366_v30 = vrot.slane %v5353_v10, %v14287_v60  ;;  %v12437_v3 = vpop.f32.mrb[89].mxu1 }
 0x360   :  { %v5356_v39 = vpop.f32.mrb[90].mxu1 }
 0x361   :  { %v5367_v58 = vcombine.high %v5366_v30, %v5366_v30  ;;  %v5370_v20 = vadd.f32 %v5366_v30, %v5281_v12  ;;  %v12438_v31 = vpop.f32.mrb[91].mxu1  ;;  %v5785_v12 = vmul.f32 %v15160_v29, %v15129_v2  ;;  %v11517_v2 = vld [vmem:[%s16897_s2 + $0x9] ss:$0 sm:$0xff]  ;;  %v5830_v29 = vadd.f32 %v5824_v19, %v5790_v18 }
 0x362   :  { %v13047_v31 = vld [vmem:[%s16896_s1 + $0x334] sm:$0xff]  }
 0x363   :  { %v5371_v25 = vadd.f32 %v5367_v58, %v5282_v53  ;;  %v5377_v6 = vadd.f32 %v11508_v4, %v5370_v20  ;;  %v5791_v33 = vadd.f32 %v5785_v12, %v5751_v43  ;;  %v15406_v39 = vadd.f32 %v15173_v38, %v5830_v29 }
 0x365   :  { %v5378_v24 = vadd.f32 %v11508_v4, %v5371_v25  ;;  %13183 = vtanh.f32 %v5377_v6  ;;  %v5831_v34 = vadd.f32 %v5825_v55, %v5791_v33  ;;  %v13050_v33 = vld [vmem:[%s16896_s1 + $0x32c] sm:$0xff]   ;;  %v15443_v55 = vunpack.c.l.b16 %v15218_v17 }
 0x367   :  { %13185 = vtanh.f32 %v5378_v24  ;;  %v15409_v58 = vadd.f32 %v15173_v38, %v5831_v34 }
 0x369   :  { %v15424_v12 = vpack.c.bf16 %v15409_v58, %v15406_v39 }
 0x36f   :  { %v13184_v5 = vpop.eup %13183 }
 0x370   :  { %v5381_v52 = vpack.c.bf16 %v13184_v5, %v13184_v5  ;;  %v5524_v50 = vmul.f32 %v13184_v5, %v11516_v32  ;;  %v13051_v5 = vld [vmem:[%s16896_s1 + $0x358] sm:$0xff]  }
 0x371   :  { %v13186_v63 = vpop.eup %13185 }
 0x372   :  { %v5393_v53 = vunpack.c.l.b16 %v5381_v52  ;;  %v5525_v54 = vmul.f32 %v13186_v63, %v11516_v32  ;;  %v5530_v10 = vadd.f32 %v11517_v2, %v5524_v50  ;;  %v5382_v30 = vpack.c.bf16 %v13186_v63, %v13186_v63  ;;  %v13052_v63 = vld [vmem:[%s16896_s1 + $0x348] sm:$0xff]  }
 0x374   :  { %v5531_v3 = vadd.f32 %v11517_v2, %v5525_v54  ;;  %v5532_v56 = vmax.f32 %v5530_v10, 0.0  ;;  %v5394_v13 = vunpack.c.l.b16 %v5382_v30  ;;  %v5395_v4 = vrot.slane %v5393_v53, 1  ;;  %v13054_v10 = vld [vmem:[%s16896_s1 + $0x350] sm:$0xff]  }
 0x375   :  { %v5920_v54 = vrot.slane %v15443_v55, 7 }
 0x376   :  { %v5396_v20 = vsel %vm216_vm1, %v5394_v13, %v5395_v4  ;;  %v5453_v25 = vrot.slane %v5394_v13, 7  ;;  %v5533_v6 = vmax.f32 %v5531_v3, 0.0  ;;  %v5534_v11 = vadd.f32 %v5532_v56, %v14728_v7  ;;  %v13049_v7 = vld [vmem:[%s16896_s1 + $0x33c] sm:$0xff]   ;;  %v13055_v3 = vld [vmem:[%s16896_s1 + $0x368] sm:$0xff]  }
 0x377   :  { %v5397_v41 = vpack.c.b16 %v5396_v20, %v5396_v20  ;;  %v13056_v4 = vld [vmem:[%s16896_s1 + $0x378] sm:$0xff]  }
 0x378   :  { %v5454_v1 = vsel %vm216_vm1, %v5453_v25, %v5393_v53  ;;  %v5535_v38 = vadd.f32 %v5533_v6, %v14679_v35  ;;  %v5536_v24 = vpack.c.bf16 %v5534_v11, %v5534_v11  ;;  %v15434_v35 = vunpack.c.l.b16 %v15424_v12  ;;  %v13053_v53 = vld [vmem:[%s16896_s1 + $0x360] sm:$0xff]   ;;  %v13057_v6 = vld [vmem:[%s16896_s1 + $0x370] sm:$0xff]  }
 0x379   :  { %12444 = vmatmul.mubr.msk.bf16.vlgmr.msra.gmra.mrb[92].mxu0 %vm231_vm2, %v5397_v41  ;;  %v5455_v43 = vpack.c.b16 %v5454_v1, %v5454_v1  ;;  %v6047_v41 = vrot.slane %v15443_v55, 2  ;;  %v13058_v1 = vld [vmem:[%s16896_s1 + $0x380] sm:$0xff]  }
 0x37a   :  { %12456 = vmatpush3.bf16.msra.mxu0 %v13047_v31  ;;  %12459 = vmatprep.mubr.msk.bf16.mxu0 %vm13250_vm0, %v16945_v36  ;;  %v5537_v45 = vpack.c.bf16 %v5535_v38, %v5535_v38  ;;  %v5548_v51 = vunpack.c.l.b16 %v5536_v24  ;;  %v5862_v29 = vrot.slane %v15434_v35, 1  ;;  %v5921_v56 = vsel %vm216_vm1, %v5920_v54, %v15434_v35  ;;  %v13059_v38 = vld [vmem:[%s16896_s1 + $0x388] sm:$0xff]  }
 0x37b   :  { %12452 = vmatmul.mubr.msk.bf16.vlgmr.msra.gmra.mrb[92].mxu1 %vm231_vm2, %v5455_v43  ;;  %12457 = vmatprep.subr.bf16.mxu0 %v16945_v36  ;;  %v5982_v20 = vrot.slane %v15434_v35, 2  ;;  %v5983_v31 = vrot.slane %v15443_v55, 1  ;;  %v5922_v25 = vpack.c.b16 %v5921_v56, %v5921_v56  ;;  %v6046_v11 = vrot.slane %v15434_v35, 3 }
 0x37c   :  { %12464 = vmatpush3.bf16.msra.mxu1 %v13048_v8  ;;  %v5549_v19 = vunpack.c.l.b16 %v5537_v45  ;;  %v5550_v18 = vrot.slane %v5548_v51, 1  ;;  %12467 = vmatprep.mubr.msk.bf16.mxu1 %vm13250_vm0, %v16945_v36  ;;  %v5863_v30 = vsel %vm216_vm1, %v15443_v55, %v5862_v29  ;;  %v6110_v45 = vrot.slane %v15434_v35, 4  ;;  %v13064_v29 = vld [vmem:[%s16896_s1 + $0x3b8] sm:$0xff]  }
 0x37d   :  { %12465 = vmatprep.subr.bf16.mxu1 %v16945_v36  ;;  %v5864_v13 = vpack.c.b16 %v5863_v30, %v5863_v30  ;;  %v5984_v8 = vsel %vm216_vm1, %v5983_v31, %v5982_v20  ;;  %v6048_v24 = vsel %vm216_vm1, %v6047_v41, %v6046_v11  ;;  %v6302_v30 = vrot.slane %v15434_v35, 7  ;;  %v13068_v31 = vld [vmem:[%s16896_s1 + $0x3d8] sm:$0xff]  }
 0x37e   :  { %12458 = vmatpush3.bf16.msra.mxu0 %v13049_v7  ;;  %v5551_v32 = vsel %vm216_vm1, %v5549_v19, %v5550_v18  ;;  %v5608_v2 = vrot.slane %v5549_v19, 7  ;;  %v5985_v43 = vpack.c.b16 %v5984_v8, %v5984_v8  ;;  %v13060_v7 = vld [vmem:[%s16896_s1 + $0x398] sm:$0xff]   ;;  %v13061_v19 = vld [vmem:[%s16896_s1 + $0x390] sm:$0xff]   ;;  %v6174_v18 = vrot.slane %v15434_v35, 5 }
 0x37f   :  { %12471 = vmatprep.subr.bf16.mxu0 %v16945_v36  ;;  %v5552_v52 = vpack.c.b16 %v5551_v32, %v5551_v32  ;;  %v6175_v32 = vrot.slane %v15443_v55, 4  ;;  %v15552_v56 = vunpack.c.h.b16 %v15218_v17  ;;  %v13067_v17 = vld [vmem:[%s16896_s1 + $0x3c8] sm:$0xff]   ;;  %v7153_v41 = vrot.slane %v15424_v12, %v13437_v59 }
 0x380   :  { %12466 = vmatpush3.bf16.msra.mxu1 %v13050_v33  ;;  %v5609_v50 = vsel %vm216_vm1, %v5608_v2, %v5548_v51  ;;  %v6111_v51 = vrot.slane %v15443_v55, 3  ;;  %v6049_v33 = vpack.c.b16 %v6048_v24, %v6048_v24 }
 0x381   :  { %12460 = vmatmul.mubr.msk.bf16.vlgmr.msra.gmra.mrb[96].mxu0 %vm231_vm2, %v5552_v52  ;;  %v5610_v34 = vpack.c.b16 %v5609_v50, %v5609_v50  ;;  %12479 = vmatprep.subr.bf16.mxu1 %v16945_v36  ;;  %v13063_v52 = vld [vmem:[%s16896_s1 + $0x3a8] sm:$0xff]   ;;  %v6176_v50 = vsel %vm216_vm1, %v6175_v32, %v6174_v18  ;;  %v6495_v32 = vrot.slane %v15552_v56, 1 }
 0x382   :  { %12472 = vmatpush3.bf16.msra.mxu0 %v13051_v5  ;;  %12475 = vmatprep.mubr.msk.bf16.mxu0 %vm13250_vm0, %v16945_v36  ;;  %v13062_v5 = vld [vmem:[%s16896_s1 + $0x3a0] sm:$0xff]   ;;  %v6112_v2 = vsel %vm216_vm1, %v6111_v51, %v6110_v45  ;;  %v6177_v54 = vpack.c.b16 %v6176_v50, %v6176_v50  ;;  %v13073_v50 = vld [vmem:[%s16896_s1 + $0x3f0] sm:$0xff]  }
 0x383   :  { %12468 = vmatmul.mubr.msk.bf16.vlgmr.msra.gmra.mrb[96].mxu1 %vm231_vm2, %v5610_v34  ;;  %12473 = vmatprep.subr.bf16.mxu0 %v16945_v36  ;;  %v6238_v34 = vrot.slane %v15434_v35, 6  ;;  %v15562_v35 = vunpack.c.h.b16 %v15424_v12 }
 0x384   :  { %12480 = vmatpush3.bf16.msra.mxu1 %v13052_v63  ;;  %12483 = vmatprep.mubr.msk.bf16.mxu1 %vm13250_vm0, %v16945_v36  ;;  %v6113_v63 = vpack.c.b16 %v6112_v2, %v6112_v2 }
 0x385   :  { %12481 = vmatprep.subr.bf16.mxu1 %v16945_v36  ;;  %v6431_v8 = vrot.slane %v15562_v35, 1  ;;  %v6494_v18 = vrot.slane %v15562_v35, 2 }
 0x386   :  { %12474 = vmatpush3.bf16.msra.mxu0 %v13053_v53  ;;  %v6239_v53 = vrot.slane %v15443_v55, 5 }
 0x387   :  { %12487 = vmatprep.subr.bf16.mxu0 %v16945_v36  ;;  %v6432_v45 = vsel %vm216_vm1, %v15552_v56, %v6431_v8 }
 0x388   :  { %12482 = vmatpush3.bf16.msra.mxu1 %v13054_v10  ;;  %v13065_v10 = vld [vmem:[%s16896_s1 + $0x3b0] sm:$0xff]   ;;  %v6433_v2 = vpack.c.b16 %v6432_v45, %v6432_v45 }
 0x389   :  { %12476 = vmatmul.mubr.msk.bf16.vlgmr.msra.gmra.mrb[100].mxu0 %vm231_vm2, %v5864_v13  ;;  %12495 = vmatprep.subr.bf16.mxu1 %v16945_v36  ;;  %v13066_v13 = vld [vmem:[%s16896_s1 + $0x3c0] sm:$0xff]  }
 0x38a   :  { %12488 = vmatpush3.bf16.msra.mxu0 %v13055_v3  ;;  %12491 = vmatprep.mubr.msk.bf16.mxu0 %vm13250_vm0, %v16945_v36  ;;  %v6303_v3 = vrot.slane %v15443_v55, 6 }
 0x38b   :  { %12484 = vmatmul.mubr.msk.bf16.vlgmr.msra.gmra.mrb[100].mxu1 %vm231_vm2, %v5922_v25  ;;  %12489 = vmatprep.subr.bf16.mxu0 %v16945_v36  ;;  %v6368_v25 = vrot.slane %v15552_v56, 7 }
 0x38c   :  { %12496 = vmatpush3.bf16.msra.mxu1 %v13056_v4  ;;  %12499 = vmatprep.mubr.msk.bf16.mxu1 %vm13250_vm0, %v16945_v36  ;;  %v6240_v4 = vsel %vm216_vm1, %v6239_v53, %v6238_v34  ;;  %v6304_v55 = vsel %vm216_vm1, %v6303_v3, %v6302_v30  ;;  %v13074_v34 = vld [vmem:[%s16896_s1 + $0x400] sm:$0xff]   ;;  %v6496_v53 = vsel %vm216_vm1, %v6495_v32, %v6494_v18  ;;  %v13075_v3 = vld [vmem:[%s16896_s1 + $0x408] sm:$0xff]  }
 0x38d   :  { %12497 = vmatprep.subr.bf16.mxu1 %v16945_v36  ;;  %v6241_v20 = vpack.c.b16 %v6240_v4, %v6240_v4  ;;  %v6305_v11 = vpack.c.b16 %v6304_v55, %v6304_v55  ;;  %v6369_v12 = vsel %vm216_vm1, %v6368_v25, %v15562_v35  ;;  %v6622_v4 = vrot.slane %v15562_v35, 4 }
 0x38e   :  { %12490 = vmatpush3.bf16.msra.mxu0 %v13057_v6  ;;  %v11587_v6 = vpack.c.bf16 %v15409_v58, %v15409_v58  ;;  %v6370_v51 = vpack.c.b16 %v6369_v12, %v6369_v12  ;;  %v6497_v55 = vpack.c.b16 %v6496_v53, %v6496_v53  ;;  %v6687_v25 = vrot.slane %v15552_v56, 4 }
 0x38f   :  { %12503 = vmatprep.subr.bf16.mxu0 %v16945_v36 }
 0x390   :  { %12498 = vmatpush3.bf16.msra.mxu1 %v13058_v1  ;;  %v13069_v1 = vld [vmem:[%s16896_s1 + $0x3d0] sm:$0xff]   ;;  %v7160_v24 = vrot.slane %v11587_v6, %v13437_v59  ;;  %v13076_v6 = vld [vmem:[%s16896_s1 + $0x418] sm:$0xff]  }
 0x391   :  { %12492 = vmatmul.mubr.msk.bf16.vlgmr.msra.gmra.mrb[104].mxu0 %vm231_vm2, %v5985_v43  ;;  %12511 = vmatprep.subr.bf16.mxu1 %v16945_v36  ;;  %v7161_v43 = vcombine.high %v7153_v41, %v7153_v41 }
 0x392   :  { %12504 = vmatpush3.bf16.msra.mxu0 %v13059_v38  ;;  %12507 = vmatprep.mubr.msk.bf16.mxu0 %vm13250_vm0, %v16945_v36  ;;  %v13070_v38 = vld [vmem:[%s16896_s1 + $0x3e0] sm:$0xff]  }
 0x393   :  { %12500 = vmatmul.mubr.msk.bf16.vlgmr.msra.gmra.mrb[104].mxu1 %vm231_vm2, %v6049_v33  ;;  %12505 = vmatprep.subr.bf16.mxu0 %v16945_v36  ;;  %v15603_v33 = vrot.slane %v7153_v41, %v13437_v59 }
 0x394   :  { %12512 = vmatpush3.bf16.msra.mxu1 %v13060_v7  ;;  %12515 = vmatprep.mubr.msk.bf16.mxu1 %vm13250_vm0, %v16945_v36  ;;  %v13071_v7 = vld [vmem:[%s16896_s1 + $0x3e8] sm:$0xff]  }
 0x395   :  { %12513 = vmatprep.subr.bf16.mxu1 %v16945_v36 }
 0x396   :  { %12506 = vmatpush3.bf16.msra.mxu0 %v13061_v19  ;;  %v13072_v19 = vld [vmem:[%s16896_s1 + $0x3f8] sm:$0xff]  }
 0x397   :  { %12519 = vmatprep.subr.bf16.mxu0 %v16945_v36 }
 0x398   :  { %12514 = vmatpush3.bf16.msra.mxu1 %v13062_v5  ;;  %v7162_v5 = vcombine.high %v7160_v24, %v7160_v24 }
 0x399   :  { %12508 = vmatmul.mubr.msk.bf16.vlgmr.msra.gmra.mrb[108].mxu0 %vm231_vm2, %v6113_v63  ;;  %12527 = vmatprep.subr.bf16.mxu1 %v16945_v36  ;;  %v6558_v63 = vrot.slane %v15562_v35, 3 }
 0x39a   :  { %12520 = vmatpush3.bf16.msra.mxu0 %v13063_v52  ;;  %12523 = vmatprep.mubr.msk.bf16.mxu0 %vm13250_vm0, %v16945_v36  ;;  %v15613_v52 = vrot.slane %v7161_v43, %v13437_v59  ;;  %v15638_v30 = vrot.slane %v7162_v5, %v13437_v59  ;;  %v13077_v43 = vld [vmem:[%s16896_s1 + $0x410] sm:$0xff]   ;;  %v13078_v5 = vld [vmem:[%s16896_s1 + $0x420] sm:$0xff]  }
 0x39b   :  { %12516 = vmatmul.mubr.msk.bf16.vlgmr.msra.gmra.mrb[108].mxu1 %vm231_vm2, %v6177_v54  ;;  %12521 = vmatprep.subr.bf16.mxu0 %v16945_v36  ;;  %v15632_v54 = vcombine.high %v15603_v33, %v15603_v33 }
 0x39c   :  { %12528 = vmatpush3.bf16.msra.mxu1 %v13064_v29  ;;  %12531 = vmatprep.mubr.msk.bf16.mxu1 %vm13250_vm0, %v16945_v36  ;;  %v6559_v29 = vrot.slane %v15552_v56, 2  ;;  %v7250_v41 = vshll.u32 %v15613_v52, 16 }
 0x39d   :  { %12529 = vmatprep.subr.bf16.mxu1 %v16945_v36  ;;  %v7258_v8 = vshll.u32 %v15632_v54, 16 }
 0x39e   :  { %12522 = vmatpush3.bf16.msra.mxu0 %v13065_v10  ;;  %v15635_v10 = vrot.slane %v7160_v24, %v13437_v59  ;;  %v15669_v24 = vcombine.high %v15638_v30, %v15638_v30 }
 0x39f   :  { %12535 = vmatprep.subr.bf16.mxu0 %v16945_v36 }
 0x3a0   :  { %12530 = vmatpush3.bf16.msra.mxu1 %v13066_v13  ;;  %v6560_v13 = vsel %vm216_vm1, %v6559_v29, %v6558_v63  ;;  %v15665_v12 = vcombine.high %v15635_v10, %v15635_v10  ;;  %v7277_v63 = vshrl.u32 %v15635_v10, 16  ;;  %v7282_v29 = vshll.u32 %v15638_v30, 16 }
 0x3a1   :  { %12524 = vmatmul.mubr.msk.bf16.vlgmr.msra.gmra.mrb[112].mxu0 %vm231_vm2, %v6241_v20  ;;  %12543 = vmatprep.subr.bf16.mxu1 %v16945_v36  ;;  %v6623_v20 = vrot.slane %v15552_v56, 3 }
 0x3a2   :  { %12536 = vmatpush3.bf16.msra.mxu0 %v13067_v17  ;;  %12539 = vmatprep.mubr.msk.bf16.mxu0 %vm13250_vm0, %v16945_v36  ;;  %v15648_v17 = vcombine.high %v15613_v52, %v15613_v52  ;;  %v7290_v53 = vshll.u32 %v15665_v12, 16 }
 0x3a3   :  { %12532 = vmatmul.mubr.msk.bf16.vlgmr.msra.gmra.mrb[112].mxu1 %vm231_vm2, %v6305_v11  ;;  %12537 = vmatprep.subr.bf16.mxu0 %v16945_v36  ;;  %v7245_v11 = vshrl.u32 %v15603_v33, 16  ;;  %v6624_v18 = vsel %vm216_vm1, %v6623_v20, %v6622_v4  ;;  %v13079_v4 = vld [vmem:[%s16896_s1 + $0x428] sm:$0xff]  }
 0x3a4   :  { %12544 = vmatpush3.bf16.msra.mxu1 %v13068_v31  ;;  %12547 = vmatprep.mubr.msk.bf16.mxu1 %vm13250_vm0, %v16945_v36  ;;  %v6686_v31 = vrot.slane %v15562_v35, 5  ;;  %v7266_v45 = vshll.u32 %v15648_v17, 16 }
 0x3a5   :  { %12545 = vmatprep.subr.bf16.mxu1 %v16945_v36 }
 0x3a6   :  { %12538 = vmatpush3.bf16.msra.mxu0 %v13069_v1  ;;  %v7253_v1 = vshrl.u32 %v15613_v52, 16  ;;  %v6688_v32 = vsel %vm216_vm1, %v6687_v25, %v6686_v31  ;;  %v7302_v31 = vshrl.u32 %v15233_v23, 16  ;;  %v7307_v25 = vshll.u32 %v15236_v47, 16 }
 0x3a7   :  { %12551 = vmatprep.subr.bf16.mxu0 %v16945_v36 }
 0x3a8   :  { %12546 = vmatpush3.bf16.msra.mxu1 %v13070_v38  ;;  %v6561_v38 = vpack.c.b16 %v6560_v13, %v6560_v13  ;;  %v7298_v13 = vshll.u32 %v15669_v24, 16 }
 0x3a9   :  { %12540 = vmatmul.mubr.msk.bf16.vlgmr.msra.gmra.mrb[116].mxu0 %vm231_vm2, %v6370_v51  ;;  %12559 = vmatprep.subr.bf16.mxu1 %v16945_v36  ;;  %v7269_v51 = vshrl.u32 %v15648_v17, 16 }
 0x3aa   :  { %12552 = vmatpush3.bf16.msra.mxu0 %v13071_v7  ;;  %12555 = vmatprep.mubr.msk.bf16.mxu0 %vm13250_vm0, %v16945_v36  ;;  %v7261_v7 = vshrl.u32 %v15632_v54, 16 }
 0x3ab   :  { %12548 = vmatmul.mubr.msk.bf16.vlgmr.msra.gmra.mrb[116].mxu1 %vm231_vm2, %v6433_v2  ;;  %12553 = vmatprep.subr.bf16.mxu0 %v16945_v36  ;;  %v7252_v2 = vsel %vm13744_vm4, %v7245_v11, %v7250_v41  ;;  %v6689_v11 = vpack.c.b16 %v6688_v32, %v6688_v32  ;;  %v6750_v41 = vrot.slane %v15562_v35, 6  ;;  %v7751_v32 = vcombine.low %v15613_v52, %v15632_v54 }
 0x3ac   :  { %12560 = vmatpush3.bf16.msra.mxu1 %v13072_v19  ;;  %12563 = vmatprep.mubr.msk.bf16.mxu1 %vm13250_vm0, %v16945_v36  ;;  %v7274_v19 = vshll.u32 %v15635_v10, 16 }
 0x3ad   :  { %12561 = vmatprep.subr.bf16.mxu1 %v16945_v36 }
 0x3ae   :  { %12554 = vmatpush3.bf16.msra.mxu0 %v13073_v50  ;;  %v15693_v50 = vsel %vm13744_vm4, %v7253_v1, %v7258_v8  ;;  %v15711_v20 = vsel %vm13744_vm4, %v7269_v51, %v7274_v19  ;;  %v6751_v1 = vrot.slane %v15552_v56, 5  ;;  %v13080_v8 = vld [vmem:[%s16896_s1 + $0x438] sm:$0xff]  }
 0x3af   :  { %12567 = vmatprep.subr.bf16.mxu0 %v16945_v36 }
 0x3b0   :  { %12562 = vmatpush3.bf16.msra.mxu1 %v13074_v34  ;;  %v7285_v34 = vshrl.u32 %v15638_v30, 16 }
 0x3b1   :  { %12556 = vmatmul.mubr.msk.bf16.vlgmr.msra.gmra.mrb[120].mxu0 %vm231_vm2, %v6497_v55  ;;  %12575 = vmatprep.subr.bf16.mxu1 %v16945_v36  ;;  %v15707_v55 = vsel %vm13744_vm4, %v7261_v7, %v7266_v45  ;;  %v15725_v7 = vsel %vm13744_vm4, %v7277_v63, %v7282_v29  ;;  %v7358_v45 = vcombine.low %v7252_v2, %v15693_v50  ;;  %v13082_v63 = vld [vmem:[%s16896_s1 + $0x440] sm:$0xff]  }
 0x3b2   :  { %12568 = vmatpush3.bf16.msra.mxu0 %v13075_v3  ;;  %12571 = vmatprep.mubr.msk.bf16.mxu0 %vm13250_vm0, %v16945_v36  ;;  %v7293_v3 = vshrl.u32 %v15665_v12, 16  ;;  %v15732_v51 = vsel %vm13744_vm4, %v7285_v34, %v7290_v53  ;;  %v8008_v2 = vrot.slane %v15311_v62, %v13437_v59  ;;  %v6752_v29 = vsel %vm216_vm1, %v6751_v1, %v6750_v41 }
 0x3b3   :  { %12564 = vmatmul.mubr.msk.bf16.vlgmr.msra.gmra.mrb[120].mxu1 %vm231_vm2, %v6561_v38  ;;  %12569 = vmatprep.subr.bf16.mxu0 %v16945_v36  ;;  %v6814_v38 = vrot.slane %v15562_v35, 7  ;;  %v13081_v35 = vld [vmem:[%s16896_s1 + $0x430] sm:$0xff]   ;;  %v7368_v62 = vrot.slane %v7358_v45, %v13437_v59  ;;  %v7310_v41 = vshrl.u32 %v15236_v47, 16  ;;  %v7315_v1 = vshll.u32 %v15249_v14, 16 }
 0x3b4   :  { %12576 = vmatpush3.bf16.msra.mxu1 %v13076_v6  ;;  %12579 = vmatprep.mubr.msk.bf16.mxu1 %vm13250_vm0, %v16945_v36  ;;  %v6625_v6 = vpack.c.b16 %v6624_v18, %v6624_v18  ;;  %v15736_v19 = vsel %vm13744_vm4, %v7293_v3, %v7298_v13  ;;  %v7309_v18 = vsel %vm13744_vm4, %v7302_v31, %v7307_v25  ;;  %v13083_v3 = vld [vmem:[%s16896_s1 + $0x448] sm:$0xff]  }
 0x3b5   :  { %12577 = vmatprep.subr.bf16.mxu1 %v16945_v36  ;;  %v7361_v34 = vcombine.low %v15736_v19, %v7309_v18  ;;  %v7753_v13 = vcombine.low %v15638_v30, %v15665_v12  ;;  %v7761_v31 = vrot.slane %v7751_v32, %v13437_v59  ;;  %v13085_v18 = vld [vmem:[%s16896_s1 + $0x450] sm:$0xff]  }
 0x3b6   :  { %12570 = vmatpush3.bf16.msra.mxu0 %v13077_v43  ;;  %v6815_v43 = vrot.slane %v15552_v56, 6  ;;  %v7359_v56 = vcombine.low %v15707_v55, %v15711_v20 }
 0x3b7   :  { %12583 = vmatprep.subr.bf16.mxu0 %v16945_v36  ;;  %v15803_v32 = vrot.slane %v7753_v13, %v13437_v59 }
 0x3b8   :  { %12578 = vmatpush3.bf16.msra.mxu1 %v13078_v5  ;;  %v7752_v5 = vcombine.low %v15648_v17, %v15635_v10  ;;  %v6816_v54 = vsel %vm216_vm1, %v6815_v43, %v6814_v38  ;;  %v7360_v17 = vcombine.low %v15725_v7, %v15732_v51  ;;  %v15768_v53 = vrot.slane %v7359_v56, %v13437_v59  ;;  %v13084_v43 = vld [vmem:[%s16896_s1 + $0x458] sm:$0xff]  }
 0x3b9   :  { %12572 = vmatmul.mubr.msk.bf16.vlgmr.msra.gmra.mrb[124].mxu0 %vm231_vm2, %v6625_v6  ;;  %12591 = vmatprep.subr.bf16.mxu1 %v16945_v36  ;;  %v15782_v6 = vrot.slane %v8008_v2, %v13437_v59  ;;  %v6817_v38 = vpack.c.b16 %v6816_v54, %v6816_v54  ;;  %v7389_v56 = vrot.slane %v7361_v34, %v13437_v59  ;;  %v8030_v54 = vshrl.u32 %v15669_v24, 16 }
 0x3ba   :  { %12584 = vmatpush3.bf16.msra.mxu0 %v13079_v4  ;;  %12587 = vmatprep.mubr.msk.bf16.mxu0 %vm13250_vm0, %v16945_v36  ;;  %v7754_v4 = vcombine.low %v15669_v24, %v15236_v47  ;;  %v15779_v25 = vrot.slane %v7752_v5, %v13437_v59  ;;  %v15793_v45 = vrot.slane %v7360_v17, %v13437_v59  ;;  %v13086_v17 = vld [vmem:[%s16896_s1 + $0x460] sm:$0xff]  }
 0x3bb   :  { %12580 = vmatmul.mubr.msk.bf16.vlgmr.msra.gmra.mrb[124].mxu1 %vm231_vm2, %v6689_v11  ;;  %12585 = vmatprep.subr.bf16.mxu0 %v16945_v36  ;;  %v6753_v11 = vpack.c.b16 %v6752_v29, %v6752_v29  ;;  %v7317_v29 = vsel %vm13744_vm4, %v7310_v41, %v7315_v1  ;;  %v6884_v41 = vpack.c.b16 %v15348_v22, %v15348_v22 }
 0x3bc   :  { %12592 = vmatpush3.bf16.msra.mxu1 %v13080_v8  ;;  %12595 = vmatprep.mubr.msk.bf16.mxu1 %vm13250_vm0, %v16945_v36  ;;  %v8516_v8 = vcombine.high %v8008_v2, %v8008_v2  ;;  %v7782_v5 = vrot.slane %v7754_v4, %v13437_v59  ;;  %v7783_v2 = vcombine.low %v7761_v31, %v15779_v25 }
 0x3bd   :  { %12593 = vmatprep.subr.bf16.mxu1 %v16945_v36  ;;  %v7407_v34 = vcombine.low %v7317_v29, %v15281_v46  ;;  %v7391_v13 = vcombine.low %v15793_v45, %v7389_v56  ;;  %v7514_v1 = vcombine.low %v15603_v33, %v15613_v52  ;;  %v7516_v22 = vcombine.low %v15635_v10, %v15638_v30 }
 0x3be   :  { %12586 = vmatpush3.bf16.msra.mxu0 %v13081_v35  ;;  %v7390_v35 = vcombine.low %v7368_v62, %v15768_v53  ;;  %v15820_v62 = vrot.slane %v8516_v8, %v13437_v59  ;;  %v7784_v31 = vcombine.low %v15803_v32, %v7782_v5  ;;  %v11607_v8 = vcombine.high %v15603_v33, %v15613_v52 }
 0x3bf   :  { %12599 = vmatprep.subr.bf16.mxu0 %v16945_v36  ;;  %v7416_v56 = vrot.slane %v7407_v34, %v13437_v59  ;;  %v11612_v33 = vcombine.high %v15233_v23, %v15236_v47  ;;  %v6947_v52 = vpack.c.b16 %v15358_v26, %v15358_v26  ;;  %v8047_v5 = vcombine.low %v15711_v20, %v15725_v7  ;;  %v13091_v20 = vld [vmem:[%s16896_s1 + $0x498] sm:$0xff]  }
 0x3c0   :  { %12594 = vmatpush3.bf16.msra.mxu1 %v13082_v63  ;;  %v8035_v63 = vshll.u32 %v15782_v6, 16  ;;  %v15828_v4 = vrot.slane %v7390_v35, %v13437_v59  ;;  %v7517_v35 = vcombine.low %v15665_v12, %v15233_v23  ;;  %v13089_v23 = vld [vmem:[%s16896_s1 + $0x470] sm:$0xff]   ;;  %v7405_v26 = vrot.slane %v7391_v13, %v13437_v59 }
 0x3c1   :  { %12588 = vmatmul.mubr.msk.bf16.vlgmr.msra.gmra.mrb[128].mxu0 %vm231_vm2, %v6753_v11  ;;  %12607 = vmatprep.subr.bf16.mxu1 %v16945_v36  ;;  %v15832_v11 = vrot.slane %v7783_v2, %v13437_v59  ;;  %v8532_v2 = vshrl.u32 %v15782_v6, 16  ;;  %v8048_v12 = vcombine.low %v15732_v51, %v15736_v19  ;;  %v7798_v7 = vrot.slane %v7784_v31, %v13437_v59  ;;  %v13090_v51 = vld [vmem:[%s16896_s1 + $0x480] sm:$0xff]  }
 0x3c2   :  { %12600 = vmatpush3.bf16.msra.mxu0 %v13083_v3  ;;  %12603 = vmatprep.mubr.msk.bf16.mxu0 %vm13250_vm0, %v16945_v36  ;;  %v13087_v3 = vld [vmem:[%s16896_s1 + $0x468] sm:$0xff]   ;;  %v7545_v34 = vrot.slane %v7517_v35, %v13437_v59  ;;  %v7809_v13 = vrot.slane %v11612_v33, %v13437_v59  ;;  %v7406_v35 = vcombine.low %v15828_v4, %v7405_v26 }
 0x3c3   :  { %12596 = vmatmul.mubr.msk.bf16.vlgmr.msra.gmra.mrb[128].mxu1 %vm231_vm2, %v6817_v38  ;;  %12601 = vmatprep.subr.bf16.mxu0 %v16945_v36  ;;  %v15843_v38 = vsel %vm13744_vm4, %v8030_v54, %v8035_v63  ;;  %v7524_v63 = vrot.slane %v7514_v1, %v13437_v59  ;;  %v15882_v54 = vrot.slane %v11607_v8, %v13437_v59 }
 0x3c4   :  { %12608 = vmatpush3.bf16.msra.mxu1 %v13084_v43  ;;  %12611 = vmatprep.mubr.msk.bf16.mxu1 %vm13250_vm0, %v16945_v36  ;;  %v13088_v43 = vld [vmem:[%s16896_s1 + $0x478] sm:$0xff]   ;;  %v7011_v8 = vpack.c.b16 %v15372_v48, %v15372_v48  ;;  %v7799_v33 = vcombine.low %v15832_v11, %v7798_v7  ;;  %v7075_v48 = vpack.c.b16 %v15375_v37, %v15375_v37  ;;  %v13095_v37 = vld [vmem:[%s16896_s1 + $0x488] sm:$0xff]   ;;  %v13097_v7 = vld [vmem:[%s16896_s1 + $0x490] sm:$0xff]  }
 0x3c5   :  { %12609 = vmatprep.subr.bf16.mxu1 %v16945_v36  ;;  %v8548_v11 = vcombine.low %v15736_v19, %v15843_v38  ;;  %v11624_v19 = vcombine.high %v15635_v10, %v15638_v30 }
 0x3c6   :  { %12602 = vmatpush3.bf16.msra.mxu0 %v13085_v18  ;;  %v8046_v18 = vcombine.low %v15693_v50, %v15707_v55  ;;  %v8049_v50 = vcombine.low %v15843_v38, %v7317_v29  ;;  %v8537_v55 = vshll.u32 %v15820_v62, 16  ;;  %v7431_v29 = vcombine.low %v7416_v56, %v15317_v28 }
 0x3c7   :  { %12615 = vmatprep.subr.bf16.mxu0 %v16945_v36  ;;  %v8070_v28 = vrot.slane %v8048_v12, %v13437_v59  ;;  %v7546_v56 = vcombine.low %v7524_v63, %v15882_v54  ;;  %v7563_v12 = vcombine.low %v15236_v47, %v15249_v14  ;;  %v8298_v38 = vcombine.low %v15782_v6, %v15249_v14  ;;  %v13096_v47 = vld [vmem:[%s16896_s1 + $0x4b8] sm:$0xff]  }
 0x3c8   :  { %12610 = vmatpush3.bf16.msra.mxu1 %v13086_v17  ;;  %v15891_v17 = vrot.slane %v7516_v22, %v13437_v59  ;;  %v8056_v31 = vrot.slane %v8046_v18, %v13437_v59  ;;  %v8077_v1 = vrot.slane %v8049_v50, %v13437_v59  ;;  %v8539_v22 = vsel %vm13744_vm4, %v8532_v2, %v8537_v55 }
 0x3c9   :  { %12604 = vmatmul.mubr.msk.bf16.vlgmr.msra.gmra.mrb[132].mxu0 %vm231_vm2, %v6884_v41  ;;  %12623 = vmatprep.subr.bf16.mxu1 %v16945_v36  ;;  %v8063_v41 = vrot.slane %v8047_v5, %v13437_v59  ;;  %v7824_v5 = vcombine.low %v7809_v13, %v15344_v16  ;;  %v7445_v16 = vrot.slane %v15303_v61, %v13437_v59 }
 0x3ca   :  { %12616 = vmatpush3.bf16.msra.mxu0 %v13087_v3  ;;  %12619 = vmatprep.mubr.msk.bf16.mxu0 %vm13250_vm0, %v16945_v36  ;;  %v13092_v3 = vld [vmem:[%s16896_s1 + $0x4a8] sm:$0xff]   ;;  %v7547_v18 = vcombine.low %v15891_v17, %v7545_v34  ;;  %v8079_v4 = vcombine.low %v8070_v28, %v8077_v1  ;;  %v7554_v26 = vrot.slane %v7546_v56, %v13437_v59 }
 0x3cb   :  { %12612 = vmatmul.mubr.msk.bf16.vlgmr.msra.gmra.mrb[132].mxu1 %vm231_vm2, %v6947_v52  ;;  %12617 = vmatprep.subr.bf16.mxu0 %v16945_v36  ;;  %v7438_v52 = vrot.slane %v7431_v29, %v13437_v59  ;;  %v8078_v2 = vcombine.low %v8056_v31, %v8063_v41  ;;  %v7831_v50 = vrot.slane %v7824_v5, %v13437_v59  ;;  %v13100_v1 = vld [vmem:[%s16896_s1 + $0x4c8] sm:$0xff]  }
 0x3cc   :  { %12624 = vmatpush3.bf16.msra.mxu1 %v13088_v43  ;;  %12627 = vmatprep.mubr.msk.bf16.mxu1 %vm13250_vm0, %v16945_v36  ;;  %v13093_v43 = vld [vmem:[%s16896_s1 + $0x4a0] sm:$0xff]   ;;  %v7838_v61 = vrot.slane %v15351_v21, %v13437_v59  ;;  %v8556_v10 = vrot.slane %v8548_v11, %v13437_v59  ;;  %v7572_v21 = vrot.slane %v7563_v12, %v13437_v59 }
 0x3cd   :  { %12625 = vmatprep.subr.bf16.mxu1 %v16945_v36  ;;  %v8086_v55 = vrot.slane %v8078_v2, %v13437_v59  ;;  %v7446_v14 = vcombine.low %v7438_v52, %v7445_v16  ;;  %v8312_v29 = vrot.slane %v8298_v38, %v13437_v59  ;;  %v8564_v31 = vcombine.low %v15768_v53, %v15793_v45 }
 0x3ce   :  { %12618 = vmatpush3.bf16.msra.mxu0 %v13089_v23  ;;  %v8549_v23 = vcombine.low %v8539_v22, %v15281_v46  ;;  %v7561_v46 = vrot.slane %v7547_v18, %v13437_v59  ;;  %v7839_v34 = vcombine.low %v7831_v50, %v7838_v61  ;;  %v8768_v28 = vcombine.low %v15820_v62, %v15253_v42  ;;  %v13099_v42 = vld [vmem:[%s16896_s1 + $0x4d8] sm:$0xff]   ;;  %v11515_v50 = vld [vmem:[%s16897_s2 + $0x7] ss:$0 sm:$0xff] }
 0x3cf   :  { %12631 = vmatprep.subr.bf16.mxu0 %v13091_v20  ;;  %v8767_v45 = vcombine.low %v15669_v24, %v15782_v6  ;;  %v8572_v62 = vrot.slane %v8564_v31, %v13437_v59 }
 0x3d0   :  { %12626 = vmatpush3.bf16.msra.mxu1 %v13090_v51  ;;  %v8563_v30 = vrot.slane %v8549_v23, %v13437_v59  ;;  %v7562_v63 = vcombine.low %v7554_v26, %v7561_v46  ;;  %v8305_v51 = vrot.slane %v11624_v19, %v13437_v59  ;;  %v8782_v22 = vrot.slane %v8768_v28, %v13437_v59 }
 0x3d1   :  { %12620 = vmatmul.mubr.msk.bf16.vlgmr.msra.gmra.mrb[136].mxu0 %vm231_vm2, %v7011_v8  ;;  %12647 = vmatprep.subr.bf16.mxu1 %v13092_v3  ;;  %v7587_v8 = vcombine.low %v7572_v21, %v15328_v40  ;;  %v8775_v6 = vrot.slane %v8767_v45, %v13437_v59 }
 0x3d2   :  { %12632 = vmatpush3.bf16.msra.mxu0 %v13091_v20  ;;  %12635 = vmatprep.mubr.msk.bf16.mxu0 %vm231_vm2, %v7406_v35  ;;  %v8093_v20 = vrot.slane %v8079_v4, %v13437_v59  ;;  %v8565_v41 = vcombine.low %v8556_v10, %v8563_v30  ;;  %v8314_v53 = vcombine.low %v8305_v51, %v8312_v29  ;;  %v13101_v35 = vld [vmem:[%s16896_s1 + $0x4e0] sm:$0xff]  }
 0x3d3   :  { %12628 = vmatmul.mubr.msk.bf16.vlgmr.msra.gmra.mrb[136].mxu1 %vm231_vm2, %v7075_v48  ;;  %12633 = vmatprep.subr.bf16.mxu0 %v13093_v43  ;;  %v7594_v56 = vrot.slane %v7587_v8, %v13437_v59  ;;  %v8783_v48 = vcombine.low %v15779_v25, %v15803_v32  ;;  %v13104_v25 = vld [vmem:[%s16896_s1 + $0x4f0] sm:$0xff]   ;;  %v11478_v4 = vld [vmem:[%s16897_s2 + $0x3] ss:$0 sm:$0xff] }
 0x3d4   :  { %12648 = vmatpush3.bf16.msra.mxu1 %v13092_v3  ;;  %12651 = vmatprep.mubr.msk.bf16.mxu1 %vm231_vm2, %v7799_v33  ;;  %v13098_v3 = vld [vmem:[%s16896_s1 + $0x4c0] sm:$0xff]   ;;  %v8094_v13 = vcombine.low %v8086_v55, %v8093_v20  ;;  %v8579_v40 = vrot.slane %v8565_v41, %v13437_v59  ;;  %v8328_v24 = vrot.slane %v8314_v53, %v13437_v59 }
 0x3d5   :  { %12649 = vmatprep.subr.bf16.mxu1 %v13094_v57  ;;  %v8791_v5 = vrot.slane %v8783_v48, %v13437_v59 }
 0x3d6   :  { %12634 = vmatpush3.bf16.msra.mxu0 %v13093_v43  ;;  %v8313_v43 = vcombine.low %v15882_v54, %v15891_v17  ;;  %v7601_v54 = vrot.slane %v15320_v0, %v13437_v59  ;;  %v8580_v33 = vcombine.low %v8572_v62, %v8579_v40  ;;  %v13102_v0 = vld [vmem:[%s16896_s1 + $0x4d0] sm:$0xff]  }
 0x3d7   :  { %12639 = vmatprep.subr.bf16.mxu0 %v13095_v37 }
 0x3d8   :  { %12650 = vmatpush3.bf16.msra.mxu1 %v13094_v57  ;;  %v8321_v17 = vrot.slane %v8313_v43, %v13437_v59  ;;  %v7602_v52 = vcombine.low %v7594_v56, %v7601_v54  ;;  %v8784_v57 = vcombine.low %v8775_v6, %v8782_v22 }
 0x3d9   :  { %12636 = vmatmul.mubr.msk.bf16.vlgmr.msra.gmra.mrb[140].mxu0 %vm231_vm2, %v7446_v14  ;;  %12655 = vmatprep.subr.bf16.mxu1 %v13096_v47 }
 0x3da   :  { %12640 = vmatpush3.bf16.msra.mxu0 %v13095_v37  ;;  %12643 = vmatprep.mubr.msk.bf16.mxu0 %vm231_vm2, %v7562_v63  ;;  %v8329_v18 = vcombine.low %v8321_v17, %v8328_v24  ;;  %v8798_v2 = vrot.slane %v8784_v57, %v13437_v59  ;;  %v4395_v37 = vadd.f32 %v11478_v4, %v15300_v9  ;;  %v11524_v9 = vld [vmem:[%s16897_s2 + $0xa] ss:$0 sm:$0xff] }
 0x3db   :  { %12652 = vmatmul.mubr.msk.bf16.vlgmr.msra.gmra.mrb[140].mxu1 %vm231_vm2, %v7839_v34  ;;  %12641 = vmatprep.subr.bf16.mxu0 %v13097_v7 }
 0x3dc   :  { %12656 = vmatpush3.bf16.msra.mxu1 %v13096_v47  ;;  %12659 = vmatprep.mubr.msk.bf16.mxu1 %vm231_vm2, %v8094_v13  ;;  %v8799_v32 = vcombine.low %v8791_v5, %v8798_v2 }
 0x3dd   :  { %12657 = vmatprep.subr.bf16.mxu1 %v13098_v3 }
 0x3de   :  { %12642 = vmatpush3.bf16.msra.mxu0 %v13097_v7 }
 0x3df   :  { %12663 = vmatprep.subr.bf16.mxu0 %v13100_v1 }
 0x3e0   :  { %12658 = vmatpush3.bf16.msra.mxu1 %v13098_v3 }
 0x3e1   :  { %12671 = vmatprep.subr.bf16.mxu1 %v13099_v42 }
 0x3e3   :  { %12660 = vmatmul.mubr.msk.bf16.vlgmr.msra.gmra.mrb[144].mxu1 %vm231_vm2, %v15314_v27  ;;  %v13103_v27 = vld [vmem:[%s16896_s1 + $0x4e8] sm:$0xff]  }
 0x3e4   :  { %12672 = vmatpush3.bf16.msra.mxu1 %v13099_v42  ;;  %12675 = vmatprep.mubr.msk.bf16.mxu1 %vm231_vm2, %v8580_v33 }
 0x3e5   :  { %12644 = vmatmul.mubr.msk.bf16.vlgmr.msra.gmra.mrb[140].mxu0 %vm231_vm2, %v7602_v52  ;;  %12673 = vmatprep.subr.bf16.mxu1 %v13101_v35 }
 0x3e6   :  { %12664 = vmatpush3.bf16.msra.mxu0 %v13100_v1  ;;  %12667 = vmatprep.mubr.msk.bf16.mxu0 %vm231_vm2, %v8329_v18 }
 0x3e7   :  { %12665 = vmatprep.subr.bf16.mxu0 %v13102_v0 }
 0x3e8   :  { %12674 = vmatpush3.bf16.msra.mxu1 %v13101_v35 }
 0x3e9   :  { %12687 = vmatprep.subr.bf16.mxu1 %v16945_v36 }
 0x3ea   :  { %12666 = vmatpush3.bf16.msra.mxu0 %v13102_v0 }
 0x3eb   :  { %12676 = vmatmul.mubr.msk.bf16.vlgmr.msra.gmra.mrb[148].mxu1 %vm231_vm2, %v15353_v15  ;;  %12679 = vmatprep.subr.bf16.mxu0 %v13103_v27 }
 0x3ec   :  { %12691 = vmatprep.mubr.msk.bf16.mxu1 %vm13250_vm0, %v16945_v36 }
 0x3ed   :  { %12668 = vmatmul.mubr.msk.bf16.vlgmr.msra.gmra.mrb[144].mxu0 %vm231_vm2, %v15360_v44 }
 0x3ee   :  { %12680 = vmatpush3.bf16.msra.mxu0 %v13103_v27  ;;  %12683 = vmatprep.mubr.msk.bf16.mxu0 %vm231_vm2, %v8799_v32 }
 0x3ef   :  { %12681 = vmatprep.subr.bf16.mxu0 %v13104_v25 }
 0x3f2   :  { %12682 = vmatpush3.bf16.msra.mxu0 %v13104_v25 }
 0x3f3   :  { %12695 = vmatprep.subr.bf16.mxu0 %v16945_v36 }
 0x3f5   :  { %12684 = vmatmul.mubr.msk.bf16.vlgmr.msra.gmra.mrb[148].mxu0 %vm231_vm2, %v15367_v49 }
 0x3f6   :  { %12699 = vmatprep.mubr.msk.bf16.mxu0 %vm13250_vm0, %v16945_v36 }
 0x44c   :  { %v5447_v15 = vpop.f32.mrb[92].mxu0 }
 0x44d   :  { %v12445_v11 = vpop.f32.mrb[93].mxu0 }
 0x44e   :  { %v5450_v44 = vpop.f32.mrb[94].mxu0  ;;  %v5505_v23 = vpop.f32.mrb[92].mxu1 }
 0x44f   :  { %v5506_v16 = vadd.f32 %v5505_v23, %v5447_v15  ;;  %v12446_v26 = vpop.f32.mrb[95].mxu0  ;;  %v12453_v12 = vpop.f32.mrb[93].mxu1 }
 0x450   :  { %v5508_v46 = vpop.f32.mrb[94].mxu1 }
 0x451   :  { %v5511_v19 = vadd.f32 %v5506_v16, %v4395_v37  ;;  %v12454_v38 = vpop.f32.mrb[95].mxu1 }
 0x453   :  { %v5517_v20 = vadd.f32 %v11515_v50, %v5511_v19 }
 0x454   :  { %v5602_v49 = vpop.f32.mrb[96].mxu0 }
 0x455   :  { %v12461_v61 = vpop.f32.mrb[97].mxu0 }
 0x456   :  { %v5605_v47 = vpop.f32.mrb[98].mxu0  ;;  %v5660_v55 = vpop.f32.mrb[96].mxu1 }
 0x457   :  { %v5661_v10 = vadd.f32 %v5660_v55, %v5602_v49  ;;  %v12462_v30 = vpop.f32.mrb[99].mxu0  ;;  %v12469_v14 = vpop.f32.mrb[97].mxu1 }
 0x458   :  { %v5663_v7 = vpop.f32.mrb[98].mxu1 }
 0x459   :  { %v5666_v21 = vadd.f32 %v5661_v10, %v5517_v20  ;;  %v12470_v63 = vpop.f32.mrb[99].mxu1 }
 0x45a   :  { %v13105_v63 = vld [vmem:[%s16896_s1 + $0x508] sm:$0xff]  }
 0x45b   :  { %v5672_v51 = vadd.f32 %v11524_v9, %v5666_v21  ;;  %12688 = vmatpush3.bf16.msra.mxu1 %v13105_v63 }
 0x45c   :  { %v5914_v29 = vpop.f32.mrb[100].mxu0  ;;  %12689 = vmatprep.subr.bf16.mxu1 %v16945_v36 }
 0x45d   :  { %5674 = vst.msk [vmem:[#allocation2] sm:$0x3] %vm5673_vm5, %v5672_v51  ;;  %v12477_v34 = vpop.f32.mrb[101].mxu0  ;;  %v13106_v51 = vld [vmem:[%s16896_s1 + $0x4f8] sm:$0xff]  }
 0x45e   :  { %v5917_v3 = vpop.f32.mrb[102].mxu0  ;;  %v5972_v13 = vpop.f32.mrb[100].mxu1  ;;  %12696 = vmatpush3.bf16.msra.mxu0 %v13106_v51 }
 0x45f   :  { %v5973_v31 = vadd.f32 %v5972_v13, %v5914_v29  ;;  %v12478_v41 = vpop.f32.mrb[103].mxu0  ;;  %v12485_v28 = vpop.f32.mrb[101].mxu1  ;;  %v13107_v3 = vld [vmem:[%s16896_s1 + $0x510] sm:$0xff]   ;;  %v13108_v13 = vld [vmem:[%s16896_s1 + $0x500] sm:$0xff]   ;;  %12697 = vmatprep.subr.bf16.mxu0 %v16945_v36 }
 0x460   :  { %v5975_v1 = vpop.f32.mrb[102].mxu1  ;;  %12690 = vmatpush3.bf16.msra.mxu1 %v13107_v3 }
 0x461   :  { %v12486_v8 = vpop.f32.mrb[103].mxu1  ;;  %12703 = vmatprep.subr.bf16.mxu1 %v16945_v36 }
 0x462   :  { %12698 = vmatpush3.bf16.msra.mxu0 %v13108_v13 }
 0x463   :  { %12711 = vmatprep.subr.bf16.mxu0 %v16945_v36 }
 0x464   :  { %v6035_v43 = vpop.f32.mrb[104].mxu0 }
 0x465   :  { %v6041_v53 = vadd.f32 %v6035_v43, %v5973_v31  ;;  %v12493_v45 = vpop.f32.mrb[105].mxu0 }
 0x466   :  { %v6038_v42 = vpop.f32.mrb[106].mxu0  ;;  %v6099_v62 = vpop.f32.mrb[104].mxu1 }
 0x467   :  { %v6105_v40 = vadd.f32 %v6099_v62, %v6041_v53  ;;  %v12494_v56 = vpop.f32.mrb[107].mxu0  ;;  %v12501_v54 = vpop.f32.mrb[105].mxu1 }
 0x468   :  { %v6102_v17 = vpop.f32.mrb[106].mxu1 }
 0x469   :  { %v12502_v24 = vpop.f32.mrb[107].mxu1 }
 0x46c   :  { %v6163_v6 = vpop.f32.mrb[108].mxu0 }
 0x46d   :  { %v6169_v22 = vadd.f32 %v6163_v6, %v6105_v40  ;;  %v12509_v35 = vpop.f32.mrb[109].mxu0 }
 0x46e   :  { %v6166_v33 = vpop.f32.mrb[110].mxu0  ;;  %v6227_v52 = vpop.f32.mrb[108].mxu1 }
 0x46f   :  { %v6233_v0 = vadd.f32 %v6227_v52, %v6169_v22  ;;  %v12510_v18 = vpop.f32.mrb[111].mxu0  ;;  %v12517_v48 = vpop.f32.mrb[109].mxu1 }
 0x470   :  { %v6230_v57 = vpop.f32.mrb[110].mxu1 }
 0x471   :  { %v12518_v27 = vpop.f32.mrb[111].mxu1 }
 0x474   :  { %v6291_v5 = vpop.f32.mrb[112].mxu0 }
 0x475   :  { %v6297_v2 = vadd.f32 %v6291_v5, %v6233_v0  ;;  %v12525_v25 = vpop.f32.mrb[113].mxu0 }
 0x476   :  { %v6294_v32 = vpop.f32.mrb[114].mxu0  ;;  %v6355_v15 = vpop.f32.mrb[112].mxu1 }
 0x477   :  { %v6361_v4 = vadd.f32 %v6355_v15, %v6297_v2  ;;  %v12526_v11 = vpop.f32.mrb[115].mxu0  ;;  %v12533_v44 = vpop.f32.mrb[113].mxu1 }
 0x478   :  { %v6358_v23 = vpop.f32.mrb[114].mxu1 }
 0x479   :  { %v12534_v37 = vpop.f32.mrb[115].mxu1 }
 0x47c   :  { %v6420_v16 = vpop.f32.mrb[116].mxu0 }
 0x47d   :  { %v6426_v26 = vadd.f32 %v6420_v16, %v6361_v4  ;;  %v12541_v12 = vpop.f32.mrb[117].mxu0 }
 0x47e   :  { %v6423_v46 = vpop.f32.mrb[118].mxu0  ;;  %v6483_v19 = vpop.f32.mrb[116].mxu1 }
 0x47f   :  { %v6489_v38 = vadd.f32 %v6483_v19, %v6426_v26  ;;  %v12542_v49 = vpop.f32.mrb[119].mxu0  ;;  %v12549_v50 = vpop.f32.mrb[117].mxu1  ;;  %v10128_v19 = vcombine.high %v15406_v39, %v15406_v39 }
 0x480   :  { %v6486_v61 = vpop.f32.mrb[118].mxu1  ;;  %v11639_v49 = vld [vmem:[%s16897_s2 + $0x12] ss:$0 sm:$0xff] }
 0x481   :  { %v12550_v47 = vpop.f32.mrb[119].mxu1  ;;  %v16057_v50 = vrot.slane %v10128_v19, %v14287_v60  ;;  %v8988_v61 = vcombine.high %v11639_v49, %v11639_v49 }
 0x483   :  { %v16070_v51 = vrot.slane %v8988_v61, %v14287_v60 }
 0x484   :  { %v6547_v55 = vpop.f32.mrb[120].mxu0 }
 0x485   :  { %v6553_v20 = vadd.f32 %v6547_v55, %v6489_v38  ;;  %v12557_v10 = vpop.f32.mrb[121].mxu0  ;;  %v11683_v55 = vld [vmem:[%s16897_s2 + $0x14] ss:$0 sm:$0xff] }
 0x486   :  { %v6550_v30 = vpop.f32.mrb[122].mxu0  ;;  %v6611_v14 = vpop.f32.mrb[120].mxu1 }
 0x487   :  { %v6617_v9 = vadd.f32 %v6611_v14, %v6553_v20  ;;  %v12558_v7 = vpop.f32.mrb[123].mxu0  ;;  %v12565_v21 = vpop.f32.mrb[121].mxu1  ;;  %v16989_v20 = vld [vmem:[#allocation7_spill] sm:$0xff] }
 0x488   :  { %v6614_v29 = vpop.f32.mrb[122].mxu1  ;;  %v10171_v10 = vcombine.high %v16989_v20, %v16989_v20  ;;  %v16065_v7 = vrot.slane %v11639_v49, %v14287_v60 }
 0x489   :  { %v12566_v34 = vpop.f32.mrb[123].mxu1  ;;  %v10033_v29 = vcombine.high %v11683_v55, %v11683_v55 }
 0x48a   :  { %v16073_v34 = vrot.slane %v11683_v55, %v14287_v60 }
 0x48c   :  { %v6675_v31 = vpop.f32.mrb[124].mxu0 }
 0x48d   :  { %v6681_v41 = vadd.f32 %v6675_v31, %v6617_v9  ;;  %v12573_v28 = vpop.f32.mrb[125].mxu0 }
 0x48e   :  { %v6678_v1 = vpop.f32.mrb[126].mxu0  ;;  %v6739_v8 = vpop.f32.mrb[124].mxu1  ;;  %v16083_v28 = vld [vmem:[%s16897_s2 + $0x15] ss:$0 sm:$0xff] }
 0x48f   :  { %v6745_v43 = vadd.f32 %v6739_v8, %v6681_v41  ;;  %v12574_v53 = vpop.f32.mrb[127].mxu0  ;;  %v12581_v45 = vpop.f32.mrb[125].mxu1  ;;  %v16087_v1 = vrot.slane %v16989_v20, %v14287_v60  ;;  %v16090_v8 = vrot.slane %v10171_v10, %v14287_v60 }
 0x490   :  { %v6742_v42 = vpop.f32.mrb[126].mxu1 }
 0x491   :  { %v12582_v62 = vpop.f32.mrb[127].mxu1 }
 0x494   :  { %v6803_v40 = vpop.f32.mrb[128].mxu0 }
 0x495   :  { %v6809_v56 = vadd.f32 %v6803_v40, %v6745_v43  ;;  %v12589_v54 = vpop.f32.mrb[129].mxu0  ;;  %v16106_v40 = vcombine.high %v16065_v7, %v16065_v7 }
 0x496   :  { %v6806_v17 = vpop.f32.mrb[130].mxu0  ;;  %v6867_v24 = vpop.f32.mrb[128].mxu1  ;;  %v16113_v54 = vrot.slane %v10033_v29, %v14287_v60 }
 0x497   :  { %v6873_v6 = vadd.f32 %v6867_v24, %v6809_v56  ;;  %v12590_v22 = vpop.f32.mrb[131].mxu0  ;;  %v12597_v35 = vpop.f32.mrb[129].mxu1  ;;  %v16110_v56 = vcombine.high %v16070_v51, %v16070_v51  ;;  %v16119_v24 = vrot.slane %v16083_v28, %v14287_v60 }
 0x498   :  { %v6870_v33 = vpop.f32.mrb[130].mxu1 }
 0x499   :  { %v12598_v52 = vpop.f32.mrb[131].mxu1 }
 0x49a   :  { %v16125_v52 = vcombine.high %v16073_v34, %v16073_v34 }
 0x49c   :  { %v6934_v0 = vpop.f32.mrb[132].mxu0 }
 0x49d   :  { %v6940_v18 = vadd.f32 %v6934_v0, %v6873_v6  ;;  %v12605_v48 = vpop.f32.mrb[133].mxu0 }
 0x49e   :  { %v6937_v57 = vpop.f32.mrb[134].mxu0  ;;  %v6997_v27 = vpop.f32.mrb[132].mxu1 }
 0x49f   :  { %v7003_v5 = vadd.f32 %v6997_v27, %v6940_v18  ;;  %v12606_v2 = vpop.f32.mrb[135].mxu0  ;;  %v12613_v25 = vpop.f32.mrb[133].mxu1 }
 0x4a0   :  { %v7000_v32 = vpop.f32.mrb[134].mxu1 }
 0x4a1   :  { %v12614_v15 = vpop.f32.mrb[135].mxu1 }
 0x4a4   :  { %v7061_v4 = vpop.f32.mrb[136].mxu0 }
 0x4a5   :  { %v7067_v11 = vadd.f32 %v7061_v4, %v7003_v5  ;;  %v12621_v44 = vpop.f32.mrb[137].mxu0 }
 0x4a6   :  { %v7064_v23 = vpop.f32.mrb[138].mxu0  ;;  %v7125_v37 = vpop.f32.mrb[136].mxu1 }
 0x4a7   :  { %v16049_v16 = vadd.f32 %v7125_v37, %v7067_v11  ;;  %v12622_v26 = vpop.f32.mrb[139].mxu0  ;;  %v12629_v12 = vpop.f32.mrb[137].mxu1 }
 0x4a8   :  { %v7128_v46 = vpop.f32.mrb[138].mxu1 }
 0x4a9   :  { %16988 = vst [vmem:[#allocation5_spill] sm:$0xff] %v16049_v16  ;;  %v12630_v38 = vpop.f32.mrb[139].mxu1 }
 0x4ae   :  { %v12653_v47 = vpop.f32.mrb[140].mxu1 }
 0x4af   :  { %v7945_v30 = vcombine.high %v12653_v47, %v12653_v47  ;;  %v7892_v14 = vpop.f32.mrb[141].mxu1  ;;  %v7952_v3 = vrot.slane %v12653_v47, %v14287_v60 }
 0x4b0   :  { %v7911_v39 = vcombine.high %v7892_v14, %v7892_v14  ;;  %v12654_v9 = vpop.f32.mrb[142].mxu1  ;;  %v16078_v31 = vrot.slane %v7892_v14, %v14287_v60 }
 0x4b1   :  { %v7895_v63 = vpop.f32.mrb[143].mxu1  ;;  %v7959_v13 = vrot.slane %v7945_v30, %v14287_v60  ;;  %v16094_v53 = vrot.slane %v12654_v9, %v14287_v60  ;;  %v7960_v6 = vcombine.high %v7952_v3, %v7952_v3 }
 0x4b2   :  { %v7928_v41 = vcombine.high %v7895_v63, %v7895_v63  ;;  %v7925_v43 = vrot.slane %v7911_v39, %v14287_v60  ;;  %v16099_v42 = vrot.slane %v7895_v63, %v14287_v60  ;;  %v7926_v35 = vcombine.high %v16078_v31, %v16078_v31 }
 0x4b3   :  { %v7961_v22 = vcombine.high %v7959_v13, %v7959_v13  ;;  %v7969_v18 = vcombine.high %v16094_v53, %v16094_v53 }
 0x4b4   :  { %v16102_v62 = vrot.slane %v7928_v41, %v14287_v60  ;;  %v7927_v0 = vcombine.high %v7925_v43, %v7925_v43  ;;  %v7943_v5 = vcombine.high %v16099_v42, %v16099_v42 }
 0x4b6   :  { %v12661_v33 = vpop.f32.mrb[144].mxu1  ;;  %v7944_v2 = vcombine.high %v16102_v62, %v16102_v62 }
 0x4b7   :  { %v8240_v48 = vcombine.high %v12661_v33, %v12661_v33  ;;  %v16130_v57 = vrot.slane %v12661_v33, %v14287_v60  ;;  %v8187_v27 = vpop.f32.mrb[145].mxu1 }
 0x4b8   :  { %v8206_v25 = vcombine.high %v8187_v27, %v8187_v27  ;;  %v16137_v32 = vrot.slane %v8187_v27, %v14287_v60  ;;  %v12645_v15 = vpop.f32.mrb[140].mxu0  ;;  %v12662_v4 = vpop.f32.mrb[146].mxu1 }
 0x4b9   :  { %v16140_v11 = vrot.slane %v8240_v48, %v14287_v60  ;;  %v8255_v44 = vcombine.high %v16130_v57, %v16130_v57  ;;  %v7708_v23 = vcombine.high %v12645_v15, %v12645_v15  ;;  %v7715_v37 = vrot.slane %v12645_v15, %v14287_v60  ;;  %v7655_v26 = vpop.f32.mrb[141].mxu0  ;;  %v8190_v12 = vpop.f32.mrb[147].mxu1 }
 0x4ba   :  { %v16146_v46 = vrot.slane %v8206_v25, %v14287_v60  ;;  %v8221_v19 = vcombine.high %v16137_v32, %v16137_v32  ;;  %v16151_v38 = vrot.slane %v12662_v4, %v14287_v60  ;;  %v7674_v49 = vcombine.high %v7655_v26, %v7655_v26  ;;  %v12646_v61 = vpop.f32.mrb[142].mxu0 }
 0x4bb   :  { %v8256_v47 = vcombine.high %v16140_v11, %v16140_v11  ;;  %v7722_v55 = vrot.slane %v7708_v23, %v14287_v60  ;;  %v7723_v20 = vcombine.high %v7715_v37, %v7715_v37  ;;  %v7992_v10 = vadd.f32 %v7952_v3, %v7715_v37  ;;  %v7658_v30 = vpop.f32.mrb[143].mxu0 }
 0x4bc   :  { %v8222_v14 = vcombine.high %v16146_v46, %v16146_v46  ;;  %v7681_v9 = vrot.slane %v7655_v26, %v14287_v60  ;;  %v7688_v63 = vrot.slane %v7674_v49, %v14287_v60  ;;  %v8223_v48 = vcombine.high %v8190_v12, %v8190_v12 }
 0x4bd   :  { %v7724_v29 = vcombine.high %v7722_v55, %v7722_v55  ;;  %v7993_v41 = vadd.f32 %v7960_v6, %v7723_v20  ;;  %v7994_v33 = vadd.f32 %v7959_v13, %v7722_v55  ;;  %v16164_v37 = vrot.slane %v8190_v12, %v14287_v60 }
 0x4be   :  { %v7689_v27 = vcombine.high %v7681_v9, %v7681_v9  ;;  %v7690_v25 = vcombine.high %v7688_v63, %v7688_v63  ;;  %v7984_v15 = vadd.f32 %v16078_v31, %v7681_v9  ;;  %v7986_v3 = vadd.f32 %v7925_v43, %v7688_v63  ;;  %v12677_v4 = vpop.f32.mrb[148].mxu1 }
 0x4bf   :  { %v7995_v23 = vadd.f32 %v7961_v22, %v7724_v29  ;;  %v16167_v21 = vrot.slane %v8223_v48, %v14287_v60  ;;  %v7731_v26 = vrot.slane %v12646_v61, %v14287_v60  ;;  %v8657_v49 = vpop.f32.mrb[149].mxu1  ;;  %v7691_v13 = vcombine.high %v7658_v30, %v7658_v30 }
 0x4c0   :  { %v7985_v45 = vadd.f32 %v7926_v35, %v7689_v27  ;;  %v7987_v6 = vadd.f32 %v7927_v0, %v7690_v25  ;;  %v7698_v55 = vrot.slane %v7658_v30, %v14287_v60  ;;  %v12669_v20 = vpop.f32.mrb[144].mxu0  ;;  %v12678_v17 = vpop.f32.mrb[150].mxu1  ;;  %v8710_v29 = vcombine.high %v12677_v4, %v12677_v4 }
 0x4c1   :  { %v7732_v22 = vcombine.high %v7731_v26, %v7731_v26  ;;  %v7996_v12 = vadd.f32 %v16094_v53, %v7731_v26  ;;  %v8406_v9 = vpop.f32.mrb[145].mxu0  ;;  %v8660_v63 = vpop.f32.mrb[151].mxu1  ;;  %v7705_v61 = vrot.slane %v7691_v13, %v14287_v60  ;;  %v16179_v27 = vrot.slane %v12677_v4, %v14287_v60 }
 0x4c2   :  { %v7706_v35 = vcombine.high %v7698_v55, %v7698_v55  ;;  %v7988_v0 = vadd.f32 %v16099_v42, %v7698_v55  ;;  %v12670_v30 = vpop.f32.mrb[146].mxu0  ;;  %v8676_v25 = vcombine.high %v8657_v49, %v8657_v49  ;;  %v16182_v31 = vrot.slane %v8657_v49, %v14287_v60 }
 0x4c3   :  { %v7997_v48 = vadd.f32 %v7969_v18, %v7732_v22  ;;  %v8409_v43 = vpop.f32.mrb[147].mxu0  ;;  %v7707_v39 = vcombine.high %v7705_v61, %v7705_v61  ;;  %v7990_v26 = vadd.f32 %v16102_v62, %v7705_v61  ;;  %v16189_v13 = vrot.slane %v8710_v29, %v14287_v60 }
 0x4c4   :  { %v7989_v53 = vadd.f32 %v7943_v5, %v7706_v35  ;;  %v8725_v18 = vcombine.high %v16179_v27, %v16179_v27  ;;  %v16194_v4 = vrot.slane %v8676_v25, %v14287_v60  ;;  %v8287_v55 = vadd.f32 %v16130_v57, %v7992_v10 }
 0x4c5   :  { %v7991_v42 = vadd.f32 %v7944_v2, %v7707_v39  ;;  %v8726_v5 = vcombine.high %v16189_v13, %v16189_v13  ;;  %v8288_v22 = vadd.f32 %v8255_v44, %v7993_v41  ;;  %v8289_v61 = vadd.f32 %v16140_v11, %v7994_v33 }
 0x4c6   :  { %v8290_v29 = vadd.f32 %v8256_v47, %v7995_v23  ;;  %v8459_v25 = vcombine.high %v12669_v20, %v12669_v20  ;;  %v8466_v10 = vrot.slane %v12669_v20, %v14287_v60  ;;  %v16212_v49 = vrot.slane %v12678_v17, %v14287_v60 }
 0x4c7   :  { %v8279_v62 = vadd.f32 %v16137_v32, %v7984_v15  ;;  %v8280_v2 = vadd.f32 %v8221_v19, %v7985_v45  ;;  %v8281_v57 = vadd.f32 %v16146_v46, %v7986_v3  ;;  %v8282_v47 = vadd.f32 %v8222_v14, %v7987_v6 }
 0x4c8   :  { %v12685_v44 = vpop.f32.mrb[148].mxu0  ;;  %v8473_v11 = vrot.slane %v8459_v25, %v14287_v60  ;;  %v8474_v39 = vcombine.high %v8466_v10, %v8466_v10  ;;  %v8506_v41 = vadd.f32 %v8466_v10, %v8287_v55  ;;  %v8734_v17 = vcombine.high %v16212_v49, %v16212_v49 }
 0x4c9   :  { %v8876_v33 = vpop.f32.mrb[149].mxu0  ;;  %v8425_v15 = vcombine.high %v8406_v9, %v8406_v9  ;;  %v8432_v23 = vrot.slane %v8406_v9, %v14287_v60  ;;  %v8693_v32 = vcombine.high %v8660_v63, %v8660_v63  ;;  %v16229_v25 = vrot.slane %v8660_v63, %v14287_v60 }
 0x4ca   :  { %v16226_v45 = vpop.f32.mrb[150].mxu0  ;;  %v8475_v19 = vcombine.high %v8473_v11, %v8473_v11  ;;  %v8507_v3 = vadd.f32 %v8474_v39, %v8288_v22  ;;  %v8508_v20 = vadd.f32 %v8473_v11, %v8289_v61  ;;  %v8291_v16 = vadd.f32 %v16151_v38, %v7996_v12 }
 0x4cb   :  { %v16231_v55 = vpop.f32.mrb[151].mxu0  ;;  %v8439_v46 = vrot.slane %v8425_v15, %v14287_v60  ;;  %v8440_v14 = vcombine.high %v8432_v23, %v8432_v23  ;;  %v8498_v6 = vadd.f32 %v8432_v23, %v8279_v62  ;;  %v16235_v10 = vrot.slane %v8693_v32, %v14287_v60 }
 0x4cc   :  { %v8509_v35 = vadd.f32 %v8475_v19, %v8290_v29  ;;  %v8708_v9 = vcombine.high %v16229_v25, %v16229_v25  ;;  %v16990_v22 = vcombine.high %v16151_v38, %v16151_v38  ;;  %v8482_v62 = vrot.slane %v12670_v30, %v14287_v60 }
 0x4cd   :  { %v8441_v61 = vcombine.high %v8439_v46, %v8439_v46  ;;  %v8499_v11 = vadd.f32 %v8440_v14, %v8280_v2  ;;  %v8500_v39 = vadd.f32 %v8439_v46, %v8281_v57  ;;  %v8283_v23 = vadd.f32 %v16164_v37, %v7988_v0 }
 0x4ce   :  { %v8292_v63 = vadd.f32 %v16990_v22, %v7997_v48  ;;  %v16991_v29 = vcombine.high %v16164_v37, %v16164_v37  ;;  %v8285_v12 = vadd.f32 %v16167_v21, %v7990_v26  ;;  %v16992_v38 = vcombine.high %v16167_v21, %v16167_v21 }
 0x4cf   :  { %v8501_v19 = vadd.f32 %v8441_v61, %v8282_v47  ;;  %v8442_v2 = vcombine.high %v8409_v43, %v8409_v43  ;;  %v8449_v57 = vrot.slane %v8409_v43, %v14287_v60  ;;  %v8483_v46 = vcombine.high %v8482_v62, %v8482_v62 }
 0x4d0   :  { %v8284_v32 = vadd.f32 %v16991_v29, %v7989_v53  ;;  %v8286_v48 = vadd.f32 %v16992_v38, %v7991_v42  ;;  %v8510_v14 = vadd.f32 %v8482_v62, %v8291_v16  ;;  %v8757_v30 = vadd.f32 %v16179_v27, %v8506_v41 }
 0x4d1   :  { %v8758_v22 = vadd.f32 %v8725_v18, %v8507_v3  ;;  %v8456_v0 = vrot.slane %v8442_v2, %v14287_v60  ;;  %v8457_v15 = vcombine.high %v8449_v57, %v8449_v57  ;;  %v8502_v37 = vadd.f32 %v8449_v57, %v8283_v23 }
 0x4d2   :  { %v8759_v53 = vadd.f32 %v16189_v13, %v8508_v20  ;;  %v8511_v26 = vadd.f32 %v8483_v46, %v8292_v63  ;;  %v8760_v47 = vadd.f32 %v8726_v5, %v8509_v35  ;;  %v8929_v61 = vcombine.high %v12685_v44, %v12685_v44 }
 0x4d3   :  { %v8936_v21 = vrot.slane %v12685_v44, %v14287_v60  ;;  %v8458_v42 = vcombine.high %v8456_v0, %v8456_v0  ;;  %v8503_v29 = vadd.f32 %v8457_v15, %v8284_v32  ;;  %v8504_v38 = vadd.f32 %v8456_v0, %v8285_v12 }
 0x4d4   :  { %v8749_v43 = vadd.f32 %v16182_v31, %v8498_v6  ;;  %v8943_v16 = vrot.slane %v8929_v61, %v14287_v60  ;;  %v16993_v41 = vcombine.high %v16182_v31, %v16182_v31  ;;  %v8751_v13 = vadd.f32 %v16194_v4, %v8500_v39 }
 0x4d5   :  { %v8944_v27 = vcombine.high %v8936_v21, %v8936_v21  ;;  %v8976_v18 = vadd.f32 %v8936_v21, %v8757_v30  ;;  %v8505_v62 = vadd.f32 %v8458_v42, %v8286_v48  ;;  %v16994_v5 = vcombine.high %v16194_v4, %v16194_v4 }
 0x4d6   :  { %v8750_v3 = vadd.f32 %v16993_v41, %v8499_v11  ;;  %v8895_v44 = vcombine.high %v8876_v33, %v8876_v33  ;;  %v8945_v20 = vcombine.high %v8943_v16, %v8943_v16  ;;  %v8978_v15 = vadd.f32 %v8943_v16, %v8759_v53 }
 0x4d7   :  { %v8752_v35 = vadd.f32 %v16994_v5, %v8501_v19  ;;  %v8977_v63 = vadd.f32 %v8944_v27, %v8758_v22  ;;  %v9017_v6 = vadd.f32 %v16106_v40, %v8976_v18  ;;  %v8902_v23 = vrot.slane %v8876_v33, %v14287_v60 }
 0x4d8   :  { %v8909_v32 = vrot.slane %v8895_v44, %v14287_v60  ;;  %v8761_v31 = vadd.f32 %v16212_v49, %v8510_v14  ;;  %v8762_v11 = vadd.f32 %v8734_v17, %v8511_v26  ;;  %v8979_v12 = vadd.f32 %v8945_v20, %v8760_v47 }
 0x4d9   :  { %v9018_v39 = vadd.f32 %v16070_v51, %v8977_v63  ;;  %v9019_v48 = vadd.f32 %v16110_v56, %v8978_v15  ;;  %13187 = vtanh.f32 %v9017_v6  ;;  %v8910_v4 = vcombine.high %v8902_v23, %v8902_v23 }
 0x4da   :  { %v8911_v19 = vcombine.high %v8909_v32, %v8909_v32  ;;  %v8968_v2 = vadd.f32 %v8902_v23, %v8749_v43  ;;  %v8970_v57 = vadd.f32 %v8909_v32, %v8751_v13  ;;  %v9020_v46 = vadd.f32 %v16065_v7, %v8979_v12 }
 0x4db   :  { %13189 = vtanh.f32 %v9018_v39  ;;  %v8952_v33 = vrot.slane %v16226_v45, %v14287_v60  ;;  %v8753_v30 = vadd.f32 %v16229_v25, %v8502_v37  ;;  %v8969_v49 = vadd.f32 %v8910_v4, %v8750_v3 }
 0x4dc   :  { %13191 = vtanh.f32 %v9019_v48  ;;  %v8971_v17 = vadd.f32 %v8911_v19, %v8752_v35  ;;  %v9009_v14 = vadd.f32 %v16065_v7, %v8968_v2  ;;  %v9011_v22 = vadd.f32 %v16070_v51, %v8970_v57 }
 0x4dd   :  { %13193 = vtanh.f32 %v9020_v46  ;;  %v8953_v0 = vcombine.high %v8952_v33, %v8952_v33  ;;  %v8980_v53 = vadd.f32 %v8952_v33, %v8761_v31  ;;  %v9010_v26 = vadd.f32 %v16106_v40, %v8969_v49 }
 0x4de   :  { %v9012_v47 = vadd.f32 %v16110_v56, %v8971_v17  ;;  %13195 = vtanh.f32 %v9009_v14  ;;  %v8754_v45 = vadd.f32 %v8708_v9, %v8503_v29  ;;  %v8755_v21 = vadd.f32 %v16235_v10, %v8504_v38 }
 0x4df   :  { %13197 = vtanh.f32 %v9011_v22  ;;  %v8981_v37 = vadd.f32 %v8953_v0, %v8762_v11  ;;  %v9021_v61 = vadd.f32 %v16106_v40, %v8980_v53  ;;  %v16995_v42 = vcombine.high %v16235_v10, %v16235_v10 }
 0x4e0   :  { %13199 = vtanh.f32 %v9010_v26  ;;  %v8912_v16 = vcombine.high %v16231_v55, %v16231_v55  ;;  %v8919_v56 = vrot.slane %v16231_v55, %v14287_v60  ;;  %v16996_v25 = vcombine.high %v16083_v28, %v16083_v28 }
 0x4e1   :  { %v8756_v43 = vadd.f32 %v16995_v42, %v8505_v62  ;;  %v16302_v29 = vcombine.high %v16119_v24, %v16119_v24  ;;  %13201 = vtanh.f32 %v9012_v47  ;;  %v9022_v10 = vadd.f32 %v16070_v51, %v8981_v37 }
 0x4e2   :  { %v16298_v9 = vrot.slane %v16996_v25, %v14287_v60  ;;  %13203 = vtanh.f32 %v9021_v61  ;;  %v8926_v38 = vrot.slane %v8912_v16, %v14287_v60  ;;  %v8927_v27 = vcombine.high %v8919_v56, %v8919_v56 }
 0x4e3   :  { %v8972_v18 = vadd.f32 %v8919_v56, %v8753_v30  ;;  %v16306_v41 = vpop.eup %13187  ;;  %v10186_v55 = vcombine.high %v16087_v1, %v16087_v1  ;;  %v16312_v28 = vrot.slane %v15409_v58, %v14287_v60  ;;  %v10049_v3 = vcombine.high %v16113_v54, %v16113_v54 }
 0x4e4   :  { %13205 = vtanh.f32 %v9022_v10  ;;  %v10062_v62 = vmul.f32 %v16306_v41, %v16125_v52  ;;  %v8928_v13 = vcombine.high %v8926_v38, %v8926_v38  ;;  %v8973_v5 = vadd.f32 %v8927_v27, %v8754_v45 }
 0x4e5   :  { %v8974_v35 = vadd.f32 %v8926_v38, %v8755_v21  ;;  %v16318_v44 = vpop.eup %13189  ;;  %v10187_v20 = vcombine.high %v16090_v8, %v16090_v8  ;;  %v16997_v63 = vcombine.high %v15409_v58, %v15409_v58  ;;  %v10089_v6 = vcombine.high %v16298_v9, %v16298_v9 }
 0x4e6   :  { %v9013_v23 = vadd.f32 %v16065_v7, %v8972_v18  ;;  %v16331_v32 = vpop.eup %13191  ;;  %v10063_v31 = vmul.f32 %v16318_v44, %v16113_v54  ;;  %v10102_v11 = vadd.f32 %v16302_v29, %v10062_v62  ;;  %v8975_v12 = vadd.f32 %v8928_v13, %v8756_v43 }
 0x4e7   :  { %v16326_v15 = vrot.slane %v16997_v63, %v14287_v60  ;;  %v9014_v39 = vadd.f32 %v16106_v40, %v8973_v5  ;;  %v13194_v48 = vpop.eup %13193  ;;  %v10152_v58 = vcombine.high %v16312_v28, %v16312_v28  ;;  %v9085_v4 = vcombine.low %v16318_v44, %v16331_v32 }
 0x4e8   :  { %v10064_v19 = vmul.f32 %v16331_v32, %v10049_v3  ;;  %13207 = vtanh.f32 %v9013_v23  ;;  %v13196_v2 = vpop.eup %13195  ;;  %v10065_v57 = vmul.f32 %v13194_v48, %v16073_v34  ;;  %v10103_v46 = vadd.f32 %v16298_v9, %v10063_v31 }
 0x4e9   :  { %v10116_v33 = vmax.f32 %v10102_v11, 0.0  ;;  %v9015_v30 = vadd.f32 %v16070_v51, %v8974_v35  ;;  %v13198_v49 = vpop.eup %13197  ;;  %v10054_v17 = vmul.f32 %v13196_v2, %v16073_v34  ;;  %v9016_v14 = vadd.f32 %v16065_v7, %v8975_v12 }
 0x4ea   :  { %v10104_v40 = vadd.f32 %v10089_v6, %v10064_v19  ;;  %13209 = vtanh.f32 %v9014_v39  ;;  %v13200_v22 = vpop.eup %13199  ;;  %v10105_v0 = vadd.f32 %v16119_v24, %v10065_v57  ;;  %v10117_v53 = vmax.f32 %v10103_v46, 0.0 }
 0x4eb   :  { %v16349_v26 = vadd.f32 %v16087_v1, %v10116_v33  ;;  %v10056_v47 = vmul.f32 %v13198_v49, %v16113_v54  ;;  %v13202_v45 = vpop.eup %13201  ;;  %v9051_v61 = vcombine.low %v13196_v2, %v13200_v22  ;;  %v10055_v51 = vmul.f32 %v13200_v22, %v16125_v52 }
 0x4ec   :  { %v10118_v37 = vmax.f32 %v10104_v40, 0.0  ;;  %v10094_v21 = vadd.f32 %v16119_v24, %v10054_v17  ;;  %v13204_v42 = vpop.eup %13203  ;;  %v10119_v43 = vmax.f32 %v10105_v0, 0.0  ;;  %v16354_v7 = vadd.f32 %v10186_v55, %v10117_v53 }
 0x4ed   :  { %v9052_v16 = vcombine.low %v13198_v49, %v13202_v45  ;;  %v10057_v56 = vmul.f32 %v13202_v45, %v10049_v3  ;;  %v16360_v1 = vrot.slane %v9051_v61, %v14287_v60  ;;  %v10095_v38 = vadd.f32 %v16302_v29, %v10055_v51 }
 0x4ee   :  { %v13206_v25 = vpop.eup %13205  ;;  %v16357_v10 = vadd.f32 %v16090_v8, %v10118_v37  ;;  %v10096_v27 = vadd.f32 %v16298_v9, %v10056_v47  ;;  %v10108_v13 = vmax.f32 %v10094_v21, 0.0  ;;  %v9101_v55 = vcombine.low %v13194_v48, %v13204_v42  ;;  %v16999_v48 = vld [vmem:[#allocation9_spill] sm:$0xff] }
 0x4ef   :  { %v16365_v18 = vrot.slane %v9052_v16, %v14287_v60  ;;  %v10097_v62 = vadd.f32 %v10089_v6, %v10057_v56  ;;  %v10109_v5 = vmax.f32 %v10095_v38, 0.0  ;;  %v9115_v63 = vrot.slane %v13206_v25, %v14287_v60 }
 0x4f0   :  { %v10272_v3 = vcombine.low %v16354_v7, %v16357_v10  ;;  %v10110_v35 = vmax.f32 %v10096_v27, 0.0  ;;  %v16998_v11 = vcombine.high %v16057_v50, %v16057_v50  ;;  %v9108_v39 = vrot.slane %v9101_v55, %v14287_v60 }
 0x4f1   :  { %v9067_v23 = vcombine.low %v16360_v1, %v16365_v18  ;;  %v10111_v31 = vmax.f32 %v10097_v62, 0.0  ;;  %v10194_v19 = vrot.slane %v16999_v48, %v14287_v60  ;;  %v10211_v2 = vadd.f32 %v16312_v28, %v10109_v5  ;;  %v17001_v18 = vld [vmem:[#allocation8_spill] sm:$0xff] }
 0x4f2   :  { %v10210_v12 = vadd.f32 %v16998_v11, %v10108_v13  ;;  %v13208_v6 = vpop.eup %13207  ;;  %v10212_v57 = vadd.f32 %v10152_v58, %v10110_v35  ;;  %v10066_v46 = vmul.f32 %v13204_v42, %v16125_v52  ;;  %v9116_v49 = vcombine.low %v9108_v39, %v9115_v63 }
 0x4f3   :  { %v10213_v33 = vadd.f32 %v16326_v15, %v10111_v31  ;;  %v10067_v40 = vmul.f32 %v13206_v25, %v16113_v54  ;;  %v10221_v50 = vadd.f32 %v10187_v20, %v10119_v43  ;;  %13211 = vtanh.f32 %v9015_v30 }
 0x4f4   :  { %v13210_v17 = vpop.eup %13209  ;;  %v10238_v22 = vcombine.low %v10210_v12, %v10211_v2  ;;  %v10106_v0 = vadd.f32 %v16302_v29, %v10066_v46  ;;  %v10058_v53 = vmul.f32 %v13208_v6, %v16073_v34  ;;  %13213 = vtanh.f32 %v9016_v14 }
 0x4f5   :  { %v10239_v28 = vcombine.low %v10212_v57, %v10213_v33  ;;  %v10107_v58 = vadd.f32 %v16298_v9, %v10067_v40  ;;  %v9068_v47 = vcombine.low %v13208_v6, %v13210_v17  ;;  %v10059_v37 = vmul.f32 %v13210_v17, %v16125_v52  ;;  %v17000_v52 = vld [vmem:[#allocation6_spill] sm:$0xff] }
 0x4f6   :  { %v10120_v45 = vmax.f32 %v10106_v0, 0.0  ;;  %v10098_v61 = vadd.f32 %v16119_v24, %v10058_v53  ;;  %v10195_v51 = vcombine.high %v10194_v19, %v10194_v19  ;;  %v10246_v8 = vrot.slane %v10238_v22, %v14287_v60 }
 0x4f7   :  { %v10253_v20 = vrot.slane %v10239_v28, %v14287_v60  ;;  %v10121_v21 = vmax.f32 %v10107_v58, 0.0  ;;  %v10153_v30 = vcombine.high %v16326_v15, %v16326_v15  ;;  %v10099_v43 = vadd.f32 %v16302_v29, %v10059_v37 }
 0x4f8   :  { %v10222_v42 = vadd.f32 %v10194_v19, %v10120_v45  ;;  %v10112_v16 = vmax.f32 %v10098_v61, 0.0  ;;  %v10160_v25 = vrot.slane %v17000_v52, %v14287_v60  ;;  %v10162_v62 = vcombine.high %v17001_v18, %v17001_v18 }
 0x4f9   :  { %v16395_v14 = vadd.f32 %v10195_v51, %v10121_v21  ;;  %v16397_v56 = vcombine.low %v10246_v8, %v10253_v20  ;;  %v10113_v38 = vmax.f32 %v10099_v43, 0.0  ;;  %v9075_v15 = vrot.slane %v9068_v47, %v14287_v60  ;;  %v13109_v51 = vld [vmem:[%s16896_s1 + $0x518] sm:$0xff]  }
 0x4fa   :  { %v10288_v1 = vcombine.low %v10221_v50, %v10222_v42  ;;  %v16401_v27 = vadd.f32 %v10153_v30, %v10112_v16  ;;  %v10169_v31 = vrot.slane %v10162_v62, %v14287_v60  ;;  %v9099_v48 = vrot.slane %v9085_v4, %v14287_v60 }
 0x4fb   :  { %v16405_v13 = vadd.f32 %v10160_v25, %v10113_v38  ;;  %v10161_v57 = vcombine.high %v10160_v25, %v10160_v25  ;;  %v13110_v25 = vld [vmem:[%s16896_s1 + $0x528] sm:$0xff]  }
 0x4fd   :  { %v13212_v29 = vpop.eup %13211  ;;  %v10255_v55 = vcombine.low %v16401_v27, %v16405_v13 }
 0x4fe   :  { %v13214_v5 = vpop.eup %13213  ;;  %v9082_v35 = vrot.slane %v13212_v29, %v14287_v60  ;;  %v10060_v63 = vmul.f32 %v13212_v29, %v16113_v54  ;;  %v10295_v54 = vrot.slane %v10288_v1, %v14287_v60  ;;  %v13111_v29 = vld [vmem:[%s16896_s1 + $0x520] sm:$0xff]  }
 0x4ff   :  { %v9084_v11 = vcombine.low %v13214_v5, %v16306_v41  ;;  %v10061_v12 = vmul.f32 %v13214_v5, %v16073_v34  ;;  %v10170_v41 = vcombine.high %v10169_v31, %v10169_v31  ;;  %v10262_v31 = vrot.slane %v10255_v55, %v14287_v60 }
 0x500   :  { %v9083_v39 = vcombine.low %v9075_v15, %v9082_v35  ;;  %v10100_v6 = vadd.f32 %v16298_v9, %v10060_v63  ;;  %v10302_v9 = vrot.slane %v16395_v14, %v14287_v60 }
 0x501   :  { %v9092_v19 = vrot.slane %v9084_v11, %v14287_v60  ;;  %v10101_v2 = vadd.f32 %v16119_v24, %v10061_v12  ;;  %v13112_v12 = vld [vmem:[%s16896_s1 + $0x530] sm:$0xff]  }
 0x502   :  { %v9121_v46 = vpack.c.bf16 %v9083_v39, %v9067_v23  ;;  %v10114_v33 = vmax.f32 %v10100_v6, 0.0  ;;  %v16431_v0 = vcombine.low %v10295_v54, %v10302_v9 }
 0x503   :  { %v9100_v40 = vcombine.low %v9092_v19, %v9099_v48  ;;  %v10115_v34 = vmax.f32 %v10101_v2, 0.0 }
 0x504   :  { %v9133_v50 = vunpack.c.l.b16 %v9121_v46  ;;  %v16425_v17 = vunpack.c.h.b16 %v9121_v46  ;;  %v16427_v44 = vadd.f32 %v10161_v57, %v10114_v33  ;;  %v11701_v15 = vpack.c.bf16 %v16431_v0, %v16431_v0  ;;  %v13113_v33 = vld [vmem:[%s16896_s1 + $0x538] sm:$0xff]  }
 0x505   :  { %v9122_v32 = vpack.c.bf16 %v9116_v49, %v9100_v40  ;;  %v16429_v4 = vadd.f32 %v10170_v41, %v10115_v34 }
 0x506   :  { %v9135_v24 = vrot.slane %v9133_v50, 1  ;;  %v9255_v22 = vrot.slane %v9133_v50, 2  ;;  %v9319_v58 = vrot.slane %v9133_v50, 3  ;;  %v9383_v47 = vrot.slane %v9133_v50, 4 }
 0x507   :  { %v9134_v23 = vunpack.c.l.b16 %v9122_v32  ;;  %v16433_v53 = vunpack.c.h.b16 %v9122_v32  ;;  %v10271_v28 = vcombine.low %v16429_v4, %v16349_v26  ;;  %v9447_v45 = vrot.slane %v9133_v50, 5 }
 0x508   :  { %v9511_v37 = vrot.slane %v9133_v50, 6  ;;  %v9704_v61 = vrot.slane %v16425_v17, 1  ;;  %v9575_v13 = vrot.slane %v9133_v50, 7  ;;  %v9767_v6 = vrot.slane %v16425_v17, 2 }
 0x509   :  { %v9136_v49 = vsel %vm216_vm1, %v9134_v23, %v9135_v24  ;;  %v9193_v8 = vrot.slane %v9134_v23, 7  ;;  %v9256_v20 = vrot.slane %v9134_v23, 1  ;;  %v9320_v21 = vrot.slane %v9134_v23, 2 }
 0x50a   :  { %v9137_v30 = vpack.c.b16 %v9136_v49, %v9136_v49  ;;  %v9384_v42 = vrot.slane %v9134_v23, 3  ;;  %v9448_v43 = vrot.slane %v9134_v23, 4  ;;  %v9512_v16 = vrot.slane %v9134_v23, 5 }
 0x50b   :  { %v9194_v52 = vsel %vm216_vm1, %v9193_v8, %v9133_v50  ;;  %v9257_v1 = vsel %vm216_vm1, %v9256_v20, %v9255_v22  ;;  %v9321_v38 = vsel %vm216_vm1, %v9320_v21, %v9319_v58  ;;  %v9576_v27 = vrot.slane %v9134_v23, 6  ;;  %v13114_v23 = vld [vmem:[%s16896_s1 + $0x548] sm:$0xff]   ;;  %v13117_v20 = vld [vmem:[%s16896_s1 + $0x558] sm:$0xff]  }
 0x50c   :  { %12692 = vmatmul.mubr.msk.bf16.vlgmr.msra.gmra.mrb[152].mxu1 %vm231_vm2, %v9137_v30  ;;  %v9195_v18 = vpack.c.b16 %v9194_v52, %v9194_v52  ;;  %v16450_v62 = vsel %vm216_vm1, %v9384_v42, %v9383_v47  ;;  %v16460_v5 = vsel %vm216_vm1, %v9448_v43, %v9447_v45  ;;  %v16463_v35 = vsel %vm216_vm1, %v9512_v16, %v9511_v37  ;;  %v13116_v45 = vld [vmem:[%s16896_s1 + $0x550] sm:$0xff]   ;;  %v13118_v52 = vld [vmem:[%s16896_s1 + $0x568] sm:$0xff]  }
 0x50d   :  { %12704 = vmatpush3.bf16.msra.mxu1 %v13109_v51  ;;  %12707 = vmatprep.mubr.msk.bf16.mxu1 %vm13250_vm0, %v16945_v36  ;;  %v9641_v63 = vrot.slane %v16433_v53, 7  ;;  %v16470_v11 = vsel %vm216_vm1, %v9576_v27, %v9575_v13  ;;  %v16483_v55 = vsel %vm216_vm1, %v16433_v53, %v9704_v61  ;;  %v9768_v48 = vrot.slane %v16433_v53, 1 }
 0x50e   :  { %12700 = vmatmul.mubr.msk.bf16.vlgmr.msra.gmra.mrb[152].mxu0 %vm231_vm2, %v9195_v18  ;;  %12705 = vmatprep.subr.bf16.mxu1 %v16945_v36  ;;  %v10269_v19 = vrot.slane %v16427_v44, %v14287_v60  ;;  %v9831_v2 = vrot.slane %v16425_v17, 3  ;;  %v9832_v57 = vrot.slane %v16433_v53, 2  ;;  %v10719_v54 = vrot.slane %v11701_v15, %v13437_v59  ;;  %v13119_v15 = vld [vmem:[%s16896_s1 + $0x560] sm:$0xff]  }
 0x50f   :  { %12712 = vmatpush3.bf16.msra.mxu0 %v13110_v25  ;;  %12715 = vmatprep.mubr.msk.bf16.mxu0 %vm13250_vm0, %v16945_v36  ;;  %v16479_v39 = vsel %vm216_vm1, %v9641_v63, %v16425_v17  ;;  %v9258_v46 = vpack.c.b16 %v9257_v1, %v9257_v1  ;;  %v16497_v41 = vsel %vm216_vm1, %v9768_v48, %v9767_v6  ;;  %v9895_v40 = vrot.slane %v16425_v17, 4  ;;  %v13121_v48 = vld [vmem:[%s16896_s1 + $0x578] sm:$0xff]  }
 0x510   :  { %12713 = vmatprep.subr.bf16.mxu0 %v16945_v36  ;;  %v9896_v34 = vrot.slane %v16433_v53, 3  ;;  %v16503_v9 = vsel %vm216_vm1, %v9832_v57, %v9831_v2  ;;  %v9959_v50 = vrot.slane %v16425_v17, 5  ;;  %v9960_v32 = vrot.slane %v16433_v53, 4  ;;  %v13122_v2 = vld [vmem:[%s16896_s1 + $0x588] sm:$0xff]  }
 0x511   :  { %12706 = vmatpush3.bf16.msra.mxu1 %v13111_v29  ;;  %v10270_v24 = vcombine.low %v10262_v31, %v10269_v19  ;;  %v10286_v22 = vrot.slane %v10272_v3, %v14287_v60  ;;  %v10279_v17 = vrot.slane %v10271_v28, %v14287_v60  ;;  %v9322_v53 = vpack.c.b16 %v9321_v38, %v9321_v38  ;;  %v13115_v3 = vld [vmem:[%s16896_s1 + $0x540] sm:$0xff]   ;;  %v13120_v31 = vld [vmem:[%s16896_s1 + $0x570] sm:$0xff]  }
 0x512   :  { %12719 = vmatprep.subr.bf16.mxu1 %v16945_v36  ;;  %v16515_v58 = vsel %vm216_vm1, %v9896_v34, %v9895_v40  ;;  %v16524_v7 = vsel %vm216_vm1, %v9960_v32, %v9959_v50  ;;  %v10822_v28 = vcombine.high %v10719_v54, %v10719_v54  ;;  %v16549_v8 = vrot.slane %v10719_v54, %v13437_v59  ;;  %v13123_v54 = vld [vmem:[%s16896_s1 + $0x580] sm:$0xff]   ;;  %v13130_v32 = vld [vmem:[%s16896_s1 + $0x5c8] sm:$0xff]  }
 0x513   :  { %12714 = vmatpush3.bf16.msra.mxu0 %v13112_v12  ;;  %v10308_v10 = vpack.c.bf16 %v10270_v24, %v16397_v56  ;;  %v16532_v26 = vcombine.low %v10279_v17, %v10286_v22  ;;  %v11700_v4 = vpack.c.bf16 %v10270_v24, %v10270_v24  ;;  %v9386_v43 = vpack.c.b16 %v16450_v62, %v16450_v62  ;;  %v13127_v34 = vld [vmem:[%s16896_s1 + $0x5a0] sm:$0xff]   ;;  %v13134_v17 = vld [vmem:[%s16896_s1 + $0x5f8] sm:$0xff]  }
 0x514   :  { %12708 = vmatmul.mubr.msk.bf16.vlgmr.msra.gmra.mrb[156].mxu1 %vm231_vm2, %v9258_v46  ;;  %12727 = vmatprep.subr.bf16.mxu0 %v16945_v36  ;;  %v9450_v16 = vpack.c.b16 %v16460_v5, %v16460_v5  ;;  %v9514_v19 = vpack.c.b16 %v16463_v35, %v16463_v35  ;;  %v9578_v57 = vpack.c.b16 %v16470_v11, %v16470_v11  ;;  %v13124_v35 = vld [vmem:[%s16896_s1 + $0x590] sm:$0xff]   ;;  %v13125_v11 = vld [vmem:[%s16896_s1 + $0x598] sm:$0xff]   ;;  %v13131_v22 = vld [vmem:[%s16896_s1 + $0x5c0] sm:$0xff]  }
 0x515   :  { %12720 = vmatpush3.bf16.msra.mxu1 %v13113_v33  ;;  %12723 = vmatprep.mubr.msk.bf16.mxu1 %vm13250_vm0, %v16945_v36  ;;  %v10326_v47 = vrot.slane %v10308_v10, %v13437_v59  ;;  %v10309_v37 = vpack.c.bf16 %v16431_v0, %v16532_v26  ;;  %v11688_v61 = vpack.c.bf16 %v16532_v26, %v16397_v56  ;;  %v13126_v33 = vld [vmem:[%s16896_s1 + $0x5a8] sm:$0xff]   ;;  %v13135_v10 = vld [vmem:[%s16896_s1 + $0x5f0] sm:$0xff]  }
 0x516   :  { %12716 = vmatmul.mubr.msk.bf16.vlgmr.msra.gmra.mrb[156].mxu0 %vm231_vm2, %v9322_v53  ;;  %12721 = vmatprep.subr.bf16.mxu1 %v16945_v36  ;;  %v10704_v49 = vrot.slane %v11700_v4, %v13437_v59  ;;  %v16556_v0 = vrot.slane %v10822_v28, %v13437_v59  ;;  %v9643_v46 = vpack.c.b16 %v16479_v39, %v16479_v39  ;;  %v13128_v39 = vld [vmem:[%s16896_s1 + $0x5b0] sm:$0xff]   ;;  %v13137_v4 = vld [vmem:[%s16896_s1 + $0x5d8] sm:$0xff]  }
 0x517   :  { %12728 = vmatpush3.bf16.msra.mxu0 %v13114_v23  ;;  %12731 = vmatprep.mubr.msk.bf16.mxu0 %vm13250_vm0, %v16945_v36  ;;  %v10327_v51 = vcombine.high %v10326_v47, %v10326_v47  ;;  %v10348_v21 = vrot.slane %v10309_v37, %v13437_v59  ;;  %v10334_v1 = vrot.slane %v10326_v47, %v13437_v59  ;;  %v13138_v47 = vld [vmem:[%s16896_s1 + $0x608] sm:$0xff]   ;;  %v13139_v37 = vld [vmem:[%s16896_s1 + $0x5e0] sm:$0xff]   ;;  %v13143_v56 = vld [vmem:[%s16896_s1 + $0x630] sm:$0xff]  }
 0x518   :  { %12729 = vmatprep.subr.bf16.mxu0 %v16945_v36  ;;  %v10814_v30 = vcombine.high %v10704_v49, %v10704_v49  ;;  %v16559_v42 = vrot.slane %v10704_v49, %v13437_v59  ;;  %v9706_v40 = vpack.c.b16 %v16483_v55, %v16483_v55  ;;  %v13129_v55 = vld [vmem:[%s16896_s1 + $0x5b8] sm:$0xff]   ;;  %v9770_v50 = vpack.c.b16 %v16497_v41, %v16497_v41  ;;  %v13132_v41 = vld [vmem:[%s16896_s1 + $0x5d0] sm:$0xff]  }
 0x519   :  { %12722 = vmatpush3.bf16.msra.mxu1 %v13115_v3  ;;  %v10349_v25 = vcombine.high %v10348_v21, %v10348_v21  ;;  %v10356_v38 = vrot.slane %v10348_v21, %v13437_v59  ;;  %v16577_v18 = vrot.slane %v10327_v51, %v13437_v59  ;;  %v9834_v24 = vpack.c.b16 %v16503_v9, %v16503_v9  ;;  %v13133_v9 = vld [vmem:[%s16896_s1 + $0x5e8] sm:$0xff]   ;;  %v13140_v49 = vld [vmem:[%s16896_s1 + $0x610] sm:$0xff]  }
 0x51a   :  { %12735 = vmatprep.subr.bf16.mxu1 %v16945_v36  ;;  %v16572_v27 = vrot.slane %v10814_v30, %v13437_v59  ;;  %v10727_v62 = vcombine.low %v16559_v42, %v16549_v8  ;;  %v11708_v13 = vcombine.high %v16559_v42, %v16549_v8  ;;  %v9898_v23 = vpack.c.b16 %v16515_v58, %v16515_v58  ;;  %v13141_v21 = vld [vmem:[%s16896_s1 + $0x628] sm:$0xff]   ;;  %v13150_v8 = vld [vmem:[%s16896_s1 + $0x650] sm:$0xff]  }
 0x51b   :  { %12730 = vmatpush3.bf16.msra.mxu0 %v13116_v45  ;;  %v16589_v29 = vrot.slane %v10349_v25, %v13437_v59  ;;  %v16591_v5 = vcombine.high %v10334_v1, %v10356_v38  ;;  %v9962_v53 = vpack.c.b16 %v16524_v7, %v16524_v7  ;;  %v13136_v7 = vld [vmem:[%s16896_s1 + $0x600] sm:$0xff]  }
 0x51c   :  { %12724 = vmatmul.mubr.msk.bf16.vlgmr.msra.gmra.mrb[160].mxu1 %vm231_vm2, %v9386_v43  ;;  %12743 = vmatprep.subr.bf16.mxu0 %v16945_v36  ;;  %v10830_v63 = vcombine.low %v16572_v27, %v16556_v0  ;;  %v13142_v43 = vld [vmem:[%s16896_s1 + $0x618] sm:$0xff]   ;;  %v13146_v38 = vld [vmem:[%s16896_s1 + $0x640] sm:$0xff]   ;;  %v10926_v27 = vrot.slane %v11708_v13, %v13437_v59 }
 0x51d   :  { %12736 = vmatpush3.bf16.msra.mxu1 %v13117_v20  ;;  %12739 = vmatprep.mubr.msk.bf16.mxu1 %vm13250_vm0, %v16945_v36  ;;  %v10364_v12 = vcombine.low %v16577_v18, %v16589_v29  ;;  %v11696_v6 = vcombine.high %v16577_v18, %v16589_v29  ;;  %v10528_v3 = vrot.slane %v16591_v5, %v13437_v59  ;;  %v13145_v0 = vld [vmem:[%s16896_s1 + $0x638] sm:$0xff]  }
 0x51e   :  { %12732 = vmatmul.mubr.msk.bf16.vlgmr.msra.gmra.mrb[160].mxu0 %vm231_vm2, %v9450_v16  ;;  %12737 = vmatprep.subr.bf16.mxu1 %v16945_v36  ;;  %v10441_v20 = vrot.slane %v11688_v61, %v13437_v59  ;;  %v10837_v26 = vrot.slane %v10830_v63, %v13437_v59  ;;  %v13144_v61 = vld [vmem:[%s16896_s1 + $0x620] sm:$0xff]   ;;  %v10933_v18 = vrot.slane %v10926_v27, %v13437_v59 }
 0x51f   :  { %12744 = vmatpush3.bf16.msra.mxu0 %v13118_v52  ;;  %12747 = vmatprep.mubr.msk.bf16.mxu0 %vm13250_vm0, %v16945_v36  ;;  %v10371_v58 = vrot.slane %v10364_v12, %v13437_v59  ;;  %v10535_v45 = vrot.slane %v10528_v3, %v13437_v59  ;;  %v10617_v51 = vrot.slane %v11696_v6, %v13437_v59 }
 0x520   :  { %12745 = vmatprep.subr.bf16.mxu0 %v16945_v36  ;;  %v10448_v16 = vrot.slane %v10441_v20, %v13437_v59  ;;  %v10734_v52 = vrot.slane %v10727_v62, %v13437_v59  ;;  %v10844_v25 = vrot.slane %v10837_v26, %v13437_v59  ;;  %v13147_v62 = vld [vmem:[%s16896_s1 + $0x658] sm:$0xff]  }
 0x521   :  { %12738 = vmatpush3.bf16.msra.mxu1 %v13119_v15  ;;  %v10378_v28 = vrot.slane %v10371_v58, %v13437_v59  ;;  %v10624_v30 = vrot.slane %v10617_v51, %v13437_v59  ;;  %v13148_v15 = vld [vmem:[%s16896_s1 + $0x648] sm:$0xff]  }
 0x522   :  { %12751 = vmatprep.subr.bf16.mxu1 %v16945_v36  ;;  %v10741_v1 = vrot.slane %v10734_v52, %v13437_v59  ;;  %v13149_v59 = vld [vmem:[%s16896_s1 + $0x660] sm:$0xff]  }
 0x523   :  { %12746 = vmatpush3.bf16.msra.mxu0 %v13120_v31 }
 0x524   :  { %12740 = vmatmul.mubr.msk.bf16.vlgmr.msra.gmra.mrb[164].mxu1 %vm231_vm2, %v9514_v19  ;;  %12759 = vmatprep.subr.bf16.mxu0 %v16945_v36 }
 0x525   :  { %12752 = vmatpush3.bf16.msra.mxu1 %v13121_v48  ;;  %12755 = vmatprep.mubr.msk.bf16.mxu1 %vm13250_vm0, %v16945_v36 }
 0x526   :  { %12748 = vmatmul.mubr.msk.bf16.vlgmr.msra.gmra.mrb[164].mxu0 %vm231_vm2, %v9578_v57  ;;  %12753 = vmatprep.subr.bf16.mxu1 %v16945_v36 }
 0x527   :  { %12760 = vmatpush3.bf16.msra.mxu0 %v13122_v2  ;;  %12763 = vmatprep.mubr.msk.bf16.mxu0 %vm13250_vm0, %v16945_v36 }
 0x528   :  { %12761 = vmatprep.subr.bf16.mxu0 %v16945_v36 }
 0x529   :  { %12754 = vmatpush3.bf16.msra.mxu1 %v13123_v54 }
 0x52a   :  { %12767 = vmatprep.subr.bf16.mxu1 %v16945_v36 }
 0x52b   :  { %12762 = vmatpush3.bf16.msra.mxu0 %v13124_v35 }
 0x52c   :  { %12756 = vmatmul.mubr.msk.bf16.vlgmr.msra.gmra.mrb[168].mxu1 %vm231_vm2, %v9643_v46  ;;  %12775 = vmatprep.subr.bf16.mxu0 %v16945_v36 }
 0x52d   :  { %12768 = vmatpush3.bf16.msra.mxu1 %v13125_v11  ;;  %12771 = vmatprep.mubr.msk.bf16.mxu1 %vm13250_vm0, %v16945_v36 }
 0x52e   :  { %12764 = vmatmul.mubr.msk.bf16.vlgmr.msra.gmra.mrb[168].mxu0 %vm231_vm2, %v9706_v40  ;;  %12769 = vmatprep.subr.bf16.mxu1 %v16945_v36 }
 0x52f   :  { %12776 = vmatpush3.bf16.msra.mxu0 %v13126_v33  ;;  %12779 = vmatprep.mubr.msk.bf16.mxu0 %vm13250_vm0, %v16945_v36 }
 0x530   :  { %12777 = vmatprep.subr.bf16.mxu0 %v16945_v36 }
 0x531   :  { %12770 = vmatpush3.bf16.msra.mxu1 %v13127_v34 }
 0x532   :  { %12783 = vmatprep.subr.bf16.mxu1 %v16945_v36 }
 0x533   :  { %12778 = vmatpush3.bf16.msra.mxu0 %v13128_v39 }
 0x534   :  { %12772 = vmatmul.mubr.msk.bf16.vlgmr.msra.gmra.mrb[172].mxu1 %vm231_vm2, %v9770_v50  ;;  %12791 = vmatprep.subr.bf16.mxu0 %v16945_v36 }
 0x535   :  { %12784 = vmatpush3.bf16.msra.mxu1 %v13129_v55  ;;  %12787 = vmatprep.mubr.msk.bf16.mxu1 %vm13250_vm0, %v16945_v36 }
 0x536   :  { %12780 = vmatmul.mubr.msk.bf16.vlgmr.msra.gmra.mrb[172].mxu0 %vm231_vm2, %v9834_v24  ;;  %12785 = vmatprep.subr.bf16.mxu1 %v16945_v36 }
 0x537   :  { %12792 = vmatpush3.bf16.msra.mxu0 %v13130_v32  ;;  %12795 = vmatprep.mubr.msk.bf16.mxu0 %vm13250_vm0, %v16945_v36 }
 0x538   :  { %12793 = vmatprep.subr.bf16.mxu0 %v16945_v36 }
 0x539   :  { %12786 = vmatpush3.bf16.msra.mxu1 %v13131_v22 }
 0x53a   :  { %12799 = vmatprep.subr.bf16.mxu1 %v16945_v36 }
 0x53b   :  { %12794 = vmatpush3.bf16.msra.mxu0 %v13132_v41 }
 0x53c   :  { %12788 = vmatmul.mubr.msk.bf16.vlgmr.msra.gmra.mrb[176].mxu1 %vm231_vm2, %v9898_v23  ;;  %12815 = vmatprep.subr.bf16.mxu0 %v16945_v36 }
 0x53d   :  { %12800 = vmatpush3.bf16.msra.mxu1 %v13133_v9  ;;  %12803 = vmatprep.mubr.msk.bf16.mxu1 %vm13250_vm0, %v16945_v36 }
 0x53e   :  { %12796 = vmatmul.mubr.msk.bf16.vlgmr.msra.gmra.mrb[176].mxu0 %vm231_vm2, %v9962_v53  ;;  %12801 = vmatprep.subr.bf16.mxu1 %v16945_v36 }
 0x53f   :  { %12816 = vmatpush3.bf16.msra.mxu0 %v13134_v17  ;;  %12819 = vmatprep.mubr.msk.bf16.mxu0 %vm13250_vm0, %v16945_v36 }
 0x540   :  { %12817 = vmatprep.subr.bf16.mxu0 %v16945_v36 }
 0x541   :  { %12802 = vmatpush3.bf16.msra.mxu1 %v13135_v10 }
 0x542   :  { %12807 = vmatprep.subr.bf16.mxu1 %v16945_v36 }
 0x543   :  { %12818 = vmatpush3.bf16.msra.mxu0 %v13136_v7 }
 0x544   :  { %12804 = vmatmul.mubr.msk.bf16.vlgmr.msra.gmra.mrb[180].mxu1 %vm231_vm2, %v10378_v28  ;;  %12823 = vmatprep.subr.bf16.mxu0 %v16945_v36 }
 0x545   :  { %12808 = vmatpush3.bf16.msra.mxu1 %v13137_v4  ;;  %12811 = vmatprep.mubr.msk.bf16.mxu1 %vm13250_vm0, %v16945_v36 }
 0x546   :  { %12820 = vmatmul.mubr.msk.bf16.vlgmr.msra.gmra.mrb[180].mxu0 %vm231_vm2, %v10535_v45  ;;  %12809 = vmatprep.subr.bf16.mxu1 %v16945_v36 }
 0x547   :  { %12824 = vmatpush3.bf16.msra.mxu0 %v13138_v47  ;;  %12827 = vmatprep.mubr.msk.bf16.mxu0 %vm13250_vm0, %v16945_v36 }
 0x548   :  { %12825 = vmatprep.subr.bf16.mxu0 %v16945_v36 }
 0x549   :  { %12810 = vmatpush3.bf16.msra.mxu1 %v13139_v37 }
 0x54a   :  { %12831 = vmatprep.subr.bf16.mxu1 %v16945_v36 }
 0x54b   :  { %12826 = vmatpush3.bf16.msra.mxu0 %v13140_v49 }
 0x54c   :  { %12839 = vmatprep.subr.bf16.mxu0 %v16945_v36 }
 0x54e   :  { %12828 = vmatmul.mubr.msk.bf16.vlgmr.msra.gmra.mrb[184].mxu0 %vm231_vm2, %v10624_v30 }
 0x54f   :  { %12840 = vmatpush3.bf16.msra.mxu0 %v13141_v21  ;;  %12843 = vmatprep.mubr.msk.bf16.mxu0 %vm13250_vm0, %v16945_v36 }
 0x550   :  { %12812 = vmatmul.mubr.msk.bf16.vlgmr.msra.gmra.mrb[180].mxu1 %vm231_vm2, %v10448_v16  ;;  %12841 = vmatprep.subr.bf16.mxu0 %v16945_v36 }
 0x551   :  { %12832 = vmatpush3.bf16.msra.mxu1 %v13142_v43  ;;  %12835 = vmatprep.mubr.msk.bf16.mxu1 %vm13250_vm0, %v16945_v36 }
 0x552   :  { %12833 = vmatprep.subr.bf16.mxu1 %v16945_v36 }
 0x553   :  { %12842 = vmatpush3.bf16.msra.mxu0 %v13143_v56 }
 0x554   :  { %12855 = vmatprep.subr.bf16.mxu0 %v16945_v36 }
 0x555   :  { %12834 = vmatpush3.bf16.msra.mxu1 %v13144_v61 }
 0x556   :  { %12844 = vmatmul.mubr.msk.bf16.vlgmr.msra.gmra.mrb[188].mxu0 %vm231_vm2, %v10844_v25  ;;  %12847 = vmatprep.subr.bf16.mxu1 %v16945_v36 }
 0x557   :  { %12859 = vmatprep.mubr.msk.bf16.mxu0 %vm13250_vm0, %v16945_v36  ;;  %12856 = vmatpush3.bf16.msra.mxu0 %v13147_v62 }
 0x558   :  { %12836 = vmatmul.mubr.msk.bf16.vlgmr.msra.gmra.mrb[184].mxu1 %vm231_vm2, %v10741_v1  ;;  %12857 = vmatprep.subr.bf16.mxu0 %v16945_v36 }
 0x559   :  { %12848 = vmatpush3.bf16.msra.mxu1 %v13145_v0  ;;  %12851 = vmatprep.mubr.msk.bf16.mxu1 %vm13250_vm0, %v16945_v36 }
 0x55a   :  { %12849 = vmatprep.subr.bf16.mxu1 %v16945_v36 }
 0x55b   :  { %12858 = vmatpush3.bf16.msra.mxu0 %v13149_v59 }
 0x55c   :  { %12871 = vmatprep.subr.bf16.mxu0 %v16945_v36 }
 0x55d   :  { %12850 = vmatpush3.bf16.msra.mxu1 %v13146_v38 }
 0x55e   :  { %12863 = vmatprep.subr.bf16.mxu1 %v16945_v36 }
 0x560   :  { %12852 = vmatmul.mubr.msk.bf16.vlgmr.msra.gmra.mrb[188].mxu1 %vm231_vm2, %v10933_v18 }
 0x561   :  { %12867 = vmatprep.mubr.msk.bf16.mxu1 %vm13250_vm0, %v16945_v36  ;;  %12864 = vmatpush3.bf16.msra.mxu1 %v13148_v15 }
 0x562   :  { %12865 = vmatprep.subr.bf16.mxu1 %v16945_v36 }
 0x565   :  { %12866 = vmatpush3.bf16.msra.mxu1 %v13150_v8  ;;  %v11586_v8 = vld [vmem:[%s16897_s2 + $0x11] ss:$0 sm:$0xff] }
 0x566   :  { %12879 = vmatprep.subr.bf16.mxu1 %v16945_v36 }
 0x5df   :  { %v9187_v42 = vpop.f32.mrb[152].mxu1 }
 0x5e0   :  { %v12693_v13 = vpop.f32.mrb[153].mxu1 }
 0x5e1   :  { %v9190_v29 = vpop.f32.mrb[154].mxu1  ;;  %v9245_v5 = vpop.f32.mrb[152].mxu0 }
 0x5e2   :  { %v9246_v63 = vadd.f32 %v9245_v5, %v9187_v42  ;;  %v12694_v31 = vpop.f32.mrb[155].mxu1  ;;  %v12701_v12 = vpop.f32.mrb[153].mxu0 }
 0x5e3   :  { %v9248_v6 = vpop.f32.mrb[154].mxu0  ;;  %v17002_v31 = vld [vmem:[#allocation5_spill] sm:$0xff] }
 0x5e4   :  { %v12702_v48 = vpop.f32.mrb[155].mxu0  ;;  %v7137_v12 = vadd.f32 %v11586_v8, %v17002_v31 }
 0x5e7   :  { %v9308_v19 = vpop.f32.mrb[156].mxu1 }
 0x5e8   :  { %v9314_v2 = vadd.f32 %v9308_v19, %v9246_v63  ;;  %v12709_v57 = vpop.f32.mrb[157].mxu1 }
 0x5e9   :  { %v9311_v54 = vpop.f32.mrb[158].mxu1  ;;  %v9372_v35 = vpop.f32.mrb[156].mxu0 }
 0x5ea   :  { %v9378_v11 = vadd.f32 %v9372_v35, %v9314_v2  ;;  %v12710_v46 = vpop.f32.mrb[159].mxu1  ;;  %v12717_v33 = vpop.f32.mrb[157].mxu0 }
 0x5eb   :  { %v9375_v40 = vpop.f32.mrb[158].mxu0 }
 0x5ec   :  { %v12718_v34 = vpop.f32.mrb[159].mxu0 }
 0x5ef   :  { %v9436_v39 = vpop.f32.mrb[160].mxu1 }
 0x5f0   :  { %v9442_v55 = vadd.f32 %v9436_v39, %v9378_v11  ;;  %v12725_v50 = vpop.f32.mrb[161].mxu1 }
 0x5f1   :  { %v9439_v32 = vpop.f32.mrb[162].mxu1  ;;  %v9500_v24 = vpop.f32.mrb[160].mxu0 }
 0x5f2   :  { %v9506_v22 = vadd.f32 %v9500_v24, %v9442_v55  ;;  %v12726_v41 = vpop.f32.mrb[163].mxu1  ;;  %v12733_v9 = vpop.f32.mrb[161].mxu0 }
 0x5f3   :  { %v9503_v23 = vpop.f32.mrb[162].mxu0 }
 0x5f4   :  { %v12734_v17 = vpop.f32.mrb[163].mxu0 }
 0x5f7   :  { %v9564_v53 = vpop.f32.mrb[164].mxu1 }
 0x5f8   :  { %v9570_v10 = vadd.f32 %v9564_v53, %v9506_v22  ;;  %v12741_v58 = vpop.f32.mrb[165].mxu1 }
 0x5f9   :  { %v9567_v7 = vpop.f32.mrb[166].mxu1  ;;  %v9628_v3 = vpop.f32.mrb[164].mxu0 }
 0x5fa   :  { %v9634_v4 = vadd.f32 %v9628_v3, %v9570_v10  ;;  %v12742_v28 = vpop.f32.mrb[167].mxu1  ;;  %v12749_v47 = vpop.f32.mrb[165].mxu0 }
 0x5fb   :  { %v9631_v45 = vpop.f32.mrb[166].mxu0 }
 0x5fc   :  { %v12750_v37 = vpop.f32.mrb[167].mxu0 }
 0x5ff   :  { %v9693_v49 = vpop.f32.mrb[168].mxu1 }
 0x600   :  { %v9699_v51 = vadd.f32 %v9693_v49, %v9634_v4  ;;  %v12757_v20 = vpop.f32.mrb[169].mxu1 }
 0x601   :  { %v9696_v21 = vpop.f32.mrb[170].mxu1  ;;  %v9756_v30 = vpop.f32.mrb[168].mxu0 }
 0x602   :  { %v9762_v43 = vadd.f32 %v9756_v30, %v9699_v51  ;;  %v12758_v16 = vpop.f32.mrb[171].mxu1  ;;  %v12765_v56 = vpop.f32.mrb[169].mxu0 }
 0x603   :  { %v9759_v26 = vpop.f32.mrb[170].mxu0 }
 0x604   :  { %v12766_v61 = vpop.f32.mrb[171].mxu0 }
 0x607   :  { %v9820_v52 = vpop.f32.mrb[172].mxu1 }
 0x608   :  { %v9826_v25 = vadd.f32 %v9820_v52, %v9762_v43  ;;  %v12773_v0 = vpop.f32.mrb[173].mxu1 }
 0x609   :  { %v9823_v1 = vpop.f32.mrb[174].mxu1  ;;  %v9884_v38 = vpop.f32.mrb[172].mxu0 }
 0x60a   :  { %v9890_v27 = vadd.f32 %v9884_v38, %v9826_v25  ;;  %v12774_v18 = vpop.f32.mrb[175].mxu1  ;;  %v12781_v62 = vpop.f32.mrb[173].mxu0 }
 0x60b   :  { %v9887_v15 = vpop.f32.mrb[174].mxu0 }
 0x60c   :  { %v12782_v59 = vpop.f32.mrb[175].mxu0 }
 0x60f   :  { %v9948_v42 = vpop.f32.mrb[176].mxu1 }
 0x610   :  { %v9954_v13 = vadd.f32 %v9948_v42, %v9890_v27  ;;  %v12789_v29 = vpop.f32.mrb[177].mxu1  ;;  %v11712_v27 = vld [vmem:[%s16897_s2 + $0x16] ss:$0 sm:$0xff] }
 0x611   :  { %v9951_v5 = vpop.f32.mrb[178].mxu1  ;;  %v10012_v63 = vpop.f32.mrb[176].mxu0  ;;  %v11720_v29 = vld [vmem:[%s16897_s2 + $0x18] ss:$0 sm:$0xff] }
 0x612   :  { %v10018_v6 = vadd.f32 %v10012_v63, %v9954_v13  ;;  %v12790_v48 = vpop.f32.mrb[179].mxu1  ;;  %v12797_v19 = vpop.f32.mrb[177].mxu0 }
 0x613   :  { %v10015_v2 = vpop.f32.mrb[178].mxu0 }
 0x614   :  { %v16827_v57 = vadd.f32 %v10018_v6, %v7137_v12  ;;  %v12798_v54 = vpop.f32.mrb[179].mxu0 }
 0x619   :  { %v10585_v35 = vpop.f32.mrb[180].mxu0 }
 0x61a   :  { %v12821_v11 = vpop.f32.mrb[181].mxu0  ;;  %v10598_v34 = vrot.slane %v10585_v35, %v14287_v60 }
 0x61b   :  { %v10588_v46 = vpop.f32.mrb[182].mxu0 }
 0x61c   :  { %v12822_v33 = vpop.f32.mrb[183].mxu0  ;;  %v10599_v23 = vcombine.high %v10598_v34, %v10598_v34 }
 0x621   :  { %v10674_v40 = vpop.f32.mrb[184].mxu0 }
 0x622   :  { %v12829_v39 = vpop.f32.mrb[185].mxu0  ;;  %v10687_v32 = vrot.slane %v10674_v40, %v14287_v60  ;;  %v13151_v40 = vld [vmem:[%s16896_s1 + $0x678] sm:$0xff]  }
 0x623   :  { %v10498_v55 = vpop.f32.mrb[180].mxu1  ;;  %v10677_v50 = vpop.f32.mrb[186].mxu0 }
 0x624   :  { %v10511_v24 = vrot.slane %v10498_v55, %v14287_v60  ;;  %v12813_v22 = vpop.f32.mrb[181].mxu1  ;;  %v12830_v41 = vpop.f32.mrb[187].mxu0  ;;  %v10688_v58 = vcombine.high %v10687_v32, %v10687_v32 }
 0x625   :  { %v10501_v9 = vpop.f32.mrb[182].mxu1 }
 0x626   :  { %v10512_v17 = vcombine.high %v10511_v24, %v10511_v24  ;;  %v10602_v53 = vadd.f32 %v10598_v34, %v10511_v24  ;;  %v12814_v10 = vpop.f32.mrb[183].mxu1  ;;  %v13152_v24 = vld [vmem:[%s16896_s1 + $0x668] sm:$0xff]  }
 0x628   :  { %v10603_v7 = vadd.f32 %v10599_v23, %v10512_v17  ;;  %v10691_v3 = vadd.f32 %v10687_v32, %v10602_v53  ;;  %v13153_v23 = vld [vmem:[%s16896_s1 + $0x680] sm:$0xff]  }
 0x629   :  { %v10894_v4 = vpop.f32.mrb[188].mxu0 }
 0x62a   :  { %v12845_v28 = vpop.f32.mrb[189].mxu0  ;;  %v10692_v47 = vadd.f32 %v10688_v58, %v10603_v7  ;;  %v10907_v49 = vrot.slane %v10894_v4, %v14287_v60 }
 0x62b   :  { %v10791_v45 = vpop.f32.mrb[184].mxu1  ;;  %v10897_v37 = vpop.f32.mrb[190].mxu0 }
 0x62c   :  { %v10804_v51 = vrot.slane %v10791_v45, %v14287_v60  ;;  %v12837_v20 = vpop.f32.mrb[185].mxu1  ;;  %v12846_v21 = vpop.f32.mrb[191].mxu0  ;;  %v10908_v26 = vcombine.high %v10907_v49, %v10907_v49  ;;  %v11682_v45 = vld [vmem:[%s16897_s2 + $0x13] ss:$0 sm:$0xff] }
 0x62d   :  { %v10794_v30 = vpop.f32.mrb[186].mxu1 }
 0x62e   :  { %v10805_v43 = vcombine.high %v10804_v51, %v10804_v51  ;;  %v10808_v16 = vadd.f32 %v10804_v51, %v10691_v3  ;;  %v12838_v56 = vpop.f32.mrb[187].mxu1  ;;  %v10025_v51 = vadd.f32 %v11682_v45, %v16827_v57  ;;  %v11728_v57 = vld [vmem:[%s16897_s2 + $0x1a] ss:$0 sm:$0xff] }
 0x630   :  { %v10809_v61 = vadd.f32 %v10805_v43, %v10692_v47  ;;  %v10911_v52 = vadd.f32 %v10907_v49, %v10808_v16 }
 0x632   :  { %v10912_v25 = vadd.f32 %v10908_v26, %v10809_v61  ;;  %v11719_v61 = vld [vmem:[%s16897_s2 + $0x17] ss:$0 sm:$0xff] }
 0x633   :  { %v10983_v0 = vpop.f32.mrb[188].mxu1 }
 0x634   :  { %v10996_v1 = vrot.slane %v10983_v0, %v14287_v60  ;;  %v12853_v38 = vpop.f32.mrb[189].mxu1  ;;  %v11721_v60 = vld [vmem:[%s16897_s2 + $0x19] ss:$0 sm:$0xff] }
 0x635   :  { %v10986_v18 = vpop.f32.mrb[190].mxu1 }
 0x636   :  { %v10997_v62 = vcombine.high %v10996_v1, %v10996_v1  ;;  %v11000_v15 = vadd.f32 %v10996_v1, %v10911_v52  ;;  %v12854_v59 = vpop.f32.mrb[191].mxu1 }
 0x638   :  { %v11001_v8 = vadd.f32 %v10997_v62, %v10912_v25  ;;  %v11007_v42 = vadd.f32 %v11712_v27, %v11000_v15 }
 0x63a   :  { %v11008_v13 = vadd.f32 %v11712_v27, %v11001_v8  ;;  %13215 = vtanh.f32 %v11007_v42 }
 0x63c   :  { %13217 = vtanh.f32 %v11008_v13 }
 0x644   :  { %v13216_v5 = vpop.eup %13215 }
 0x645   :  { %v11011_v63 = vpack.c.bf16 %v13216_v5, %v13216_v5  ;;  %v11154_v31 = vmul.f32 %v13216_v5, %v11720_v29 }
 0x646   :  { %v13218_v12 = vpop.eup %13217 }
 0x647   :  { %v11023_v6 = vunpack.c.l.b16 %v11011_v63  ;;  %v11155_v48 = vmul.f32 %v13218_v12, %v11720_v29  ;;  %v11160_v19 = vadd.f32 %v11721_v60, %v11154_v31  ;;  %v11012_v2 = vpack.c.bf16 %v13218_v12, %v13218_v12 }
 0x649   :  { %v11161_v54 = vadd.f32 %v11721_v60, %v11155_v48  ;;  %v11162_v35 = vmax.f32 %v11160_v19, 0.0  ;;  %v11024_v11 = vunpack.c.l.b16 %v11012_v2  ;;  %v11025_v46 = vrot.slane %v11023_v6, 1 }
 0x64b   :  { %v11026_v33 = vsel %vm216_vm1, %v11024_v11, %v11025_v46  ;;  %v11083_v34 = vrot.slane %v11024_v11, 7  ;;  %v11163_v39 = vmax.f32 %v11161_v54, 0.0  ;;  %v11164_v55 = vadd.f32 %v11162_v35, %v16427_v44 }
 0x64c   :  { %v11027_v50 = vpack.c.b16 %v11026_v33, %v11026_v33 }
 0x64d   :  { %v11084_v32 = vsel %vm216_vm1, %v11083_v34, %v11023_v6  ;;  %v11165_v22 = vadd.f32 %v11163_v39, %v16395_v14  ;;  %v11166_v41 = vpack.c.bf16 %v11164_v55, %v11164_v55  ;;  %v13154_v14 = vld [vmem:[%s16896_s1 + $0x670] sm:$0xff]  }
 0x64e   :  { %12860 = vmatmul.mubr.msk.bf16.vlgmr.msra.gmra.mrb[192].mxu0 %vm231_vm2, %v11027_v50  ;;  %v11085_v9 = vpack.c.b16 %v11084_v32, %v11084_v32 }
 0x64f   :  { %12872 = vmatpush3.bf16.msra.mxu0 %v13151_v40  ;;  %12875 = vmatprep.mubr.msk.bf16.mxu0 %vm13250_vm0, %v16945_v36  ;;  %v11167_v44 = vpack.c.bf16 %v11165_v22, %v11165_v22  ;;  %v11178_v17 = vunpack.c.l.b16 %v11166_v41 }
 0x650   :  { %12868 = vmatmul.mubr.msk.bf16.vlgmr.msra.gmra.mrb[192].mxu1 %vm231_vm2, %v11085_v9  ;;  %12873 = vmatprep.subr.bf16.mxu0 %v16945_v36 }
 0x651   :  { %12880 = vmatpush3.bf16.msra.mxu1 %v13152_v24  ;;  %v11179_v53 = vunpack.c.l.b16 %v11167_v44  ;;  %v11180_v10 = vrot.slane %v11178_v17, 1  ;;  %12883 = vmatprep.mubr.msk.bf16.mxu1 %vm13250_vm0, %v16945_v36 }
 0x652   :  { %12881 = vmatprep.subr.bf16.mxu1 %v16945_v36 }
 0x653   :  { %12874 = vmatpush3.bf16.msra.mxu0 %v13153_v23  ;;  %v11181_v58 = vsel %vm216_vm1, %v11179_v53, %v11180_v10  ;;  %v11238_v7 = vrot.slane %v11179_v53, 7 }
 0x654   :  { %v11182_v3 = vpack.c.b16 %v11181_v58, %v11181_v58 }
 0x655   :  { %12882 = vmatpush3.bf16.msra.mxu1 %v13154_v14  ;;  %v11239_v4 = vsel %vm216_vm1, %v11238_v7, %v11178_v17 }
 0x656   :  { %12876 = vmatmul.mubr.msk.bf16.vlgmr.msra.gmra.mrb[196].mxu0 %vm231_vm2, %v11182_v3  ;;  %v11240_v28 = vpack.c.b16 %v11239_v4, %v11239_v4 }
 0x658   :  { %12884 = vmatmul.mubr.msk.bf16.vlgmr.msra.gmra.mrb[196].mxu1 %vm231_vm2, %v11240_v28 }
 0x721   :  { %v11077_v47 = vpop.f32.mrb[192].mxu0 }
 0x722   :  { %v12861_v37 = vpop.f32.mrb[193].mxu0 }
 0x723   :  { %v11080_v36 = vpop.f32.mrb[194].mxu0  ;;  %v11135_v49 = vpop.f32.mrb[192].mxu1 }
 0x724   :  { %v11136_v20 = vadd.f32 %v11135_v49, %v11077_v47  ;;  %v12862_v21 = vpop.f32.mrb[195].mxu0  ;;  %v12869_v30 = vpop.f32.mrb[193].mxu1 }
 0x725   :  { %v11138_v43 = vpop.f32.mrb[194].mxu1 }
 0x726   :  { %v11141_v16 = vadd.f32 %v11136_v20, %v10025_v51  ;;  %v12870_v56 = vpop.f32.mrb[195].mxu1 }
 0x728   :  { %v11147_v1 = vadd.f32 %v11719_v61, %v11141_v16 }
 0x729   :  { %v11232_v26 = vpop.f32.mrb[196].mxu0 }
 0x72a   :  { %v12877_v52 = vpop.f32.mrb[197].mxu0 }
 0x72b   :  { %v11235_v25 = vpop.f32.mrb[198].mxu0  ;;  %v11290_v0 = vpop.f32.mrb[196].mxu1 }
 0x72c   :  { %v11291_v38 = vadd.f32 %v11290_v0, %v11232_v26  ;;  %v12878_v27 = vpop.f32.mrb[199].mxu0  ;;  %v12885_v18 = vpop.f32.mrb[197].mxu1 }
 0x72d   :  { %v11293_v62 = vpop.f32.mrb[198].mxu1 }
 0x72e   :  { %v11296_v15 = vadd.f32 %v11291_v38, %v11147_v1  ;;  %v12886_v59 = vpop.f32.mrb[199].mxu1 }
 0x730   :  { %v11302_v8 = vadd.f32 %v11728_v57, %v11296_v15 }
 0x732   :  { %11304 = vst.msk [vmem:[#allocation2 + $0x2] sm:$0x3] %vm5673_vm5, %v11302_v8 }
 0x733   :  { %13232 = shalt.err (!%p13229_p4)
}
 0x734   :  { %s13233_s2 = scalar_lea.hbm %s16898_s3, 64 }
 0x735   :  { %p13234_p5 = scmp.ne.s32.totalorder %s16898_s3, %s13233_s2  ;;  %p13237_p6 = scmp.lt.u32.totalorder %s13233_s2, %s16898_s3 }
 0x737   :  { %p13239_p7 = pnand %p13237_p6, %p13234_p5 }
 0x739   :  { %13242 = shalt.err (!%p13239_p7)
}
 0x73a   :  { %s13254_s9 = smov 32   ;;  %s13255_s10 = smov 2  }
 0x73b   :  { %11316 = dma.vmem_to_hbm [thread:$0]  %s11311_s28, 64, %s16898_s3, [#allocation3], %s13254_s9, %s13254_s9, %s13255_s10  }
 0x73c   :  { %13243 = dma.done.wait [#allocation3], 64  }
 0x73d   :  { %13244 = vsyncadd [#allocation3], 4294967232 }
 0x73e   :  { %11320 = vsyncpa [#allocation3], 1 }

</bundles_post_ra>
